<compile_context>
chip_gen: v7x
topology: tpu7x:2x2x1
jax: 0.10.0
libtpu: 0.0.40
codegen_flags: <defaults>
</compile_context>

<pallas_src>
import jax
import jax.numpy as jnp
import numpy as np
from jax.experimental import pallas as pl
from jax.experimental.pallas import tpu as pltpu

BN_EPS = 1e-5


def _round_up(x, m):
    return (x + m - 1) // m * m


def _make_double_conv_kernel(offs, delta, pz, pw, inv_m, c1_pad):
    """Builds the fused (conv3x3x3 + bias + BN + ReLU) x2 kernel for a fixed geometry.

    offs  : 27 static lane offsets (one per conv tap) into the padded flat slab.
    delta : lane shift that maps output voxel q -> its interior padded position.
    pz    : lane width of conv-output / BN / output slabs (multiple of 128).
    pw    : lane width of zero-padded activation slabs (multiple of 128).
    inv_m : 1 / (N*D*H*W)  -- BatchNorm normalization count.
    c1_pad: stage-2 input channels rounded up to a sublane multiple.
    """

    def kernel(x_ref, w1_ref, b1_ref, g1_ref, be1_ref,
               w2_ref, b2_ref, g2_ref, be2_ref,
               mask_c_ref, mask_i_ref, o_ref):
        mask_c = mask_c_ref[...]   # (1, pz) 1.0 on valid output voxels
        mask_i = mask_i_ref[...]   # (1, pw) 1.0 on interior padded voxels

        def conv_bn_relu(act_pad, wmat, b, g, be):
            # act_pad: (cin_pad, pw) zero-padded flat activations.
            # im2col: each tap is a contiguous lane slice; stack along K and run
            # ONE MXU contraction (bf16 operands, f32 accumulation).
            cols = [act_pad[:, off:off + pz] for off in offs]       # 27 x (cin, pz)
            xcol = jnp.concatenate(cols, axis=0)                    # (27*cin, pz)
            z = jnp.dot(wmat.astype(jnp.bfloat16), xcol.astype(jnp.bfloat16),
                        preferred_element_type=jnp.float32)         # (cout, pz) MXU
            z = z + b                                               # conv bias
            # BatchNorm3d, training-mode batch stats over valid voxels only:
            # single-axis lane reductions (XLU) on the compact (cout, pz) slab.
            mean = jnp.sum(z * mask_c, axis=-1, keepdims=True) * inv_m
            cen = z - mean
            var = jnp.sum(cen * cen * mask_c, axis=-1, keepdims=True) * inv_m
            y = cen * (g * jax.lax.rsqrt(var + BN_EPS)) + be         # f32 epilogue
            return jnp.maximum(y, 0.0)                               # ReLU

        y1 = conv_bn_relu(x_ref[...], w1_ref[...], b1_ref[...],
                          g1_ref[...], be1_ref[...])

        # Re-embed stage-1 output into the zero-padded flat layout for stage 2:
        # padded position p holds y1[p - delta] iff p is an interior voxel,
        # else 0 (this realizes the second conv's 'same' zero padding).
        # The intermediate stays in VMEM -- no HBM round trip between stages.
        c1 = y1.shape[0]
        y1p = jnp.concatenate(
            [jnp.zeros((c1, delta), jnp.float32), y1,
             jnp.zeros((c1, pw - pz - delta), jnp.float32)], axis=1) * mask_i
        if c1_pad != c1:  # static branch: pad channels to a sublane multiple
            y1p = jnp.concatenate(
                [y1p, jnp.zeros((c1_pad - c1, pw), jnp.float32)], axis=0)

        y2 = conv_bn_relu(y1p, w2_ref[...], b2_ref[...],
                          g2_ref[...], be2_ref[...])
        # Lane-dense (cout, pz) store; invalid (padding) lanes are zeroed.
        o_ref[...] = (y2 * mask_c).astype(o_ref.dtype)

    return kernel


def _weight_matrix(w, cin_pad):
    """PyTorch layout (O, I, 3, 3, 3) -> (O, 27*cin_pad), tap-major / ci-minor K order."""
    o, i = w.shape[0], w.shape[1]
    wpad = jnp.pad(w, ((0, 0), (0, cin_pad - i), (0, 0), (0, 0), (0, 0)))
    return jnp.transpose(wpad, (0, 2, 3, 4, 1)).reshape(o, 27 * cin_pad)


def init_double_conv3d_params(key, in_channels, out_channels):
    k1, k2, k3, k4 = jax.random.split(key, 4)
    # Conv weights in PyTorch layout (Cout, Cin, KD, KH, KW).
    w1 = 0.1 * jax.random.normal(k1, (out_channels, in_channels, 3, 3, 3), jnp.float32)
    b1 = 0.1 * jax.random.normal(k2, (out_channels,), jnp.float32)
    w2 = 0.1 * jax.random.normal(k3, (out_channels, out_channels, 3, 3, 3), jnp.float32)
    b2 = 0.1 * jax.random.normal(k4, (out_channels,), jnp.float32)
    ones = jnp.ones((out_channels,), jnp.float32)
    zeros = jnp.zeros((out_channels,), jnp.float32)
    return dict(w1=w1, b1=b1, g1=ones, beta1=zeros,
                w2=w2, b2=b2, g2=ones, beta2=zeros)


@jax.jit
def double_conv3d(x_ncdhw, params):
    """Forward pass of DoubleConv3D.  Input/output are PyTorch-style NCDHW."""
    n, cin, d, h, w = x_ncdhw.shape
    c1 = params["w1"].shape[0]
    c2 = params["w2"].shape[0]
    dp, hp, wq = d + 2, h + 2, w + 2
    p = n * dp * hp * wq                         # flat padded voxel count
    pz = _round_up(p, 128)                       # lane width of output slabs
    max_off = 2 * hp * wq + 2 * wq + 2           # largest conv-tap lane offset
    pw = _round_up(pz + max_off, 128)            # lane width of padded act slabs
    cin_pad = _round_up(cin, 8)                  # sublane-aligned channel counts
    c1_pad = _round_up(c1, 8)

    # Input: NCDHW -> channels-major zero-padded flat slab (cin_pad, pw).
    # (Only small leading-axis transposes remain in the wrapper; the per-element
    #  im2col relayout happens in-kernel on lane-dense data.)
    xc = jnp.transpose(x_ncdhw, (1, 0, 2, 3, 4))
    xc = jnp.pad(xc, ((0, cin_pad - cin), (0, 0), (1, 1), (1, 1), (1, 1)))
    x_flat = jnp.pad(xc.reshape(cin_pad, p), ((0, 0), (0, pw - p)))

    w1m = _weight_matrix(params["w1"], cin_pad)
    w2m = _weight_matrix(params["w2"], c1_pad)
    colv = lambda v: v.reshape(-1, 1).astype(jnp.float32)

    # Static masks over the flat padded index space (compile-time constants).
    idx = np.arange(p)
    dd = (idx // (hp * wq)) % dp
    hh = (idx // wq) % hp
    ww = idx % wq
    corner = ((dd < d) & (hh < h) & (ww < w)).astype(np.float32)       # valid outputs
    interior = ((dd >= 1) & (dd <= d) & (hh >= 1) & (hh <= h)
                & (ww >= 1) & (ww <= w)).astype(np.float32)            # non-padding voxels
    mask_c = jnp.asarray(np.pad(corner, (0, pz - p)).reshape(1, pz))
    mask_i = jnp.asarray(np.pad(interior, (0, pw - p)).reshape(1, pw))

    offs = tuple(kd * hp * wq + kh * wq + kw
                 for kd in range(3) for kh in range(3) for kw in range(3))
    kernel = _make_double_conv_kernel(
        offs=offs, delta=hp * wq + wq + 1, pz=pz, pw=pw,
        inv_m=1.0 / float(n * d * h * w), c1_pad=c1_pad)

    vmem = pl.BlockSpec(memory_space=pltpu.MemorySpace.VMEM)
    out_flat = pl.pallas_call(
        kernel,
        out_shape=jax.ShapeDtypeStruct((c2, pz), jnp.float32),
        in_specs=[vmem] * 11,
        out_specs=vmem,
    )(x_flat, w1m,
      colv(params["b1"]), colv(params["g1"]), colv(params["beta1"]),
      w2m,
      colv(params["b2"]), colv(params["g2"]), colv(params["beta2"]),
      mask_c, mask_i)

    # Un-flatten the lane-dense slab back to NCDHW (cheap wrapper glue).
    out = out_flat[:, :p].reshape(c2, n, dp, hp, wq)[:, :, :d, :h, :w]
    return jnp.transpose(out, (1, 0, 2, 3, 4))


# ---------------- pure-JAX reference (for correctness check) ----------------
def _ref_stage(x, w, b, g, be):
    y = jax.lax.conv_general_dilated(
        x, w, window_strides=(1, 1, 1), padding=[(1, 1)] * 3,
        dimension_numbers=("NCDHW", "OIDHW", "NCDHW"),
        precision=jax.lax.Precision.HIGHEST)
    y = y + b.reshape(1, -1, 1, 1, 1)
    mean = jnp.mean(y, axis=(0, 2, 3, 4), keepdims=True)
    var = jnp.mean((y - mean) ** 2, axis=(0, 2, 3, 4), keepdims=True)
    y = (g.reshape(1, -1, 1, 1, 1) * (y - mean) * jax.lax.rsqrt(var + BN_EPS)
         + be.reshape(1, -1, 1, 1, 1))
    return jnp.maximum(y, 0.0)


def double_conv3d_ref(x, prm):
    y = _ref_stage(x, prm["w1"], prm["b1"], prm["g1"], prm["beta1"])
    return _ref_stage(y, prm["w2"], prm["b2"], prm["g2"], prm["beta2"])


if __name__ == "__main__":
    key = jax.random.PRNGKey(0)
    kx, kp = jax.random.split(key)

    # Small shapes consistent with the module: batch=2, in_ch=4, out_ch=8, 8^3 volume.
    N, CIN, COUT, D, H, W = 2, 4, 8, 8, 8, 8
    x = jax.random.normal(kx, (N, CIN, D, H, W), jnp.float32)   # PyTorch NCDHW
    params = init_double_conv3d_params(kp, CIN, COUT)

    out = jax.block_until_ready(double_conv3d(x, params))
    assert out.shape == (N, COUT, D, H, W)

    ref = double_conv3d_ref(x, params)
    # bf16 MXU operands (f32 accumulation) vs. a HIGHEST-precision f32 reference:
    # tolerance reflects bf16 operand rounding, not algorithmic differences.
    np.testing.assert_allclose(np.asarray(out), np.asarray(ref), rtol=5e-2, atol=5e-2)

    print("KERNEL_OK")
</pallas_src>

<mosaic_0001>
module attributes {stable_mosaic.version = 11 : i64} {
  func.func @kernel(%arg0: memref<8x2304xf32, #tpu.memory_space<vmem>>, %arg1: memref<8x216xf32, #tpu.memory_space<vmem>>, %arg2: memref<8x1xf32, #tpu.memory_space<vmem>>, %arg3: memref<8x1xf32, #tpu.memory_space<vmem>>, %arg4: memref<8x1xf32, #tpu.memory_space<vmem>>, %arg5: memref<8x216xf32, #tpu.memory_space<vmem>>, %arg6: memref<8x1xf32, #tpu.memory_space<vmem>>, %arg7: memref<8x1xf32, #tpu.memory_space<vmem>>, %arg8: memref<8x1xf32, #tpu.memory_space<vmem>>, %arg9: memref<1x2048xf32, #tpu.memory_space<vmem>>, %arg10: memref<1x2304xf32, #tpu.memory_space<vmem>>, %arg11: memref<8x2048xf32, #tpu.memory_space<vmem>>) attributes {dimension_semantics = [], scalar_prefetch = 0 : i64, scratch_operands = 0 : i64, tpu.core_type = #tpu.core_type<tc>} {
    %c0 = arith.constant 0 : index
    %c0_0 = arith.constant 0 : index
    %0 = vector.load %arg9[%c0, %c0_0] : memref<1x2048xf32, #tpu.memory_space<vmem>>, vector<1x2048xf32>
    %c0_1 = arith.constant 0 : index
    %c0_2 = arith.constant 0 : index
    %1 = vector.load %arg10[%c0_1, %c0_2] : memref<1x2304xf32, #tpu.memory_space<vmem>>, vector<1x2304xf32>
    %c0_3 = arith.constant 0 : index
    %c0_4 = arith.constant 0 : index
    %2 = vector.load %arg0[%c0_3, %c0_4] : memref<8x2304xf32, #tpu.memory_space<vmem>>, vector<8x2304xf32>
    %c0_5 = arith.constant 0 : index
    %c0_6 = arith.constant 0 : index
    %3 = vector.load %arg1[%c0_5, %c0_6] : memref<8x216xf32, #tpu.memory_space<vmem>>, vector<8x216xf32>
    %c0_7 = arith.constant 0 : index
    %c0_8 = arith.constant 0 : index
    %4 = vector.load %arg2[%c0_7, %c0_8] : memref<8x1xf32, #tpu.memory_space<vmem>>, vector<8x1xf32>
    %c0_9 = arith.constant 0 : index
    %c0_10 = arith.constant 0 : index
    %5 = vector.load %arg3[%c0_9, %c0_10] : memref<8x1xf32, #tpu.memory_space<vmem>>, vector<8x1xf32>
    %c0_11 = arith.constant 0 : index
    %c0_12 = arith.constant 0 : index
    %6 = vector.load %arg4[%c0_11, %c0_12] : memref<8x1xf32, #tpu.memory_space<vmem>>, vector<8x1xf32>
    %7 = vector.extract_strided_slice %2 {offsets = [0, 0], sizes = [8, 2048], strides = [1, 1]} : vector<8x2304xf32> to vector<8x2048xf32>
    %8 = vector.extract_strided_slice %2 {offsets = [0, 1], sizes = [8, 2048], strides = [1, 1]} : vector<8x2304xf32> to vector<8x2048xf32>
    %9 = vector.extract_strided_slice %2 {offsets = [0, 2], sizes = [8, 2048], strides = [1, 1]} : vector<8x2304xf32> to vector<8x2048xf32>
    %10 = vector.extract_strided_slice %2 {offsets = [0, 10], sizes = [8, 2048], strides = [1, 1]} : vector<8x2304xf32> to vector<8x2048xf32>
    %11 = vector.extract_strided_slice %2 {offsets = [0, 11], sizes = [8, 2048], strides = [1, 1]} : vector<8x2304xf32> to vector<8x2048xf32>
    %12 = vector.extract_strided_slice %2 {offsets = [0, 12], sizes = [8, 2048], strides = [1, 1]} : vector<8x2304xf32> to vector<8x2048xf32>
    %13 = vector.extract_strided_slice %2 {offsets = [0, 20], sizes = [8, 2048], strides = [1, 1]} : vector<8x2304xf32> to vector<8x2048xf32>
    %14 = vector.extract_strided_slice %2 {offsets = [0, 21], sizes = [8, 2048], strides = [1, 1]} : vector<8x2304xf32> to vector<8x2048xf32>
    %15 = vector.extract_strided_slice %2 {offsets = [0, 22], sizes = [8, 2048], strides = [1, 1]} : vector<8x2304xf32> to vector<8x2048xf32>
    %16 = vector.extract_strided_slice %2 {offsets = [0, 100], sizes = [8, 2048], strides = [1, 1]} : vector<8x2304xf32> to vector<8x2048xf32>
    %17 = vector.extract_strided_slice %2 {offsets = [0, 101], sizes = [8, 2048], strides = [1, 1]} : vector<8x2304xf32> to vector<8x2048xf32>
    %18 = vector.extract_strided_slice %2 {offsets = [0, 102], sizes = [8, 2048], strides = [1, 1]} : vector<8x2304xf32> to vector<8x2048xf32>
    %19 = vector.extract_strided_slice %2 {offsets = [0, 110], sizes = [8, 2048], strides = [1, 1]} : vector<8x2304xf32> to vector<8x2048xf32>
    %20 = vector.extract_strided_slice %2 {offsets = [0, 111], sizes = [8, 2048], strides = [1, 1]} : vector<8x2304xf32> to vector<8x2048xf32>
    %21 = vector.extract_strided_slice %2 {offsets = [0, 112], sizes = [8, 2048], strides = [1, 1]} : vector<8x2304xf32> to vector<8x2048xf32>
    %22 = vector.extract_strided_slice %2 {offsets = [0, 120], sizes = [8, 2048], strides = [1, 1]} : vector<8x2304xf32> to vector<8x2048xf32>
    %23 = vector.extract_strided_slice %2 {offsets = [0, 121], sizes = [8, 2048], strides = [1, 1]} : vector<8x2304xf32> to vector<8x2048xf32>
    %24 = vector.extract_strided_slice %2 {offsets = [0, 122], sizes = [8, 2048], strides = [1, 1]} : vector<8x2304xf32> to vector<8x2048xf32>
    %25 = vector.extract_strided_slice %2 {offsets = [0, 200], sizes = [8, 2048], strides = [1, 1]} : vector<8x2304xf32> to vector<8x2048xf32>
    %26 = vector.extract_strided_slice %2 {offsets = [0, 201], sizes = [8, 2048], strides = [1, 1]} : vector<8x2304xf32> to vector<8x2048xf32>
    %27 = vector.extract_strided_slice %2 {offsets = [0, 202], sizes = [8, 2048], strides = [1, 1]} : vector<8x2304xf32> to vector<8x2048xf32>
    %28 = vector.extract_strided_slice %2 {offsets = [0, 210], sizes = [8, 2048], strides = [1, 1]} : vector<8x2304xf32> to vector<8x2048xf32>
    %29 = vector.extract_strided_slice %2 {offsets = [0, 211], sizes = [8, 2048], strides = [1, 1]} : vector<8x2304xf32> to vector<8x2048xf32>
    %30 = vector.extract_strided_slice %2 {offsets = [0, 212], sizes = [8, 2048], strides = [1, 1]} : vector<8x2304xf32> to vector<8x2048xf32>
    %31 = vector.extract_strided_slice %2 {offsets = [0, 220], sizes = [8, 2048], strides = [1, 1]} : vector<8x2304xf32> to vector<8x2048xf32>
    %32 = vector.extract_strided_slice %2 {offsets = [0, 221], sizes = [8, 2048], strides = [1, 1]} : vector<8x2304xf32> to vector<8x2048xf32>
    %33 = vector.extract_strided_slice %2 {offsets = [0, 222], sizes = [8, 2048], strides = [1, 1]} : vector<8x2304xf32> to vector<8x2048xf32>
    %34 = tpu.concatenate %7, %8, %9, %10, %11, %12, %13, %14, %15, %16, %17, %18, %19, %20, %21, %22 in 0 : vector<8x2048xf32>, vector<8x2048xf32>, vector<8x2048xf32>, vector<8x2048xf32>, vector<8x2048xf32>, vector<8x2048xf32>, vector<8x2048xf32>, vector<8x2048xf32>, vector<8x2048xf32>, vector<8x2048xf32>, vector<8x2048xf32>, vector<8x2048xf32>, vector<8x2048xf32>, vector<8x2048xf32>, vector<8x2048xf32>, vector<8x2048xf32> -> vector<128x2048xf32>
    %35 = tpu.concatenate %23, %24, %25, %26, %27, %28, %29, %30, %31, %32, %33 in 0 : vector<8x2048xf32>, vector<8x2048xf32>, vector<8x2048xf32>, vector<8x2048xf32>, vector<8x2048xf32>, vector<8x2048xf32>, vector<8x2048xf32>, vector<8x2048xf32>, vector<8x2048xf32>, vector<8x2048xf32>, vector<8x2048xf32> -> vector<88x2048xf32>
    %36 = tpu.concatenate %34, %35 in 0 : vector<128x2048xf32>, vector<88x2048xf32> -> vector<216x2048xf32>
    %37 = arith.truncf %3 : vector<8x216xf32> to vector<8x216xbf16>
    %38 = arith.truncf %36 : vector<216x2048xf32> to vector<216x2048xbf16>
    %cst = arith.constant dense<0.000000e+00> : vector<8x2048xf32>
    %39 = tpu.matmul %37, %38, %cst {dimension_numbers = #tpu.dot_dimension_numbers<[1], [0], [0], [1], [0, 0, 1, 1], [], []>} : vector<8x216xbf16>, vector<216x2048xbf16>, vector<8x2048xf32> -> vector<8x2048xf32>
    %40 = vector.broadcast %4 : vector<8x1xf32> to vector<8x2048xf32>
    %41 = arith.addf %39, %40 : vector<8x2048xf32>
    %42 = vector.broadcast %0 : vector<1x2048xf32> to vector<8x2048xf32>
    %43 = arith.mulf %41, %42 : vector<8x2048xf32>
    %cst_13 = arith.constant dense<0.000000e+00> : vector<8xf32>
    %44 = vector.multi_reduction <add>, %43, %cst_13 [1] : vector<8x2048xf32> to vector<8xf32>
    %45 = vector.shape_cast %44 : vector<8xf32> to vector<8x1xf32>
    %cst_14 = arith.constant 9.765625E-4 : f32
    %46 = vector.broadcast %cst_14 : f32 to vector<8x1xf32>
    %47 = arith.mulf %45, %46 : vector<8x1xf32>
    %48 = vector.broadcast %47 : vector<8x1xf32> to vector<8x2048xf32>
    %49 = arith.subf %41, %48 : vector<8x2048xf32>
    %50 = arith.mulf %49, %49 : vector<8x2048xf32>
    %51 = vector.broadcast %0 : vector<1x2048xf32> to vector<8x2048xf32>
    %52 = arith.mulf %50, %51 : vector<8x2048xf32>
    %cst_15 = arith.constant dense<0.000000e+00> : vector<8xf32>
    %53 = vector.multi_reduction <add>, %52, %cst_15 [1] : vector<8x2048xf32> to vector<8xf32>
    %54 = vector.shape_cast %53 : vector<8xf32> to vector<8x1xf32>
    %cst_16 = arith.constant 9.765625E-4 : f32
    %55 = vector.broadcast %cst_16 : f32 to vector<8x1xf32>
    %56 = arith.mulf %54, %55 : vector<8x1xf32>
    %cst_17 = arith.constant 9.99999974E-6 : f32
    %57 = vector.broadcast %cst_17 : f32 to vector<8x1xf32>
    %58 = arith.addf %56, %57 : vector<8x1xf32>
    %59 = math.rsqrt %58 : vector<8x1xf32>
    %60 = arith.mulf %5, %59 : vector<8x1xf32>
    %61 = vector.broadcast %60 : vector<8x1xf32> to vector<8x2048xf32>
    %62 = arith.mulf %49, %61 : vector<8x2048xf32>
    %63 = vector.broadcast %6 : vector<8x1xf32> to vector<8x2048xf32>
    %64 = arith.addf %62, %63 : vector<8x2048xf32>
    %cst_18 = arith.constant 0.000000e+00 : f32
    %65 = vector.broadcast %cst_18 : f32 to vector<8x2048xf32>
    %66 = arith.maximumf %64, %65 : vector<8x2048xf32>
    %cst_19 = arith.constant 0.000000e+00 : f32
    %67 = vector.broadcast %cst_19 : f32 to vector<8x111xf32>
    %cst_20 = arith.constant 0.000000e+00 : f32
    %68 = vector.broadcast %cst_20 : f32 to vector<8x145xf32>
    %69 = tpu.concatenate %67, %66, %68 in 1 : vector<8x111xf32>, vector<8x2048xf32>, vector<8x145xf32> -> vector<8x2304xf32>
    %70 = vector.broadcast %1 : vector<1x2304xf32> to vector<8x2304xf32>
    %71 = arith.mulf %69, %70 : vector<8x2304xf32>
    %c0_21 = arith.constant 0 : index
    %c0_22 = arith.constant 0 : index
    %72 = vector.load %arg5[%c0_21, %c0_22] : memref<8x216xf32, #tpu.memory_space<vmem>>, vector<8x216xf32>
    %c0_23 = arith.constant 0 : index
    %c0_24 = arith.constant 0 : index
    %73 = vector.load %arg6[%c0_23, %c0_24] : memref<8x1xf32, #tpu.memory_space<vmem>>, vector<8x1xf32>
    %c0_25 = arith.constant 0 : index
    %c0_26 = arith.constant 0 : index
    %74 = vector.load %arg7[%c0_25, %c0_26] : memref<8x1xf32, #tpu.memory_space<vmem>>, vector<8x1xf32>
    %c0_27 = arith.constant 0 : index
    %c0_28 = arith.constant 0 : index
    %75 = vector.load %arg8[%c0_27, %c0_28] : memref<8x1xf32, #tpu.memory_space<vmem>>, vector<8x1xf32>
    %76 = vector.extract_strided_slice %71 {offsets = [0, 0], sizes = [8, 2048], strides = [1, 1]} : vector<8x2304xf32> to vector<8x2048xf32>
    %77 = vector.extract_strided_slice %71 {offsets = [0, 1], sizes = [8, 2048], strides = [1, 1]} : vector<8x2304xf32> to vector<8x2048xf32>
    %78 = vector.extract_strided_slice %71 {offsets = [0, 2], sizes = [8, 2048], strides = [1, 1]} : vector<8x2304xf32> to vector<8x2048xf32>
    %79 = vector.extract_strided_slice %71 {offsets = [0, 10], sizes = [8, 2048], strides = [1, 1]} : vector<8x2304xf32> to vector<8x2048xf32>
    %80 = vector.extract_strided_slice %71 {offsets = [0, 11], sizes = [8, 2048], strides = [1, 1]} : vector<8x2304xf32> to vector<8x2048xf32>
    %81 = vector.extract_strided_slice %71 {offsets = [0, 12], sizes = [8, 2048], strides = [1, 1]} : vector<8x2304xf32> to vector<8x2048xf32>
    %82 = vector.extract_strided_slice %71 {offsets = [0, 20], sizes = [8, 2048], strides = [1, 1]} : vector<8x2304xf32> to vector<8x2048xf32>
    %83 = vector.extract_strided_slice %71 {offsets = [0, 21], sizes = [8, 2048], strides = [1, 1]} : vector<8x2304xf32> to vector<8x2048xf32>
    %84 = vector.extract_strided_slice %71 {offsets = [0, 22], sizes = [8, 2048], strides = [1, 1]} : vector<8x2304xf32> to vector<8x2048xf32>
    %85 = vector.extract_strided_slice %71 {offsets = [0, 100], sizes = [8, 2048], strides = [1, 1]} : vector<8x2304xf32> to vector<8x2048xf32>
    %86 = vector.extract_strided_slice %71 {offsets = [0, 101], sizes = [8, 2048], strides = [1, 1]} : vector<8x2304xf32> to vector<8x2048xf32>
    %87 = vector.extract_strided_slice %71 {offsets = [0, 102], sizes = [8, 2048], strides = [1, 1]} : vector<8x2304xf32> to vector<8x2048xf32>
    %88 = vector.extract_strided_slice %71 {offsets = [0, 110], sizes = [8, 2048], strides = [1, 1]} : vector<8x2304xf32> to vector<8x2048xf32>
    %89 = vector.extract_strided_slice %71 {offsets = [0, 111], sizes = [8, 2048], strides = [1, 1]} : vector<8x2304xf32> to vector<8x2048xf32>
    %90 = vector.extract_strided_slice %71 {offsets = [0, 112], sizes = [8, 2048], strides = [1, 1]} : vector<8x2304xf32> to vector<8x2048xf32>
    %91 = vector.extract_strided_slice %71 {offsets = [0, 120], sizes = [8, 2048], strides = [1, 1]} : vector<8x2304xf32> to vector<8x2048xf32>
    %92 = vector.extract_strided_slice %71 {offsets = [0, 121], sizes = [8, 2048], strides = [1, 1]} : vector<8x2304xf32> to vector<8x2048xf32>
    %93 = vector.extract_strided_slice %71 {offsets = [0, 122], sizes = [8, 2048], strides = [1, 1]} : vector<8x2304xf32> to vector<8x2048xf32>
    %94 = vector.extract_strided_slice %71 {offsets = [0, 200], sizes = [8, 2048], strides = [1, 1]} : vector<8x2304xf32> to vector<8x2048xf32>
    %95 = vector.extract_strided_slice %71 {offsets = [0, 201], sizes = [8, 2048], strides = [1, 1]} : vector<8x2304xf32> to vector<8x2048xf32>
    %96 = vector.extract_strided_slice %71 {offsets = [0, 202], sizes = [8, 2048], strides = [1, 1]} : vector<8x2304xf32> to vector<8x2048xf32>
    %97 = vector.extract_strided_slice %71 {offsets = [0, 210], sizes = [8, 2048], strides = [1, 1]} : vector<8x2304xf32> to vector<8x2048xf32>
    %98 = vector.extract_strided_slice %71 {offsets = [0, 211], sizes = [8, 2048], strides = [1, 1]} : vector<8x2304xf32> to vector<8x2048xf32>
    %99 = vector.extract_strided_slice %71 {offsets = [0, 212], sizes = [8, 2048], strides = [1, 1]} : vector<8x2304xf32> to vector<8x2048xf32>
    %100 = vector.extract_strided_slice %71 {offsets = [0, 220], sizes = [8, 2048], strides = [1, 1]} : vector<8x2304xf32> to vector<8x2048xf32>
    %101 = vector.extract_strided_slice %71 {offsets = [0, 221], sizes = [8, 2048], strides = [1, 1]} : vector<8x2304xf32> to vector<8x2048xf32>
    %102 = vector.extract_strided_slice %71 {offsets = [0, 222], sizes = [8, 2048], strides = [1, 1]} : vector<8x2304xf32> to vector<8x2048xf32>
    %103 = tpu.concatenate %76, %77, %78, %79, %80, %81, %82, %83, %84, %85, %86, %87, %88, %89, %90, %91 in 0 : vector<8x2048xf32>, vector<8x2048xf32>, vector<8x2048xf32>, vector<8x2048xf32>, vector<8x2048xf32>, vector<8x2048xf32>, vector<8x2048xf32>, vector<8x2048xf32>, vector<8x2048xf32>, vector<8x2048xf32>, vector<8x2048xf32>, vector<8x2048xf32>, vector<8x2048xf32>, vector<8x2048xf32>, vector<8x2048xf32>, vector<8x2048xf32> -> vector<128x2048xf32>
    %104 = tpu.concatenate %92, %93, %94, %95, %96, %97, %98, %99, %100, %101, %102 in 0 : vector<8x2048xf32>, vector<8x2048xf32>, vector<8x2048xf32>, vector<8x2048xf32>, vector<8x2048xf32>, vector<8x2048xf32>, vector<8x2048xf32>, vector<8x2048xf32>, vector<8x2048xf32>, vector<8x2048xf32>, vector<8x2048xf32> -> vector<88x2048xf32>
    %105 = tpu.concatenate %103, %104 in 0 : vector<128x2048xf32>, vector<88x2048xf32> -> vector<216x2048xf32>
    %106 = arith.truncf %72 : vector<8x216xf32> to vector<8x216xbf16>
    %107 = arith.truncf %105 : vector<216x2048xf32> to vector<216x2048xbf16>
    %cst_29 = arith.constant dense<0.000000e+00> : vector<8x2048xf32>
    %108 = tpu.matmul %106, %107, %cst_29 {dimension_numbers = #tpu.dot_dimension_numbers<[1], [0], [0], [1], [0, 0, 1, 1], [], []>} : vector<8x216xbf16>, vector<216x2048xbf16>, vector<8x2048xf32> -> vector<8x2048xf32>
    %109 = vector.broadcast %73 : vector<8x1xf32> to vector<8x2048xf32>
    %110 = arith.addf %108, %109 : vector<8x2048xf32>
    %111 = vector.broadcast %0 : vector<1x2048xf32> to vector<8x2048xf32>
    %112 = arith.mulf %110, %111 : vector<8x2048xf32>
    %cst_30 = arith.constant dense<0.000000e+00> : vector<8xf32>
    %113 = vector.multi_reduction <add>, %112, %cst_30 [1] : vector<8x2048xf32> to vector<8xf32>
    %114 = vector.shape_cast %113 : vector<8xf32> to vector<8x1xf32>
    %cst_31 = arith.constant 9.765625E-4 : f32
    %115 = vector.broadcast %cst_31 : f32 to vector<8x1xf32>
    %116 = arith.mulf %114, %115 : vector<8x1xf32>
    %117 = vector.broadcast %116 : vector<8x1xf32> to vector<8x2048xf32>
    %118 = arith.subf %110, %117 : vector<8x2048xf32>
    %119 = arith.mulf %118, %118 : vector<8x2048xf32>
    %120 = vector.broadcast %0 : vector<1x2048xf32> to vector<8x2048xf32>
    %121 = arith.mulf %119, %120 : vector<8x2048xf32>
    %cst_32 = arith.constant dense<0.000000e+00> : vector<8xf32>
    %122 = vector.multi_reduction <add>, %121, %cst_32 [1] : vector<8x2048xf32> to vector<8xf32>
    %123 = vector.shape_cast %122 : vector<8xf32> to vector<8x1xf32>
    %cst_33 = arith.constant 9.765625E-4 : f32
    %124 = vector.broadcast %cst_33 : f32 to vector<8x1xf32>
    %125 = arith.mulf %123, %124 : vector<8x1xf32>
    %cst_34 = arith.constant 9.99999974E-6 : f32
    %126 = vector.broadcast %cst_34 : f32 to vector<8x1xf32>
    %127 = arith.addf %125, %126 : vector<8x1xf32>
    %128 = math.rsqrt %127 : vector<8x1xf32>
    %129 = arith.mulf %74, %128 : vector<8x1xf32>
    %130 = vector.broadcast %129 : vector<8x1xf32> to vector<8x2048xf32>
    %131 = arith.mulf %118, %130 : vector<8x2048xf32>
    %132 = vector.broadcast %75 : vector<8x1xf32> to vector<8x2048xf32>
    %133 = arith.addf %131, %132 : vector<8x2048xf32>
    %cst_35 = arith.constant 0.000000e+00 : f32
    %134 = vector.broadcast %cst_35 : f32 to vector<8x2048xf32>
    %135 = arith.maximumf %133, %134 : vector<8x2048xf32>
    %136 = vector.broadcast %0 : vector<1x2048xf32> to vector<8x2048xf32>
    %137 = arith.mulf %135, %136 : vector<8x2048xf32>
    %c0_36 = arith.constant 0 : index
    %c0_37 = arith.constant 0 : index
    %138 = vector.load %arg11[%c0_36, %c0_37] : memref<8x2048xf32, #tpu.memory_space<vmem>>, vector<8x2048xf32>
    tpu.vector_store %arg11[%c0_36, %c0_37], %137 {strides = array<i32>} : memref<8x2048xf32, #tpu.memory_space<vmem>>, vector<8x2048xf32>,
    return
  }
}

</mosaic_0001>

<bundles_post_ra>
// kernel: double_conv3d.1
= control target key start
LH: loop header
LB: loop body
LE: loop exit
PB: predicated region body
PF: predicated region fallthrough
CT: control target
= control target key end

     0   :  { %s8935_s14 = smov 127   ;;  %s8936_s15 = smov 126   ;;  %vm118_vm0 = vcmask 1039360   ;;  %vm185_vm1 = vcmask 1031168   ;;  %vm252_vm2 = vcmask 965632   ;;  %vm319_vm3 = vcmask 957440   ;;  %s16231_s0 = inlined_call_operand.vmem [shape: f32[8,2304], index: 0, kind: input, shape index: {}]   ;;  %s16232_s1 = inlined_call_operand.vmem [shape: f32[8,216], index: 1, kind: input, shape index: {}]   ;;  %s16233_s2 = inlined_call_operand.vmem [shape: f32[8,1], index: 2, kind: input, shape index: {}]   ;;  %s16234_s4 = inlined_call_operand.vmem [shape: f32[8,1], index: 4, kind: input, shape index: {}]   ;;  %s16235_s10 = inlined_call_operand.vmem [shape: f32[1,2304], index: 10, kind: input, shape index: {}]   ;;  %s16236_s9 = inlined_call_operand.vmem [shape: f32[1,2048], index: 9, kind: input, shape index: {}]   ;;  %s16237_s3 = inlined_call_operand.vmem [shape: f32[8,1], index: 3, kind: input, shape index: {}]   ;;  %s16238_s5 = inlined_call_operand.vmem [shape: f32[8,216], index: 5, kind: input, shape index: {}]   ;;  %s16239_s6 = inlined_call_operand.vmem [shape: f32[8,1], index: 6, kind: input, shape index: {}]   ;;  %s16240_s8 = inlined_call_operand.vmem [shape: f32[8,1], index: 8, kind: input, shape index: {}]   ;;  %s16241_s7 = inlined_call_operand.vmem [shape: f32[8,1], index: 7, kind: input, shape index: {}]   ;;  %s16242_s11 = inlined_call_operand.vmem [shape: f32[8,2048], index: 11, kind: output, shape index: {}]  }
   0x1   :  { %v48_v0 = vld [vmem:[%s16231_s0 + $0x20] sm:$0xff]  ;;  %v49_v1 = vld [vmem:[%s16231_s0 + $0x28] sm:$0xff]  ;;  %v50_v5 = vld [vmem:[%s16231_s0 + $0x30] sm:$0xff]  ;;  %s8937_s16 = smov 118   ;;  %s8938_s17 = smov 117   ;;  %vm386_vm4 = vcmask 949248  }
   0x2   :  { %v9029_v2 = vld [vmem:[%s16231_s0] sm:$0xff]  ;;  %v9031_v3 = vpack.i.bf16 %v49_v1, %v48_v0  ;;  %v9036_v4 = vld [vmem:[%s16231_s0 + $0x8] sm:$0xff]  ;;  %v51_v6 = vld [vmem:[%s16231_s0 + $0x38] sm:$0xff]  ;;  %s8939_s18 = smov 116   ;;  %s8940_s19 = smov 108   ;;  %vm16389_vm5 = vcmask 883712  }
   0x3   :  { %v9046_v7 = vpack.i.bf16 %v9036_v4, %v9029_v2  ;;  %v9051_v8 = vld [vmem:[%s16231_s0 + $0x10] sm:$0xff]  ;;  %v9056_v9 = vld [vmem:[%s16231_s0 + $0x18] sm:$0xff]  ;;  %v9060_v10 = vpack.i.bf16 %v51_v6, %v50_v5  ;;  %v52_v14 = vld [vmem:[%s16231_s0 + $0x40] sm:$0xff]  ;;  %s8941_s20 = smov 107   ;;  %s8942_s21 = smov 106   ;;  %vm16391_vm6 = vcmask 875520  }
   0x4   :  { %6199 = vrot.lane.b32.xlu1 %v9031_v3, %s8935_s14  ;;  %v9066_v11 = vpack.i.bf16 %v9056_v9, %v9051_v8  ;;  %v54_v12 = vld [vmem:[%s16231_s0 + $0x50] sm:$0xff]  ;;  %v55_v13 = vld [vmem:[%s16231_s0 + $0x58] sm:$0xff]  ;;  %v9080_v15 = vld [vmem:[%s16231_s0 + $0x48] sm:$0xff]  ;;  %s8943_s22 = smov 28   ;;  %s8944_s25 = smov 27   ;;  %vm16386_vm7 = vcmask 867328  }
   0x5   :  { %6189 = vrot.lane.b32.xlu0 %v9046_v7, %s8935_s14  ;;  %v9084_v16 = vpack.i.bf16 %v55_v13, %v54_v12  ;;  %v9089_v17 = vpack.i.bf16 %v9080_v15, %v52_v14  ;;  %v58_v18 = vld [vmem:[%s16231_s0 + $0x70] sm:$0xff]  ;;  %v59_v19 = vld [vmem:[%s16231_s0 + $0x78] sm:$0xff]  ;;  %v56_v20 = vld [vmem:[%s16231_s0 + $0x60] sm:$0xff]  ;;  %s8945_s26 = smov 26   ;;  %s16274_s27 = smov 18   ;;  %vm654_vm8 = vcmask 228352  }
   0x6   :  { %v9103_v21 = vld [vmem:[%s16231_s0 + $0x68] sm:$0xff]  ;;  %v9107_v22 = vpack.i.bf16 %v59_v19, %v58_v18  ;;  %v9121_v24 = vld [vmem:[%s16231_s0 + $0x80] sm:$0xff]  ;;  %s16346_s28 = smov 17   ;;  %s16272_s29 = smov 16   ;;  %vm721_vm9 = vcmask 220160   ;;  %vm16373_vm10 = vcmask 211968  }
   0x7   :  { %v9112_v23 = vpack.i.bf16 %v9103_v21, %v56_v20  ;;  %v9328_v19 = vld [vmem:[%s16231_s0 + $0x88] sm:$0xff]  ;;  %s16276_s30 = smov 8   ;;  %s8950_s12 = smov 49   ;;  %vm16359_vm11 = vcmask 146432   ;;  %vm16370_vm12 = vcmask 138240   ;;  %vm16352_vm13 = vcmask 130048  }
   0x8   :  { %6204 = vrot.lane.b32.xlu1 %v9060_v10, %s8935_s14  ;;  %s8952_s24 = smov 47   ;;  %s16407_s13 = smov 39   ;;  %vm16356_vm14 = vcmask 64512   ;;  %vm1124_vm15 = vcmask 400384  }
   0x9   :  { %6194 = vrot.lane.b32.xlu0 %v9066_v11, %s8935_s14  ;;  %s16348_s23 = smov 38  }
   0xc   :  { %6214 = vrot.lane.b32.xlu1 %v9084_v16, %s8935_s14 }
   0xd   :  { %6209 = vrot.lane.b32.xlu0 %v9089_v17, %s8935_s14 }
  0x10   :  { %6224 = vrot.lane.b32.xlu1 %v9107_v22, %s8935_s14 }
  0x11   :  { %6219 = vrot.lane.b32.xlu0 %v9112_v23, %s8935_s14 }
  0x14   :  { %6229 = vrot.lane.b32.xlu1 %v9046_v7, %s8936_s15 }
  0x15   :  { %116 = vrot.lane.b32.xlu0 %v9121_v24, %s8935_s14 }
  0x18   :  { %6239 = vrot.lane.b32.xlu1 %v9031_v3, %s8936_s15 }
  0x19   :  { %6234 = vrot.lane.b32.xlu0 %v9066_v11, %s8936_s15 }
  0x1c   :  { %6249 = vrot.lane.b32.xlu1 %v9089_v17, %s8936_s15 }
  0x1d   :  { %6244 = vrot.lane.b32.xlu0 %v9060_v10, %s8936_s15 }
  0x20   :  { %6259 = vrot.lane.b32.xlu1 %v9112_v23, %s8936_s15 }
  0x21   :  { %6254 = vrot.lane.b32.xlu0 %v9084_v16, %s8936_s15 }
  0x24   :  { %183 = vrot.lane.b32.xlu1 %v9121_v24, %s8936_s15 }
  0x25   :  { %6264 = vrot.lane.b32.xlu0 %v9107_v22, %s8936_s15 }
  0x28   :  { %6274 = vrot.lane.b32.xlu1 %v9066_v11, %s8937_s16 }
  0x29   :  { %6269 = vrot.lane.b32.xlu0 %v9046_v7, %s8937_s16 }
  0x2c   :  { %6284 = vrot.lane.b32.xlu1 %v9060_v10, %s8937_s16 }
  0x2d   :  { %6279 = vrot.lane.b32.xlu0 %v9031_v3, %s8937_s16 }
  0x30   :  { %6294 = vrot.lane.b32.xlu1 %v9084_v16, %s8937_s16 }
  0x31   :  { %6289 = vrot.lane.b32.xlu0 %v9089_v17, %s8937_s16 }
  0x34   :  { %6304 = vrot.lane.b32.xlu1 %v9107_v22, %s8937_s16 }
  0x35   :  { %6299 = vrot.lane.b32.xlu0 %v9112_v23, %s8937_s16 }
  0x38   :  { %6309 = vrot.lane.b32.xlu1 %v9046_v7, %s8938_s17 }
  0x39   :  { %250 = vrot.lane.b32.xlu0 %v9121_v24, %s8937_s16 }
  0x3c   :  { %6319 = vrot.lane.b32.xlu1 %v9031_v3, %s8938_s17 }
  0x3d   :  { %6314 = vrot.lane.b32.xlu0 %v9066_v11, %s8938_s17 }
  0x40   :  { %6329 = vrot.lane.b32.xlu1 %v9089_v17, %s8938_s17 }
  0x41   :  { %6324 = vrot.lane.b32.xlu0 %v9060_v10, %s8938_s17 }
  0x44   :  { %6339 = vrot.lane.b32.xlu1 %v9112_v23, %s8938_s17 }
  0x45   :  { %6334 = vrot.lane.b32.xlu0 %v9084_v16, %s8938_s17 }
  0x48   :  { %317 = vrot.lane.b32.xlu1 %v9121_v24, %s8938_s17 }
  0x49   :  { %6344 = vrot.lane.b32.xlu0 %v9107_v22, %s8938_s17 }
  0x4c   :  { %6354 = vrot.lane.b32.xlu1 %v9066_v11, %s8939_s18 }
  0x4d   :  { %6349 = vrot.lane.b32.xlu0 %v9046_v7, %s8939_s18 }
  0x50   :  { %6364 = vrot.lane.b32.xlu1 %v9060_v10, %s8939_s18 }
  0x51   :  { %6359 = vrot.lane.b32.xlu0 %v9031_v3, %s8939_s18 }
  0x54   :  { %6374 = vrot.lane.b32.xlu1 %v9084_v16, %s8939_s18 }
  0x55   :  { %6369 = vrot.lane.b32.xlu0 %v9089_v17, %s8939_s18 }
  0x58   :  { %6384 = vrot.lane.b32.xlu1 %v9107_v22, %s8939_s18 }
  0x59   :  { %6379 = vrot.lane.b32.xlu0 %v9112_v23, %s8939_s18 }
  0x5c   :  { %6389 = vrot.lane.b32.xlu1 %v9046_v7, %s8940_s19 }
  0x5d   :  { %384 = vrot.lane.b32.xlu0 %v9121_v24, %s8939_s18 }
  0x60   :  { %6399 = vrot.lane.b32.xlu1 %v9031_v3, %s8940_s19 }
  0x61   :  { %6394 = vrot.lane.b32.xlu0 %v9066_v11, %s8940_s19 }
  0x64   :  { %6409 = vrot.lane.b32.xlu1 %v9089_v17, %s8940_s19 }
  0x65   :  { %6404 = vrot.lane.b32.xlu0 %v9060_v10, %s8940_s19 }
  0x68   :  { %6419 = vrot.lane.b32.xlu1 %v9112_v23, %s8940_s19 }
  0x69   :  { %6414 = vrot.lane.b32.xlu0 %v9084_v16, %s8940_s19 }
  0x6c   :  { %451 = vrot.lane.b32.xlu1 %v9121_v24, %s8940_s19 }
  0x6d   :  { %6424 = vrot.lane.b32.xlu0 %v9107_v22, %s8940_s19 }
  0x70   :  { %6434 = vrot.lane.b32.xlu1 %v9066_v11, %s8941_s20 }
  0x71   :  { %6429 = vrot.lane.b32.xlu0 %v9046_v7, %s8941_s20 }
  0x74   :  { %6444 = vrot.lane.b32.xlu1 %v9060_v10, %s8941_s20 }
  0x75   :  { %6439 = vrot.lane.b32.xlu0 %v9031_v3, %s8941_s20 }
  0x76   :  { %v9223_v25 = vpop.permute.xlu1 %6199 }
  0x77   :  { %v6190_v26 = vpop.permute.xlu0 %6189  ;;  %v16245_v31 = vunpack.i.l.bf16 %v9223_v25 }
  0x78   :  { %6454 = vrot.lane.b32.xlu1 %v9084_v16, %s8941_s20  ;;  %v6192_v27 = vunpack.i.h.bf16 %v6190_v26  ;;  %v6191_v28 = vunpack.i.l.bf16 %v6190_v26 }
  0x79   :  { %6449 = vrot.lane.b32.xlu0 %v9089_v17, %s8941_s20 }
  0x7a   :  { %v9229_v29 = vpop.permute.xlu1 %6204  ;;  %v9237_v34 = vsel %vm118_vm0, %v6191_v28, %v6192_v27 }
  0x7b   :  { %v6195_v30 = vpop.permute.xlu0 %6194  ;;  %v2182_v44 = vpack.c.bf16 %v9237_v34, %v9029_v2 }
  0x7c   :  { %v6197_v32 = vunpack.i.h.bf16 %v6195_v30  ;;  %v6196_v33 = vunpack.i.l.bf16 %v6195_v30  ;;  %6464 = vrot.lane.b32.xlu1 %v9107_v22, %s8941_s20 }
  0x7d   :  { %6459 = vrot.lane.b32.xlu0 %v9112_v23, %s8941_s20 }
  0x7e   :  { %v9239_v35 = vpop.permute.xlu1 %6214  ;;  %v9242_v36 = vsel %vm118_vm0, %v6192_v27, %v6196_v33  ;;  %v9245_v37 = vsel %vm118_vm0, %v6196_v33, %v6197_v32  ;;  %v9250_v38 = vsel %vm118_vm0, %v6197_v32, %v16245_v31  ;;  %v6548_v33 = vpack.i.bf16 %v9328_v19, %v9121_v24 }
  0x7f   :  { %v9252_v39 = vpop.permute.xlu0 %6209  ;;  %v2183_v41 = vpack.c.bf16 %v9242_v36, %v9036_v4  ;;  %v2185_v42 = vpack.c.bf16 %v9250_v38, %v9056_v9  ;;  %v2184_v45 = vpack.c.bf16 %v9245_v37, %v9051_v8 }
  0x80   :  { %6469 = vrot.lane.b32.xlu1 %v9046_v7, %s8942_s21 }
  0x81   :  { %518 = vrot.lane.b32.xlu0 %v9121_v24, %s8941_s20  ;;  %2464 = vmatprep.subr.bf16.mxu0 %v2183_v41 }
  0x82   :  { %2505 = vmatprep.subr.bf16.mxu1 %v2185_v42  ;;  %2465 = vmatpush1.bf16.msra.mxu0 %v2182_v44  ;;  %v9270_v46 = vpop.permute.xlu1 %6224 }
  0x83   :  { %16887 = vst [vmem:[#allocation2_spill] sm:$0xff] %v9270_v46  ;;  %2506 = vmatpush1.bf16.msra.mxu1 %v2184_v45  ;;  %v9272_v47 = vpop.permute.xlu0 %6219 }
  0x84   :  { %6479 = vrot.lane.b32.xlu1 %v9031_v3, %s8942_s21 }
  0x85   :  { %6474 = vrot.lane.b32.xlu0 %v9066_v11, %s8942_s21 }
  0x86   :  { %v6230_v48 = vpop.permute.xlu1 %6229 }
  0x87   :  { %v9278_v49 = vpop.permute.xlu0 %116  ;;  %v6232_v58 = vunpack.i.h.bf16 %v6230_v48  ;;  %v6231_v59 = vunpack.i.l.bf16 %v6230_v48 }
  0x88   :  { %16888 = vst [vmem:[#allocation3_spill] sm:$0xff] %v9278_v49  ;;  %6489 = vrot.lane.b32.xlu1 %v9089_v17, %s8942_s21 }
  0x89   :  { %6484 = vrot.lane.b32.xlu0 %v9060_v10, %s8942_s21  ;;  %v186_v6 = vsel %vm185_vm1, %v6231_v59, %v6232_v58 }
  0x8a   :  { %v9284_v50 = vpop.permute.xlu1 %6239 }
  0x8b   :  { %16889 = vst [vmem:[#allocation4_spill] sm:$0xff] %v9284_v50  ;;  %v6235_v51 = vpop.permute.xlu0 %6234  ;;  %v6241_v2 = vunpack.i.l.bf16 %v9284_v50  ;;  %v16244_v20 = vunpack.i.h.bf16 %v9284_v50 }
  0x8c   :  { %6499 = vrot.lane.b32.xlu1 %v9112_v23, %s8942_s21  ;;  %v6236_v60 = vunpack.i.l.bf16 %v6235_v51  ;;  %v6237_v9 = vunpack.i.h.bf16 %v6235_v51 }
  0x8d   :  { %6494 = vrot.lane.b32.xlu0 %v9084_v16, %s8942_s21  ;;  %v9354_v51 = vsel %vm185_vm1, %v6241_v2, %v16244_v20 }
  0x8e   :  { %v9290_v52 = vpop.permute.xlu1 %6249  ;;  %v187_v13 = vsel %vm185_vm1, %v6232_v58, %v6236_v60  ;;  %v189_v45 = vsel %vm185_vm1, %v6237_v9, %v6241_v2  ;;  %16900 = vst [vmem:[#allocation15_spill] sm:$0xff] %v9354_v51 }
  0x8f   :  { %16890 = vst [vmem:[#allocation5_spill] sm:$0xff] %v9290_v52  ;;  %v9292_v53 = vpop.permute.xlu0 %6244 }
  0x90   :  { %16891 = vst [vmem:[#allocation6_spill] sm:$0xff] %v9292_v53  ;;  %585 = vrot.lane.b32.xlu1 %v9121_v24, %s8942_s21 }
  0x91   :  { %6504 = vrot.lane.b32.xlu0 %v9107_v22, %s8942_s21 }
  0x92   :  { %v9298_v54 = vpop.permute.xlu1 %6259 }
  0x93   :  { %16892 = vst [vmem:[#allocation7_spill] sm:$0xff] %v9298_v54  ;;  %v9300_v55 = vpop.permute.xlu0 %6254 }
  0x94   :  { %16893 = vst [vmem:[#allocation8_spill] sm:$0xff] %v9300_v55  ;;  %6514 = vrot.lane.b32.xlu1 %v9066_v11, %s8943_s22 }
  0x95   :  { %6509 = vrot.lane.b32.xlu0 %v9046_v7, %s8943_s22 }
  0x96   :  { %v9306_v56 = vpop.permute.xlu1 %183 }
  0x97   :  { %16894 = vst [vmem:[#allocation9_spill] sm:$0xff] %v9306_v56  ;;  %v9308_v57 = vpop.permute.xlu0 %6264 }
  0x98   :  { %16895 = vst [vmem:[#allocation10_spill] sm:$0xff] %v9308_v57  ;;  %6524 = vrot.lane.b32.xlu1 %v9060_v10, %s8943_s22 }
  0x99   :  { %6519 = vrot.lane.b32.xlu0 %v9031_v3, %s8943_s22 }
  0x9a   :  { %v6275_v61 = vpop.permute.xlu1 %6274 }
  0x9b   :  { %v6276_v62 = vunpack.i.l.bf16 %v6275_v61  ;;  %v6270_v63 = vpop.permute.xlu0 %6269  ;;  %v6277_v5 = vunpack.i.h.bf16 %v6275_v61  ;;  %v188_v61 = vsel %vm185_vm1, %v6236_v60, %v6237_v9 }
  0x9c   :  { %v6272_v0 = vunpack.i.h.bf16 %v6270_v63  ;;  %v6271_v1 = vunpack.i.l.bf16 %v6270_v63  ;;  %6534 = vrot.lane.b32.xlu1 %v9084_v16, %s8943_s22 }
  0x9d   :  { %6529 = vrot.lane.b32.xlu0 %v9089_v17, %s8943_s22  ;;  %v255_v41 = vsel %vm252_vm2, %v6276_v62, %v6277_v5 }
  0x9e   :  { %v9320_v12 = vpop.permute.xlu1 %6284  ;;  %v254_v14 = vsel %vm252_vm2, %v6272_v0, %v6276_v62  ;;  %v253_v18 = vsel %vm252_vm2, %v6271_v1, %v6272_v0  ;;  %v2200_v62 = vpack.c.bf16 %v255_v41, %v188_v61 }
  0x9f   :  { %16896 = vst [vmem:[#allocation11_spill] sm:$0xff] %v9320_v12  ;;  %v9331_v26 = vpop.permute.xlu0 %6279  ;;  %v2199_v27 = vpack.c.bf16 %v254_v14, %v187_v13  ;;  %v2198_v28 = vpack.c.bf16 %v253_v18, %v186_v6 }
  0xa0   :  { %16897 = vst [vmem:[#allocation12_spill] sm:$0xff] %v9331_v26  ;;  %v16243_v30 = vunpack.i.h.bf16 %v9331_v26  ;;  %v6281_v32 = vunpack.i.l.bf16 %v9331_v26  ;;  %6544 = vrot.lane.b32.xlu1 %v9107_v22, %s8943_s22 }
  0xa1   :  { %6539 = vrot.lane.b32.xlu0 %v9112_v23, %s8943_s22  ;;  %2466 = vmatprep.subr.bf16.mxu0 %v2199_v27 }
  0xa2   :  { %v9345_v42 = vsel %vm252_vm2, %v6281_v32, %v16243_v30  ;;  %2467 = vmatpush1.bf16.msra.mxu0 %v2198_v28  ;;  %v9347_v44 = vpop.permute.xlu1 %6294  ;;  %v256_v48 = vsel %vm252_vm2, %v6277_v5, %v6281_v32 }
  0xa3   :  { %16898 = vst [vmem:[#allocation13_spill] sm:$0xff] %v9345_v42  ;;  %16899 = vst [vmem:[#allocation14_spill] sm:$0xff] %v9347_v44  ;;  %v9356_v58 = vpop.permute.xlu0 %6289  ;;  %v2201_v59 = vpack.c.bf16 %v256_v48, %v189_v45 }
  0xa4   :  { %16901 = vst [vmem:[#allocation16_spill] sm:$0xff] %v9356_v58  ;;  %6554 = vrot.lane.b32.xlu1 %v9046_v7, %s8944_s25 }
  0xa5   :  { %6549 = vrot.lane.b32.xlu0 %v6548_v33, %s8943_s22  ;;  %2507 = vmatprep.subr.bf16.mxu1 %v2201_v59 }
  0xa6   :  { %2508 = vmatpush1.bf16.msra.mxu1 %v2200_v62  ;;  %v9364_v0 = vpop.permute.xlu1 %6304 }
  0xa7   :  { %16902 = vst [vmem:[#allocation17_spill] sm:$0xff] %v9364_v0  ;;  %v9366_v1 = vpop.permute.xlu0 %6299 }
  0xa8   :  { %16903 = vst [vmem:[#allocation18_spill] sm:$0xff] %v9366_v1  ;;  %6564 = vrot.lane.b32.xlu1 %v9031_v3, %s8944_s25 }
  0xa9   :  { %6559 = vrot.lane.b32.xlu0 %v9066_v11, %s8944_s25 }
  0xaa   :  { %v6310_v60 = vpop.permute.xlu1 %6309 }
  0xab   :  { %v9372_v2 = vpop.permute.xlu0 %250  ;;  %v6312_v32 = vunpack.i.h.bf16 %v6310_v60 }
  0xac   :  { %16904 = vst [vmem:[#allocation19_spill] sm:$0xff] %v9372_v2  ;;  %6574 = vrot.lane.b32.xlu1 %v9089_v17, %s8944_s25 }
  0xad   :  { %6569 = vrot.lane.b32.xlu0 %v9060_v10, %s8944_s25 }
  0xae   :  { %v9378_v5 = vpop.permute.xlu1 %6319 }
  0xaf   :  { %16905 = vst [vmem:[#allocation20_spill] sm:$0xff] %v9378_v5  ;;  %v6315_v6 = vpop.permute.xlu0 %6314  ;;  %v6321_v63 = vunpack.i.l.bf16 %v9378_v5 }
  0xb0   :  { %6584 = vrot.lane.b32.xlu1 %v9112_v23, %s8944_s25  ;;  %v6316_v41 = vunpack.i.l.bf16 %v6315_v6  ;;  %v6317_v20 = vunpack.i.h.bf16 %v6315_v6 }
  0xb1   :  { %6579 = vrot.lane.b32.xlu0 %v9084_v16, %s8944_s25 }
  0xb2   :  { %v9384_v9 = vpop.permute.xlu1 %6329  ;;  %v321_v31 = vsel %vm319_vm3, %v6312_v32, %v6316_v41 }
  0xb3   :  { %16906 = vst [vmem:[#allocation21_spill] sm:$0xff] %v9384_v9  ;;  %v9386_v13 = vpop.permute.xlu0 %6324 }
  0xb4   :  { %16907 = vst [vmem:[#allocation22_spill] sm:$0xff] %v9386_v13  ;;  %6594 = vrot.lane.b32.xlu1 %v6548_v33, %s8944_s25  ;;  %v6311_v33 = vunpack.i.l.bf16 %v6310_v60  ;;  %v8918_v13 = vld [vmem:[%s16231_s0 + $0x48] sm:$0xff] }
  0xb5   :  { %6589 = vrot.lane.b32.xlu0 %v9107_v22, %s8944_s25 }
  0xb6   :  { %v9391_v14 = vpop.permute.xlu1 %6339  ;;  %v320_v60 = vsel %vm319_vm3, %v6311_v33, %v6312_v32 }
  0xb7   :  { %16908 = vst [vmem:[#allocation23_spill] sm:$0xff] %v9391_v14  ;;  %v9393_v18 = vpop.permute.xlu0 %6334 }
  0xb8   :  { %16909 = vst [vmem:[#allocation24_spill] sm:$0xff] %v9393_v18  ;;  %6604 = vrot.lane.b32.xlu1 %v9066_v11, %s8945_s26 }
  0xb9   :  { %6599 = vrot.lane.b32.xlu0 %v9046_v7, %s8945_s26 }
  0xba   :  { %v9399_v27 = vpop.permute.xlu1 %317 }
  0xbb   :  { %16910 = vst [vmem:[#allocation25_spill] sm:$0xff] %v9399_v27  ;;  %v9401_v28 = vpop.permute.xlu0 %6344  ;;  %v16248_v27 = vunpack.i.h.bf16 %v9378_v5 }
  0xbc   :  { %16911 = vst [vmem:[#allocation26_spill] sm:$0xff] %v9401_v28  ;;  %6614 = vrot.lane.b32.xlu1 %v9060_v10, %s8945_s26 }
  0xbd   :  { %6609 = vrot.lane.b32.xlu0 %v9031_v3, %s8945_s26 }
  0xbe   :  { %v6355_v45 = vpop.permute.xlu1 %6354 }
  0xbf   :  { %v6356_v48 = vunpack.i.l.bf16 %v6355_v45  ;;  %v6350_v59 = vpop.permute.xlu0 %6349  ;;  %v6357_v30 = vunpack.i.h.bf16 %v6355_v45 }
  0xc0   :  { %v6352_v61 = vunpack.i.h.bf16 %v6350_v59  ;;  %v6351_v62 = vunpack.i.l.bf16 %v6350_v59  ;;  %6624 = vrot.lane.b32.xlu1 %v9084_v16, %s8945_s26 }
  0xc1   :  { %6619 = vrot.lane.b32.xlu0 %v9089_v17, %s8945_s26  ;;  %v389_v6 = vsel %vm386_vm4, %v6356_v48, %v6357_v30 }
  0xc2   :  { %v9413_v43 = vpop.permute.xlu1 %6364  ;;  %v388_v40 = vsel %vm386_vm4, %v6352_v61, %v6356_v48  ;;  %v387_v59 = vsel %vm386_vm4, %v6351_v62, %v6352_v61  ;;  %v9440_v61 = vsel %vm319_vm3, %v6321_v63, %v16248_v27  ;;  %v322_v62 = vsel %vm319_vm3, %v6316_v41, %v6317_v20 }
  0xc3   :  { %16912 = vst [vmem:[#allocation27_spill] sm:$0xff] %v9413_v43  ;;  %v9419_v28 = vpop.permute.xlu0 %6359  ;;  %v2215_v2 = vpack.c.bf16 %v388_v40, %v321_v31  ;;  %v2214_v45 = vpack.c.bf16 %v387_v59, %v320_v60  ;;  %v323_v40 = vsel %vm319_vm3, %v6317_v20, %v6321_v63  ;;  %16916 = vst [vmem:[#allocation31_spill] sm:$0xff] %v9440_v61 }
  0xc4   :  { %16913 = vst [vmem:[#allocation28_spill] sm:$0xff] %v9419_v28  ;;  %v16249_v56 = vunpack.i.h.bf16 %v9419_v28  ;;  %v6361_v0 = vunpack.i.l.bf16 %v9419_v28  ;;  %6634 = vrot.lane.b32.xlu1 %v9107_v22, %s8945_s26  ;;  %v2216_v60 = vpack.c.bf16 %v389_v6, %v322_v62 }
  0xc5   :  { %6629 = vrot.lane.b32.xlu0 %v9112_v23, %s8945_s26  ;;  %2468 = vmatprep.subr.bf16.mxu0 %v2215_v2 }
  0xc6   :  { %v9431_v32 = vsel %vm386_vm4, %v6361_v0, %v16249_v56  ;;  %2469 = vmatpush1.bf16.msra.mxu0 %v2214_v45  ;;  %v9433_v31 = vpop.permute.xlu1 %6374  ;;  %v390_v33 = vsel %vm386_vm4, %v6357_v30, %v6361_v0 }
  0xc7   :  { %16914 = vst [vmem:[#allocation29_spill] sm:$0xff] %v9431_v32  ;;  %16915 = vst [vmem:[#allocation30_spill] sm:$0xff] %v9433_v31  ;;  %v9442_v2 = vpop.permute.xlu0 %6369  ;;  %v2217_v48 = vpack.c.bf16 %v390_v33, %v323_v40 }
  0xc8   :  { %16917 = vst [vmem:[#allocation32_spill] sm:$0xff] %v9442_v2  ;;  %6639 = vrot.lane.b32.xlu1 %v9046_v7, %s16274_s27 }
  0xc9   :  { %786 = vrot.lane.b32.xlu0 %v9121_v24, %s8945_s26  ;;  %2509 = vmatprep.subr.bf16.mxu1 %v2217_v48 }
  0xca   :  { %2510 = vmatpush1.bf16.msra.mxu1 %v2216_v60  ;;  %v9451_v30 = vpop.permute.xlu1 %6384 }
  0xcb   :  { %16918 = vst [vmem:[#allocation33_spill] sm:$0xff] %v9451_v30  ;;  %v9453_v63 = vpop.permute.xlu0 %6379 }
  0xcc   :  { %16919 = vst [vmem:[#allocation34_spill] sm:$0xff] %v9453_v63  ;;  %6649 = vrot.lane.b32.xlu1 %v9031_v3, %s16274_s27 }
  0xcd   :  { %6644 = vrot.lane.b32.xlu0 %v9066_v11, %s16274_s27 }
  0xce   :  { %v6390_v20 = vpop.permute.xlu1 %6389 }
  0xcf   :  { %v9459_v0 = vpop.permute.xlu0 %384  ;;  %v6392_v59 = vunpack.i.h.bf16 %v6390_v20  ;;  %v6391_v27 = vunpack.i.l.bf16 %v6390_v20 }
  0xd0   :  { %16920 = vst [vmem:[#allocation35_spill] sm:$0xff] %v9459_v0  ;;  %6659 = vrot.lane.b32.xlu1 %v9089_v17, %s16274_s27 }
  0xd1   :  { %6654 = vrot.lane.b32.xlu0 %v9060_v10, %s16274_s27  ;;  %v454_v20 = vsel %vm16389_vm5, %v6391_v27, %v6392_v59 }
  0xd2   :  { %v9465_v41 = vpop.permute.xlu1 %6399 }
  0xd3   :  { %16921 = vst [vmem:[#allocation36_spill] sm:$0xff] %v9465_v41  ;;  %v6395_v45 = vpop.permute.xlu0 %6394  ;;  %v16264_v61 = vunpack.i.h.bf16 %v9465_v41 }
  0xd4   :  { %6669 = vrot.lane.b32.xlu1 %v9112_v23, %s16274_s27  ;;  %v6396_v56 = vunpack.i.l.bf16 %v6395_v45  ;;  %v6397_v14 = vunpack.i.h.bf16 %v6395_v45 }
  0xd5   :  { %6664 = vrot.lane.b32.xlu0 %v9084_v16, %s16274_s27 }
  0xd6   :  { %v9471_v6 = vpop.permute.xlu1 %6409  ;;  %v455_v63 = vsel %vm16389_vm5, %v6392_v59, %v6396_v56 }
  0xd7   :  { %16922 = vst [vmem:[#allocation37_spill] sm:$0xff] %v9471_v6  ;;  %v9473_v40 = vpop.permute.xlu0 %6404 }
  0xd8   :  { %16923 = vst [vmem:[#allocation38_spill] sm:$0xff] %v9473_v40  ;;  %853 = vrot.lane.b32.xlu1 %v9121_v24, %s16274_s27 }
  0xd9   :  { %6674 = vrot.lane.b32.xlu0 %v9107_v22, %s16274_s27  ;;  %s16405_s27 = smov 29  }
  0xda   :  { %v9479_v33 = vpop.permute.xlu1 %6419 }
  0xdb   :  { %16924 = vst [vmem:[#allocation39_spill] sm:$0xff] %v9479_v33  ;;  %v9481_v48 = vpop.permute.xlu0 %6414 }
  0xdc   :  { %16925 = vst [vmem:[#allocation40_spill] sm:$0xff] %v9481_v48  ;;  %6684 = vrot.lane.b32.xlu1 %v9066_v11, %s16346_s28 }
  0xdd   :  { %6679 = vrot.lane.b32.xlu0 %v9046_v7, %s16346_s28 }
  0xde   :  { %v9487_v62 = vpop.permute.xlu1 %451 }
  0xdf   :  { %16926 = vst [vmem:[#allocation41_spill] sm:$0xff] %v9487_v62  ;;  %v9489_v60 = vpop.permute.xlu0 %6424  ;;  %v6401_v62 = vunpack.i.l.bf16 %v9465_v41 }
  0xe0   :  { %16927 = vst [vmem:[#allocation42_spill] sm:$0xff] %v9489_v60  ;;  %6694 = vrot.lane.b32.xlu1 %v9060_v10, %s16346_s28 }
  0xe1   :  { %6689 = vrot.lane.b32.xlu0 %v9031_v3, %s16346_s28 }
  0xe2   :  { %v6435_v0 = vpop.permute.xlu1 %6434 }
  0xe3   :  { %v6436_v30 = vunpack.i.l.bf16 %v6435_v0  ;;  %v6430_v57 = vpop.permute.xlu0 %6429  ;;  %v6437_v60 = vunpack.i.h.bf16 %v6435_v0 }
  0xe4   :  { %v6432_v48 = vunpack.i.h.bf16 %v6430_v57  ;;  %v6431_v33 = vunpack.i.l.bf16 %v6430_v57  ;;  %6704 = vrot.lane.b32.xlu1 %v9084_v16, %s16346_s28 }
  0xe5   :  { %6699 = vrot.lane.b32.xlu0 %v9089_v17, %s16346_s28  ;;  %v523_v27 = vsel %vm16391_vm6, %v6436_v30, %v6437_v60 }
  0xe6   :  { %v9501_v18 = vpop.permute.xlu1 %6444  ;;  %v522_v31 = vsel %vm16391_vm6, %v6432_v48, %v6436_v30  ;;  %v521_v57 = vsel %vm16391_vm6, %v6431_v33, %v6432_v48  ;;  %v9528_v33 = vsel %vm16389_vm5, %v6401_v62, %v16264_v61  ;;  %v456_v48 = vsel %vm16389_vm5, %v6396_v56, %v6397_v14 }
  0xe7   :  { %16928 = vst [vmem:[#allocation43_spill] sm:$0xff] %v9501_v18  ;;  %v9507_v32 = vpop.permute.xlu0 %6439  ;;  %v2231_v51 = vpack.c.bf16 %v522_v31, %v455_v63  ;;  %v2230_v0 = vpack.c.bf16 %v521_v57, %v454_v20  ;;  %v457_v63 = vsel %vm16389_vm5, %v6397_v14, %v6401_v62  ;;  %16932 = vst [vmem:[#allocation47_spill] sm:$0xff] %v9528_v33  ;;  %v8911_v33 = vld [vmem:[%s16231_s0 + $0x70] sm:$0xff]  ;;  %vm2411_vm5 = vcmask 719872  }
  0xe8   :  { %16929 = vst [vmem:[#allocation44_spill] sm:$0xff] %v9507_v32  ;;  %v16265_v42 = vunpack.i.h.bf16 %v9507_v32  ;;  %v6441_v6 = vunpack.i.l.bf16 %v9507_v32  ;;  %6714 = vrot.lane.b32.xlu1 %v9107_v22, %s16346_s28  ;;  %v2232_v20 = vpack.c.bf16 %v523_v27, %v456_v48 }
  0xe9   :  { %6709 = vrot.lane.b32.xlu0 %v9112_v23, %s16346_s28  ;;  %2470 = vmatprep.subr.bf16.mxu0 %v2231_v51 }
  0xea   :  { %v9519_v59 = vsel %vm16391_vm6, %v6441_v6, %v16265_v42  ;;  %2471 = vmatpush1.bf16.msra.mxu0 %v2230_v0  ;;  %v9521_v31 = vpop.permute.xlu1 %6454  ;;  %v524_v45 = vsel %vm16391_vm6, %v6437_v60, %v6441_v6  ;;  %vm1827_vm6 = vcmask 56320  }
  0xeb   :  { %16930 = vst [vmem:[#allocation45_spill] sm:$0xff] %v9519_v59  ;;  %16931 = vst [vmem:[#allocation46_spill] sm:$0xff] %v9521_v31  ;;  %v9530_v51 = vpop.permute.xlu0 %6449  ;;  %v2233_v30 = vpack.c.bf16 %v524_v45, %v457_v63  ;;  %v6828_v59 = vpack.i.bf16 %v8911_v33, %v9103_v21 }
  0xec   :  { %16933 = vst [vmem:[#allocation48_spill] sm:$0xff] %v9530_v51  ;;  %6719 = vrot.lane.b32.xlu1 %v9046_v7, %s16272_s29 }
  0xed   :  { %920 = vrot.lane.b32.xlu0 %v9121_v24, %s16346_s28  ;;  %2511 = vmatprep.subr.bf16.mxu1 %v2233_v30 }
  0xee   :  { %2512 = vmatpush1.bf16.msra.mxu1 %v2232_v20  ;;  %v9539_v6 = vpop.permute.xlu1 %6464 }
  0xef   :  { %16934 = vst [vmem:[#allocation49_spill] sm:$0xff] %v9539_v6  ;;  %v9541_v62 = vpop.permute.xlu0 %6459 }
  0xf0   :  { %16935 = vst [vmem:[#allocation50_spill] sm:$0xff] %v9541_v62  ;;  %6729 = vrot.lane.b32.xlu1 %v9031_v3, %s16272_s29 }
  0xf1   :  { %6724 = vrot.lane.b32.xlu0 %v9066_v11, %s16272_s29 }
  0xf2   :  { %v6470_v56 = vpop.permute.xlu1 %6469 }
  0xf3   :  { %v9547_v14 = vpop.permute.xlu0 %518  ;;  %v6472_v57 = vunpack.i.h.bf16 %v6470_v56  ;;  %v6471_v61 = vunpack.i.l.bf16 %v6470_v56 }
  0xf4   :  { %16936 = vst [vmem:[#allocation51_spill] sm:$0xff] %v9547_v14  ;;  %6739 = vrot.lane.b32.xlu1 %v9089_v17, %s16272_s29 }
  0xf5   :  { %6734 = vrot.lane.b32.xlu0 %v9060_v10, %s16272_s29 }
  0xf6   :  { %v9553_v60 = vpop.permute.xlu1 %6479 }
  0xf7   :  { %16937 = vst [vmem:[#allocation52_spill] sm:$0xff] %v9553_v60  ;;  %v6475_v0 = vpop.permute.xlu0 %6474 }
  0xf8   :  { %6749 = vrot.lane.b32.xlu1 %v9112_v23, %s16272_s29  ;;  %v6476_v42 = vunpack.i.l.bf16 %v6475_v0  ;;  %v6477_v56 = vunpack.i.h.bf16 %v6475_v0 }
  0xf9   :  { %6744 = vrot.lane.b32.xlu0 %v9084_v16, %s16272_s29 }
  0xfa   :  { %v9559_v27 = vpop.permute.xlu1 %6489 }
  0xfb   :  { %16938 = vst [vmem:[#allocation53_spill] sm:$0xff] %v9559_v27  ;;  %v9561_v63 = vpop.permute.xlu0 %6484  ;;  %v8913_v27 = vld [vmem:[%s16231_s0 + $0x60] sm:$0xff] }
  0xfc   :  { %16939 = vst [vmem:[#allocation54_spill] sm:$0xff] %v9561_v63  ;;  %987 = vrot.lane.b32.xlu1 %v9121_v24, %s16272_s29 }
  0xfd   :  { %6754 = vrot.lane.b32.xlu0 %v9107_v22, %s16272_s29  ;;  %s16350_s29 = smov 37  }
  0xfe   :  { %v9567_v45 = vpop.permute.xlu1 %6499 }
  0xff   :  { %16940 = vst [vmem:[#allocation55_spill] sm:$0xff] %v9567_v45  ;;  %v9569_v30 = vpop.permute.xlu0 %6494 }
 0x100   :  { %16941 = vst [vmem:[#allocation56_spill] sm:$0xff] %v9569_v30  ;;  %6764 = vrot.lane.b32.xlu1 %v9066_v11, %s16276_s30  ;;  %v589_v30 = vsel %vm16386_vm7, %v6472_v57, %v6476_v42 }
 0x101   :  { %6759 = vrot.lane.b32.xlu0 %v9046_v7, %s16276_s30 }
 0x102   :  { %v9575_v48 = vpop.permute.xlu1 %585 }
 0x103   :  { %16942 = vst [vmem:[#allocation57_spill] sm:$0xff] %v9575_v48  ;;  %v9577_v20 = vpop.permute.xlu0 %6504  ;;  %v6481_v48 = vunpack.i.l.bf16 %v9553_v60 }
 0x104   :  { %16943 = vst [vmem:[#allocation58_spill] sm:$0xff] %v9577_v20  ;;  %6774 = vrot.lane.b32.xlu1 %v9060_v10, %s16276_s30 }
 0x105   :  { %6769 = vrot.lane.b32.xlu0 %v9031_v3, %s16276_s30  ;;  %v588_v3 = vsel %vm16386_vm7, %v6471_v61, %v6472_v57  ;;  %v6798_v57 = vpack.i.bf16 %v9051_v8, %v9036_v4 }
 0x106   :  { %v6515_v14 = vpop.permute.xlu1 %6514 }
 0x107   :  { %v6516_v6 = vunpack.i.l.bf16 %v6515_v14  ;;  %v6510_v11 = vpop.permute.xlu0 %6509  ;;  %v6517_v10 = vunpack.i.h.bf16 %v6515_v14 }
 0x108   :  { %v9583_v45 = vunpack.i.h.bf16 %v6510_v11  ;;  %v6511_v7 = vunpack.i.l.bf16 %v6510_v11  ;;  %6784 = vrot.lane.b32.xlu1 %v9084_v16, %s16276_s30  ;;  %v16278_v11 = vunpack.i.h.bf16 %v9553_v60  ;;  %v8912_v60 = vld [vmem:[%s16231_s0 + $0x58] sm:$0xff] }
 0x109   :  { %6779 = vrot.lane.b32.xlu0 %v9089_v17, %s16276_s30  ;;  %v9715_v63 = vpack.i.bf16 %v8913_v27, %v8912_v60  ;;  %v8914_v60 = vld [vmem:[%s16231_s0 + $0x78] sm:$0xff]  ;;  %v8915_v27 = vld [vmem:[%s16231_s0 + $0x80] sm:$0xff] }
 0x10a   :  { %v9591_v20 = vpop.permute.xlu1 %6524  ;;  %v9596_v62 = vsel %vm654_vm8, %v9583_v45, %v6516_v6  ;;  %v655_v16 = vsel %vm654_vm8, %v6511_v7, %v9583_v45  ;;  %v9613_v7 = vsel %vm654_vm8, %v6516_v6, %v6517_v10  ;;  %v9629_v4 = vsel %vm16386_vm7, %v6481_v48, %v16278_v11 }
 0x10b   :  { %v9601_v14 = vpop.permute.xlu0 %6519  ;;  %v2247_v17 = vpack.c.bf16 %v9596_v62, %v589_v30  ;;  %v2246_v31 = vpack.c.bf16 %v655_v16, %v588_v3  ;;  %16946 = vst [vmem:[#allocation61_spill] sm:$0xff] %v9629_v4  ;;  %v590_v6 = vsel %vm16386_vm7, %v6476_v42, %v6477_v56  ;;  %v9689_v42 = vld [vmem:[%s16231_s0 + $0x40] sm:$0xff] }
 0x10c   :  { %v16279_v61 = vunpack.i.h.bf16 %v9601_v14  ;;  %v6521_v0 = vunpack.i.l.bf16 %v9601_v14  ;;  %6794 = vrot.lane.b32.xlu1 %v9107_v22, %s16276_s30  ;;  %v591_v22 = vsel %vm16386_vm7, %v6477_v56, %v6481_v48  ;;  %v9645_v48 = vld [vmem:[%s16231_s0 + $0x30] sm:$0xff]  ;;  %v9658_v56 = vld [vmem:[%s16231_s0 + $0x20] sm:$0xff]  ;;  %vm16475_vm7 = vcmask 236544  }
 0x10d   :  { %6789 = vrot.lane.b32.xlu0 %v9112_v23, %s16276_s30  ;;  %2472 = vmatprep.subr.bf16.mxu0 %v2247_v17 }
 0x10e   :  { %v9618_v30 = vsel %vm654_vm8, %v6521_v0, %v16279_v61  ;;  %2473 = vmatpush1.bf16.msra.mxu0 %v2246_v31  ;;  %v9620_v3 = vpop.permute.xlu1 %6534  ;;  %v9624_v16 = vsel %vm654_vm8, %v6517_v10, %v6521_v0  ;;  %v2248_v31 = vpack.c.bf16 %v9613_v7, %v590_v6  ;;  %v9640_v10 = vld [vmem:[%s16231_s0 + $0x28] sm:$0xff]  ;;  %v9663_v0 = vld [vmem:[%s16231_s0 + $0x18] sm:$0xff] }
 0x10f   :  { %16944 = vst [vmem:[#allocation59_spill] sm:$0xff] %v9618_v30  ;;  %16945 = vst [vmem:[#allocation60_spill] sm:$0xff] %v9620_v3  ;;  %v9631_v8 = vpop.permute.xlu0 %6529  ;;  %v2249_v23 = vpack.c.bf16 %v9624_v16, %v591_v22  ;;  %v9649_v17 = vpack.i.bf16 %v9645_v48, %v9640_v10 }
 0x110   :  { %6799 = vrot.lane.b32.xlu1 %v6798_v57, %s8950_s12  ;;  %v9667_v57 = vpack.i.bf16 %v9658_v56, %v9663_v0 }
 0x111   :  { %1054 = vrot.lane.b32.xlu0 %v9121_v24, %s16276_s30  ;;  %2513 = vmatprep.subr.bf16.mxu1 %v2249_v23  ;;  %v8908_v24 = vld [vmem:[%s16231_s0 + $0x50] sm:$0xff]  ;;  %s8951_s30 = smov 48  }
 0x112   :  { %2514 = vmatpush1.bf16.msra.mxu1 %v2248_v31  ;;  %v9669_v22 = vpop.permute.xlu1 %6544  ;;  %v6818_v23 = vpack.i.bf16 %v8908_v24, %v9080_v15  ;;  %v9684_v31 = vld [vmem:[%s16231_s0 + $0x38] sm:$0xff]  ;;  %v9794_v9 = vpack.i.bf16 %v8908_v24, %v8918_v13  ;;  %v8919_v13 = vld [vmem:[%s16231_s0 + $0x68] sm:$0xff] }
 0x113   :  { %16947 = vst [vmem:[#allocation62_spill] sm:$0xff] %v9669_v22  ;;  %v9671_v6 = vpop.permute.xlu0 %6539  ;;  %v9693_v11 = vpack.i.bf16 %v9689_v42, %v9684_v31  ;;  %v9804_v24 = vpack.i.bf16 %v8911_v33, %v8919_v13 }
 0x114   :  { %16948 = vst [vmem:[#allocation63_spill] sm:$0xff] %v9671_v6  ;;  %6809 = vrot.lane.b32.xlu1 %v9649_v17, %s8950_s12 }
 0x115   :  { %6804 = vrot.lane.b32.xlu0 %v9667_v57, %s8950_s12 }
 0x116   :  { %v9695_v61 = vpop.permute.xlu1 %6554 }
 0x117   :  { %v9698_v15 = vunpack.i.h.bf16 %v9695_v61  ;;  %v9700_v4 = vpop.permute.xlu0 %6549  ;;  %v6556_v22 = vunpack.i.l.bf16 %v9695_v61 }
 0x118   :  { %16949 = vst [vmem:[#allocation64_spill] sm:$0xff] %v9700_v4  ;;  %6819 = vrot.lane.b32.xlu1 %v6818_v23, %s8950_s12  ;;  %v9732_v23 = vpack.i.bf16 %v8915_v27, %v8914_v60 }
 0x119   :  { %6814 = vrot.lane.b32.xlu0 %v9693_v11, %s8950_s12 }
 0x11a   :  { %v9719_v41 = vpop.permute.xlu1 %6564 }
 0x11b   :  { %v16295_v21 = vunpack.i.h.bf16 %v9719_v41  ;;  %v6566_v32 = vunpack.i.l.bf16 %v9719_v41  ;;  %v6560_v5 = vpop.permute.xlu0 %6559 }
 0x11c   :  { %v6562_v51 = vunpack.i.h.bf16 %v6560_v5  ;;  %v6561_v18 = vunpack.i.l.bf16 %v6560_v5  ;;  %6829 = vrot.lane.b32.xlu1 %v6828_v59, %s8950_s12 }
 0x11d   :  { %6824 = vrot.lane.b32.xlu0 %v9715_v63, %s8950_s12  ;;  %v9737_v5 = vsel %vm721_vm9, %v6566_v32, %v16295_v21 }
 0x11e   :  { %16950 = vst [vmem:[#allocation65_spill] sm:$0xff] %v9737_v5  ;;  %v9739_v59 = vpop.permute.xlu1 %6574  ;;  %v9743_v40 = vsel %vm721_vm9, %v9698_v15, %v6561_v18  ;;  %v9746_v2 = vsel %vm721_vm9, %v6562_v51, %v6566_v32  ;;  %v9749_v28 = vsel %vm721_vm9, %v6561_v18, %v6562_v51  ;;  %v9764_v32 = vld [vmem:[%s16231_s0 + $0x8] sm:$0xff]  ;;  %v9769_v18 = vld [vmem:[%s16231_s0 + $0x10] sm:$0xff] }
 0x11f   :  { %v9751_v4 = vpop.permute.xlu0 %6569  ;;  %v9773_v51 = vpack.i.bf16 %v9769_v18, %v9764_v32 }
 0x120   :  { %1122 = vrot.lane.b32.xlu1 %v9328_v19, %s8950_s12 }
 0x121   :  { %6834 = vrot.lane.b32.xlu0 %v9732_v23, %s8950_s12 }
 0x122   :  { %v9775_v21 = vpop.permute.xlu1 %6584 }
 0x123   :  { %16951 = vst [vmem:[#allocation66_spill] sm:$0xff] %v9775_v21  ;;  %v9777_v60 = vpop.permute.xlu0 %6579 }
 0x124   :  { %16952 = vst [vmem:[#allocation67_spill] sm:$0xff] %v9777_v60  ;;  %6844 = vrot.lane.b32.xlu1 %v9667_v57, %s8951_s30 }
 0x125   :  { %6839 = vrot.lane.b32.xlu0 %v9773_v51, %s8951_s30 }
 0x126   :  { %v9783_v27 = vpop.permute.xlu1 %6594 }
 0x127   :  { %16953 = vst [vmem:[#allocation68_spill] sm:$0xff] %v9783_v27  ;;  %v9785_v43 = vpop.permute.xlu0 %6589 }
 0x128   :  { %16954 = vst [vmem:[#allocation69_spill] sm:$0xff] %v9785_v43  ;;  %6854 = vrot.lane.b32.xlu1 %v9693_v11, %s8951_s30 }
 0x129   :  { %6849 = vrot.lane.b32.xlu0 %v9649_v17, %s8951_s30 }
 0x12a   :  { %v6605_v1 = vpop.permute.xlu1 %6604 }
 0x12b   :  { %v6606_v26 = vunpack.i.l.bf16 %v6605_v1  ;;  %v6600_v58 = vpop.permute.xlu0 %6599  ;;  %v6607_v44 = vunpack.i.h.bf16 %v6605_v1 }
 0x12c   :  { %v6602_v27 = vunpack.i.h.bf16 %v6600_v58  ;;  %v6601_v43 = vunpack.i.l.bf16 %v6600_v58  ;;  %6864 = vrot.lane.b32.xlu1 %v9715_v63, %s8951_s30  ;;  %v722_v58 = vsel %vm721_vm9, %v6556_v22, %v9698_v15 }
 0x12d   :  { %6859 = vrot.lane.b32.xlu0 %v9794_v9, %s8951_s30  ;;  %v791_v33 = vsel %vm16373_vm10, %v6606_v26, %v6607_v44 }
 0x12e   :  { %v9806_v61 = vpop.permute.xlu1 %6614  ;;  %v790_v50 = vsel %vm16373_vm10, %v6602_v27, %v6606_v26  ;;  %v789_v12 = vsel %vm16373_vm10, %v6601_v43, %v6602_v27  ;;  %v2264_v26 = vpack.c.bf16 %v791_v33, %v9749_v28 }
 0x12f   :  { %16955 = vst [vmem:[#allocation70_spill] sm:$0xff] %v9806_v61  ;;  %v9812_v60 = vpop.permute.xlu0 %6609  ;;  %v2263_v1 = vpack.c.bf16 %v790_v50, %v9743_v40  ;;  %v2262_v21 = vpack.c.bf16 %v789_v12, %v722_v58 }
 0x130   :  { %16956 = vst [vmem:[#allocation71_spill] sm:$0xff] %v9812_v60  ;;  %v16312_v6 = vunpack.i.h.bf16 %v9812_v60  ;;  %v6611_v55 = vunpack.i.l.bf16 %v9812_v60  ;;  %6874 = vrot.lane.b32.xlu1 %v9732_v23, %s8951_s30 }
 0x131   :  { %6869 = vrot.lane.b32.xlu0 %v9804_v24, %s8951_s30  ;;  %2474 = vmatprep.subr.bf16.mxu0 %v2263_v1 }
 0x132   :  { %v9825_v43 = vsel %vm16373_vm10, %v6611_v55, %v16312_v6  ;;  %2475 = vmatpush1.bf16.msra.mxu0 %v2262_v21  ;;  %v9827_v50 = vpop.permute.xlu1 %6624  ;;  %v792_v12 = vsel %vm16373_vm10, %v6607_v44, %v6611_v55  ;;  %vm16476_vm10 = vcmask 302080  }
 0x133   :  { %16957 = vst [vmem:[#allocation72_spill] sm:$0xff] %v9825_v43  ;;  %16958 = vst [vmem:[#allocation73_spill] sm:$0xff] %v9827_v50  ;;  %v9830_v22 = vpop.permute.xlu0 %6619  ;;  %v2265_v27 = vpack.c.bf16 %v792_v12, %v9746_v2 }
 0x134   :  { %16959 = vst [vmem:[#allocation74_spill] sm:$0xff] %v9830_v22  ;;  %6879 = vrot.lane.b32.xlu1 %v9773_v51, %s8952_s24 }
 0x135   :  { %1173 = vrot.lane.b32.xlu0 %v9328_v19, %s8951_s30  ;;  %2515 = vmatprep.subr.bf16.mxu1 %v2265_v27 }
 0x136   :  { %2516 = vmatpush1.bf16.msra.mxu1 %v2264_v26  ;;  %v9840_v21 = vpop.permute.xlu1 %6634 }
 0x137   :  { %16960 = vst [vmem:[#allocation75_spill] sm:$0xff] %v9840_v21  ;;  %v9842_v55 = vpop.permute.xlu0 %6629 }
 0x138   :  { %16961 = vst [vmem:[#allocation76_spill] sm:$0xff] %v9842_v55  ;;  %6889 = vrot.lane.b32.xlu1 %v9649_v17, %s8952_s24 }
 0x139   :  { %6884 = vrot.lane.b32.xlu0 %v9667_v57, %s8952_s24 }
 0x13a   :  { %v6640_v44 = vpop.permute.xlu1 %6639 }
 0x13b   :  { %v9848_v58 = vpop.permute.xlu0 %786  ;;  %v6642_v21 = vunpack.i.h.bf16 %v6640_v44  ;;  %v6641_v55 = vunpack.i.l.bf16 %v6640_v44 }
 0x13c   :  { %16962 = vst [vmem:[#allocation77_spill] sm:$0xff] %v9848_v58  ;;  %6899 = vrot.lane.b32.xlu1 %v9794_v9, %s8952_s24 }
 0x13d   :  { %6894 = vrot.lane.b32.xlu0 %v9693_v11, %s8952_s24  ;;  %v856_v44 = vsel %vm16359_vm11, %v6641_v55, %v6642_v21 }
 0x13e   :  { %v9854_v1 = vpop.permute.xlu1 %6649 }
 0x13f   :  { %16963 = vst [vmem:[#allocation78_spill] sm:$0xff] %v9854_v1  ;;  %v6645_v33 = vpop.permute.xlu0 %6644  ;;  %v16331_v53 = vunpack.i.h.bf16 %v9854_v1 }
 0x140   :  { %6909 = vrot.lane.b32.xlu1 %v9804_v24, %s8952_s24 }
 0x141   :  { %6904 = vrot.lane.b32.xlu0 %v9715_v63, %s8952_s24 }
 0x142   :  { %v9860_v12 = vpop.permute.xlu1 %6659 }
 0x143   :  { %16964 = vst [vmem:[#allocation79_spill] sm:$0xff] %v9860_v12  ;;  %v9862_v27 = vpop.permute.xlu0 %6654 }
 0x144   :  { %16965 = vst [vmem:[#allocation80_spill] sm:$0xff] %v9862_v27  ;;  %1224 = vrot.lane.b32.xlu1 %v9328_v19, %s8952_s24  ;;  %v6647_v27 = vunpack.i.h.bf16 %v6645_v33 }
 0x145   :  { %6914 = vrot.lane.b32.xlu0 %v9732_v23, %s8952_s24 }
 0x146   :  { %v9868_v26 = vpop.permute.xlu1 %6669 }
 0x147   :  { %16966 = vst [vmem:[#allocation81_spill] sm:$0xff] %v9868_v26  ;;  %v9870_v13 = vpop.permute.xlu0 %6664  ;;  %v6646_v26 = vunpack.i.l.bf16 %v6645_v33 }
 0x148   :  { %16967 = vst [vmem:[#allocation82_spill] sm:$0xff] %v9870_v13  ;;  %6924 = vrot.lane.b32.xlu1 %v9667_v57, %s16407_s13 }
 0x149   :  { %6919 = vrot.lane.b32.xlu0 %v9773_v51, %s16407_s13  ;;  %v857_v61 = vsel %vm16359_vm11, %v6642_v21, %v6646_v26 }
 0x14a   :  { %v9876_v6 = vpop.permute.xlu1 %853 }
 0x14b   :  { %16968 = vst [vmem:[#allocation83_spill] sm:$0xff] %v9876_v6  ;;  %v9878_v58 = vpop.permute.xlu0 %6674  ;;  %v6651_v6 = vunpack.i.l.bf16 %v9854_v1 }
 0x14c   :  { %16969 = vst [vmem:[#allocation84_spill] sm:$0xff] %v9878_v58  ;;  %6934 = vrot.lane.b32.xlu1 %v9693_v11, %s16407_s13 }
 0x14d   :  { %6929 = vrot.lane.b32.xlu0 %v9649_v17, %s16407_s13  ;;  %v9917_v33 = vsel %vm16359_vm11, %v6651_v6, %v16331_v53 }
 0x14e   :  { %v6685_v13 = vpop.permute.xlu1 %6684  ;;  %16974 = vst [vmem:[#allocation89_spill] sm:$0xff] %v9917_v33 }
 0x14f   :  { %v6686_v50 = vunpack.i.l.bf16 %v6685_v13  ;;  %v6680_v43 = vpop.permute.xlu0 %6679  ;;  %v6687_v58 = vunpack.i.h.bf16 %v6685_v13 }
 0x150   :  { %v6682_v12 = vunpack.i.h.bf16 %v6680_v43  ;;  %v6681_v60 = vunpack.i.l.bf16 %v6680_v43  ;;  %6944 = vrot.lane.b32.xlu1 %v9715_v63, %s16407_s13 }
 0x151   :  { %6939 = vrot.lane.b32.xlu0 %v9794_v9, %s16407_s13  ;;  %v925_v21 = vsel %vm16370_vm12, %v6686_v50, %v6687_v58 }
 0x152   :  { %v9890_v22 = vpop.permute.xlu1 %6694  ;;  %v924_v54 = vsel %vm16370_vm12, %v6682_v12, %v6686_v50  ;;  %v923_v43 = vsel %vm16370_vm12, %v6681_v60, %v6682_v12  ;;  %v858_v12 = vsel %vm16359_vm11, %v6646_v26, %v6647_v27 }
 0x153   :  { %16970 = vst [vmem:[#allocation85_spill] sm:$0xff] %v9890_v22  ;;  %v9896_v3 = vpop.permute.xlu0 %6689  ;;  %v2279_v52 = vpack.c.bf16 %v924_v54, %v857_v61  ;;  %v2278_v13 = vpack.c.bf16 %v923_v43, %v856_v44  ;;  %v859_v61 = vsel %vm16359_vm11, %v6647_v27, %v6651_v6  ;;  %v2280_v44 = vpack.c.bf16 %v925_v21, %v858_v12 }
 0x154   :  { %16971 = vst [vmem:[#allocation86_spill] sm:$0xff] %v9896_v3  ;;  %v16332_v49 = vunpack.i.h.bf16 %v9896_v3  ;;  %v6691_v46 = vunpack.i.l.bf16 %v9896_v3  ;;  %6954 = vrot.lane.b32.xlu1 %v9732_v23, %s16407_s13  ;;  %vm16486_vm11 = vcmask 318464  }
 0x155   :  { %6949 = vrot.lane.b32.xlu0 %v9804_v24, %s16407_s13  ;;  %2476 = vmatprep.subr.bf16.mxu0 %v2279_v52 }
 0x156   :  { %v9908_v60 = vsel %vm16370_vm12, %v6691_v46, %v16332_v49  ;;  %2477 = vmatpush1.bf16.msra.mxu0 %v2278_v13  ;;  %v9910_v54 = vpop.permute.xlu1 %6704  ;;  %v926_v55 = vsel %vm16370_vm12, %v6687_v58, %v6691_v46  ;;  %vm16474_vm12 = vcmask 310272  }
 0x157   :  { %16972 = vst [vmem:[#allocation87_spill] sm:$0xff] %v9908_v60  ;;  %16973 = vst [vmem:[#allocation88_spill] sm:$0xff] %v9910_v54  ;;  %v9919_v52 = vpop.permute.xlu0 %6699  ;;  %v2281_v50 = vpack.c.bf16 %v926_v55, %v859_v61 }
 0x158   :  { %16975 = vst [vmem:[#allocation90_spill] sm:$0xff] %v9919_v52  ;;  %6959 = vrot.lane.b32.xlu1 %v9773_v51, %s16348_s23 }
 0x159   :  { %1275 = vrot.lane.b32.xlu0 %v9328_v19, %s16407_s13  ;;  %2517 = vmatprep.subr.bf16.mxu1 %v2281_v50 }
 0x15a   :  { %2518 = vmatpush1.bf16.msra.mxu1 %v2280_v44  ;;  %v9928_v46 = vpop.permute.xlu1 %6714 }
 0x15b   :  { %16976 = vst [vmem:[#allocation91_spill] sm:$0xff] %v9928_v46  ;;  %v9930_v6 = vpop.permute.xlu0 %6709 }
 0x15c   :  { %16977 = vst [vmem:[#allocation92_spill] sm:$0xff] %v9930_v6  ;;  %6969 = vrot.lane.b32.xlu1 %v9649_v17, %s16348_s23 }
 0x15d   :  { %6964 = vrot.lane.b32.xlu0 %v9667_v57, %s16348_s23 }
 0x15e   :  { %v6720_v58 = vpop.permute.xlu1 %6719 }
 0x15f   :  { %v9936_v27 = vpop.permute.xlu0 %920  ;;  %v6721_v43 = vunpack.i.l.bf16 %v6720_v58 }
 0x160   :  { %16978 = vst [vmem:[#allocation93_spill] sm:$0xff] %v9936_v27  ;;  %6979 = vrot.lane.b32.xlu1 %v9794_v9, %s16348_s23 }
 0x161   :  { %6974 = vrot.lane.b32.xlu0 %v9693_v11, %s16348_s23 }
 0x162   :  { %v9942_v26 = vpop.permute.xlu1 %6729 }
 0x163   :  { %16979 = vst [vmem:[#allocation94_spill] sm:$0xff] %v9942_v26  ;;  %v6725_v13 = vpop.permute.xlu0 %6724  ;;  %v16353_v1 = vunpack.i.h.bf16 %v9942_v26 }
 0x164   :  { %6989 = vrot.lane.b32.xlu1 %v9804_v24, %s16348_s23  ;;  %v6726_v53 = vunpack.i.l.bf16 %v6725_v13  ;;  %v6727_v6 = vunpack.i.h.bf16 %v6725_v13 }
 0x165   :  { %6984 = vrot.lane.b32.xlu0 %v9715_v63, %s16348_s23 }
 0x166   :  { %v9948_v21 = vpop.permute.xlu1 %6739 }
 0x167   :  { %16980 = vst [vmem:[#allocation95_spill] sm:$0xff] %v9948_v21  ;;  %v9950_v61 = vpop.permute.xlu0 %6734 }
 0x168   :  { %16981 = vst [vmem:[#allocation96_spill] sm:$0xff] %v9950_v61  ;;  %1326 = vrot.lane.b32.xlu1 %v9328_v19, %s16348_s23  ;;  %v6722_v19 = vunpack.i.h.bf16 %v6720_v58 }
 0x169   :  { %6994 = vrot.lane.b32.xlu0 %v9732_v23, %s16348_s23 }
 0x16a   :  { %v9956_v55 = vpop.permute.xlu1 %6749  ;;  %v990_v58 = vsel %vm16352_vm13, %v6721_v43, %v6722_v19  ;;  %v991_v33 = vsel %vm16352_vm13, %v6722_v19, %v6726_v53  ;;  %v992_v19 = vsel %vm16352_vm13, %v6726_v53, %v6727_v6 }
 0x16b   :  { %16982 = vst [vmem:[#allocation97_spill] sm:$0xff] %v9956_v55  ;;  %v9958_v50 = vpop.permute.xlu0 %6744 }
 0x16c   :  { %16983 = vst [vmem:[#allocation98_spill] sm:$0xff] %v9958_v50  ;;  %7004 = vrot.lane.b32.xlu1 %v9667_v57, %s16350_s29 }
 0x16d   :  { %6999 = vrot.lane.b32.xlu0 %v9773_v51, %s16350_s29 }
 0x16e   :  { %v9964_v12 = vpop.permute.xlu1 %987 }
 0x16f   :  { %16984 = vst [vmem:[#allocation99_spill] sm:$0xff] %v9964_v12  ;;  %v9966_v44 = vpop.permute.xlu0 %6754  ;;  %v6731_v12 = vunpack.i.l.bf16 %v9942_v26 }
 0x170   :  { %16985 = vst [vmem:[#allocation100_spill] sm:$0xff] %v9966_v44  ;;  %7014 = vrot.lane.b32.xlu1 %v9693_v11, %s16350_s29 }
 0x171   :  { %7009 = vrot.lane.b32.xlu0 %v9649_v17, %s16350_s29 }
 0x172   :  { %v6765_v49 = vpop.permute.xlu1 %6764 }
 0x173   :  { %v6766_v27 = vunpack.i.l.bf16 %v6765_v49  ;;  %v6760_v46 = vpop.permute.xlu0 %6759  ;;  %v6767_v44 = vunpack.i.h.bf16 %v6765_v49 }
 0x174   :  { %v6762_v50 = vunpack.i.h.bf16 %v6760_v46  ;;  %v6761_v55 = vunpack.i.l.bf16 %v6760_v46  ;;  %7024 = vrot.lane.b32.xlu1 %v9715_v63, %s16350_s29 }
 0x175   :  { %7019 = vrot.lane.b32.xlu0 %v9794_v9, %s16350_s29  ;;  %v1059_v43 = vsel %vm16356_vm14, %v6766_v27, %v6767_v44 }
 0x176   :  { %v9978_v54 = vpop.permute.xlu1 %6774  ;;  %v1058_v60 = vsel %vm16356_vm14, %v6762_v50, %v6766_v27  ;;  %v1057_v46 = vsel %vm16356_vm14, %v6761_v55, %v6762_v50  ;;  %v10005_v50 = vsel %vm16352_vm13, %v6731_v12, %v16353_v1 }
 0x177   :  { %16986 = vst [vmem:[#allocation101_spill] sm:$0xff] %v9978_v54  ;;  %v9984_v21 = vpop.permute.xlu0 %6769  ;;  %v2295_v61 = vpack.c.bf16 %v1058_v60, %v991_v33  ;;  %v2294_v49 = vpack.c.bf16 %v1057_v46, %v990_v58  ;;  %v993_v33 = vsel %vm16352_vm13, %v6727_v6, %v6731_v12  ;;  %16990 = vst [vmem:[#allocation105_spill] sm:$0xff] %v10005_v50  ;;  %vm16523_vm13 = vcmask 392192  }
 0x178   :  { %16987 = vst [vmem:[#allocation102_spill] sm:$0xff] %v9984_v21  ;;  %v16354_v3 = vunpack.i.h.bf16 %v9984_v21  ;;  %v6771_v52 = vunpack.i.l.bf16 %v9984_v21  ;;  %7034 = vrot.lane.b32.xlu1 %v9732_v23, %s16350_s29  ;;  %v2296_v58 = vpack.c.bf16 %v1059_v43, %v992_v19  ;;  %v16997_v19 = vpack.i.bf16 %v9245_v37, %v9242_v36 }
 0x179   :  { %7029 = vrot.lane.b32.xlu0 %v9804_v24, %s16350_s29  ;;  %2478 = vmatprep.subr.bf16.mxu0 %v2295_v61 }
 0x17a   :  { %v9996_v13 = vsel %vm16356_vm14, %v6771_v52, %v16354_v3  ;;  %2479 = vmatpush1.bf16.msra.mxu0 %v2294_v49  ;;  %v9998_v60 = vpop.permute.xlu1 %6784  ;;  %v1060_v55 = vsel %vm16356_vm14, %v6767_v44, %v6771_v52  ;;  %v8920_v52 = vld [vmem:[%s16231_s0 + $0x88] sm:$0xff]  ;;  %vm16477_vm14 = vcmask 384000  }
 0x17b   :  { %16988 = vst [vmem:[#allocation103_spill] sm:$0xff] %v9996_v13  ;;  %16989 = vst [vmem:[#allocation104_spill] sm:$0xff] %v9998_v60  ;;  %v10007_v61 = vpop.permute.xlu0 %6779  ;;  %v2297_v27 = vpack.c.bf16 %v1060_v55, %v993_v33 }
 0x17c   :  { %16991 = vst [vmem:[#allocation106_spill] sm:$0xff] %v10007_v61  ;;  %7039 = vrot.lane.b32.xlu1 %v9773_v51, %s16405_s27 }
 0x17d   :  { %1377 = vrot.lane.b32.xlu0 %v8920_v52, %s16350_s29  ;;  %2519 = vmatprep.subr.bf16.mxu1 %v2297_v27  ;;  %s8957_s29 = smov 7  }
 0x17e   :  { %2520 = vmatpush1.bf16.msra.mxu1 %v2296_v58  ;;  %v10018_v12 = vpop.permute.xlu1 %6794  ;;  %v16998_v58 = vunpack.i.l.bf16 %v9223_v25 }
 0x17f   :  { %16992 = vst [vmem:[#allocation107_spill] sm:$0xff] %v10018_v12  ;;  %v10020_v44 = vpop.permute.xlu0 %6789 }
 0x180   :  { %16993 = vst [vmem:[#allocation108_spill] sm:$0xff] %v10020_v44  ;;  %7049 = vrot.lane.b32.xlu1 %v9649_v17, %s16405_s27 }
 0x181   :  { %7044 = vrot.lane.b32.xlu0 %v9667_v57, %s16405_s27 }
 0x182   :  { %v6800_v53 = vpop.permute.xlu1 %6799 }
 0x183   :  { %v10026_v51 = vpop.permute.xlu0 %1054  ;;  %v6801_v33 = vunpack.i.l.bf16 %v6800_v53 }
 0x184   :  { %16994 = vst [vmem:[#allocation109_spill] sm:$0xff] %v10026_v51  ;;  %7059 = vrot.lane.b32.xlu1 %v9794_v9, %s16405_s27  ;;  %v7083_v9 = vpack.i.bf16 %v9663_v0, %v9769_v18  ;;  %v16355_v0 = vunpack.i.h.bf16 %v9223_v25 }
 0x185   :  { %7054 = vrot.lane.b32.xlu0 %v9693_v11, %s16405_s27  ;;  %v8921_v11 = vld [vmem:[%s16231_s0] sm:$0xff] }
 0x186   :  { %v10032_v6 = vpop.permute.xlu1 %6809 }
 0x187   :  { %v6805_v49 = vpop.permute.xlu0 %6804  ;;  %v16357_v37 = vunpack.i.l.bf16 %v10032_v6 }
 0x188   :  { %7069 = vrot.lane.b32.xlu1 %v9804_v24, %s16405_s27  ;;  %v7078_v24 = vpack.i.bf16 %v9764_v32, %v8921_v11 }
 0x189   :  { %7064 = vrot.lane.b32.xlu0 %v9715_v63, %s16405_s27  ;;  %v6802_v63 = vunpack.i.h.bf16 %v6800_v53 }
 0x18a   :  { %v10038_v17 = vpop.permute.xlu1 %6819 }
 0x18b   :  { %v10040_v57 = vpop.permute.xlu0 %6814  ;;  %v1125_v32 = vsel %vm1124_vm15, %v6801_v33, %v6802_v63 }
 0x18c   :  { %1428 = vrot.lane.b32.xlu1 %v8920_v52, %s16405_s27  ;;  %v10074_v52 = vsel %vm118_vm0, %v16998_v58, %v16355_v0 }
 0x18d   :  { %7074 = vrot.lane.b32.xlu0 %v9732_v23, %s16405_s27  ;;  %v7088_v23 = vpack.i.bf16 %v9640_v10, %v9658_v56  ;;  %v6806_v10 = vunpack.i.l.bf16 %v6805_v49  ;;  %v7103_v53 = vpack.i.bf16 %v1125_v32, %v10074_v52 }
 0x18e   :  { %v10051_v43 = vpop.permute.xlu1 %6829 }
 0x18f   :  { %v10053_v55 = vpop.permute.xlu0 %6824  ;;  %v1126_v58 = vsel %vm1124_vm15, %v6802_v63, %v6806_v10 }
 0x190   :  { %7084 = vrot.lane.b32.xlu1 %v7083_v9, %s8957_s29 }
 0x191   :  { %7079 = vrot.lane.b32.xlu0 %v7078_v24, %s8957_s29 }
 0x192   :  { %v10060_v18 = vpop.permute.xlu1 %1122 }
 0x193   :  { %16995 = vst [vmem:[#allocation110_spill] sm:$0xff] %v10060_v18  ;;  %v10063_v27 = vpop.permute.xlu0 %6834 }
 0x194   :  { %16996 = vst [vmem:[#allocation111_spill] sm:$0xff] %v10063_v27  ;;  %7094 = vrot.lane.b32.xlu1 %v16997_v19, %s8957_s29  ;;  %v16999_v19 = vpack.i.bf16 %v9250_v38, %v9237_v34 }
 0x195   :  { %7089 = vrot.lane.b32.xlu0 %v7088_v23, %s8957_s29  ;;  %v6807_v23 = vunpack.i.h.bf16 %v6805_v49 }
 0x196   :  { %v6845_v56 = vpop.permute.xlu1 %6844 }
 0x197   :  { %v6846_v9 = vunpack.i.l.bf16 %v6845_v56  ;;  %v6840_v11 = vpop.permute.xlu0 %6839  ;;  %v6847_v24 = vunpack.i.h.bf16 %v6845_v56  ;;  %v1128_v34 = vsel %vm1124_vm15, %v6807_v23, %v16357_v37  ;;  %v1127_v38 = vsel %vm1124_vm15, %v6806_v10, %v6807_v23 }
 0x198   :  { %v6842_v46 = vunpack.i.h.bf16 %v6840_v11  ;;  %v6841_v36 = vunpack.i.l.bf16 %v6840_v11  ;;  %7104 = vrot.lane.b32.xlu1 %v7103_v53, %s8957_s29 }
 0x199   :  { %7099 = vrot.lane.b32.xlu0 %v16999_v19, %s8957_s29  ;;  %v1178_v0 = vsel %vm16523_vm13, %v6846_v9, %v6847_v24 }
 0x19a   :  { %v1177_v32 = vsel %vm16523_vm13, %v6842_v46, %v6846_v9  ;;  %v1176_v1 = vsel %vm16523_vm13, %v6841_v36, %v6842_v46  ;;  %v10087_v3 = vpop.permute.xlu1 %6854  ;;  %v7118_v46 = vpack.i.bf16 %v1127_v38, %v6841_v36  ;;  %v7123_v19 = vpack.i.bf16 %v1178_v0, %v1128_v34 }
 0x19b   :  { %v10089_v56 = vpop.permute.xlu0 %6849  ;;  %v7113_v11 = vpack.i.bf16 %v6801_v33, %v1177_v32  ;;  %v7108_v53 = vpack.i.bf16 %v1176_v1, %v1126_v58 }
 0x19c   :  { %v16358_v9 = vunpack.i.l.bf16 %v10089_v56 }
 0x19d   :  { %7114 = vrot.lane.b32.xlu1 %v7113_v11, %s8957_s29  ;;  %7109 = vrot.lane.b32.xlu0 %v7108_v53, %s8957_s29 }
 0x19e   :  { %v10098_v49 = vpop.permute.xlu1 %6864  ;;  %v1179_v0 = vsel %vm16523_vm13, %v6847_v24, %v16358_v9 }
 0x19f   :  { %v10100_v63 = vpop.permute.xlu0 %6859 }
 0x1a1   :  { %7124 = vrot.lane.b32.xlu1 %v7123_v19, %s8957_s29  ;;  %7119 = vrot.lane.b32.xlu0 %v7118_v46, %s8957_s29 }
 0x1a2   :  { %v10104_v1 = vpop.permute.xlu1 %6874 }
 0x1a3   :  { %17000 = vst [vmem:[#allocation112_spill] sm:$0xff] %v10104_v1  ;;  %v10106_v33 = vpop.permute.xlu0 %6869 }
 0x1a4   :  { %17001 = vst [vmem:[#allocation113_spill] sm:$0xff] %v10106_v33 }
 0x1a6   :  { %v6880_v58 = vpop.permute.xlu1 %6879 }
 0x1a7   :  { %v6882_v32 = vunpack.i.h.bf16 %v6880_v58  ;;  %v6881_v10 = vunpack.i.l.bf16 %v6880_v58  ;;  %v10109_v23 = vpop.permute.xlu0 %1173 }
 0x1a8   :  { %17002 = vst [vmem:[#allocation114_spill] sm:$0xff] %v10109_v23 }
 0x1a9   :  { %v1227_v36 = vsel %vm16477_vm14, %v6881_v10, %v6882_v32 }
 0x1aa   :  { %v10115_v11 = vpop.permute.xlu1 %6889  ;;  %v7128_v53 = vpack.i.bf16 %v1227_v36, %v1179_v0 }
 0x1ab   :  { %v6885_v34 = vpop.permute.xlu0 %6884  ;;  %v16371_v60 = vunpack.i.l.bf16 %v10115_v11 }
 0x1ac   :  { %7129 = vrot.lane.b32.xlu0 %v7128_v53, %s8957_s29  ;;  %v6886_v24 = vunpack.i.l.bf16 %v6885_v34  ;;  %v6887_v50 = vunpack.i.h.bf16 %v6885_v34 }
 0x1ae   :  { %v10118_v38 = vpop.permute.xlu1 %6899  ;;  %v1228_v13 = vsel %vm16477_vm14, %v6882_v32, %v6886_v24  ;;  %v1229_v32 = vsel %vm16477_vm14, %v6886_v24, %v6887_v50 }
 0x1af   :  { %v10120_v46 = vpop.permute.xlu0 %6894 }
 0x1b2   :  { %v10122_v19 = vpop.permute.xlu1 %6909 }
 0x1b3   :  { %17003 = vst [vmem:[#allocation115_spill] sm:$0xff] %v10122_v19  ;;  %v10124_v58 = vpop.permute.xlu0 %6904 }
 0x1b4   :  { %17004 = vst [vmem:[#allocation116_spill] sm:$0xff] %v10124_v58 }
 0x1b6   :  { %v10126_v37 = vpop.permute.xlu1 %1224 }
 0x1b7   :  { %17005 = vst [vmem:[#allocation117_spill] sm:$0xff] %v10126_v37  ;;  %v10128_v51 = vpop.permute.xlu0 %6914 }
 0x1b8   :  { %17006 = vst [vmem:[#allocation118_spill] sm:$0xff] %v10128_v51 }
 0x1ba   :  { %v6925_v9 = vpop.permute.xlu1 %6924 }
 0x1bb   :  { %v6926_v12 = vunpack.i.l.bf16 %v6925_v9  ;;  %v6920_v0 = vpop.permute.xlu0 %6919  ;;  %v6927_v36 = vunpack.i.h.bf16 %v6925_v9  ;;  %v1230_v9 = vsel %vm16477_vm14, %v6887_v50, %v16371_v60 }
 0x1bc   :  { %v6922_v44 = vunpack.i.h.bf16 %v6920_v0  ;;  %v6921_v53 = vunpack.i.l.bf16 %v6920_v0 }
 0x1bd   :  { %v1280_v23 = vsel %vm16486_vm11, %v6926_v12, %v6927_v36 }
 0x1be   :  { %v1279_v26 = vsel %vm16486_vm11, %v6922_v44, %v6926_v12  ;;  %v1278_v21 = vsel %vm16486_vm11, %v6921_v53, %v6922_v44  ;;  %v10134_v61 = vpop.permute.xlu1 %6934  ;;  %v7143_v44 = vpack.i.bf16 %v1229_v32, %v6921_v53  ;;  %v7148_v18 = vpack.i.bf16 %v1280_v23, %v1230_v9 }
 0x1bf   :  { %v10136_v54 = vpop.permute.xlu0 %6929  ;;  %v7133_v22 = vpack.i.bf16 %v1278_v21, %v1228_v13  ;;  %v7138_v37 = vpack.i.bf16 %v6881_v10, %v1279_v26 }
 0x1c0   :  { %v16372_v21 = vunpack.i.l.bf16 %v10136_v54 }
 0x1c1   :  { %7134 = vrot.lane.b32.xlu1 %v7133_v22, %s8957_s29  ;;  %7139 = vrot.lane.b32.xlu0 %v7138_v37, %s8957_s29 }
 0x1c2   :  { %v10145_v34 = vpop.permute.xlu1 %6944  ;;  %v1281_v10 = vsel %vm16486_vm11, %v6927_v36, %v16372_v21 }
 0x1c3   :  { %17007 = vst [vmem:[#allocation119_spill] sm:$0xff] %v10145_v34  ;;  %v10147_v0 = vpop.permute.xlu0 %6939 }
 0x1c5   :  { %7144 = vrot.lane.b32.xlu1 %v7143_v44, %s8957_s29  ;;  %7149 = vrot.lane.b32.xlu0 %v7148_v18, %s8957_s29 }
 0x1c6   :  { %v10151_v26 = vpop.permute.xlu1 %6954 }
 0x1c7   :  { %17008 = vst [vmem:[#allocation120_spill] sm:$0xff] %v10151_v26  ;;  %v10153_v22 = vpop.permute.xlu0 %6949 }
 0x1c8   :  { %17009 = vst [vmem:[#allocation121_spill] sm:$0xff] %v10153_v22 }
 0x1ca   :  { %v6960_v13 = vpop.permute.xlu1 %6959 }
 0x1cb   :  { %v6962_v12 = vunpack.i.h.bf16 %v6960_v13  ;;  %v6961_v50 = vunpack.i.l.bf16 %v6960_v13  ;;  %v10156_v37 = vpop.permute.xlu0 %1275 }
 0x1cc   :  { %17010 = vst [vmem:[#allocation122_spill] sm:$0xff] %v10156_v37 }
 0x1cd   :  { %v1329_v23 = vsel %vm16474_vm12, %v6961_v50, %v6962_v12 }
 0x1ce   :  { %v10162_v24 = vpop.permute.xlu1 %6969  ;;  %v7153_v18 = vpack.i.bf16 %v1329_v23, %v1281_v10 }
 0x1cf   :  { %v6965_v53 = vpop.permute.xlu0 %6964  ;;  %v16387_v1 = vunpack.i.l.bf16 %v10162_v24 }
 0x1d0   :  { %7154 = vrot.lane.b32.xlu1 %v7153_v18, %s8957_s29  ;;  %v6966_v36 = vunpack.i.l.bf16 %v6965_v53  ;;  %v6967_v27 = vunpack.i.h.bf16 %v6965_v53 }
 0x1d2   :  { %v10165_v9 = vpop.permute.xlu1 %6979  ;;  %v1330_v22 = vsel %vm16474_vm12, %v6962_v12, %v6966_v36  ;;  %v1331_v12 = vsel %vm16474_vm12, %v6966_v36, %v6967_v27 }
 0x1d3   :  { %v10167_v32 = vpop.permute.xlu0 %6974 }
 0x1d6   :  { %v10169_v44 = vpop.permute.xlu1 %6989 }
 0x1d7   :  { %17011 = vst [vmem:[#allocation123_spill] sm:$0xff] %v10169_v44  ;;  %v10171_v13 = vpop.permute.xlu0 %6984 }
 0x1d8   :  { %17012 = vst [vmem:[#allocation124_spill] sm:$0xff] %v10171_v13 }
 0x1da   :  { %v10173_v60 = vpop.permute.xlu1 %1326 }
 0x1db   :  { %17013 = vst [vmem:[#allocation125_spill] sm:$0xff] %v10173_v60  ;;  %v10175_v37 = vpop.permute.xlu0 %6994 }
 0x1dc   :  { %17014 = vst [vmem:[#allocation126_spill] sm:$0xff] %v10175_v37 }
 0x1de   :  { %v7005_v21 = vpop.permute.xlu1 %7004 }
 0x1df   :  { %v7006_v26 = vunpack.i.l.bf16 %v7005_v21  ;;  %v7000_v10 = vpop.permute.xlu0 %6999  ;;  %v7007_v23 = vunpack.i.h.bf16 %v7005_v21  ;;  %v1332_v21 = vsel %vm16474_vm12, %v6967_v27, %v16387_v1 }
 0x1e0   :  { %v7002_v51 = vunpack.i.h.bf16 %v7000_v10  ;;  %v7001_v18 = vunpack.i.l.bf16 %v7000_v10 }
 0x1e1   :  { %v1382_v33 = vsel %vm16476_vm10, %v7006_v26, %v7007_v23 }
 0x1e2   :  { %v1381_v44 = vsel %vm16476_vm10, %v7002_v51, %v7006_v26  ;;  %v1380_v13 = vsel %vm16476_vm10, %v7001_v18, %v7002_v51  ;;  %v10181_v60 = vpop.permute.xlu1 %7014  ;;  %v7168_v51 = vpack.i.bf16 %v1331_v12, %v7001_v18  ;;  %v7173_v58 = vpack.i.bf16 %v1382_v33, %v1332_v21 }
 0x1e3   :  { %v10183_v37 = vpop.permute.xlu0 %7009  ;;  %v7163_v19 = vpack.i.bf16 %v6961_v50, %v1381_v44  ;;  %v7158_v34 = vpack.i.bf16 %v1380_v13, %v1330_v22 }
 0x1e5   :  { %7164 = vrot.lane.b32.xlu1 %v7163_v19, %s8957_s29  ;;  %7159 = vrot.lane.b32.xlu0 %v7158_v34, %s8957_s29  ;;  %v16388_v34 = vunpack.i.l.bf16 %v10183_v37 }
 0x1e6   :  { %v10192_v53 = vpop.permute.xlu1 %7024 }
 0x1e7   :  { %17015 = vst [vmem:[#allocation127_spill] sm:$0xff] %v10192_v53  ;;  %v10194_v10 = vpop.permute.xlu0 %7019  ;;  %v1383_v33 = vsel %vm16476_vm10, %v7007_v23, %v16388_v34 }
 0x1e9   :  { %7174 = vrot.lane.b32.xlu1 %v7173_v58, %s8957_s29  ;;  %7169 = vrot.lane.b32.xlu0 %v7168_v51, %s8957_s29 }
 0x1ea   :  { %v10198_v26 = vpop.permute.xlu1 %7034 }
 0x1eb   :  { %17016 = vst [vmem:[#allocation128_spill] sm:$0xff] %v10198_v26  ;;  %v10200_v19 = vpop.permute.xlu0 %7029 }
 0x1ec   :  { %17017 = vst [vmem:[#allocation129_spill] sm:$0xff] %v10200_v19 }
 0x1ee   :  { %v7040_v22 = vpop.permute.xlu1 %7039 }
 0x1ef   :  { %v7042_v50 = vunpack.i.h.bf16 %v7040_v22  ;;  %v7041_v27 = vunpack.i.l.bf16 %v7040_v22  ;;  %v10203_v44 = vpop.permute.xlu0 %1377 }
 0x1f0   :  { %17018 = vst [vmem:[#allocation130_spill] sm:$0xff] %v10203_v44 }
 0x1f1   :  { %v1431_v58 = vsel %vm16475_vm7, %v7041_v27, %v7042_v50  ;;  %v7188_v22 = vpack.i.bf16 %v7041_v27, %v9613_v7  ;;  %v6206_v7 = vunpack.i.l.bf16 %v9229_v29 }
 0x1f2   :  { %v10209_v13 = vpop.permute.xlu1 %7049  ;;  %v7178_v36 = vpack.i.bf16 %v1431_v58, %v1383_v33 }
 0x1f3   :  { %v16390_v18 = vunpack.i.l.bf16 %v10209_v13  ;;  %v7045_v21 = vpop.permute.xlu0 %7044 }
 0x1f4   :  { %v7047_v12 = vunpack.i.h.bf16 %v7045_v21  ;;  %v7046_v51 = vunpack.i.l.bf16 %v7045_v21  ;;  %7179 = vrot.lane.b32.xlu0 %v7178_v36, %s8957_s29 }
 0x1f6   :  { %v1432_v1 = vsel %vm16475_vm7, %v7042_v50, %v7046_v51  ;;  %v10215_v44 = vpop.permute.xlu1 %7059  ;;  %v1434_v23 = vsel %vm16475_vm7, %v7047_v12, %v16390_v18  ;;  %v1433_v58 = vsel %vm16475_vm7, %v7046_v51, %v7047_v12  ;;  %v6211_v51 = vunpack.i.l.bf16 %v9252_v39 }
 0x1f7   :  { %v10220_v34 = vpop.permute.xlu0 %7054  ;;  %v7183_v33 = vpack.i.bf16 %v9596_v62, %v1432_v1  ;;  %v7198_v50 = vpack.i.bf16 %v9624_v16, %v1434_v23  ;;  %v7193_v21 = vpack.i.bf16 %v1433_v58, %v9583_v45  ;;  %v6207_v62 = vunpack.i.h.bf16 %v9229_v29  ;;  %v63_v45 = vld [vmem:[%s16232_s1 + $0x8] sm:$0xff] }
 0x1f8   :  { %7189 = vrot.lane.b32.xlu0 %v7188_v22, %s8957_s29  ;;  %v17021_v1 = vunpack.i.h.bf16 %v9223_v25  ;;  %v16395_v16 = vunpack.i.h.bf16 %v9252_v39  ;;  %v17024_v25 = vpack.i.bf16 %v9749_v28, %v9743_v40  ;;  %v10254_v29 = vpack.c.bf16 %v63_v45, %v63_v45 }
 0x1f9   :  { %7184 = vrot.lane.b32.xlu1 %v7183_v33, %s8957_s29  ;;  %v10257_v33 = vsel %vm118_vm0, %v6206_v7, %v6207_v62  ;;  %v6812_v58 = vunpack.i.h.bf16 %v10032_v6  ;;  %v6856_v40 = vunpack.i.l.bf16 %v10087_v3  ;;  %v17028_v28 = vunpack.i.l.bf16 %v10032_v6 }
 0x1fa   :  { %v10227_v27 = vpop.permute.xlu1 %7069  ;;  %v10239_v12 = vsel %vm118_vm0, %v17021_v1, %v6206_v7  ;;  %17025 = vst [vmem:[#allocation135_spill] sm:$0xff] %v10254_v29  ;;  %v10267_v1 = vsel %vm118_vm0, %v6207_v62, %v6211_v51  ;;  %v6852_v7 = vunpack.i.h.bf16 %v10089_v56  ;;  %6132 = vmatprep.mubr.msk.bf16.mxu0 %vm2411_vm5, %v10254_v29  ;;  %6134 = vmatprep.mubr.msk.bf16.mxu1 %vm2411_vm5, %v10254_v29  ;;  %v6816_v29 = vunpack.i.l.bf16 %v10040_v57 }
 0x1fb   :  { %17019 = vst [vmem:[#allocation131_spill] sm:$0xff] %v10227_v27  ;;  %v10230_v36 = vpop.permute.xlu0 %7064  ;;  %v17033_v27 = vunpack.i.l.bf16 %v10038_v17 }
 0x1fc   :  { %17020 = vst [vmem:[#allocation132_spill] sm:$0xff] %v10230_v36  ;;  %7199 = vrot.lane.b32.xlu0 %v7198_v50, %s8957_s29  ;;  %v17026_v50 = vpack.i.bf16 %v9698_v15, %v9618_v30  ;;  %v1129_v30 = vsel %vm1124_vm15, %v17028_v28, %v6812_v58  ;;  %v1181_v6 = vsel %vm16523_vm13, %v6852_v7, %v6856_v40  ;;  %v17031_v28 = vunpack.i.l.bf16 %v10089_v56 }
 0x1fd   :  { %7194 = vrot.lane.b32.xlu1 %v7193_v21, %s8957_s29  ;;  %v7218_v21 = vpack.i.bf16 %v10239_v12, %v9645_v48  ;;  %v10279_v48 = vsel %vm118_vm0, %v6211_v51, %v16395_v16  ;;  %v17029_v51 = vpack.i.bf16 %v9737_v5, %v9746_v2  ;;  %v7223_v16 = vpack.i.bf16 %v9684_v31, %v10257_v33 }
 0x1fe   :  { %v10242_v22 = vpop.permute.xlu1 %1428  ;;  %17027 = vst [vmem:[#allocation136_spill] sm:$0xff] %v10279_v48  ;;  %v7233_v56 = vpack.i.bf16 %v1129_v30, %v10279_v48  ;;  %v6861_v36 = vunpack.i.l.bf16 %v10100_v63 }
 0x1ff   :  { %17022 = vst [vmem:[#allocation133_spill] sm:$0xff] %v10242_v22  ;;  %v10245_v23 = vpop.permute.xlu0 %7074 }
 0x200   :  { %17023 = vst [vmem:[#allocation134_spill] sm:$0xff] %v10245_v23  ;;  %7209 = vrot.lane.b32.xlu0 %v17024_v25, %s8957_s29  ;;  %v7228_v25 = vpack.i.bf16 %v10267_v1, %v9689_v42  ;;  %v6892_v23 = vunpack.i.h.bf16 %v10115_v11 }
 0x201   :  { %7204 = vrot.lane.b32.xlu1 %v17026_v50, %s8957_s29  ;;  %v6817_v50 = vunpack.i.h.bf16 %v10040_v57  ;;  %v1180_v57 = vsel %vm16523_vm13, %v17031_v28, %v6852_v7  ;;  %v1130_v7 = vsel %vm1124_vm15, %v6812_v58, %v6816_v29  ;;  %v6932_v58 = vunpack.i.h.bf16 %v10136_v54 }
 0x202   :  { %v7085_v45 = vpop.permute.xlu1 %7084 }
 0x203   :  { %v7086_v15 = vunpack.i.l.bf16 %v7085_v45  ;;  %v7080_v62 = vpop.permute.xlu0 %7079 }
 0x204   :  { %v7082_v18 = vunpack.i.h.bf16 %v7080_v62  ;;  %7219 = vrot.lane.b32.xlu0 %v7218_v21, %s8957_s29  ;;  %v17030_v21 = vunpack.i.h.bf16 %v10087_v3  ;;  %v7081_v19 = vunpack.i.l.bf16 %v7080_v62 }
 0x205   :  { %7214 = vrot.lane.b32.xlu1 %v17029_v51, %s8957_s29  ;;  %v7087_v51 = vunpack.i.h.bf16 %v7085_v45  ;;  %v1131_v45 = vsel %vm1124_vm15, %v6816_v29, %v6817_v50 }
 0x206   :  { %v1182_v22 = vsel %vm16523_vm13, %v6856_v40, %v17030_v21  ;;  %v7095_v2 = vpop.permute.xlu1 %7094  ;;  %v1829_v42 = vsel %vm1827_vm6, %v7082_v18, %v7086_v15  ;;  %v1132_v21 = vsel %vm1124_vm15, %v6817_v50, %v17033_v27  ;;  %v7238_v27 = vpack.i.bf16 %v1180_v57, %v1130_v7 }
 0x207   :  { %v10304_v5 = vpop.permute.xlu0 %7089  ;;  %v7097_v31 = vunpack.i.h.bf16 %v7095_v2  ;;  %v7096_v26 = vunpack.i.l.bf16 %v7095_v2  ;;  %v7248_v2 = vpack.i.bf16 %v1182_v22, %v1132_v21  ;;  %v7243_v40 = vpack.i.bf16 %v1131_v45, %v1181_v6 }
 0x208   :  { %17032 = vst [vmem:[#allocation137_spill] sm:$0xff] %v10304_v5  ;;  %7229 = vrot.lane.b32.xlu0 %v7228_v25, %s8957_s29  ;;  %v17035_v25 = vunpack.i.l.bf16 %v10115_v11  ;;  %v1828_v57 = vsel %vm1827_vm6, %v7081_v19, %v7082_v18  ;;  %v17036_v6 = vunpack.i.l.bf16 %v10304_v5  ;;  %v6896_v21 = vunpack.i.l.bf16 %v10120_v46 }
 0x209   :  { %7224 = vrot.lane.b32.xlu1 %v7223_v16, %s8957_s29  ;;  %v1845_v28 = vsel %vm1827_vm6, %v7096_v26, %v7097_v31  ;;  %v1830_v16 = vsel %vm1827_vm6, %v7086_v15, %v7087_v51  ;;  %v6937_v7 = vunpack.i.h.bf16 %v10134_v61  ;;  %v6936_v45 = vunpack.i.l.bf16 %v10134_v61 }
 0x20a   :  { %v10318_v53 = vpop.permute.xlu1 %7104  ;;  %v2311_v62 = vpack.c.bf16 %v1845_v28, %v1829_v42  ;;  %v1231_v30 = vsel %vm16477_vm14, %v17035_v25, %v6892_v23  ;;  %v1831_v11 = vsel %vm1827_vm6, %v7087_v51, %v17036_v6  ;;  %v16418_v42 = vunpack.i.l.bf16 %v10118_v38 }
 0x20b   :  { %17034 = vst [vmem:[#allocation138_spill] sm:$0xff] %v10318_v53  ;;  %v16411_v29 = vunpack.i.l.bf16 %v10318_v53  ;;  %v7100_v50 = vpop.permute.xlu0 %7099  ;;  %v6897_v15 = vunpack.i.h.bf16 %v10120_v46  ;;  %v17037_v51 = vunpack.i.l.bf16 %v10136_v54  ;;  %v7107_v46 = vunpack.i.h.bf16 %v10318_v53 }
 0x20c   :  { %v7102_v48 = vunpack.i.h.bf16 %v7100_v50  ;;  %v7101_v22 = vunpack.i.l.bf16 %v7100_v50  ;;  %7239 = vrot.lane.b32.xlu0 %v7238_v27, %s8957_s29  ;;  %2480 = vmatprep.subr.bf16.mxu0 %v2311_v62  ;;  %v17038_v54 = vunpack.i.h.bf16 %v10087_v3 }
 0x20d   :  { %7234 = vrot.lane.b32.xlu1 %v7233_v56, %s8957_s29  ;;  %v1282_v27 = vsel %vm16486_vm11, %v17037_v51, %v6932_v58  ;;  %v1234_v51 = vsel %vm16477_vm14, %v6897_v15, %v16418_v42 }
 0x20e   :  { %v1844_v28 = vsel %vm1827_vm6, %v7101_v22, %v7096_v26  ;;  %v1847_v19 = vsel %vm1827_vm6, %v7102_v48, %v16411_v29  ;;  %v1846_v18 = vsel %vm1827_vm6, %v7097_v31, %v7102_v48  ;;  %v1183_v48 = vsel %vm16523_vm13, %v17038_v54, %v6861_v36 }
 0x20f   :  { %v10345_v62 = vpop.permute.xlu1 %7114  ;;  %v10347_v25 = vpop.permute.xlu0 %7109  ;;  %v2310_v61 = vpack.c.bf16 %v1844_v28, %v1828_v57  ;;  %v2313_v56 = vpack.c.bf16 %v1847_v19, %v1831_v11  ;;  %v2312_v50 = vpack.c.bf16 %v1846_v18, %v1830_v16  ;;  %v1232_v31 = vsel %vm16477_vm14, %v6892_v23, %v6896_v21 }
 0x210   :  { %v7116_v26 = vunpack.i.l.bf16 %v10345_v62  ;;  %v7112_v22 = vunpack.i.h.bf16 %v10347_v25  ;;  %v7111_v6 = vunpack.i.l.bf16 %v10347_v25  ;;  %7249 = vrot.lane.b32.xlu0 %v7248_v2, %s8957_s29  ;;  %v1284_v16 = vsel %vm16486_vm11, %v6936_v45, %v6937_v7 }
 0x211   :  { %7244 = vrot.lane.b32.xlu1 %v7243_v40, %s8957_s29  ;;  %2481 = vmatpush1.bf16.msra.mxu0 %v2310_v61  ;;  %v7117_v57 = vunpack.i.h.bf16 %v10345_v62  ;;  %v7258_v11 = vpack.i.bf16 %v1282_v27, %v1232_v31  ;;  %v1283_v28 = vsel %vm16486_vm11, %v6932_v58, %v6936_v45  ;;  %v7012_v23 = vunpack.i.h.bf16 %v10183_v37 }
 0x212   :  { %2521 = vmatprep.subr.bf16.mxu1 %v2313_v56  ;;  %v1861_v2 = vsel %vm1827_vm6, %v7107_v46, %v7111_v6  ;;  %v1877_v3 = vsel %vm1827_vm6, %v7112_v22, %v7116_v26  ;;  %v7253_v40 = vpack.i.bf16 %v1231_v30, %v1183_v48  ;;  %v6972_v27 = vunpack.i.h.bf16 %v10162_v24 }
 0x213   :  { %2522 = vmatpush1.bf16.msra.mxu1 %v2312_v50  ;;  %v7120_v19 = vpop.permute.xlu0 %7119  ;;  %v2327_v18 = vpack.c.bf16 %v1877_v3, %v1861_v2  ;;  %v1233_v56 = vsel %vm16477_vm14, %v6896_v21, %v6897_v15  ;;  %v6976_v54 = vunpack.i.l.bf16 %v10167_v32  ;;  %v7268_v58 = vpack.i.bf16 %v1284_v16, %v1234_v51 }
 0x214   :  { %v7121_v61 = vunpack.i.l.bf16 %v7120_v19  ;;  %7259 = vrot.lane.b32.xlu0 %v7258_v11, %s8957_s29  ;;  %v16419_v30 = vunpack.i.l.bf16 %v10147_v0  ;;  %v7263_v45 = vpack.i.bf16 %v1233_v56, %v1283_v28  ;;  %v1860_v50 = vsel %vm1827_vm6, %v7117_v57, %v7107_v46  ;;  %v10394_v57 = vpop.permute.xlu1 %7124 }
 0x215   :  { %7254 = vrot.lane.b32.xlu1 %v7253_v40, %s8957_s29  ;;  %2482 = vmatprep.subr.bf16.mxu0 %v2327_v18  ;;  %v7017_v31 = vunpack.i.h.bf16 %v10181_v60  ;;  %v7016_v2 = vunpack.i.l.bf16 %v10181_v60  ;;  %v17039_v11 = vunpack.i.l.bf16 %v10183_v37  ;;  %v17040_v3 = vunpack.i.l.bf16 %v10162_v24  ;;  %17041 = vst [vmem:[#allocation139_spill] sm:$0xff] %v10394_v57 }
 0x216   :  { %v1876_v48 = vsel %vm1827_vm6, %v7121_v61, %v7112_v22  ;;  %v16415_v28 = vunpack.i.l.bf16 %v10165_v9  ;;  %v6977_v46 = vunpack.i.h.bf16 %v10167_v32  ;;  %v1334_v22 = vsel %vm16474_vm12, %v6972_v27, %v6976_v54 }
 0x217   :  { %v1384_v21 = vsel %vm16476_vm10, %v17039_v11, %v7012_v23  ;;  %v2326_v15 = vpack.c.bf16 %v1876_v48, %v1860_v50  ;;  %v1333_v16 = vsel %vm16474_vm12, %v17040_v3, %v6972_v27  ;;  %v1285_v60 = vsel %vm16486_vm11, %v6937_v7, %v16419_v30  ;;  %v17065_v30 = vld [vmem:[#allocation3_spill] sm:$0xff] }
 0x218   :  { %7269 = vrot.lane.b32.xlu0 %v7268_v58, %s8957_s29  ;;  %v7278_v37 = vpack.i.bf16 %v1384_v21, %v1334_v22  ;;  %v1386_v24 = vsel %vm16476_vm10, %v7016_v2, %v7017_v31  ;;  %v1385_v40 = vsel %vm16476_vm10, %v7012_v23, %v7016_v2  ;;  %v7056_v18 = vunpack.i.l.bf16 %v10220_v34 }
 0x219   :  { %7264 = vrot.lane.b32.xlu1 %v7263_v45, %s8957_s29  ;;  %2483 = vmatpush1.bf16.msra.mxu0 %v2326_v15  ;;  %v7273_v51 = vpack.i.bf16 %v1333_v16, %v1285_v60  ;;  %v6526_v32 = vunpack.i.l.bf16 %v9591_v20  ;;  %v7052_v27 = vunpack.i.h.bf16 %v10209_v13  ;;  %v7127_v61 = vunpack.i.h.bf16 %v10394_v57 }
 0x21a   :  { %v7122_v56 = vunpack.i.h.bf16 %v7120_v19  ;;  %v1336_v7 = vsel %vm16474_vm12, %v6977_v46, %v16415_v28  ;;  %v1335_v58 = vsel %vm16474_vm12, %v6976_v54, %v6977_v46  ;;  %v16410_v23 = vunpack.i.l.bf16 %v10394_v57 }
 0x21b   :  { %v6527_v45 = vunpack.i.h.bf16 %v9591_v20  ;;  %v16416_v50 = vunpack.i.l.bf16 %v10194_v10  ;;  %v7283_v2 = vpack.i.bf16 %v1335_v58, %v1385_v40  ;;  %v7288_v19 = vpack.i.bf16 %v1386_v24, %v1336_v7 }
 0x21c   :  { %7279 = vrot.lane.b32.xlu0 %v7278_v37, %s8957_s29  ;;  %v16414_v11 = vunpack.i.l.bf16 %v10215_v44  ;;  %v7057_v21 = vunpack.i.h.bf16 %v10220_v34  ;;  %v1436_v15 = vsel %vm16475_vm7, %v7052_v27, %v7056_v18  ;;  %v17043_v3 = vunpack.i.h.bf16 %v9601_v14 }
 0x21d   :  { %7274 = vrot.lane.b32.xlu1 %v7273_v51, %s8957_s29  ;;  %v17044_v20 = vunpack.i.l.bf16 %v10209_v13  ;;  %v1862_v22 = vsel %vm1827_vm6, %v7111_v6, %v7122_v56  ;;  %v1878_v34 = vsel %vm1827_vm6, %v7116_v26, %v7127_v61  ;;  %v6531_v60 = vunpack.i.l.bf16 %v9631_v8 }
 0x21e   :  { %v10415_v48 = vpop.permute.xlu0 %7129  ;;  %v10424_v16 = vsel %vm654_vm8, %v17043_v3, %v6526_v32  ;;  %v6576_v14 = vunpack.i.l.bf16 %v9739_v59  ;;  %v1863_v13 = vsel %vm1827_vm6, %v7122_v56, %v16410_v23  ;;  %v6572_v6 = vunpack.i.h.bf16 %v9751_v4 }
 0x21f   :  { %17042 = vst [vmem:[#allocation140_spill] sm:$0xff] %v10415_v48  ;;  %v16409_v54 = vunpack.i.l.bf16 %v10415_v48  ;;  %v1435_v46 = vsel %vm16475_vm7, %v17044_v20, %v7052_v27  ;;  %v1387_v62 = vsel %vm16476_vm10, %v7017_v31, %v16416_v50  ;;  %v7298_v26 = vpack.i.bf16 %v10424_v16, %v1436_v15 }
 0x220   :  { %7289 = vrot.lane.b32.xlu0 %v7288_v19, %s8957_s29  ;;  %v6571_v24 = vunpack.i.l.bf16 %v9751_v4  ;;  %v1438_v40 = vsel %vm16475_vm7, %v7057_v21, %v16414_v11  ;;  %v7293_v51 = vpack.i.bf16 %v1435_v46, %v1387_v62  ;;  %v2328_v27 = vpack.c.bf16 %v1878_v34, %v1862_v22  ;;  %v10513_v62 = vld [vmem:[%s16231_s0 + $0x50] sm:$0xff] }
 0x221   :  { %7284 = vrot.lane.b32.xlu1 %v7283_v2, %s8957_s29  ;;  %v1879_v25 = vsel %vm1827_vm6, %v7127_v61, %v16409_v54  ;;  %v1437_v56 = vsel %vm16475_vm7, %v7056_v18, %v7057_v21  ;;  %v10457_v61 = vsel %vm654_vm8, %v6527_v45, %v6531_v60  ;;  %v10461_v31 = vsel %vm654_vm8, %v6526_v32, %v6527_v45 }
 0x222   :  { %v2329_v37 = vpack.c.bf16 %v1879_v25, %v1863_v13  ;;  %v16413_v4 = vunpack.i.h.bf16 %v9631_v8  ;;  %v7308_v7 = vpack.i.bf16 %v10457_v61, %v1438_v40  ;;  %v6216_v58 = vunpack.i.l.bf16 %v9239_v35  ;;  %17054 = vst [vmem:[#allocation146_spill] sm:$0xff] %v10513_v62  ;;  %v10525_v40 = vld [vmem:[%s16231_s0 + $0x48] sm:$0xff] }
 0x223   :  { %v10467_v18 = vsel %vm721_vm9, %v6572_v6, %v6576_v14  ;;  %v10470_v2 = vsel %vm721_vm9, %v6571_v24, %v6572_v6  ;;  %v7303_v19 = vpack.i.bf16 %v1437_v56, %v10461_v31  ;;  %v16412_v21 = vunpack.i.h.bf16 %v9739_v59  ;;  %17056 = vst [vmem:[#allocation148_spill] sm:$0xff] %v10525_v40 }
 0x224   :  { %7299 = vrot.lane.b32.xlu0 %v7298_v26, %s8957_s29  ;;  %2523 = vmatprep.subr.bf16.mxu1 %v2329_v37  ;;  %17045 = vst [vmem:[#allocation141_spill] sm:$0xff] %v10467_v18  ;;  %v17046_v15 = vunpack.i.h.bf16 %v9719_v41  ;;  %v6217_v45 = vunpack.i.h.bf16 %v9239_v35  ;;  %v10485_v3 = vsel %vm654_vm8, %v6531_v60, %v16413_v4  ;;  %v7318_v20 = vpack.i.bf16 %v10467_v18, %v10470_v2  ;;  %v17052_v60 = vld [vmem:[#allocation2_spill] sm:$0xff] }
 0x225   :  { %7294 = vrot.lane.b32.xlu1 %v7293_v51, %s8957_s29  ;;  %2524 = vmatpush1.bf16.msra.mxu1 %v2328_v27  ;;  %17048 = vst [vmem:[#allocation143_spill] sm:$0xff] %v10485_v3  ;;  %v17049_v46 = vunpack.i.h.bf16 %v9252_v39  ;;  %v6221_v22 = vunpack.i.l.bf16 %v9272_v47  ;;  %v10500_v35 = vsel %vm721_vm9, %v6576_v14, %v16412_v21  ;;  %v6227_v13 = vunpack.i.h.bf16 %v17052_v60  ;;  %v10533_v51 = vld [vmem:[%s16231_s0 + $0x20] sm:$0xff] }
 0x226   :  { %v10477_v32 = vsel %vm721_vm9, %v17046_v15, %v6571_v24  ;;  %17051 = vst [vmem:[#allocation145_spill] sm:$0xff] %v10500_v35  ;;  %v6226_v25 = vunpack.i.l.bf16 %v17052_v60  ;;  %v10507_v39 = vsel %vm118_vm0, %v6216_v58, %v6217_v45  ;;  %v6222_v6 = vunpack.i.h.bf16 %v9272_v47 }
 0x227   :  { %17047 = vst [vmem:[#allocation142_spill] sm:$0xff] %v10477_v32  ;;  %v10492_v41 = vsel %vm118_vm0, %v17049_v46, %v6216_v58  ;;  %v7313_v34 = vpack.i.bf16 %v10477_v32, %v10485_v3  ;;  %17053 = vst [vmem:[#allocation2_spill] sm:$0xff] %v10507_v39  ;;  %v10518_v26 = vsel %vm118_vm0, %v6217_v45, %v6221_v22  ;;  %v6822_v37 = vunpack.i.h.bf16 %v10038_v17 }
 0x228   :  { %7309 = vrot.lane.b32.xlu0 %v7308_v7, %s8957_s29  ;;  %17050 = vst [vmem:[#allocation144_spill] sm:$0xff] %v10492_v41  ;;  %v7328_v14 = vpack.i.bf16 %v10492_v41, %v10513_v62  ;;  %17055 = vst [vmem:[#allocation147_spill] sm:$0xff] %v10518_v26  ;;  %v6862_v24 = vunpack.i.h.bf16 %v10100_v63  ;;  %v7323_v47 = vpack.i.bf16 %v10525_v40, %v10500_v35  ;;  %v6826_v7 = vunpack.i.l.bf16 %v10053_v55 }
 0x229   :  { %7304 = vrot.lane.b32.xlu1 %v7303_v19, %s8957_s29  ;;  %v10538_v56 = vsel %vm118_vm0, %v6226_v25, %v6227_v13  ;;  %v16417_v58 = vunpack.i.h.bf16 %v10098_v49  ;;  %v6866_v19 = vunpack.i.l.bf16 %v10098_v49  ;;  %v10545_v15 = vsel %vm118_vm0, %v6222_v6, %v6226_v25 }
 0x22a   :  { %17057 = vst [vmem:[#allocation149_spill] sm:$0xff] %v10538_v56  ;;  %17058 = vst [vmem:[#allocation150_spill] sm:$0xff] %v10545_v15  ;;  %v10548_v45 = vsel %vm118_vm0, %v6221_v22, %v6222_v6  ;;  %v17062_v25 = vunpack.i.l.bf16 %v10038_v17  ;;  %v16423_v6 = vunpack.i.l.bf16 %v10051_v43  ;;  %v7132_v29 = vunpack.i.h.bf16 %v10415_v48 }
 0x22b   :  { %17059 = vst [vmem:[#allocation151_spill] sm:$0xff] %v10548_v45  ;;  %v1186_v63 = vsel %vm16523_vm13, %v6866_v19, %v16417_v58  ;;  %v1185_v21 = vsel %vm16523_vm13, %v6862_v24, %v6866_v19  ;;  %v6942_v50 = vunpack.i.h.bf16 %v10147_v0  ;;  %v17067_v19 = vld [vmem:[#allocation116_spill] sm:$0xff] }
 0x22c   :  { %7319 = vrot.lane.b32.xlu0 %v7318_v20, %s8957_s29  ;;  %v10553_v20 = vld [vmem:[%s16231_s0 + $0x58] sm:$0xff]  ;;  %v1133_v22 = vsel %vm1124_vm15, %v17062_v25, %v6822_v37  ;;  %v6906_v35 = vunpack.i.l.bf16 %v17067_v19 }
 0x22d   :  { %7314 = vrot.lane.b32.xlu1 %v7313_v34, %s8957_s29  ;;  %17060 = vst [vmem:[#allocation152_spill] sm:$0xff] %v10553_v20  ;;  %v7333_v46 = vpack.i.bf16 %v10553_v20, %v10507_v39  ;;  %v10560_v34 = vld [vmem:[%s16231_s0 + $0x60] sm:$0xff]  ;;  %v7343_v42 = vpack.i.bf16 %v1133_v22, %v10548_v45 }
 0x22e   :  { %17061 = vst [vmem:[#allocation153_spill] sm:$0xff] %v10560_v34  ;;  %v7338_v60 = vpack.i.bf16 %v10518_v26, %v10560_v34  ;;  %v10643_v22 = vld [vmem:[%s16231_s0 + $0x80] sm:$0xff] }
 0x230   :  { %7329 = vrot.lane.b32.xlu0 %v7328_v14, %s8957_s29  ;;  %v6827_v14 = vunpack.i.h.bf16 %v10053_v55  ;;  %v1134_v55 = vsel %vm1124_vm15, %v6822_v37, %v6826_v7 }
 0x231   :  { %7324 = vrot.lane.b32.xlu1 %v7323_v47, %s8957_s29  ;;  %v1184_v47 = vsel %vm16523_vm13, %v6861_v36, %v6862_v24  ;;  %v10589_v36 = vld [vmem:[%s16231_s0 + $0x70] sm:$0xff] }
 0x232   :  { %17063 = vst [vmem:[#allocation154_spill] sm:$0xff] %v10589_v36  ;;  %v7348_v11 = vpack.i.bf16 %v1184_v47, %v1134_v55  ;;  %v10614_v47 = vsel %vm118_vm0, %v6227_v13, %v17065_v30  ;;  %v1136_v55 = vsel %vm1124_vm15, %v6827_v14, %v16423_v6  ;;  %v1135_v24 = vsel %vm1124_vm15, %v6826_v7, %v6827_v14  ;;  %v10628_v13 = vld [vmem:[%s16231_s0 + $0x28] sm:$0xff] }
 0x233   :  { %v10572_v54 = vpop.permute.xlu1 %7134  ;;  %v10574_v23 = vpop.permute.xlu0 %7139  ;;  %17066 = vst [vmem:[#allocation3_spill] sm:$0xff] %v10614_v47  ;;  %v7353_v3 = vpack.i.bf16 %v1135_v24, %v1185_v21  ;;  %v17069_v14 = vld [vmem:[#allocation119_spill] sm:$0xff] }
 0x234   :  { %v7137_v27 = vunpack.i.h.bf16 %v10572_v54  ;;  %v16420_v17 = vunpack.i.l.bf16 %v10572_v54  ;;  %v16421_v25 = vunpack.i.l.bf16 %v10574_v23  ;;  %7339 = vrot.lane.b32.xlu0 %v7338_v60, %s8957_s29  ;;  %v10596_v60 = vld [vmem:[%s16231_s0 + $0x78] sm:$0xff]  ;;  %v7142_v4 = vunpack.i.h.bf16 %v10574_v23  ;;  %v17072_v24 = vld [vmem:[#allocation115_spill] sm:$0xff] }
 0x235   :  { %7334 = vrot.lane.b32.xlu1 %v7333_v46, %s8957_s29  ;;  %17064 = vst [vmem:[#allocation155_spill] sm:$0xff] %v10596_v60  ;;  %v6947_v48 = vunpack.i.h.bf16 %v17069_v14  ;;  %v10709_v21 = vld [vmem:[%s16231_s0 + $0x68] sm:$0xff] }
 0x236   :  { %v1893_v46 = vsel %vm1827_vm6, %v7132_v29, %v16420_v17  ;;  %v1909_v28 = vsel %vm1827_vm6, %v7137_v27, %v16421_v25  ;;  %v6902_v17 = vunpack.i.h.bf16 %v10118_v38  ;;  %17081 = vst [vmem:[#allocation115_spill] sm:$0xff] %v10709_v21 }
 0x237   :  { %v10609_v58 = vpop.permute.xlu1 %7144  ;;  %v2343_v37 = vpack.c.bf16 %v1909_v28, %v1893_v46  ;;  %v7358_v28 = vpack.i.bf16 %v1186_v63, %v1136_v55  ;;  %v17068_v46 = vld [vmem:[#allocation113_spill] sm:$0xff]  ;;  %v17070_v63 = vunpack.i.l.bf16 %v10147_v0 }
 0x238   :  { %v7146_v25 = vunpack.i.l.bf16 %v10609_v58  ;;  %7349 = vrot.lane.b32.xlu0 %v7348_v11, %s8957_s29  ;;  %v16426_v6 = vunpack.i.l.bf16 %v17068_v46  ;;  %v1892_v11 = vsel %vm1827_vm6, %v7142_v4, %v7132_v29  ;;  %v17071_v29 = vunpack.i.l.bf16 %v10118_v38  ;;  %v10654_v0 = vld [vmem:[%s16231_s0 + $0x38] sm:$0xff] }
 0x239   :  { %7344 = vrot.lane.b32.xlu1 %v7343_v42, %s8957_s29  ;;  %2484 = vmatprep.subr.bf16.mxu0 %v2343_v37  ;;  %v6946_v42 = vunpack.i.l.bf16 %v17069_v14  ;;  %v1286_v37 = vsel %vm16486_vm11, %v17070_v63, %v6942_v50  ;;  %v10668_v14 = vpop.permute.xlu0 %7149 }
 0x23a   :  { %v1908_v7 = vsel %vm1827_vm6, %v7146_v25, %v7137_v27  ;;  %v1235_v4 = vsel %vm16477_vm14, %v17071_v29, %v6902_v17  ;;  %v10661_v25 = vld [vmem:[%s16231_s0 + $0x30] sm:$0xff]  ;;  %17073 = vst [vmem:[#allocation116_spill] sm:$0xff] %v10668_v14  ;;  %v17074_v29 = vunpack.i.h.bf16 %v10098_v49  ;;  %v7022_v49 = vunpack.i.h.bf16 %v10194_v10 }
 0x23b   :  { %v2342_v55 = vpack.c.bf16 %v1908_v7, %v1892_v11  ;;  %v1236_v7 = vsel %vm16477_vm14, %v6902_v17, %v6906_v35  ;;  %v1287_v63 = vsel %vm16486_vm11, %v6942_v50, %v6946_v42 }
 0x23c   :  { %7359 = vrot.lane.b32.xlu0 %v7358_v28, %s8957_s29  ;;  %v6907_v28 = vunpack.i.h.bf16 %v17067_v19  ;;  %v1187_v38 = vsel %vm16523_vm13, %v17074_v29, %v16426_v6  ;;  %v7368_v27 = vpack.i.bf16 %v1286_v37, %v1236_v7  ;;  %v10681_v19 = vld [vmem:[%s16231_s0 + $0x40] sm:$0xff]  ;;  %v6982_v37 = vunpack.i.h.bf16 %v10165_v9 }
 0x23d   :  { %7354 = vrot.lane.b32.xlu1 %v7353_v3, %s8957_s29  ;;  %2485 = vmatpush1.bf16.msra.mxu0 %v2342_v55  ;;  %17075 = vst [vmem:[#allocation113_spill] sm:$0xff] %v10681_v19  ;;  %v1288_v55 = vsel %vm16486_vm11, %v6946_v42, %v6947_v48  ;;  %v7363_v11 = vpack.i.bf16 %v1235_v4, %v1187_v38  ;;  %v7147_v7 = vunpack.i.h.bf16 %v10609_v58  ;;  %v7152_v29 = vunpack.i.h.bf16 %v10668_v14  ;;  %v17078_v42 = vld [vmem:[#allocation124_spill] sm:$0xff]  ;;  %v17079_v58 = vld [vmem:[#allocation121_spill] sm:$0xff] }
 0x23e   :  { %v17077_v3 = vunpack.i.l.bf16 %v17072_v24  ;;  %v1237_v50 = vsel %vm16477_vm14, %v6906_v35, %v6907_v28  ;;  %v6986_v20 = vunpack.i.l.bf16 %v17078_v42  ;;  %v17086_v35 = vunpack.i.l.bf16 %v10572_v54 }
 0x240   :  { %7369 = vrot.lane.b32.xlu0 %v7368_v27, %s8957_s29  ;;  %v1238_v6 = vsel %vm16477_vm14, %v6907_v28, %v17077_v3  ;;  %v7373_v27 = vpack.i.bf16 %v1237_v50, %v1287_v63  ;;  %v17082_v28 = vld [vmem:[#allocation127_spill] sm:$0xff]  ;;  %v1894_v39 = vsel %vm1827_vm6, %v17086_v35, %v7147_v7  ;;  %v1338_v62 = vsel %vm16474_vm12, %v6982_v37, %v6986_v20 }
 0x241   :  { %7364 = vrot.lane.b32.xlu1 %v7363_v11, %s8957_s29  ;;  %v7378_v19 = vpack.i.bf16 %v1288_v55, %v1238_v6  ;;  %v7027_v3 = vunpack.i.h.bf16 %v17082_v28  ;;  %v7026_v4 = vunpack.i.l.bf16 %v17082_v28  ;;  %v17083_v11 = vunpack.i.l.bf16 %v10194_v10  ;;  %v17085_v55 = vld [vmem:[#allocation123_spill] sm:$0xff] }
 0x242   :  { %v10704_v26 = vpop.permute.xlu1 %7154  ;;  %v17084_v6 = vunpack.i.l.bf16 %v10165_v9  ;;  %v17087_v28 = vunpack.i.l.bf16 %v10574_v23  ;;  %v17088_v9 = vunpack.i.l.bf16 %v10668_v14  ;;  %v17090_v35 = vunpack.i.l.bf16 %v17079_v58 }
 0x243   :  { %17080 = vst [vmem:[#allocation119_spill] sm:$0xff] %v10704_v26  ;;  %v1388_v38 = vsel %vm16476_vm10, %v17083_v11, %v7022_v49  ;;  %v6987_v11 = vunpack.i.h.bf16 %v17078_v42  ;;  %v17099_v42 = vld [vmem:[#allocation7_spill] sm:$0xff] }
 0x244   :  { %v1337_v63 = vsel %vm16474_vm12, %v17084_v6, %v6982_v37  ;;  %7379 = vrot.lane.b32.xlu0 %v7378_v19, %s8957_s29  ;;  %v1910_v10 = vsel %vm1827_vm6, %v17087_v28, %v7152_v29  ;;  %v1895_v6 = vsel %vm1827_vm6, %v7147_v7, %v17088_v9  ;;  %v17089_v19 = vunpack.i.l.bf16 %v10704_v26  ;;  %v17092_v7 = vld [vmem:[#allocation5_spill] sm:$0xff] }
 0x245   :  { %7374 = vrot.lane.b32.xlu1 %v7373_v27, %s8957_s29  ;;  %v1289_v23 = vsel %vm16486_vm11, %v6947_v48, %v17090_v35  ;;  %v7388_v50 = vpack.i.bf16 %v1388_v38, %v1338_v62  ;;  %v1390_v37 = vsel %vm16476_vm10, %v7026_v4, %v7027_v3  ;;  %v17091_v27 = vld [vmem:[#allocation132_spill] sm:$0xff]  ;;  %v2344_v41 = vpack.c.bf16 %v1910_v10, %v1894_v39  ;;  %v17096_v10 = vld [vmem:[#allocation129_spill] sm:$0xff] }
 0x246   :  { %v1911_v54 = vsel %vm1827_vm6, %v7152_v29, %v17089_v19  ;;  %v7066_v17 = vunpack.i.l.bf16 %v17091_v27  ;;  %v7383_v40 = vpack.i.bf16 %v1337_v63, %v1289_v23  ;;  %v16436_v9 = vunpack.i.h.bf16 %v17092_v7  ;;  %v17093_v48 = vld [vmem:[#allocation60_spill] sm:$0xff]  ;;  %v17097_v23 = vld [vmem:[#allocation131_spill] sm:$0xff] }
 0x247   :  { %v2345_v28 = vpack.c.bf16 %v1911_v54, %v1895_v6  ;;  %v6251_v14 = vunpack.i.l.bf16 %v17092_v7  ;;  %v1389_v29 = vsel %vm16476_vm10, %v7022_v49, %v7026_v4  ;;  %v7062_v19 = vunpack.i.h.bf16 %v10215_v44  ;;  %v17095_v4 = vld [vmem:[#allocation6_spill] sm:$0xff] }
 0x248   :  { %7389 = vrot.lane.b32.xlu0 %v7388_v50, %s8957_s29  ;;  %v6536_v62 = vunpack.i.l.bf16 %v17093_v48  ;;  %v17094_v38 = vunpack.i.l.bf16 %v17085_v55  ;;  %v6247_v63 = vunpack.i.h.bf16 %v17095_v4  ;;  %v1339_v50 = vsel %vm16474_vm12, %v6986_v20, %v6987_v11 }
 0x249   :  { %2525 = vmatprep.subr.bf16.mxu1 %v2345_v28  ;;  %7384 = vrot.lane.b32.xlu1 %v7383_v40, %s8957_s29  ;;  %v16444_v54 = vunpack.i.l.bf16 %v17096_v10  ;;  %v1440_v40 = vsel %vm16475_vm7, %v7062_v19, %v7066_v17  ;;  %v10769_v39 = vsel %vm185_vm1, %v6251_v14, %v16436_v9  ;;  %v6246_v49 = vunpack.i.l.bf16 %v17095_v4  ;;  %v17104_v9 = vld [vmem:[#allocation63_spill] sm:$0xff] }
 0x24a   :  { %v1340_v6 = vsel %vm16474_vm12, %v6987_v11, %v17094_v38  ;;  %2526 = vmatpush1.bf16.msra.mxu1 %v2344_v41  ;;  %v7067_v38 = vunpack.i.h.bf16 %v17091_v27  ;;  %v7393_v41 = vpack.i.bf16 %v1339_v50, %v1389_v29  ;;  %17098 = vst [vmem:[#allocation124_spill] sm:$0xff] %v10769_v39  ;;  %v17100_v20 = vunpack.i.l.bf16 %v10215_v44  ;;  %v17101_v27 = vld [vmem:[#allocation8_spill] sm:$0xff]  ;;  %v17105_v44 = vld [vmem:[#allocation66_spill] sm:$0xff] }
 0x24b   :  { %v7398_v35 = vpack.i.bf16 %v1390_v37, %v1340_v6  ;;  %v6261_v37 = vunpack.i.l.bf16 %v17099_v42  ;;  %v6257_v6 = vunpack.i.h.bf16 %v17101_v27  ;;  %v17102_v29 = vunpack.i.h.bf16 %v9631_v8 }
 0x24c   :  { %v1439_v11 = vsel %vm16475_vm7, %v17100_v20, %v7062_v19  ;;  %v6541_v28 = vunpack.i.l.bf16 %v17104_v9  ;;  %v6537_v4 = vunpack.i.h.bf16 %v17093_v48  ;;  %v6586_v34 = vunpack.i.l.bf16 %v17105_v44  ;;  %v17106_v20 = vld [vmem:[#allocation67_spill] sm:$0xff] }
 0x24d   :  { %7399 = vrot.lane.b32.xlu0 %v7398_v35, %s8957_s29  ;;  %v10782_v50 = vsel %vm654_vm8, %v17102_v29, %v6536_v62  ;;  %7394 = vrot.lane.b32.xlu1 %v7393_v41, %s8957_s29  ;;  %v1391_v19 = vsel %vm16476_vm10, %v7027_v3, %v16444_v54  ;;  %v6582_v45 = vunpack.i.h.bf16 %v17106_v20  ;;  %v6581_v8 = vunpack.i.l.bf16 %v17106_v20  ;;  %v17108_v48 = vld [vmem:[#allocation11_spill] sm:$0xff]  ;;  %v17110_v20 = vld [vmem:[#allocation4_spill] sm:$0xff] }
 0x24e   :  { %17103 = vst [vmem:[#allocation121_spill] sm:$0xff] %v10782_v50  ;;  %v7408_v35 = vpack.i.bf16 %v10782_v50, %v1440_v40  ;;  %v17107_v29 = vunpack.i.l.bf16 %v17097_v23  ;;  %v7403_v53 = vpack.i.bf16 %v1439_v11, %v1391_v19  ;;  %v6256_v41 = vunpack.i.l.bf16 %v17101_v27  ;;  %v17121_v54 = vld [vmem:[#allocation16_spill] sm:$0xff]  ;;  %v17135_v50 = vld [vmem:[#allocation62_spill] sm:$0xff] }
 0x24f   :  { %v6287_v5 = vunpack.i.h.bf16 %v17108_v48  ;;  %v6286_v18 = vunpack.i.l.bf16 %v17108_v48  ;;  %v1441_v32 = vsel %vm16475_vm7, %v7066_v17, %v7067_v38  ;;  %v10803_v3 = vsel %vm185_vm1, %v6246_v49, %v6247_v63 }
 0x250   :  { %v1442_v57 = vsel %vm16475_vm7, %v7067_v38, %v17107_v29  ;;  %v10806_v40 = vsel %vm654_vm8, %v6537_v4, %v6541_v28  ;;  %v17111_v11 = vunpack.i.h.bf16 %v17110_v20  ;;  %v10815_v19 = vsel %vm185_vm1, %v6247_v63, %v6251_v14 }
 0x251   :  { %7409 = vrot.lane.b32.xlu0 %v7408_v35, %s8957_s29  ;;  %17109 = vst [vmem:[#allocation127_spill] sm:$0xff] %v10806_v40  ;;  %7404 = vrot.lane.b32.xlu1 %v7403_v53, %s8957_s29  ;;  %v10818_v17 = vsel %vm654_vm8, %v6536_v62, %v6537_v4  ;;  %v16446_v38 = vunpack.i.h.bf16 %v17104_v9  ;;  %v7418_v35 = vpack.i.bf16 %v10806_v40, %v1442_v57  ;;  %v8958_v20 = vmov 0  }
 0x252   :  { %v10812_v27 = vsel %vm185_vm1, %v17111_v11, %v6246_v49  ;;  %17112 = vst [vmem:[#allocation123_spill] sm:$0xff] %v10818_v17  ;;  %v10824_v48 = vsel %vm721_vm9, %v6582_v45, %v6586_v34  ;;  %v10827_v53 = vsel %vm721_vm9, %v6581_v8, %v6582_v45  ;;  %v7413_v49 = vpack.i.bf16 %v1441_v32, %v10818_v17  ;;  %v17120_v32 = vld [vmem:[#allocation14_spill] sm:$0xff] }
 0x253   :  { %17113 = vst [vmem:[#allocation132_spill] sm:$0xff] %v10824_v48  ;;  %17114 = vst [vmem:[#allocation5_spill] sm:$0xff] %v10827_v53  ;;  %7543 = vset.pattern.permute.xlu0 %v8958_v20  ;;  %7544 = vset.pattern.permute.xlu1 %v8958_v20  ;;  %v17115_v14 = vunpack.i.h.bf16 %v17099_v42  ;;  %v10836_v57 = vsel %vm185_vm1, %v6256_v41, %v6257_v6  ;;  %v10839_v63 = vsel %vm252_vm2, %v6286_v18, %v6287_v5 }
 0x254   :  { %17117 = vst [vmem:[#allocation6_spill] sm:$0xff] %v10836_v57  ;;  %v17118_v4 = vunpack.i.h.bf16 %v9739_v59  ;;  %v6297_v11 = vunpack.i.h.bf16 %v17120_v32  ;;  %v6296_v20 = vunpack.i.l.bf16 %v17120_v32  ;;  %v6291_v29 = vunpack.i.l.bf16 %v17121_v54 }
 0x255   :  { %v10833_v62 = vsel %vm185_vm1, %v6261_v37, %v17115_v14  ;;  %7419 = vrot.lane.b32.xlu0 %v7418_v35, %s8957_s29  ;;  %v6292_v14 = vunpack.i.h.bf16 %v17121_v54  ;;  %7414 = vrot.lane.b32.xlu1 %v7413_v49, %s8957_s29  ;;  %v7428_v59 = vpack.i.bf16 %v10824_v48, %v10827_v53  ;;  %v17125_v32 = vunpack.i.h.bf16 %v17092_v7 }
 0x256   :  { %17116 = vst [vmem:[#allocation60_spill] sm:$0xff] %v10833_v62  ;;  %v10844_v45 = vsel %vm721_vm9, %v17118_v4, %v6581_v8  ;;  %v10855_v62 = vsel %vm654_vm8, %v6541_v28, %v16446_v38  ;;  %v17123_v8 = vld [vmem:[#allocation12_spill] sm:$0xff]  ;;  %v17127_v54 = vunpack.i.h.bf16 %v17105_v44  ;;  %v10883_v7 = vsel %vm185_vm1, %v6257_v6, %v6261_v37 }
 0x257   :  { %17119 = vst [vmem:[#allocation129_spill] sm:$0xff] %v10844_v45  ;;  %17122 = vst [vmem:[#allocation131_spill] sm:$0xff] %v10855_v62  ;;  %v17124_v35 = vunpack.i.h.bf16 %v17123_v8  ;;  %v10867_v42 = vsel %vm185_vm1, %v17125_v32, %v6256_v41  ;;  %v10874_v28 = vpop.permute.xlu1 %7164  ;;  %v10876_v38 = vpop.permute.xlu0 %7159  ;;  %v7423_v8 = vpack.i.bf16 %v10844_v45, %v10855_v62  ;;  %v7157_v41 = vunpack.i.h.bf16 %v10704_v26  ;;  %v17133_v45 = vld [vmem:[#allocation18_spill] sm:$0xff]  ;;  %v17136_v26 = vld [vmem:[#allocation111_spill] sm:$0xff] }
 0x258   :  { %17126 = vst [vmem:[#allocation8_spill] sm:$0xff] %v10867_v42  ;;  %v10872_v49 = vsel %vm721_vm9, %v6586_v34, %v17127_v54  ;;  %17129 = vst [vmem:[#allocation66_spill] sm:$0xff] %v10883_v7  ;;  %v7162_v34 = vunpack.i.h.bf16 %v10876_v38  ;;  %v16454_v32 = vunpack.i.l.bf16 %v10876_v38  ;;  %v10891_v54 = vsel %vm252_vm2, %v6296_v20, %v6297_v11 }
 0x259   :  { %v10862_v4 = vsel %vm252_vm2, %v17124_v35, %v6286_v18  ;;  %17128 = vst [vmem:[#allocation63_spill] sm:$0xff] %v10872_v49  ;;  %v16455_v35 = vunpack.i.l.bf16 %v10874_v28  ;;  %7429 = vrot.lane.b32.xlu0 %v7428_v59, %s8957_s29  ;;  %17130 = vst [vmem:[#allocation67_spill] sm:$0xff] %v10891_v54  ;;  %v10894_v62 = vsel %vm252_vm2, %v6291_v29, %v6292_v14  ;;  %7424 = vrot.lane.b32.xlu1 %v7423_v8, %s8957_s29  ;;  %v17141_v54 = vld [vmem:[#allocation22_spill] sm:$0xff] }
 0x25a   :  { %17131 = vst [vmem:[#allocation11_spill] sm:$0xff] %v10894_v62  ;;  %v10900_v6 = vsel %vm252_vm2, %v6287_v5, %v6291_v29  ;;  %v7167_v18 = vunpack.i.h.bf16 %v10874_v28  ;;  %v1925_v59 = vsel %vm1827_vm6, %v7157_v41, %v16454_v32  ;;  %v10910_v53 = vsel %vm252_vm2, %v6292_v14, %v6296_v20 }
 0x25b   :  { %v1941_v48 = vsel %vm1827_vm6, %v7162_v34, %v16455_v35  ;;  %17132 = vst [vmem:[#allocation4_spill] sm:$0xff] %v10910_v53  ;;  %v6832_v8 = vunpack.i.h.bf16 %v10051_v43  ;;  %v6872_v37 = vunpack.i.h.bf16 %v17068_v46  ;;  %v10914_v40 = vpop.permute.xlu0 %7169  ;;  %v7433_v5 = vpack.i.bf16 %v10709_v21, %v10872_v49 }
 0x25c   :  { %v2359_v29 = vpack.c.bf16 %v1941_v48, %v1925_v59  ;;  %v7171_v32 = vunpack.i.l.bf16 %v10914_v40  ;;  %v17134_v35 = vpack.i.bf16 %v10545_v15, %v10589_v36  ;;  %v6836_v49 = vunpack.i.l.bf16 %v17136_v26  ;;  %v17140_v59 = vld [vmem:[#allocation21_spill] sm:$0xff] }
 0x25d   :  { %7434 = vrot.lane.b32.xlu1 %v7433_v5, %s8957_s29  ;;  %v1924_v36 = vsel %vm1827_vm6, %v7167_v18, %v7157_v41  ;;  %v17138_v7 = vunpack.i.l.bf16 %v10051_v43  ;;  %v17139_v5 = vunpack.i.l.bf16 %v17068_v46  ;;  %v6912_v48 = vunpack.i.h.bf16 %v17072_v24 }
 0x25e   :  { %7439 = vrot.lane.b32.xlu0 %v17134_v35, %s8957_s29  ;;  %2486 = vmatprep.subr.bf16.mxu0 %v2359_v29  ;;  %v17137_v35 = vld [vmem:[#allocation112_spill] sm:$0xff]  ;;  %v1940_v14 = vsel %vm1827_vm6, %v7171_v32, %v7162_v34  ;;  %v17143_v18 = vpack.i.bf16 %v10614_v47, %v10643_v22  ;;  %v17144_v43 = vunpack.i.l.bf16 %v17133_v45  ;;  %v17146_v41 = vunpack.i.h.bf16 %v17104_v9  ;;  %v10968_v22 = vpop.permute.xlu1 %7174 }
 0x25f   :  { %v6877_v17 = vunpack.i.h.bf16 %v17137_v35  ;;  %v6876_v20 = vunpack.i.l.bf16 %v17137_v35  ;;  %v1137_v21 = vsel %vm1124_vm15, %v17138_v7, %v6832_v8  ;;  %v1188_v29 = vsel %vm16523_vm13, %v17139_v5, %v6872_v37  ;;  %v17142_v35 = vld [vmem:[#allocation27_spill] sm:$0xff]  ;;  %v17151_v7 = vld [vmem:[#allocation120_spill] sm:$0xff] }
 0x260   :  { %v2358_v15 = vpack.c.bf16 %v1940_v14, %v1924_v36  ;;  %v10956_v46 = vsel %vm252_vm2, %v6297_v11, %v17144_v43  ;;  %v17145_v36 = vunpack.i.l.bf16 %v17135_v50  ;;  %v6837_v32 = vunpack.i.h.bf16 %v17136_v26 }
 0x261   :  { %v1138_v14 = vsel %vm1124_vm15, %v6832_v8, %v6836_v49  ;;  %v17148_v11 = vpack.i.bf16 %v10596_v60, %v10538_v56  ;;  %v1190_v5 = vsel %vm16523_vm13, %v6876_v20, %v6877_v17  ;;  %v7453_v9 = vpack.i.bf16 %v1137_v21, %v17065_v30  ;;  %v17152_v30 = vld [vmem:[#allocation64_spill] sm:$0xff]  ;;  %v17156_v60 = vld [vmem:[#allocation117_spill] sm:$0xff] }
 0x262   :  { %7449 = vrot.lane.b32.xlu0 %v17143_v18, %s8957_s29  ;;  %v10964_v34 = vsel %vm654_vm8, %v17146_v41, %v17145_v36  ;;  %2487 = vmatpush1.bf16.msra.mxu0 %v2358_v15  ;;  %v6952_v18 = vunpack.i.h.bf16 %v17079_v58  ;;  %v7458_v43 = vpack.i.bf16 %v1188_v29, %v1138_v14  ;;  %v1189_v36 = vsel %vm16523_vm13, %v6872_v37, %v6876_v20  ;;  %v17150_v41 = vld [vmem:[#allocation118_spill] sm:$0xff] }
 0x263   :  { %17147 = vst [vmem:[#allocation14_spill] sm:$0xff] %v10964_v34  ;;  %7444 = vrot.lane.b32.xlu1 %v17148_v11, %s8957_s29  ;;  %v17149_v26 = vunpack.i.l.bf16 %v17072_v24  ;;  %v6917_v57 = vunpack.i.h.bf16 %v17150_v41  ;;  %v6916_v39 = vunpack.i.l.bf16 %v17150_v41  ;;  %v6957_v11 = vunpack.i.h.bf16 %v17151_v7  ;;  %v17153_v37 = vld [vmem:[#allocation110_spill] sm:$0xff] }
 0x264   :  { %v6956_v15 = vunpack.i.l.bf16 %v17151_v7  ;;  %v7177_v62 = vunpack.i.h.bf16 %v10968_v22  ;;  %v7172_v56 = vunpack.i.h.bf16 %v10914_v40  ;;  %v1140_v24 = vsel %vm1124_vm15, %v6837_v32, %v17153_v37  ;;  %v17154_v14 = vld [vmem:[#allocation114_spill] sm:$0xff] }
 0x265   :  { %v1239_v8 = vsel %vm16477_vm14, %v17149_v26, %v6912_v48  ;;  %v1139_v20 = vsel %vm1124_vm15, %v6836_v49, %v6837_v32  ;;  %v1191_v7 = vsel %vm16523_vm13, %v6877_v17, %v17154_v14  ;;  %v17155_v26 = vunpack.i.l.bf16 %v17079_v58 }
 0x266   :  { %7459 = vrot.lane.b32.xlu0 %v7458_v43, %s8957_s29  ;;  %v6992_v43 = vunpack.i.h.bf16 %v17085_v55  ;;  %v11000_v41 = vpop.permute.xlu0 %7179  ;;  %v7468_v21 = vpack.i.bf16 %v1190_v5, %v1140_v24  ;;  %v1242_v37 = vsel %vm16477_vm14, %v6917_v57, %v17156_v60  ;;  %v7463_v32 = vpack.i.bf16 %v1139_v20, %v1189_v36 }
 0x267   :  { %7454 = vrot.lane.b32.xlu1 %v7453_v9, %s8957_s29  ;;  %v1290_v40 = vsel %vm16486_vm11, %v17155_v26, %v6952_v18  ;;  %v16469_v49 = vunpack.i.l.bf16 %v11000_v41  ;;  %v7473_v29 = vpack.i.bf16 %v1239_v8, %v1191_v7  ;;  %v1240_v9 = vsel %vm16477_vm14, %v6912_v48, %v6916_v39 }
 0x268   :  { %v1292_v17 = vsel %vm16486_vm11, %v6956_v15, %v6957_v11  ;;  %v17157_v58 = vunpack.i.l.bf16 %v10876_v38  ;;  %v17158_v26 = vunpack.i.l.bf16 %v10874_v28  ;;  %v1291_v60 = vsel %vm16486_vm11, %v6952_v18, %v6956_v15  ;;  %v17161_v28 = vld [vmem:[#allocation128_spill] sm:$0xff] }
 0x269   :  { %v7478_v36 = vpack.i.bf16 %v1290_v40, %v1240_v9  ;;  %v17159_v8 = vunpack.i.l.bf16 %v10968_v22  ;;  %v17160_v38 = vunpack.i.l.bf16 %v17085_v55  ;;  %v7036_v7 = vunpack.i.l.bf16 %v17161_v28 }
 0x26a   :  { %7469 = vrot.lane.b32.xlu0 %v7468_v21, %s8957_s29  ;;  %v1926_v14 = vsel %vm1827_vm6, %v17157_v58, %v7172_v56  ;;  %v1942_v5 = vsel %vm1827_vm6, %v17158_v26, %v7177_v62  ;;  %v1943_v21 = vsel %vm1827_vm6, %v7177_v62, %v16469_v49  ;;  %v7190_v18 = vpop.permute.xlu0 %7189  ;;  %v7032_v9 = vunpack.i.h.bf16 %v17096_v10 }
 0x26b   :  { %7464 = vrot.lane.b32.xlu1 %v7463_v32, %s8957_s29  ;;  %v1927_v48 = vsel %vm1827_vm6, %v7172_v56, %v17159_v8  ;;  %v1341_v24 = vsel %vm16474_vm12, %v17160_v38, %v6992_v43  ;;  %v17162_v32 = vld [vmem:[#allocation126_spill] sm:$0xff]  ;;  %v7185_v58 = vpop.permute.xlu1 %7184  ;;  %v7191_v56 = vunpack.i.l.bf16 %v7190_v18  ;;  %v2360_v26 = vpack.c.bf16 %v1942_v5, %v1926_v14  ;;  %v17163_v38 = vld [vmem:[#allocation68_spill] sm:$0xff] }
 0x26c   :  { %v2361_v15 = vpack.c.bf16 %v1943_v21, %v1927_v48  ;;  %v6997_v40 = vunpack.i.h.bf16 %v17162_v32  ;;  %v6996_v8 = vunpack.i.l.bf16 %v17162_v32  ;;  %v7182_v62 = vunpack.i.h.bf16 %v11000_v41  ;;  %v17164_v21 = vld [vmem:[#allocation122_spill] sm:$0xff] }
 0x26d   :  { %v7187_v55 = vunpack.i.h.bf16 %v7185_v58  ;;  %v7186_v49 = vunpack.i.l.bf16 %v7185_v58  ;;  %v1241_v48 = vsel %vm16477_vm14, %v6916_v39, %v6917_v57  ;;  %v1293_v47 = vsel %vm16486_vm11, %v6957_v11, %v17164_v21 }
 0x26e   :  { %7479 = vrot.lane.b32.xlu0 %v7478_v36, %s8957_s29  ;;  %2527 = vmatprep.subr.bf16.mxu1 %v2361_v15  ;;  %v7488_v14 = vpack.i.bf16 %v1292_v17, %v1242_v37  ;;  %v17165_v5 = vunpack.i.h.bf16 %v17161_v28  ;;  %v7192_v45 = vunpack.i.h.bf16 %v7190_v18  ;;  %v11040_v58 = vpop.permute.xlu0 %7199  ;;  %v17166_v39 = vunpack.i.l.bf16 %v17096_v10  ;;  %v17167_v37 = vld [vmem:[#allocation125_spill] sm:$0xff] }
 0x26f   :  { %7474 = vrot.lane.b32.xlu1 %v7473_v29, %s8957_s29  ;;  %2528 = vmatpush1.bf16.msra.mxu1 %v2360_v26  ;;  %v1957_v36 = vsel %vm1827_vm6, %v7182_v62, %v7186_v49  ;;  %v1973_v15 = vsel %vm1827_vm6, %v7187_v55, %v7191_v56  ;;  %v7195_v11 = vpop.permute.xlu1 %7194  ;;  %v7483_v21 = vpack.i.bf16 %v1241_v48, %v1291_v60  ;;  %v7202_v10 = vunpack.i.h.bf16 %v11040_v58 }
 0x270   :  { %v1394_v32 = vsel %vm16476_vm10, %v7036_v7, %v17165_v5  ;;  %v1392_v57 = vsel %vm16476_vm10, %v17166_v39, %v7032_v9  ;;  %v2375_v29 = vpack.c.bf16 %v1973_v15, %v1957_v36  ;;  %v7493_v26 = vpack.i.bf16 %v1341_v24, %v1293_v47 }
 0x271   :  { %v1344_v17 = vsel %vm16474_vm12, %v6997_v40, %v17167_v37  ;;  %v1342_v5 = vsel %vm16474_vm12, %v6992_v43, %v6996_v8  ;;  %v1343_v18 = vsel %vm16474_vm12, %v6996_v8, %v6997_v40  ;;  %v7196_v20 = vunpack.i.l.bf16 %v7195_v11  ;;  %v17168_v8 = vld [vmem:[#allocation134_spill] sm:$0xff] }
 0x272   :  { %7489 = vrot.lane.b32.xlu0 %v7488_v14, %s8957_s29  ;;  %v1393_v42 = vsel %vm16476_vm10, %v7032_v9, %v7036_v7  ;;  %v7197_v53 = vunpack.i.h.bf16 %v7195_v11  ;;  %2488 = vmatprep.subr.bf16.mxu0 %v2375_v29  ;;  %v7508_v60 = vpack.i.bf16 %v1394_v32, %v1344_v17  ;;  %v16485_v47 = vunpack.i.l.bf16 %v11040_v58  ;;  %v7210_v24 = vpop.permute.xlu0 %7209  ;;  %v62_v37 = vld [vmem:[%s16232_s1] sm:$0xff] }
 0x273   :  { %7484 = vrot.lane.b32.xlu1 %v7483_v21, %s8957_s29  ;;  %v7498_v48 = vpack.i.bf16 %v1392_v57, %v1342_v5  ;;  %v1956_v43 = vsel %vm1827_vm6, %v7192_v45, %v7182_v62  ;;  %v1972_v40 = vsel %vm1827_vm6, %v7196_v20, %v7187_v55  ;;  %v7076_v36 = vunpack.i.l.bf16 %v17168_v8  ;;  %v11059_v14 = vpop.permute.xlu1 %7204 }
 0x274   :  { %v7212_v7 = vunpack.i.h.bf16 %v7210_v24  ;;  %v7211_v9 = vunpack.i.l.bf16 %v7210_v24  ;;  %v2374_v15 = vpack.c.bf16 %v1972_v40, %v1956_v43  ;;  %v7072_v39 = vunpack.i.h.bf16 %v17097_v23  ;;  %v17170_v40 = vld [vmem:[#allocation69_spill] sm:$0xff] }
 0x275   :  { %v7207_v11 = vunpack.i.h.bf16 %v11059_v14  ;;  %v16484_v32 = vunpack.i.l.bf16 %v11059_v14  ;;  %v7503_v57 = vpack.i.bf16 %v1343_v18, %v1393_v42  ;;  %vm16598_vm12 = vcmask 1043456  }
 0x276   :  { %7499 = vrot.lane.b32.xlu0 %v7498_v48, %s8957_s29  ;;  %2489 = vmatpush1.bf16.msra.mxu0 %v2374_v15  ;;  %v1989_v45 = vsel %vm1827_vm6, %v7211_v9, %v7212_v7  ;;  %v1958_v20 = vsel %vm1827_vm6, %v7186_v49, %v7197_v53  ;;  %v1974_v62 = vsel %vm1827_vm6, %v7191_v56, %v7202_v10  ;;  %v11069_v55 = vpop.permute.xlu0 %7219  ;;  %v7077_v49 = vunpack.i.h.bf16 %v17168_v8 }
 0x277   :  { %7494 = vrot.lane.b32.xlu1 %v7493_v26, %s8957_s29  ;;  %v2391_v21 = vpack.c.bf16 %v1989_v45, %v1989_v45  ;;  %v1959_v29 = vsel %vm1827_vm6, %v7197_v53, %v16485_v47  ;;  %v1975_v42 = vsel %vm1827_vm6, %v7202_v10, %v16484_v32  ;;  %v1988_v26 = vsel %vm1827_vm6, %v7207_v11, %v7211_v9  ;;  %v11083_v17 = vpop.permute.xlu1 %7214  ;;  %v17171_v9 = vld [vmem:[#allocation130_spill] sm:$0xff]  ;;  %v17257_v47 = vld [vmem:[#allocation141_spill] sm:$0xff] }
 0x278   :  { %v1444_v56 = vsel %vm16475_vm7, %v7072_v39, %v7076_v36  ;;  %v2377_v5 = vpack.c.bf16 %v1975_v42, %v1959_v29  ;;  %v2390_v18 = vpack.c.bf16 %v1988_v26, %v1988_v26  ;;  %v17169_v53 = vunpack.i.l.bf16 %v17097_v23 }
 0x279   :  { %v16483_v10 = vunpack.i.h.bf16 %v11083_v17  ;;  %v7216_v48 = vunpack.i.l.bf16 %v11083_v17  ;;  %6131 = vmatprep.subr.msk.bf16.mxu0 %vm16598_vm12, %v2391_v21  ;;  %v2376_v43 = vpack.c.bf16 %v1974_v62, %v1958_v20  ;;  %v6592_v8 = vunpack.i.h.bf16 %v17170_v40 }
 0x27a   :  { %v1443_v24 = vsel %vm16475_vm7, %v17169_v53, %v7072_v39  ;;  %7509 = vrot.lane.b32.xlu0 %v7508_v60, %s8957_s29  ;;  %v17172_v15 = vunpack.i.h.bf16 %v17161_v28  ;;  %2529 = vmatprep.subr.bf16.mxu1 %v2377_v5  ;;  %v2417_v23 = vsel %vm16598_vm12, %v2390_v18, 0  ;;  %v11099_v39 = vpack.c.bf16 %v62_v37, %v62_v37  ;;  %v11102_v60 = vpop.permute.xlu0 %7229 }
 0x27b   :  { %7504 = vrot.lane.b32.xlu1 %v7503_v57, %s8957_s29  ;;  %v6591_v45 = vunpack.i.l.bf16 %v17170_v40  ;;  %2491 = vmatpush1.bf16.msra.mxu0 %v2417_v23  ;;  %v7518_v20 = vpack.i.bf16 %v10964_v34, %v1444_v56  ;;  %v1991_v28 = vsel %vm1827_vm6, %v7216_v48, %v16483_v10  ;;  %v1990_v62 = vsel %vm1827_vm6, %v7212_v7, %v7216_v48  ;;  %v17174_v57 = vld [vmem:[#allocation133_spill] sm:$0xff]  ;;  %v11111_v29 = vpop.permute.xlu1 %7224  ;;  %v17177_v48 = vld [vmem:[#allocation28_spill] sm:$0xff]  ;;  %v17254_v10 = vld [vmem:[#allocation59_spill] sm:$0xff] }
 0x27c   :  { %v1395_v11 = vsel %vm16476_vm10, %v17172_v15, %v17171_v9  ;;  %17173 = vst [vmem:[#allocation16_spill] sm:$0xff] %v11099_v39  ;;  %2530 = vmatpush1.bf16.msra.mxu1 %v2376_v43  ;;  %v1446_v21 = vsel %vm16475_vm7, %v7077_v49, %v17174_v57  ;;  %v17175_v42 = vpack.c.bf16 %v10239_v12, %v10628_v13  ;;  %v6326_v56 = vunpack.i.l.bf16 %v17141_v54  ;;  %v17179_v9 = vld [vmem:[#allocation32_spill] sm:$0xff]  ;;  %v17180_v13 = vld [vmem:[#allocation38_spill] sm:$0xff] }
 0x27d   :  { %v7513_v26 = vpack.i.bf16 %v1443_v24, %v1395_v11  ;;  %v2393_v37 = vpack.c.bf16 %v1991_v28, %v1991_v28  ;;  %v2392_v5 = vpack.c.bf16 %v1990_v62, %v1990_v62  ;;  %v6367_v18 = vunpack.i.h.bf16 %v17142_v35 }
 0x27e   :  { %2546 = vmatprep.subr.bf16.mxu0 %v17175_v42  ;;  %v1445_v53 = vsel %vm16475_vm7, %v7076_v36, %v7077_v49  ;;  %7519 = vrot.lane.b32.xlu0 %v7518_v20, %s8957_s29  ;;  %v17176_v7 = vunpack.i.l.bf16 %v17142_v35  ;;  %v17178_v43 = vunpack.i.h.bf16 %v17177_v48  ;;  %v16482_v12 = vunpack.i.l.bf16 %v17179_v9  ;;  %v17184_v49 = vld [vmem:[#allocation43_spill] sm:$0xff] }
 0x27f   :  { %v6406_v24 = vunpack.i.l.bf16 %v17180_v13  ;;  %v17181_v15 = vunpack.i.l.bf16 %v17152_v30  ;;  %v17182_v11 = vunpack.i.h.bf16 %v17135_v50  ;;  %7514 = vrot.lane.b32.xlu1 %v7513_v26, %s8957_s29  ;;  %2497 = vmatmul.mubr.bf16.vlgmr.msra.gmra.mrb[0].mxu0 %v11099_v39  ;;  %v2423_v36 = vsel %vm16598_vm12, %v2392_v5, 0 }
 0x280   :  { %v392_v40 = vsel %vm386_vm4, %v17178_v43, %v17176_v7  ;;  %v6446_v20 = vunpack.i.l.bf16 %v17184_v49  ;;  %v17186_v62 = vunpack.i.l.bf16 %v17135_v50  ;;  %v6552_v42 = vunpack.i.h.bf16 %v17152_v30  ;;  %6133 = vmatprep.subr.msk.bf16.mxu1 %vm16598_vm12, %v2393_v37  ;;  %v11150_v7 = vpop.permute.xlu0 %7239  ;;  %v11162_v37 = vpop.permute.xlu1 %7234 }
 0x281   :  { %v11132_v23 = vsel %vm654_vm8, %v17182_v11, %v17181_v15  ;;  %v17185_v28 = vmov %v17182_v11  ;;  %v17188_v26 = vpack.c.bf16 %v10074_v52, %v10533_v51  ;;  %v6447_v48 = vunpack.i.h.bf16 %v17184_v49  ;;  %2532 = vmatpush1.bf16.msra.mxu1 %v2423_v36  ;;  %v17194_v49 = vld [vmem:[#allocation48_spill] sm:$0xff] }
 0x282   :  { %17183 = vst [vmem:[#allocation12_spill] sm:$0xff] %v11132_v23  ;;  %v11143_v57 = vsel %vm654_vm8, %v17186_v62, %v17185_v28  ;;  %v7528_v5 = vpack.i.bf16 %v11132_v23, %v1446_v21  ;;  %v11155_v43 = vsel %vm721_vm9, %v6591_v45, %v6592_v8  ;;  %v17190_v50 = vunpack.i.l.bf16 %v17163_v38 }
 0x283   :  { %17187 = vst [vmem:[#allocation62_spill] sm:$0xff] %v11143_v57  ;;  %2547 = vmatpush1.bf16.msra.mxu0 %v17188_v26  ;;  %17189 = vst [vmem:[#allocation111_spill] sm:$0xff] %v11155_v43  ;;  %v17192_v52 = vpack.c.bf16 %v10862_v4, %v10812_v27  ;;  %v7523_v51 = vpack.i.bf16 %v1445_v53, %v11143_v57  ;;  %v17193_v21 = vunpack.i.h.bf16 %v17141_v54  ;;  %v16478_v28 = vunpack.i.l.bf16 %v17194_v49  ;;  %v17198_v27 = vld [vmem:[#allocation20_spill] sm:$0xff] }
 0x284   :  { %v11160_v15 = vsel %vm721_vm9, %v6592_v8, %v17190_v50  ;;  %v17195_v62 = vunpack.i.h.bf16 %v17105_v44  ;;  %v17197_v36 = vpack.c.bf16 %v10267_v1, %v10654_v0  ;;  %7529 = vrot.lane.b32.xlu0 %v7528_v5, %s8957_s29  ;;  %v17199_v4 = vunpack.i.h.bf16 %v17198_v27  ;;  %v17202_v0 = vld [vmem:[#allocation135_spill] sm:$0xff]  ;;  %2538 = vmatmul.mubr.bf16.vlgmr.msra.gmra.mrb[0].mxu1 %v11099_v39 }
 0x285   :  { %17191 = vst [vmem:[#allocation112_spill] sm:$0xff] %v11160_v15  ;;  %2548 = vmatprep.subr.bf16.mxu0 %v17192_v52  ;;  %v11171_v11 = vsel %vm319_vm3, %v6326_v56, %v17193_v21  ;;  %v17200_v26 = vunpack.i.l.bf16 %v17142_v35  ;;  %v17201_v52 = vld [vmem:[#allocation37_spill] sm:$0xff]  ;;  %7524 = vrot.lane.b32.xlu1 %v7523_v51, %s8957_s29  ;;  %v394_v1 = vsel %vm386_vm4, %v6367_v18, %v16482_v12  ;;  %v6407_v5 = vunpack.i.h.bf16 %v17180_v13  ;;  %v17253_v12 = vld [vmem:[#allocation96_spill] sm:$0xff] }
 0x286   :  { %v11177_v8 = vsel %vm721_vm9, %v17195_v62, %v6591_v45  ;;  %2587 = vmatprep.subr.bf16.mxu1 %v17197_v36  ;;  %v325_v53 = vsel %vm319_vm3, %v17199_v4, %v6326_v56  ;;  %v16479_v44 = vunpack.i.l.bf16 %v17201_v52  ;;  %6136 = vmatprep.mubr.msk.bf16.mxu0 %vm2411_vm5, %v17202_v0  ;;  %v17203_v56 = vunpack.i.l.bf16 %v17152_v30  ;;  %v17204_v51 = vld [vmem:[#allocation13_spill] sm:$0xff]  ;;  %v11208_v36 = vpop.permute.xlu0 %7249 }
 0x287   :  { %17196 = vst [vmem:[#allocation21_spill] sm:$0xff] %v11177_v8  ;;  %v11189_v50 = vsel %vm386_vm4, %v17200_v26, %v6367_v18  ;;  %v2219_v45 = vpack.c.bf16 %v392_v40, %v325_v53  ;;  %v7538_v21 = vpack.i.bf16 %v11160_v15, %v11155_v43  ;;  %v17205_v40 = vld [vmem:[#allocation15_spill] sm:$0xff]  ;;  %v17207_v18 = vld [vmem:[#allocation44_spill] sm:$0xff]  ;;  %vm17209_vm7 = vcmask 875520   ;;  %6138 = vmatprep.mubr.msk.bf16.mxu1 %vm2411_vm5, %v17202_v0  ;;  %v17276_v15 = vld [vmem:[#allocation94_spill] sm:$0xff] }
 0x288   :  { %v1449_v35 = vsel %vm654_vm8, %v17203_v56, %v6552_v42  ;;  %v17206_v62 = vpack.c.bf16 %v17204_v51, %v17205_v40  ;;  %v17208_v27 = vunpack.i.h.bf16 %v17207_v18  ;;  %vm17210_vm10 = vmmov %vm17209_vm7  ;;  %v17211_v30 = vpack.c.bf16 %v10257_v33, %v10661_v25  ;;  %v11219_v42 = vpop.permute.xlu1 %7244  ;;  %v17212_v26 = vld [vmem:[#allocation36_spill] sm:$0xff]  ;;  %v17215_v40 = vld [vmem:[#allocation54_spill] sm:$0xff] }
 0x289   :  { %v11214_v13 = vsel %vm17210_vm10, %v6446_v20, %v6447_v48  ;;  %v7533_v53 = vpack.i.bf16 %v11177_v8, %v1449_v35  ;;  %v17213_v56 = vunpack.i.h.bf16 %v17212_v26  ;;  %vm17214_vm14 = vcmask 883712   ;;  %7539 = vrot.lane.b32.xlu0 %v7538_v21, %s8957_s29  ;;  %v17217_v25 = vld [vmem:[#allocation70_spill] sm:$0xff]  ;;  %v17221_v21 = vld [vmem:[#allocation53_spill] sm:$0xff] }
 0x28a   :  { %2549 = vmatpush1.bf16.msra.mxu0 %v17206_v62  ;;  %v526_v4 = vsel %vm17209_vm7, %v17208_v27, %v6446_v20  ;;  %2588 = vmatpush1.bf16.msra.mxu1 %v17211_v30  ;;  %v6487_v62 = vunpack.i.h.bf16 %v17215_v40  ;;  %v6486_v18 = vunpack.i.l.bf16 %v17215_v40  ;;  %v6597_v20 = vunpack.i.h.bf16 %v17163_v38  ;;  %vm17220_vm10 = vmmov %vm17214_vm14 }
 0x28b   :  { %2550 = vmatprep.subr.bf16.mxu0 %v2219_v45  ;;  %v459_v51 = vsel %vm17214_vm14, %v17213_v56, %v6406_v24  ;;  %v17216_v27 = vpack.c.bf16 %v10900_v6, %v10815_v19  ;;  %v528_v33 = vsel %vm17209_vm7, %v6447_v48, %v16478_v28  ;;  %v6617_v45 = vunpack.i.h.bf16 %v17217_v25  ;;  %7534 = vrot.lane.b32.xlu1 %v7533_v53, %s8957_s29  ;;  %v64_v6 = vld [vmem:[%s16233_s2] sm:$0xff]  ;;  %v17223_v53 = vld [vmem:[#allocation31_spill] sm:$0xff]  ;;  %vm17225_vm14 = vmmov %vm17220_vm10 }
 0x28c   :  { %v6616_v35 = vunpack.i.l.bf16 %v17217_v25  ;;  %v2235_v30 = vpack.c.bf16 %v526_v4, %v459_v51  ;;  %v17218_v26 = vunpack.i.l.bf16 %v17140_v59  ;;  %v17219_v56 = vunpack.i.h.bf16 %v17141_v54  ;;  %v11253_v51 = vpop.permute.xlu0 %7259 }
 0x28d   :  { %2589 = vmatprep.subr.bf16.mxu1 %v17216_v27  ;;  %v460_v48 = vsel %vm17220_vm10, %v6406_v24, %v6407_v5  ;;  %v16480_v40 = vunpack.i.l.bf16 %v17221_v21  ;;  %v17222_v27 = vld [vmem:[#allocation29_spill] sm:$0xff]  ;;  %v461_v25 = vsel %vm17225_vm14, %v6407_v5, %v16479_v44  ;;  %v17227_v28 = vpack.c.bf16 %v10839_v63, %v10803_v3  ;;  %v11262_v24 = vpop.permute.xlu1 %7254  ;;  %v17230_v44 = vld [vmem:[#allocation52_spill] sm:$0xff]  ;;  %2408 = vperm.xlu0 %7543, %v64_v6   ;;  %v17239_v6 = vld [vmem:[#allocation71_spill] sm:$0xff] }
 0x28e   :  { %v327_v19 = vsel %vm319_vm3, %v17219_v56, %v17218_v26  ;;  %v17224_v4 = vpack.c.bf16 %v17222_v27, %v17223_v53  ;;  %v17226_v26 = vld [vmem:[#allocation74_spill] sm:$0xff]  ;;  %v2220_v27 = vpack.c.bf16 %v11189_v50, %v11171_v11  ;;  %v2237_v53 = vpack.c.bf16 %v528_v33, %v461_v25  ;;  %v17234_v11 = vld [vmem:[#allocation85_spill] sm:$0xff] }
 0x28f   :  { %v2221_v54 = vpack.c.bf16 %v394_v1, %v327_v19  ;;  %v16481_v56 = vunpack.i.l.bf16 %v17226_v26  ;;  %2590 = vmatpush1.bf16.msra.mxu1 %v17227_v28  ;;  %vm17228_vm7 = vcmask 867328   ;;  %v17229_v5 = vunpack.i.l.bf16 %v17163_v38 }
 0x290   :  { %2551 = vmatpush1.bf16.msra.mxu0 %v17224_v4  ;;  %v2236_v4 = vpack.c.bf16 %v11214_v13, %v460_v48  ;;  %v11268_v1 = vsel %vm17228_vm7, %v6486_v18, %v6487_v62  ;;  %v17231_v3 = vunpack.i.h.bf16 %v17230_v44  ;;  %vm17232_vm10 = vmmov %vm17228_vm7  ;;  %vm17233_vm14 = vcmask 211968   ;;  %v17236_v48 = vld [vmem:[#allocation45_spill] sm:$0xff]  ;;  %v17237_v44 = vld [vmem:[#allocation47_spill] sm:$0xff] }
 0x291   :  { %2552 = vmatprep.subr.bf16.mxu0 %v2235_v30  ;;  %2591 = vmatprep.subr.bf16.mxu1 %v2221_v54  ;;  %v1452_v19 = vsel %vm721_vm9, %v17229_v5, %v6597_v20  ;;  %v11277_v28 = vsel %vm17233_vm14, %v6616_v35, %v6617_v45  ;;  %v6697_v50 = vunpack.i.h.bf16 %v17234_v11  ;;  %v6696_v13 = vunpack.i.l.bf16 %v17234_v11  ;;  %v17235_v30 = vld [vmem:[#allocation80_spill] sm:$0xff]  ;;  %vm17241_vm7 = vmmov %vm17233_vm14 }
 0x292   :  { %v593_v63 = vsel %vm17232_vm10, %v17231_v3, %v6486_v18  ;;  %1825 = vrot.lane.b32.xlu1 %v1452_v19, %s8957_s29  ;;  %v6657_v38 = vunpack.i.h.bf16 %v17235_v30  ;;  %v6656_v20 = vunpack.i.l.bf16 %v17235_v30  ;;  %v17238_v54 = vpack.c.bf16 %v17236_v48, %v17237_v44  ;;  %v11288_v18 = vpop.permute.xlu0 %7269  ;;  %v17242_v3 = vld [vmem:[#allocation90_spill] sm:$0xff]  ;;  %vm17243_vm14 = vmmov %vm17241_vm7 }
 0x293   :  { %v2251_v33 = vpack.c.bf16 %v10424_v16, %v593_v63  ;;  %v17240_v25 = vunpack.i.h.bf16 %v17239_v6  ;;  %v595_v19 = vsel %vm17232_vm10, %v6487_v62, %v16480_v40  ;;  %v16487_v16 = vunpack.i.l.bf16 %v17242_v3  ;;  %2592 = vmatpush1.bf16.msra.mxu1 %v2220_v27  ;;  %v11297_v63 = vpop.permute.xlu1 %7264 }
 0x294   :  { %2553 = vmatpush1.bf16.msra.mxu0 %v17238_v54  ;;  %v2253_v11 = vpack.c.bf16 %v10457_v61, %v595_v19  ;;  %v2252_v30 = vpack.c.bf16 %v10461_v31, %v11268_v1  ;;  %v796_v48 = vsel %vm17243_vm14, %v6617_v45, %v16481_v56  ;;  %v17245_v54 = vld [vmem:[#allocation101_spill] sm:$0xff]  ;;  %2593 = vmatprep.subr.bf16.mxu1 %v2237_v53  ;;  %v17247_v61 = vld [vmem:[#allocation106_spill] sm:$0xff]  ;;  %vm17252_vm14 = vcmask 146432  }
 0x295   :  { %v794_v5 = vsel %vm17241_vm7, %v17240_v25, %v6616_v35  ;;  %2554 = vmatprep.subr.bf16.mxu0 %v2251_v33  ;;  %v17244_v35 = vld [vmem:[#allocation79_spill] sm:$0xff]  ;;  %v6777_v6 = vunpack.i.h.bf16 %v17245_v54  ;;  %v6776_v62 = vunpack.i.l.bf16 %v17245_v54  ;;  %v2268_v27 = vpack.c.bf16 %v11277_v28, %v10470_v2  ;;  %v17248_v31 = vld [vmem:[#allocation142_spill] sm:$0xff]  ;;  %v17255_v2 = vld [vmem:[#allocation61_spill] sm:$0xff] }
 0x296   :  { %vm17246_vm7 = vcmask 138240   ;;  %v2267_v1 = vpack.c.bf16 %v794_v5, %v17248_v31  ;;  %v17249_v19 = vld [vmem:[#allocation86_spill] sm:$0xff]  ;;  %v11319_v56 = vsel %vm17252_vm14, %v6656_v20, %v6657_v38  ;;  %v6737_v54 = vunpack.i.h.bf16 %v17253_v12  ;;  %v11326_v32 = vpop.permute.xlu0 %7279  ;;  %v17258_v5 = vld [vmem:[#allocation95_spill] sm:$0xff] }
 0x297   :  { %v11311_v33 = vsel %vm17246_vm7, %v6696_v13, %v6697_v50  ;;  %v17250_v40 = vunpack.i.h.bf16 %v17249_v19  ;;  %vm17251_vm10 = vmmov %vm17246_vm7  ;;  %v6736_v53 = vunpack.i.l.bf16 %v17253_v12  ;;  %v17256_v28 = vpack.c.bf16 %v17254_v10, %v17255_v2  ;;  %2594 = vmatpush1.bf16.msra.mxu1 %v2236_v4 }
 0x298   :  { %v2269_v25 = vpack.c.bf16 %v796_v48, %v17257_v47  ;;  %v7222_v19 = vunpack.i.h.bf16 %v11069_v55  ;;  %vm17261_vm7 = vmmov %vm17252_vm14  ;;  %v930_v10 = vsel %vm17251_vm10, %v6697_v50, %v16487_v16  ;;  %vm17262_vm14 = vcmask 64512   ;;  %2595 = vmatprep.subr.bf16.mxu1 %v2253_v11 }
 0x299   :  { %v928_v45 = vsel %vm17251_vm10, %v17250_v40, %v6696_v13  ;;  %2555 = vmatpush1.bf16.msra.mxu0 %v17256_v28  ;;  %v11331_v40 = vpop.permute.xlu1 %7274  ;;  %v17259_v13 = vld [vmem:[#allocation78_spill] sm:$0xff]  ;;  %v11340_v2 = vsel %vm17262_vm14, %v6776_v62, %v6777_v6  ;;  %v17263_v48 = vunpack.i.l.bf16 %v17244_v35  ;;  %vm17264_vm11 = vmmov %vm17261_vm7  ;;  %v17265_v28 = vld [vmem:[#allocation137_spill] sm:$0xff]  ;;  %v17269_v16 = vunpack.i.l.bf16 %v17247_v61 }
 0x29a   :  { %2556 = vmatprep.subr.bf16.mxu0 %v2267_v1  ;;  %v17260_v44 = vunpack.i.h.bf16 %v17259_v13  ;;  %v2284_v1 = vpack.c.bf16 %v11311_v33, %v11319_v56  ;;  %v7092_v13 = vunpack.i.h.bf16 %v17265_v28  ;;  %v11362_v33 = vpop.permute.xlu0 %7289  ;;  %v17277_v57 = vunpack.i.h.bf16 %v17276_v15 }
 0x29b   :  { %v863_v4 = vsel %vm17264_vm11, %v6657_v38, %v17263_v48  ;;  %v7221_v38 = vunpack.i.l.bf16 %v11069_v55  ;;  %v17273_v48 = vld [vmem:[#allocation65_spill] sm:$0xff]  ;;  %17275 = vst [vmem:[#allocation22_spill] sm:$0xff] %v11362_v33  ;;  %v7232_v55 = vunpack.i.h.bf16 %v11102_v60  ;;  %2596 = vmatpush1.bf16.msra.mxu1 %v2252_v30  ;;  %v16495_v30 = vunpack.i.l.bf16 %v11102_v60 }
 0x29c   :  { %v861_v12 = vsel %vm17261_vm7, %v17260_v44, %v6656_v20  ;;  %v7226_v20 = vunpack.i.l.bf16 %v11111_v29  ;;  %v17266_v44 = vld [vmem:[#allocation102_spill] sm:$0xff]  ;;  %vm17268_vm7 = vmmov %vm17262_vm14  ;;  %vm17271_vm14 = vcmask 130048   ;;  %2597 = vmatprep.subr.bf16.mxu1 %v2269_v25  ;;  %v17284_v25 = vld [vmem:[#allocation87_spill] sm:$0xff] }
 0x29d   :  { %v2283_v47 = vpack.c.bf16 %v928_v45, %v861_v12  ;;  %v17267_v31 = vunpack.i.h.bf16 %v17266_v44  ;;  %vm17270_vm10 = vmmov %vm17268_vm7  ;;  %v11356_v45 = vsel %vm17271_vm14, %v6736_v53, %v6737_v54  ;;  %v17272_v12 = vld [vmem:[#allocation72_spill] sm:$0xff]  ;;  %v11374_v8 = vpop.permute.xlu1 %7284 }
 0x29e   :  { %v1064_v11 = vsel %vm17270_vm10, %v6777_v6, %v17269_v16  ;;  %v17274_v56 = vpack.c.bf16 %v17272_v12, %v17273_v48  ;;  %vm17278_vm11 = vmmov %vm17271_vm14  ;;  %v7227_v6 = vunpack.i.h.bf16 %v11111_v29  ;;  %v17281_v12 = vunpack.i.l.bf16 %v17258_v5 }
 0x29f   :  { %v1062_v50 = vsel %vm17268_vm7, %v17267_v31, %v6776_v62  ;;  %v995_v44 = vsel %vm17278_vm11, %v17277_v57, %v6736_v53  ;;  %v2285_v62 = vpack.c.bf16 %v930_v10, %v863_v4  ;;  %v17279_v31 = vld [vmem:[#allocation138_spill] sm:$0xff]  ;;  %vm17282_vm7 = vmmov %vm17278_vm11  ;;  %v16492_v57 = vunpack.i.l.bf16 %v11162_v37  ;;  %2598 = vmatpush1.bf16.msra.mxu1 %v2268_v27 }
 0x2a0   :  { %2557 = vmatpush1.bf16.msra.mxu0 %v17274_v56  ;;  %v17280_v23 = vunpack.i.l.bf16 %v17279_v31  ;;  %v997_v15 = vsel %vm17282_vm7, %v6737_v54, %v17281_v12  ;;  %v2299_v53 = vpack.c.bf16 %v1062_v50, %v995_v44  ;;  %v17283_v29 = vunpack.i.l.bf16 %v17265_v28  ;;  %v17285_v50 = vld [vmem:[#allocation89_spill] sm:$0xff]  ;;  %v11393_v44 = vpop.permute.xlu0 %7299 }
 0x2a1   :  { %2558 = vmatprep.subr.bf16.mxu0 %v2283_v47  ;;  %v2301_v10 = vpack.c.bf16 %v1064_v11, %v997_v15  ;;  %v7246_v47 = vunpack.i.l.bf16 %v11219_v42  ;;  %v1849_v48 = vsel %vm1827_vm6, %v7222_v19, %v7226_v20  ;;  %v7237_v54 = vunpack.i.h.bf16 %v11162_v37  ;;  %v11405_v15 = vpop.permute.xlu1 %7294  ;;  %2599 = vmatprep.subr.bf16.mxu1 %v2285_v62  ;;  %v17290_v62 = vld [vmem:[#allocation140_spill] sm:$0xff] }
 0x2a2   :  { %v11370_v16 = vsel %vm1827_vm6, %v17280_v23, %v7222_v19  ;;  %v2300_v23 = vpack.c.bf16 %v11340_v2, %v11356_v45  ;;  %v1832_v4 = vsel %vm1827_vm6, %v17283_v29, %v7092_v13  ;;  %v7242_v56 = vunpack.i.h.bf16 %v11150_v7  ;;  %17287 = vst [vmem:[#allocation27_spill] sm:$0xff] %v11405_v15 }
 0x2a3   :  { %v17286_v11 = vpack.c.bf16 %v17284_v25, %v17285_v50  ;;  %v1833_v2 = vsel %vm1827_vm6, %v7092_v13, %v7221_v38  ;;  %v2314_v28 = vpack.c.bf16 %v11370_v16, %v1832_v4  ;;  %v11398_v45 = vsel %vm1827_vm6, %v7221_v38, %v7227_v6  ;;  %2600 = vmatpush1.bf16.msra.mxu1 %v2284_v1 }
 0x2a4   :  { %v11401_v31 = vsel %vm1827_vm6, %v7226_v20, %v7232_v55  ;;  %v7241_v19 = vunpack.i.l.bf16 %v11150_v7  ;;  %v7247_v12 = vunpack.i.h.bf16 %v11219_v42  ;;  %v7252_v29 = vunpack.i.h.bf16 %v11208_v36  ;;  %v11428_v7 = vpop.permute.xlu0 %7309  ;;  %2601 = vmatprep.subr.bf16.mxu1 %v2301_v10 }
 0x2a5   :  { %2559 = vmatpush1.bf16.msra.mxu0 %v17286_v11  ;;  %v7262_v13 = vunpack.i.h.bf16 %v11253_v51  ;;  %v2315_v16 = vpack.c.bf16 %v1849_v48, %v1833_v2  ;;  %v1851_v38 = vsel %vm1827_vm6, %v7232_v55, %v16492_v57  ;;  %v7257_v20 = vunpack.i.h.bf16 %v11262_v24  ;;  %v17292_v11 = vld [vmem:[#allocation103_spill] sm:$0xff]  ;;  %v17293_v2 = vld [vmem:[#allocation105_spill] sm:$0xff]  ;;  %17295 = vst [vmem:[#allocation118_spill] sm:$0xff] %v11428_v7 }
 0x2a6   :  { %2560 = vmatprep.subr.bf16.mxu0 %v2299_v53  ;;  %v1881_v42 = vsel %vm1827_vm6, %v7242_v56, %v7246_v47  ;;  %v1835_v27 = vsel %vm1827_vm6, %v7227_v6, %v16495_v30  ;;  %v17288_v53 = vld [vmem:[#allocation139_spill] sm:$0xff]  ;;  %v17291_v48 = vunpack.i.l.bf16 %v17290_v62  ;;  %v7266_v55 = vunpack.i.l.bf16 %v11297_v63  ;;  %v17298_v30 = vld [vmem:[#allocation116_spill] sm:$0xff] }
 0x2a7   :  { %v17289_v4 = vunpack.i.l.bf16 %v17288_v53  ;;  %v17294_v57 = vpack.c.bf16 %v17292_v11, %v17293_v2  ;;  %v2316_v43 = vpack.c.bf16 %v11401_v31, %v11398_v45  ;;  %v11433_v6 = vsel %vm1827_vm6, %v7241_v19, %v7247_v12  ;;  %2602 = vmatpush1.bf16.msra.mxu1 %v2300_v23 }
 0x2a8   :  { %v1880_v50 = vsel %vm1827_vm6, %v17291_v48, %v7242_v56  ;;  %v1865_v56 = vsel %vm1827_vm6, %v7237_v54, %v7241_v19  ;;  %v2317_v62 = vpack.c.bf16 %v1851_v38, %v1835_v27  ;;  %v1882_v48 = vsel %vm1827_vm6, %v7246_v47, %v7252_v29  ;;  %v11455_v10 = vpop.permute.xlu0 %7319 }
 0x2a9   :  { %v1864_v25 = vsel %vm1827_vm6, %v17289_v4, %v7237_v54  ;;  %2561 = vmatpush1.bf16.msra.mxu0 %v17294_v57  ;;  %v11436_v4 = vpop.permute.xlu1 %7304  ;;  %v17296_v57 = vld [vmem:[#allocation119_spill] sm:$0xff]  ;;  %v7261_v45 = vunpack.i.l.bf16 %v11253_v51  ;;  %v2331_v31 = vpack.c.bf16 %v1881_v42, %v1865_v56  ;;  %v17299_v34 = vunpack.i.l.bf16 %v17298_v30 }
 0x2aa   :  { %2562 = vmatprep.subr.bf16.mxu0 %v2315_v16  ;;  %v17297_v11 = vunpack.i.l.bf16 %v17296_v57  ;;  %v7267_v53 = vunpack.i.h.bf16 %v11297_v63  ;;  %v7272_v16 = vunpack.i.h.bf16 %v11288_v18  ;;  %v17300_v54 = vunpack.i.l.bf16 %v11262_v24  ;;  %2603 = vmatprep.subr.bf16.mxu1 %v2317_v62 }
 0x2ab   :  { %v1896_v1 = vsel %vm1827_vm6, %v17299_v34, %v7257_v20  ;;  %v7277_v19 = vunpack.i.h.bf16 %v11331_v40  ;;  %v7282_v38 = vunpack.i.h.bf16 %v11326_v32  ;;  %v7286_v51 = vunpack.i.l.bf16 %v11374_v8  ;;  %2604 = vmatpush1.bf16.msra.mxu1 %v2316_v43 }
 0x2ac   :  { %v1912_v2 = vsel %vm1827_vm6, %v17297_v11, %v7262_v13  ;;  %v1883_v47 = vsel %vm1827_vm6, %v7252_v29, %v17300_v54  ;;  %v1913_v30 = vsel %vm1827_vm6, %v7262_v13, %v7266_v55  ;;  %v7281_v63 = vunpack.i.l.bf16 %v11326_v32 }
 0x2ad   :  { %2563 = vmatpush1.bf16.msra.mxu0 %v2314_v28  ;;  %v11460_v42 = vpop.permute.xlu1 %7314  ;;  %v2330_v29 = vpack.c.bf16 %v1880_v50, %v1864_v25  ;;  %v17302_v27 = vunpack.i.l.bf16 %v11208_v36  ;;  %v16504_v57 = vunpack.i.l.bf16 %v11288_v18  ;;  %v1897_v28 = vsel %vm1827_vm6, %v7257_v20, %v7261_v45  ;;  %v11477_v20 = vpop.permute.xlu0 %7329 }
 0x2ae   :  { %17301 = vst [vmem:[#allocation120_spill] sm:$0xff] %v11460_v42  ;;  %2564 = vmatprep.subr.bf16.mxu0 %v2331_v31  ;;  %v2332_v13 = vpack.c.bf16 %v1882_v48, %v11433_v6  ;;  %v1898_v54 = vsel %vm1827_vm6, %v7261_v45, %v7267_v53  ;;  %v1914_v32 = vsel %vm1827_vm6, %v7266_v55, %v7272_v16  ;;  %v17303_v25 = vunpack.i.l.bf16 %v10968_v22 }
 0x2af   :  { %v1867_v56 = vsel %vm1827_vm6, %v7247_v12, %v17302_v27  ;;  %v2347_v23 = vpack.c.bf16 %v1913_v30, %v1897_v28  ;;  %v2346_v34 = vpack.c.bf16 %v1912_v2, %v1896_v1  ;;  %v17304_v12 = vunpack.i.l.bf16 %v11000_v41 }
 0x2b0   :  { %v2333_v11 = vpack.c.bf16 %v1883_v47, %v1867_v56  ;;  %v1928_v50 = vsel %vm1827_vm6, %v17303_v25, %v7277_v19  ;;  %v7306_v62 = vunpack.i.l.bf16 %v11436_v4  ;;  %v1945_v6 = vsel %vm1827_vm6, %v7282_v38, %v7286_v51 }
 0x2b1   :  { %v1944_v31 = vsel %vm1827_vm6, %v17304_v12, %v7282_v38  ;;  %2565 = vmatpush1.bf16.msra.mxu0 %v2330_v29  ;;  %v7287_v55 = vunpack.i.h.bf16 %v11374_v8  ;;  %v16503_v48 = vunpack.i.l.bf16 %v11405_v15  ;;  %v11484_v22 = vpop.permute.xlu1 %7324  ;;  %v1929_v41 = vsel %vm1827_vm6, %v7277_v19, %v7281_v63  ;;  %v11500_v28 = vpop.permute.xlu0 %7339 }
 0x2b2   :  { %2566 = vmatprep.subr.bf16.mxu0 %v2347_v23  ;;  %v17305_v2 = vunpack.i.l.bf16 %v11331_v40  ;;  %v16502_v1 = vunpack.i.l.bf16 %v11362_v33  ;;  %v7297_v47 = vunpack.i.h.bf16 %v11405_v15  ;;  %v7302_v38 = vunpack.i.h.bf16 %v11393_v44  ;;  %2605 = vmatprep.subr.bf16.mxu1 %v2333_v11 }
 0x2b3   :  { %v7301_v30 = vunpack.i.l.bf16 %v11393_v44  ;;  %v7292_v43 = vunpack.i.h.bf16 %v11362_v33  ;;  %v2363_v29 = vpack.c.bf16 %v1945_v6, %v1929_v41  ;;  %v1899_v19 = vsel %vm1827_vm6, %v7267_v53, %v16504_v57  ;;  %2606 = vmatpush1.bf16.msra.mxu1 %v2332_v13 }
 0x2b4   :  { %v1915_v45 = vsel %vm1827_vm6, %v7272_v16, %v17305_v2  ;;  %v2348_v27 = vpack.c.bf16 %v1914_v32, %v1898_v54  ;;  %v7317_v56 = vunpack.i.h.bf16 %v11460_v42  ;;  %v7321_v16 = vunpack.i.l.bf16 %v11455_v10 }
 0x2b5   :  { %2567 = vmatpush1.bf16.msra.mxu0 %v2346_v34  ;;  %v2349_v23 = vpack.c.bf16 %v1915_v45, %v1899_v19  ;;  %v1977_v44 = vsel %vm1827_vm6, %v7302_v38, %v7306_v62  ;;  %v1930_v11 = vsel %vm1827_vm6, %v7281_v63, %v7287_v55  ;;  %v16498_v25 = vunpack.i.l.bf16 %v11460_v42  ;;  %v11507_v12 = vpop.permute.xlu1 %7334  ;;  %v11528_v45 = vpop.permute.xlu0 %7349 }
 0x2b6   :  { %2568 = vmatprep.subr.bf16.mxu0 %v2363_v29  ;;  %v2362_v53 = vpack.c.bf16 %v1944_v31, %v1928_v50  ;;  %v1947_v34 = vsel %vm1827_vm6, %v7292_v43, %v16503_v48  ;;  %v17306_v54 = vunpack.i.l.bf16 %v11040_v58  ;;  %v17307_v6 = vunpack.i.l.bf16 %v11059_v14 }
 0x2b7   :  { %2607 = vmatprep.subr.bf16.mxu1 %v2349_v23  ;;  %v1961_v63 = vsel %vm1827_vm6, %v7297_v47, %v7301_v30  ;;  %v1931_v13 = vsel %vm1827_vm6, %v7287_v55, %v16502_v1  ;;  %v7307_v50 = vunpack.i.h.bf16 %v11436_v4  ;;  %v7312_v31 = vunpack.i.h.bf16 %v11428_v7  ;;  %v17325_v1 = vld [vmem:[#allocation136_spill] sm:$0xff] }
 0x2b8   :  { %v1960_v32 = vsel %vm1827_vm6, %v17306_v54, %v7297_v47  ;;  %v1976_v41 = vsel %vm1827_vm6, %v17307_v6, %v7302_v38  ;;  %v16500_v2 = vunpack.i.l.bf16 %v11428_v7  ;;  %v2379_v58 = vpack.c.bf16 %v1977_v44, %v1961_v63  ;;  %2608 = vmatpush1.bf16.msra.mxu1 %v2348_v27  ;;  %v17310_v63 = vld [vmem:[#allocation34_spill] sm:$0xff] }
 0x2b9   :  { %v1946_v14 = vsel %vm1827_vm6, %v7286_v51, %v7292_v43  ;;  %2569 = vmatpush1.bf16.msra.mxu0 %v2362_v53  ;;  %v2365_v38 = vpack.c.bf16 %v1947_v34, %v1931_v13  ;;  %v1993_v47 = vsel %vm1827_vm6, %v7317_v56, %v7321_v16  ;;  %v17308_v29 = vunpack.i.h.bf16 %v11083_v17  ;;  %v11537_v8 = vpop.permute.xlu1 %7344  ;;  %v17309_v43 = vld [vmem:[#allocation30_spill] sm:$0xff] }
 0x2ba   :  { %v6332_v19 = vunpack.i.h.bf16 %v17140_v59  ;;  %v7322_v23 = vunpack.i.h.bf16 %v11455_v10  ;;  %v16497_v44 = vunpack.i.l.bf16 %v11484_v22  ;;  %2570 = vmatprep.subr.bf16.mxu0 %v2379_v58  ;;  %v1979_v51 = vsel %vm1827_vm6, %v7312_v31, %v16498_v25 }
 0x2bb   :  { %v1992_v55 = vsel %vm1827_vm6, %v17308_v29, %v7317_v56  ;;  %v6377_v53 = vunpack.i.h.bf16 %v17309_v43  ;;  %v6376_v17 = vunpack.i.l.bf16 %v17309_v43  ;;  %v6372_v56 = vunpack.i.h.bf16 %v17179_v9  ;;  %2609 = vmatprep.subr.bf16.mxu1 %v2365_v38  ;;  %v11553_v43 = vpop.permute.xlu0 %7359 }
 0x2bc   :  { %v2378_v34 = vpack.c.bf16 %v1976_v41, %v1960_v32  ;;  %v2364_v54 = vpack.c.bf16 %v1946_v14, %v1930_v11  ;;  %v2395_v10 = vpack.c.bf16 %v1993_v47, %v1993_v47  ;;  %v1963_v27 = vsel %vm1827_vm6, %v7307_v50, %v16500_v2  ;;  %v17311_v32 = vld [vmem:[#allocation24_spill] sm:$0xff] }
 0x2bd   :  { %v2394_v6 = vpack.c.bf16 %v1992_v55, %v1992_v55  ;;  %v16499_v13 = vunpack.i.l.bf16 %v17310_v63  ;;  %v1962_v58 = vsel %vm1827_vm6, %v7301_v30, %v7307_v50  ;;  %v1978_v29 = vsel %vm1827_vm6, %v7306_v62, %v7312_v31  ;;  %v11557_v14 = vpop.permute.xlu1 %7354  ;;  %v17313_v31 = vld [vmem:[#allocation23_spill] sm:$0xff]  ;;  %v17352_v63 = vld [vmem:[#allocation2_spill] sm:$0xff] }
 0x2be   :  { %2571 = vmatpush1.bf16.msra.mxu0 %v2378_v34  ;;  %v2381_v38 = vpack.c.bf16 %v1979_v51, %v1963_v27  ;;  %v6337_v11 = vunpack.i.h.bf16 %v17311_v32  ;;  %v6336_v41 = vunpack.i.l.bf16 %v17311_v32  ;;  %2610 = vmatpush1.bf16.msra.mxu1 %v2364_v54  ;;  %v1995_v30 = vsel %vm1827_vm6, %v7322_v23, %v16497_v44  ;;  %v17314_v51 = vld [vmem:[#allocation66_spill] sm:$0xff] }
 0x2bf   :  { %6135 = vmatprep.subr.msk.bf16.mxu0 %vm16598_vm12, %v2395_v10  ;;  %v1994_v4 = vsel %vm1827_vm6, %v7321_v16, %v7322_v23  ;;  %v17312_v62 = vunpack.i.l.bf16 %v17140_v59  ;;  %v16501_v47 = vunpack.i.l.bf16 %v17313_v31  ;;  %v11571_v55 = vsel %vm386_vm4, %v6376_v17, %v6377_v53  ;;  %v11582_v27 = vpop.permute.xlu0 %7369  ;;  %v17342_v31 = vld [vmem:[#allocation55_spill] sm:$0xff] }
 0x2c0   :  { %2611 = vmatprep.subr.bf16.mxu1 %v2381_v38  ;;  %v17315_v54 = vunpack.i.l.bf16 %v17179_v9  ;;  %v6412_v16 = vunpack.i.h.bf16 %v17201_v52  ;;  %v2429_v59 = vsel %vm16598_vm12, %v2394_v6, 0  ;;  %v2380_v23 = vpack.c.bf16 %v1978_v29, %v1962_v58 }
 0x2c1   :  { %v11567_v50 = vsel %vm319_vm3, %v17312_v62, %v6332_v19  ;;  %v2397_v32 = vpack.c.bf16 %v1995_v30, %v1995_v30  ;;  %v2396_v62 = vpack.c.bf16 %v1994_v4, %v1994_v4  ;;  %v396_v38 = vsel %vm386_vm4, %v6372_v56, %v6376_v17  ;;  %v11596_v29 = vpop.permute.xlu1 %7364  ;;  %v17317_v30 = vld [vmem:[#allocation144_spill] sm:$0xff] }
 0x2c2   :  { %v11578_v10 = vsel %vm386_vm4, %v17315_v54, %v6372_v56  ;;  %2573 = vmatpush1.bf16.msra.mxu0 %v2429_v59  ;;  %v11588_v44 = vsel %vm386_vm4, %v6377_v53, %v16499_v13  ;;  %v11591_v9 = vsel %vm319_vm3, %v6336_v41, %v6337_v11  ;;  %v17316_v54 = vld [vmem:[#allocation46_spill] sm:$0xff]  ;;  %v6452_v58 = vunpack.i.h.bf16 %v17194_v49  ;;  %2612 = vmatpush1.bf16.msra.mxu1 %v2380_v23  ;;  %v17318_v4 = vld [vmem:[#allocation148_spill] sm:$0xff] }
 0x2c3   :  { %v6457_v25 = vunpack.i.h.bf16 %v17316_v54  ;;  %v6456_v6 = vunpack.i.l.bf16 %v17316_v54  ;;  %v17319_v17 = vpack.c.bf16 %v17317_v30, %v17318_v4  ;;  %v17320_v56 = vld [vmem:[#allocation50_spill] sm:$0xff]  ;;  %6137 = vmatprep.subr.msk.bf16.mxu1 %vm16598_vm12, %v2397_v32  ;;  %v329_v53 = vsel %vm319_vm3, %v6332_v19, %v6336_v41  ;;  %v17323_v41 = vld [vmem:[#allocation39_spill] sm:$0xff]  ;;  %v17324_v4 = vld [vmem:[#allocation40_spill] sm:$0xff]  ;;  %v11628_v57 = vpop.permute.xlu0 %7379 }
 0x2c4   :  { %v11607_v13 = vsel %vm319_vm3, %v6337_v11, %v16501_v47  ;;  %v17321_v54 = vunpack.i.l.bf16 %v17201_v52  ;;  %vm17322_vm10 = vcmask 883712   ;;  %v2223_v30 = vpack.c.bf16 %v396_v38, %v329_v53  ;;  %v17332_v53 = vld [vmem:[#allocation4_spill] sm:$0xff]  ;;  %v17337_v11 = vld [vmem:[#allocation147_spill] sm:$0xff] }
 0x2c5   :  { %2628 = vmatprep.subr.bf16.mxu0 %v17319_v17  ;;  %2579 = vmatmul.mubr.bf16.vlgmr.msra.gmra.mrb[4].mxu0 %v11099_v39  ;;  %v2222_v32 = vpack.c.bf16 %v11578_v10, %v11567_v50  ;;  %v2225_v19 = vpack.c.bf16 %v11588_v44, %v11607_v13  ;;  %v6417_v17 = vunpack.i.h.bf16 %v17324_v4  ;;  %v6416_v47 = vunpack.i.l.bf16 %v17324_v4  ;;  %v17336_v23 = vld [vmem:[#allocation56_spill] sm:$0xff]  ;;  %v17353_v50 = vld [vmem:[#allocation146_spill] sm:$0xff] }
 0x2c6   :  { %v11614_v2 = vsel %vm17322_vm10, %v17321_v54, %v6412_v16  ;;  %v2435_v52 = vsel %vm16598_vm12, %v2396_v62, 0  ;;  %v17326_v54 = vld [vmem:[#allocation113_spill] sm:$0xff]  ;;  %6140 = vmatprep.mubr.msk.bf16.mxu0 %vm2411_vm5, %v17202_v0  ;;  %vm17329_vm14 = vcmask 875520   ;;  %v17330_v13 = vunpack.i.l.bf16 %v17194_v49  ;;  %v11639_v62 = vpop.permute.xlu1 %7374  ;;  %v17338_v59 = vld [vmem:[#allocation152_spill] sm:$0xff] }
 0x2c7   :  { %v17327_v48 = vpack.c.bf16 %v17325_v1, %v17326_v54  ;;  %v11634_v44 = vsel %vm17329_vm14, %v6456_v6, %v6457_v25  ;;  %vm17331_vm11 = vmmov %vm17329_vm14  ;;  %2614 = vmatpush1.bf16.msra.mxu1 %v2435_v52  ;;  %v17333_v1 = vld [vmem:[#allocation8_spill] sm:$0xff]  ;;  %v6492_v54 = vunpack.i.h.bf16 %v17221_v21  ;;  %v6497_v10 = vunpack.i.h.bf16 %v17336_v23 }
 0x2c8   :  { %v529_v38 = vsel %vm17331_vm11, %v17330_v13, %v6452_v58  ;;  %vm17335_vm7 = vmmov %vm17331_vm11  ;;  %v6496_v34 = vunpack.i.l.bf16 %v17336_v23  ;;  %v17339_v49 = vpack.c.bf16 %v17337_v11, %v17338_v59  ;;  %v17340_v52 = vunpack.i.l.bf16 %v17320_v56  ;;  %v17345_v59 = vld [vmem:[#allocation11_spill] sm:$0xff]  ;;  %v17346_v11 = vld [vmem:[#allocation124_spill] sm:$0xff] }
 0x2c9   :  { %2629 = vmatpush1.bf16.msra.mxu0 %v17327_v48  ;;  %v17334_v48 = vpack.c.bf16 %v17332_v53, %v17333_v1  ;;  %v530_v4 = vsel %vm17335_vm7, %v6452_v58, %v6456_v6  ;;  %vm17341_vm10 = vmmov %vm17335_vm7  ;;  %v17343_v1 = vld [vmem:[#allocation73_spill] sm:$0xff]  ;;  %v6622_v58 = vunpack.i.h.bf16 %v17226_v26  ;;  %vm17344_vm14 = vcmask 883712   ;;  %v17351_v56 = vld [vmem:[#allocation76_spill] sm:$0xff] }
 0x2ca   :  { %2669 = vmatprep.subr.bf16.mxu1 %v17339_v49  ;;  %v11654_v13 = vsel %vm17341_vm10, %v6457_v25, %v17340_v52  ;;  %v6626_v6 = vunpack.i.l.bf16 %v17343_v1  ;;  %v11662_v23 = vsel %vm17344_vm14, %v6416_v47, %v6417_v17  ;;  %2620 = vmatmul.mubr.bf16.vlgmr.msra.gmra.mrb[4].mxu1 %v11099_v39  ;;  %v17347_v49 = vpack.c.bf16 %v17345_v59, %v17346_v11  ;;  %v11668_v25 = vpop.permute.xlu0 %7389  ;;  %vm17348_vm11 = vmmov %vm17344_vm14  ;;  %v11678_v33 = vpop.permute.xlu1 %7384 }
 0x2cb   :  { %2630 = vmatprep.subr.bf16.mxu0 %v17334_v48  ;;  %v6627_v48 = vunpack.i.h.bf16 %v17343_v1  ;;  %v463_v52 = vsel %vm17348_vm11, %v6412_v16, %v6416_v47  ;;  %v17349_v53 = vunpack.i.l.bf16 %v17323_v41  ;;  %vm17350_vm7 = vmmov %vm17348_vm11  ;;  %v16520_v42 = vunpack.i.l.bf16 %v17351_v56  ;;  %v17355_v47 = vld [vmem:[#allocation17_spill] sm:$0xff]  ;;  %6142 = vmatprep.mubr.msk.bf16.mxu1 %vm2411_vm5, %v17202_v0 }
 0x2cc   :  { %v17354_v7 = vpack.c.bf16 %v17352_v63, %v17353_v50  ;;  %v2239_v39 = vpack.c.bf16 %v530_v4, %v463_v52  ;;  %v2238_v59 = vpack.c.bf16 %v529_v38, %v11614_v2  ;;  %vm17357_vm10 = vcmask 867328   ;;  %v17377_v41 = vld [vmem:[#allocation129_spill] sm:$0xff] }
 0x2cd   :  { %2631 = vmatpush1.bf16.msra.mxu0 %v17347_v49  ;;  %v465_v1 = vsel %vm17350_vm7, %v6417_v17, %v17349_v53  ;;  %v17356_v49 = vunpack.i.l.bf16 %v17221_v21  ;;  %vm17358_vm14 = vmmov %vm17357_vm10  ;;  %vm17360_vm11 = vcmask 211968   ;;  %v597_v50 = vsel %vm17357_vm10, %v6492_v54, %v6496_v34  ;;  %v17379_v56 = vld [vmem:[#allocation5_spill] sm:$0xff] }
 0x2ce   :  { %2670 = vmatpush1.bf16.msra.mxu1 %v17354_v7  ;;  %2632 = vmatprep.subr.bf16.mxu0 %v2223_v30  ;;  %v11688_v53 = vsel %vm17358_vm14, %v6496_v34, %v6497_v10  ;;  %v17359_v7 = vpack.c.bf16 %v10956_v46, %v17314_v51  ;;  %v2241_v63 = vpack.c.bf16 %v11654_v13, %v465_v1  ;;  %v17361_v30 = vunpack.i.l.bf16 %v17226_v26  ;;  %vm17362_vm7 = vmmov %vm17360_vm11  ;;  %v17365_v51 = vld [vmem:[#allocation88_spill] sm:$0xff]  ;;  %v17368_v34 = vld [vmem:[#allocation67_spill] sm:$0xff] }
 0x2cf   :  { %v596_v17 = vsel %vm17357_vm10, %v17356_v49, %v6492_v54  ;;  %v11697_v2 = vsel %vm17360_vm11, %v6626_v6, %v6627_v48  ;;  %v17363_v38 = vunpack.i.l.bf16 %v17342_v31  ;;  %vm17364_vm14 = vmmov %vm17357_vm10  ;;  %v6707_v4 = vunpack.i.h.bf16 %v17365_v51  ;;  %v17367_v49 = vld [vmem:[#allocation82_spill] sm:$0xff] }
 0x2d0   :  { %2671 = vmatprep.subr.bf16.mxu1 %v17359_v7  ;;  %v11702_v21 = vsel %vm17362_vm7, %v17361_v30, %v6622_v58  ;;  %v6706_v13 = vunpack.i.l.bf16 %v17365_v51  ;;  %v6702_v52 = vunpack.i.h.bf16 %v17242_v3  ;;  %vm17366_vm11 = vmmov %vm17362_vm7  ;;  %v6662_v26 = vunpack.i.h.bf16 %v17244_v35  ;;  %v17369_v54 = vld [vmem:[#allocation6_spill] sm:$0xff]  ;;  %v17373_v51 = vld [vmem:[#allocation121_spill] sm:$0xff] }
 0x2d1   :  { %v599_v46 = vsel %vm17364_vm14, %v6497_v10, %v17363_v38  ;;  %2633 = vmatpush1.bf16.msra.mxu0 %v2222_v32  ;;  %v798_v1 = vsel %vm17366_vm11, %v6622_v58, %v6626_v6  ;;  %v6667_v7 = vunpack.i.h.bf16 %v17367_v49  ;;  %v6666_v30 = vunpack.i.l.bf16 %v17367_v49  ;;  %v11718_v10 = vpop.permute.xlu1 %7394  ;;  %v11720_v38 = vpop.permute.xlu0 %7399  ;;  %v17372_v6 = vld [vmem:[#allocation92_spill] sm:$0xff]  ;;  %v17374_v49 = vld [vmem:[#allocation143_spill] sm:$0xff] }
 0x2d2   :  { %v17370_v16 = vpack.c.bf16 %v17368_v34, %v17369_v54  ;;  %17371 = vst [vmem:[#allocation64_spill] sm:$0xff] %v11720_v38  ;;  %2634 = vmatprep.subr.bf16.mxu0 %v2239_v39  ;;  %v11725_v32 = vsel %vm17362_vm7, %v6627_v48, %v16520_v42  ;;  %v16522_v58 = vunpack.i.l.bf16 %v17372_v6  ;;  %v2255_v11 = vpack.c.bf16 %v17373_v51, %v597_v50  ;;  %v17375_v34 = vld [vmem:[#allocation123_spill] sm:$0xff]  ;;  %v17376_v54 = vld [vmem:[#allocation81_spill] sm:$0xff]  ;;  %v17383_v51 = vld [vmem:[#allocation132_spill] sm:$0xff] }
 0x2d3   :  { %v2254_v31 = vpack.c.bf16 %v17374_v49, %v596_v17  ;;  %v16521_v0 = vunpack.i.l.bf16 %v17376_v54  ;;  %v2271_v38 = vpack.c.bf16 %v798_v1, %v17377_v41  ;;  %v17378_v39 = vld [vmem:[#allocation127_spill] sm:$0xff]  ;;  %vm17380_vm10 = vcmask 138240   ;;  %v17387_v1 = vld [vmem:[#allocation104_spill] sm:$0xff] }
 0x2d4   :  { %2672 = vmatpush1.bf16.msra.mxu1 %v17370_v16  ;;  %v2256_v16 = vpack.c.bf16 %v17375_v34, %v11688_v53  ;;  %v2257_v15 = vpack.c.bf16 %v17378_v39, %v599_v46  ;;  %v11738_v42 = vsel %vm17380_vm10, %v6706_v13, %v6707_v4  ;;  %vm17382_vm14 = vmmov %vm17380_vm10  ;;  %v2273_v53 = vpack.c.bf16 %v11725_v32, %v17383_v51 }
 0x2d5   :  { %2673 = vmatprep.subr.bf16.mxu1 %v2225_v19  ;;  %2635 = vmatpush1.bf16.msra.mxu0 %v2238_v59  ;;  %v17381_v19 = vld [vmem:[#allocation145_spill] sm:$0xff]  ;;  %v932_v17 = vsel %vm17382_vm14, %v6702_v52, %v6706_v13  ;;  %v17384_v49 = vunpack.i.l.bf16 %v17244_v35  ;;  %vm17385_vm11 = vcmask 146432   ;;  %v6787_v34 = vunpack.i.h.bf16 %v17387_v1 }
 0x2d6   :  { %v2270_v50 = vpack.c.bf16 %v11702_v21, %v17381_v19  ;;  %vm17386_vm7 = vmmov %vm17385_vm11  ;;  %v6786_v39 = vunpack.i.l.bf16 %v17387_v1  ;;  %v17388_v59 = vpack.c.bf16 %v11571_v55, %v11591_v9  ;;  %2636 = vmatprep.subr.bf16.mxu0 %v2255_v11  ;;  %v17389_v21 = vunpack.i.l.bf16 %v17242_v3  ;;  %v11767_v55 = vpop.permute.xlu0 %7409  ;;  %v17394_v1 = vld [vmem:[#allocation108_spill] sm:$0xff] }
 0x2d7   :  { %v864_v41 = vsel %vm17385_vm11, %v17384_v49, %v6662_v26  ;;  %v11749_v46 = vsel %vm17386_vm7, %v6666_v30, %v6667_v7  ;;  %v6782_v35 = vunpack.i.h.bf16 %v17247_v61  ;;  %vm17390_vm14 = vmmov %vm17386_vm7  ;;  %v6742_v51 = vunpack.i.h.bf16 %v17258_v5  ;;  %v11765_v49 = vpop.permute.xlu1 %7404 }
 0x2d8   :  { %2674 = vmatpush1.bf16.msra.mxu1 %v17388_v59  ;;  %v931_v13 = vsel %vm17380_vm10, %v17389_v21, %v6702_v52  ;;  %v865_v32 = vsel %vm17390_vm14, %v6662_v26, %v6666_v30  ;;  %vm17391_vm11 = vmmov %vm17380_vm10  ;;  %v867_v3 = vsel %vm17386_vm7, %v6667_v7, %v16521_v0  ;;  %v17393_v26 = vld [vmem:[#allocation98_spill] sm:$0xff]  ;;  %vm17395_vm10 = vcmask 64512  }
 0x2d9   :  { %2675 = vmatprep.subr.bf16.mxu1 %v2241_v63  ;;  %v934_v19 = vsel %vm17391_vm11, %v6707_v4, %v16522_v58  ;;  %v2287_v9 = vpack.c.bf16 %v932_v17, %v865_v32  ;;  %v17392_v63 = vld [vmem:[#allocation97_spill] sm:$0xff]  ;;  %v6747_v30 = vunpack.i.h.bf16 %v17393_v26  ;;  %v6746_v4 = vunpack.i.l.bf16 %v17393_v26  ;;  %2637 = vmatpush1.bf16.msra.mxu0 %v2254_v31  ;;  %vm17398_vm14 = vmmov %vm17395_vm10 }
 0x2da   :  { %v16535_v52 = vunpack.i.l.bf16 %v17392_v63  ;;  %v11780_v17 = vsel %vm17395_vm10, %v6786_v39, %v6787_v34  ;;  %v17396_v7 = vpack.c.bf16 %v11634_v44, %v11662_v23  ;;  %2638 = vmatprep.subr.bf16.mxu0 %v2271_v38  ;;  %v2286_v32 = vpack.c.bf16 %v931_v13, %v864_v41  ;;  %vm17399_vm11 = vmmov %vm17395_vm10 }
 0x2db   :  { %v2289_v0 = vpack.c.bf16 %v934_v19, %v867_v3  ;;  %v17397_v58 = vunpack.i.l.bf16 %v17247_v61  ;;  %v7327_v26 = vunpack.i.h.bf16 %v11484_v22  ;;  %v7332_v31 = vunpack.i.h.bf16 %v11477_v20 }
 0x2dc   :  { %2676 = vmatpush1.bf16.msra.mxu1 %v17396_v7  ;;  %v1066_v21 = vsel %vm17399_vm11, %v6782_v35, %v6786_v39  ;;  %v17400_v48 = vunpack.i.l.bf16 %v17258_v5  ;;  %vm17401_vm7 = vcmask 130048   ;;  %v7337_v44 = vunpack.i.h.bf16 %v11507_v12  ;;  %v11808_v39 = vpop.permute.xlu1 %7414 }
 0x2dd   :  { %v1065_v11 = vsel %vm17398_vm14, %v17397_v58, %v6782_v35  ;;  %2677 = vmatprep.subr.bf16.mxu1 %v2257_v15  ;;  %v7336_v23 = vunpack.i.l.bf16 %v11507_v12  ;;  %v7342_v38 = vunpack.i.h.bf16 %v11500_v28  ;;  %vm17402_vm10 = vmmov %vm17401_vm7  ;;  %2639 = vmatpush1.bf16.msra.mxu0 %v2270_v50  ;;  %v17405_v5 = vunpack.i.l.bf16 %v17394_v1  ;;  %v11810_v12 = vpop.permute.xlu0 %7419 }
 0x2de   :  { %v998_v59 = vsel %vm17401_vm7, %v17400_v48, %v6742_v51  ;;  %v11798_v61 = vsel %vm17402_vm10, %v6746_v4, %v6747_v30  ;;  %vm17403_vm14 = vmmov %vm17401_vm7  ;;  %v7331_v41 = vunpack.i.l.bf16 %v11477_v20  ;;  %2640 = vmatprep.subr.bf16.mxu0 %v2287_v9  ;;  %v17406_v19 = vunpack.i.l.bf16 %v11102_v60 }
 0x2df   :  { %v999_v58 = vsel %vm17403_vm14, %v6742_v51, %v6746_v4  ;;  %vm17404_vm13 = vmmov %vm17401_vm7  ;;  %v1068_v48 = vsel %vm17399_vm11, %v6787_v34, %v17405_v5  ;;  %v2302_v50 = vpack.c.bf16 %v1065_v11, %v998_v59  ;;  %v2304_v35 = vpack.c.bf16 %v11780_v17, %v11798_v61 }
 0x2e0   :  { %v1001_v15 = vsel %vm17404_vm13, %v6747_v30, %v16535_v52  ;;  %2678 = vmatpush1.bf16.msra.mxu1 %v2256_v16  ;;  %v2303_v13 = vpack.c.bf16 %v1066_v21, %v999_v58  ;;  %v1836_v51 = vsel %vm1827_vm6, %v17406_v19, %v7327_v26  ;;  %v17407_v3 = vunpack.i.l.bf16 %v11162_v37 }
 0x2e1   :  { %v16534_v20 = vunpack.i.l.bf16 %v11500_v28  ;;  %v16533_v30 = vunpack.i.l.bf16 %v11537_v8  ;;  %2679 = vmatprep.subr.bf16.mxu1 %v2273_v53  ;;  %v11823_v16 = vsel %vm1827_vm6, %v7331_v41, %v7337_v44  ;;  %v11826_v9 = vsel %vm1827_vm6, %v7336_v23, %v7342_v38  ;;  %2641 = vmatpush1.bf16.msra.mxu0 %v2286_v32  ;;  %v11850_v32 = vpop.permute.xlu0 %7429 }
 0x2e2   :  { %v1852_v34 = vsel %vm1827_vm6, %v17407_v3, %v7332_v31  ;;  %v7356_v11 = vunpack.i.l.bf16 %v11557_v14  ;;  %v2305_v60 = vpack.c.bf16 %v1068_v48, %v1001_v15  ;;  %v7347_v4 = vunpack.i.h.bf16 %v11537_v8  ;;  %2642 = vmatprep.subr.bf16.mxu0 %v2303_v13 }
 0x2e3   :  { %v7352_v37 = vunpack.i.h.bf16 %v11528_v45  ;;  %v7351_v59 = vunpack.i.l.bf16 %v11528_v45  ;;  %v1853_v21 = vsel %vm1827_vm6, %v7332_v31, %v7336_v23  ;;  %v7357_v53 = vunpack.i.h.bf16 %v11557_v14 }
 0x2e4   :  { %v7362_v17 = vunpack.i.h.bf16 %v11553_v43  ;;  %v17408_v7 = vpack.c.bf16 %v11697_v2, %v17379_v56  ;;  %v1837_v61 = vsel %vm1827_vm6, %v7327_v26, %v7331_v41  ;;  %v2318_v58 = vpack.c.bf16 %v1852_v34, %v1836_v51  ;;  %v11848_v2 = vpop.permute.xlu1 %7424 }
 0x2e5   :  { %v7367_v15 = vunpack.i.h.bf16 %v11596_v29  ;;  %v7372_v5 = vunpack.i.h.bf16 %v11582_v27  ;;  %v1839_v45 = vsel %vm1827_vm6, %v7337_v44, %v16534_v20  ;;  %v1855_v14 = vsel %vm1827_vm6, %v7342_v38, %v16533_v30  ;;  %2643 = vmatpush1.bf16.msra.mxu0 %v2302_v50  ;;  %v17476_v20 = vld [vmem:[#allocation149_spill] sm:$0xff] }
 0x2e6   :  { %2680 = vmatpush1.bf16.msra.mxu1 %v17408_v7  ;;  %v16531_v56 = vunpack.i.l.bf16 %v11596_v29  ;;  %v2319_v26 = vpack.c.bf16 %v1853_v21, %v1837_v61  ;;  %v1885_v31 = vsel %vm1827_vm6, %v7352_v37, %v7356_v11  ;;  %v17409_v23 = vunpack.i.l.bf16 %v11208_v36  ;;  %v11893_v7 = vpop.permute.xlu0 %7439 }
 0x2e7   :  { %2681 = vmatprep.subr.bf16.mxu1 %v2289_v0  ;;  %v2320_v0 = vpack.c.bf16 %v11826_v9, %v11823_v16  ;;  %v17410_v48 = vunpack.i.l.bf16 %v11262_v24  ;;  %v7376_v41 = vunpack.i.l.bf16 %v11639_v62  ;;  %v1869_v13 = vsel %vm1827_vm6, %v7347_v4, %v7351_v59 }
 0x2e8   :  { %v1868_v44 = vsel %vm1827_vm6, %v17409_v23, %v7347_v4  ;;  %v11864_v19 = vsel %vm1827_vm6, %v7351_v59, %v7357_v53  ;;  %v11867_v51 = vsel %vm1827_vm6, %v7356_v11, %v7362_v17  ;;  %v16532_v3 = vunpack.i.l.bf16 %v11553_v43  ;;  %2644 = vmatprep.subr.bf16.mxu0 %v2319_v26 }
 0x2e9   :  { %v1884_v38 = vsel %vm1827_vm6, %v17410_v48, %v7352_v37  ;;  %v17411_v36 = vpack.c.bf16 %v11738_v42, %v11749_v46  ;;  %v2321_v24 = vpack.c.bf16 %v1855_v14, %v1839_v45  ;;  %v17412_v34 = vunpack.i.l.bf16 %v11288_v18  ;;  %2645 = vmatpush1.bf16.msra.mxu0 %v2318_v58 }
 0x2ea   :  { %v17413_v16 = vunpack.i.l.bf16 %v11331_v40  ;;  %v7371_v4 = vunpack.i.l.bf16 %v11582_v27  ;;  %v2335_v11 = vpack.c.bf16 %v1885_v31, %v1869_v13  ;;  %v7377_v37 = vunpack.i.h.bf16 %v11639_v62  ;;  %v11891_v62 = vpop.permute.xlu1 %7434  ;;  %v17416_v13 = vld [vmem:[#allocation22_spill] sm:$0xff] }
 0x2eb   :  { %2682 = vmatpush1.bf16.msra.mxu1 %v17411_v36  ;;  %v1900_v50 = vsel %vm1827_vm6, %v17412_v34, %v7367_v15  ;;  %v7382_v59 = vunpack.i.h.bf16 %v11628_v57  ;;  %v16529_v42 = vunpack.i.l.bf16 %v11628_v57  ;;  %v1887_v18 = vsel %vm1827_vm6, %v7362_v17, %v16531_v56 }
 0x2ec   :  { %v1916_v9 = vsel %vm1827_vm6, %v17413_v16, %v7372_v5  ;;  %2683 = vmatprep.subr.bf16.mxu1 %v2305_v60  ;;  %v16530_v46 = vunpack.i.l.bf16 %v11678_v33  ;;  %v7392_v40 = vunpack.i.h.bf16 %v11668_v25  ;;  %v7396_v21 = vunpack.i.l.bf16 %v11718_v10  ;;  %2646 = vmatprep.subr.bf16.mxu0 %v2335_v11 }
 0x2ed   :  { %v1917_v27 = vsel %vm1827_vm6, %v7372_v5, %v7376_v41  ;;  %v7387_v60 = vunpack.i.h.bf16 %v11678_v33  ;;  %v2334_v61 = vpack.c.bf16 %v1884_v38, %v1868_v44  ;;  %v1871_v17 = vsel %vm1827_vm6, %v7357_v53, %v16532_v3  ;;  %v17414_v53 = vld [vmem:[#allocation27_spill] sm:$0xff] }
 0x2ee   :  { %v2336_v45 = vpack.c.bf16 %v11867_v51, %v11864_v19  ;;  %v7391_v58 = vunpack.i.l.bf16 %v11668_v25  ;;  %v1901_v5 = vsel %vm1827_vm6, %v7367_v15, %v7371_v4  ;;  %v2337_v14 = vpack.c.bf16 %v1887_v18, %v1871_v17  ;;  %v11930_v18 = vpop.permute.xlu0 %7449 }
 0x2ef   :  { %2684 = vmatpush1.bf16.msra.mxu1 %v2304_v35  ;;  %v2350_v26 = vpack.c.bf16 %v1916_v9, %v1900_v50  ;;  %v1902_v31 = vsel %vm1827_vm6, %v7371_v4, %v7377_v37  ;;  %v1918_v35 = vsel %vm1827_vm6, %v7376_v41, %v7382_v59  ;;  %v2351_v23 = vpack.c.bf16 %v1917_v27, %v1901_v5 }
 0x2f0   :  { %2685 = vmatprep.subr.bf16.mxu1 %v2321_v24  ;;  %v1903_v44 = vsel %vm1827_vm6, %v7377_v37, %v16529_v42  ;;  %v17415_v48 = vunpack.i.l.bf16 %v17414_v53  ;;  %v7416_v25 = vunpack.i.l.bf16 %v11808_v39  ;;  %2647 = vmatpush1.bf16.msra.mxu0 %v2334_v61  ;;  %v1949_v15 = vsel %vm1827_vm6, %v7392_v40, %v7396_v21  ;;  %v17418_v24 = vld [vmem:[#allocation64_spill] sm:$0xff]  ;;  %v17420_v53 = vld [vmem:[#allocation118_spill] sm:$0xff] }
 0x2f1   :  { %v1919_v41 = vsel %vm1827_vm6, %v7382_v59, %v16530_v46  ;;  %v17417_v19 = vunpack.i.l.bf16 %v17416_v13  ;;  %v7397_v36 = vunpack.i.h.bf16 %v11718_v10  ;;  %v16528_v34 = vunpack.i.l.bf16 %v17418_v24  ;;  %2648 = vmatprep.subr.bf16.mxu0 %v2351_v23  ;;  %v11928_v59 = vpop.permute.xlu1 %7444  ;;  %v17469_v46 = vld [vmem:[#allocation58_spill] sm:$0xff] }
 0x2f2   :  { %v1948_v38 = vsel %vm1827_vm6, %v17415_v48, %v7392_v40  ;;  %v16525_v50 = vunpack.i.l.bf16 %v11765_v49  ;;  %v7407_v16 = vunpack.i.h.bf16 %v11765_v49  ;;  %v7412_v9 = vunpack.i.h.bf16 %v11767_v55 }
 0x2f3   :  { %v1932_v51 = vsel %vm1827_vm6, %v17417_v19, %v7387_v60  ;;  %2686 = vmatpush1.bf16.msra.mxu1 %v2320_v0  ;;  %v7411_v4 = vunpack.i.l.bf16 %v11767_v55  ;;  %v1933_v11 = vsel %vm1827_vm6, %v7387_v60, %v7391_v58  ;;  %v7402_v37 = vunpack.i.h.bf16 %v17418_v24  ;;  %v66_v0 = vld [vmem:[%s16234_s4] sm:$0xff] }
 0x2f4   :  { %2687 = vmatprep.subr.bf16.mxu1 %v2337_v14  ;;  %v2367_v40 = vpack.c.bf16 %v1949_v15, %v1933_v11  ;;  %v2353_v27 = vpack.c.bf16 %v1919_v41, %v1903_v44  ;;  %v2352_v61 = vpack.c.bf16 %v1918_v35, %v1902_v31  ;;  %v7427_v17 = vunpack.i.h.bf16 %v11848_v2  ;;  %2649 = vmatpush1.bf16.msra.mxu0 %v2350_v26  ;;  %v17419_v26 = vld [vmem:[#allocation18_spill] sm:$0xff]  ;;  %v17422_v15 = vld [vmem:[#allocation120_spill] sm:$0xff] }
 0x2f5   :  { %v7431_v55 = vunpack.i.l.bf16 %v11850_v32  ;;  %v2366_v5 = vpack.c.bf16 %v1948_v38, %v1932_v51  ;;  %v1981_v60 = vsel %vm1827_vm6, %v7412_v9, %v7416_v25  ;;  %v1934_v14 = vsel %vm1827_vm6, %v7391_v58, %v7397_v36  ;;  %3000 = vperm.xlu0 %7543, %v66_v0  }
 0x2f6   :  { %v16524_v23 = vunpack.i.l.bf16 %v11848_v2  ;;  %2650 = vmatprep.subr.bf16.mxu0 %v2367_v40  ;;  %v1935_v31 = vsel %vm1827_vm6, %v7397_v36, %v16528_v34  ;;  %v1951_v35 = vsel %vm1827_vm6, %v7402_v37, %v16525_v50  ;;  %v6302_v44 = vunpack.i.h.bf16 %v17419_v26  ;;  %v17458_v34 = vld [vmem:[#allocation42_spill] sm:$0xff] }
 0x2f7   :  { %2688 = vmatpush1.bf16.msra.mxu1 %v2336_v45  ;;  %v17421_v48 = vunpack.i.l.bf16 %v17420_v53  ;;  %v17423_v58 = vunpack.i.l.bf16 %v17422_v15  ;;  %v1965_v45 = vsel %vm1827_vm6, %v7407_v16, %v7411_v4  ;;  %v7417_v13 = vunpack.i.h.bf16 %v11808_v39 }
 0x2f8   :  { %2689 = vmatprep.subr.bf16.mxu1 %v2353_v27  ;;  %v7422_v19 = vunpack.i.h.bf16 %v11810_v12  ;;  %v16527_v51 = vunpack.i.l.bf16 %v11810_v12  ;;  %v2383_v36 = vpack.c.bf16 %v1981_v60, %v1965_v45  ;;  %v1950_v11 = vsel %vm1827_vm6, %v7396_v21, %v7402_v37  ;;  %2651 = vmatpush1.bf16.msra.mxu0 %v2366_v5  ;;  %v17425_v27 = vld [vmem:[#allocation10_spill] sm:$0xff]  ;;  %v11975_v21 = vpop.permute.xlu1 %7454  ;;  %v11977_v37 = vpop.permute.xlu0 %7459 }
 0x2f9   :  { %v1964_v38 = vsel %vm1827_vm6, %v17421_v48, %v7407_v16  ;;  %v1980_v41 = vsel %vm1827_vm6, %v17423_v58, %v7412_v9  ;;  %v2369_v40 = vpack.c.bf16 %v1951_v35, %v1935_v31  ;;  %v1997_v53 = vsel %vm1827_vm6, %v7427_v17, %v7431_v55 }
 0x2fa   :  { %v17424_v9 = vunpack.i.l.bf16 %v11484_v22  ;;  %v17426_v0 = vunpack.i.h.bf16 %v17425_v27  ;;  %v17427_v48 = vunpack.i.l.bf16 %v17425_v27  ;;  %v7432_v60 = vunpack.i.h.bf16 %v11850_v32  ;;  %2652 = vmatprep.subr.bf16.mxu0 %v2383_v36  ;;  %v17430_v32 = vld [vmem:[#allocation9_spill] sm:$0xff] }
 0x2fb   :  { %v16526_v10 = vunpack.i.l.bf16 %v11891_v62  ;;  %2690 = vmatpush1.bf16.msra.mxu1 %v2352_v61  ;;  %v1983_v22 = vsel %vm1827_vm6, %v7422_v19, %v16524_v23  ;;  %v17429_v5 = vunpack.i.l.bf16 %v17355_v47  ;;  %v2382_v61 = vpack.c.bf16 %v1980_v41, %v1964_v38 }
 0x2fc   :  { %v1996_v16 = vsel %vm1827_vm6, %v17424_v9, %v7427_v17  ;;  %v11971_v15 = vsel %vm185_vm1, %v17427_v48, %v17426_v0  ;;  %v17428_v17 = vunpack.i.h.bf16 %v17355_v47  ;;  %v17431_v35 = vmov %v17426_v0  ;;  %2691 = vmatprep.subr.bf16.mxu1 %v2369_v40 }
 0x2fd   :  { %v11993_v58 = vsel %vm185_vm1, %v17431_v35, %v17430_v32  ;;  %v17432_v45 = vmov %v17429_v5  ;;  %v2368_v9 = vpack.c.bf16 %v1950_v11, %v1934_v14  ;;  %v2399_v0 = vpack.c.bf16 %v1997_v53, %v1997_v53  ;;  %2653 = vmatpush1.bf16.msra.mxu0 %v2382_v61  ;;  %v17434_v32 = vld [vmem:[#allocation34_spill] sm:$0xff]  ;;  %v17440_v61 = vld [vmem:[#allocation7_spill] sm:$0xff] }
 0x2fe   :  { %v11987_v31 = vsel %vm252_vm2, %v17429_v5, %v17428_v17  ;;  %v266_v36 = vsel %vm252_vm2, %v6302_v44, %v17432_v45  ;;  %v1967_v48 = vsel %vm1827_vm6, %v7417_v13, %v16527_v51  ;;  %v2398_v17 = vpack.c.bf16 %v1996_v16, %v1996_v16  ;;  %v17433_v5 = vld [vmem:[#allocation33_spill] sm:$0xff]  ;;  %v17438_v16 = vld [vmem:[#allocation23_spill] sm:$0xff] }
 0x2ff   :  { %v6387_v23 = vunpack.i.h.bf16 %v17433_v5  ;;  %v1966_v50 = vsel %vm1827_vm6, %v7411_v4, %v7417_v13  ;;  %v1982_v40 = vsel %vm1827_vm6, %v7416_v25, %v7422_v19  ;;  %v2385_v38 = vpack.c.bf16 %v1983_v22, %v1967_v48  ;;  %2692 = vmatpush1.bf16.msra.mxu1 %v2368_v9  ;;  %6139 = vmatprep.subr.msk.bf16.mxu0 %vm16598_vm12, %v2399_v0  ;;  %v17436_v25 = vld [vmem:[#allocation19_spill] sm:$0xff]  ;;  %v12032_v0 = vpop.permute.xlu0 %7469 }
 0x300   :  { %v6386_v41 = vunpack.i.l.bf16 %v17433_v5  ;;  %v6382_v14 = vunpack.i.h.bf16 %v17434_v32  ;;  %v1999_v11 = vsel %vm1827_vm6, %v7432_v60, %v16526_v10  ;;  %v1998_v53 = vsel %vm1827_vm6, %v7431_v55, %v7432_v60  ;;  %v17442_v55 = vld [vmem:[#allocation26_spill] sm:$0xff] }
 0x301   :  { %v17435_v4 = vunpack.i.l.bf16 %v17419_v26  ;;  %v17437_v13 = vunpack.i.h.bf16 %v17355_v47  ;;  %v6342_v22 = vunpack.i.h.bf16 %v17438_v16  ;;  %2693 = vmatprep.subr.bf16.mxu1 %v2385_v38  ;;  %v17439_v35 = vunpack.i.l.bf16 %v17425_v27 }
 0x302   :  { %v17441_v45 = vunpack.i.h.bf16 %v17440_v61  ;;  %v6347_v60 = vunpack.i.h.bf16 %v17442_v55  ;;  %v6346_v26 = vunpack.i.l.bf16 %v17442_v55  ;;  %v2441_v47 = vsel %vm16598_vm12, %v2398_v17, 0 }
 0x303   :  { %v265_v39 = vsel %vm252_vm2, %v17435_v4, %v6302_v44  ;;  %v12020_v19 = vsel %vm252_vm2, %v17437_v13, %v17436_v25  ;;  %v12030_v44 = vpop.permute.xlu1 %7464  ;;  %v2384_v48 = vpack.c.bf16 %v1982_v40, %v1966_v50  ;;  %2655 = vmatpush1.bf16.msra.mxu0 %v2441_v47  ;;  %v2401_v5 = vpack.c.bf16 %v1999_v11, %v1999_v11  ;;  %v17443_v13 = vld [vmem:[#allocation150_spill] sm:$0xff]  ;;  %v17447_v40 = vld [vmem:[#allocation49_spill] sm:$0xff] }
 0x304   :  { %v199_v9 = vsel %vm185_vm1, %v17441_v45, %v17439_v35  ;;  %v2400_v38 = vpack.c.bf16 %v1998_v53, %v1998_v53  ;;  %v2212_v27 = vpack.c.bf16 %v11987_v31, %v11971_v15  ;;  %v12038_v25 = vsel %vm386_vm4, %v6386_v41, %v6387_v23  ;;  %v17444_v35 = vld [vmem:[#allocation115_spill] sm:$0xff]  ;;  %v17446_v45 = vld [vmem:[#allocation60_spill] sm:$0xff]  ;;  %v17448_v53 = vld [vmem:[#allocation50_spill] sm:$0xff] }
 0x305   :  { %v2211_v4 = vpack.c.bf16 %v266_v36, %v199_v9  ;;  %2694 = vmatpush1.bf16.msra.mxu1 %v2384_v48  ;;  %v17445_v61 = vpack.c.bf16 %v17443_v13, %v17444_v35  ;;  %v2210_v55 = vpack.c.bf16 %v265_v39, %v17446_v45  ;;  %v400_v17 = vsel %vm386_vm4, %v6382_v14, %v6386_v41  ;;  %v17452_v35 = vld [vmem:[#allocation25_spill] sm:$0xff]  ;;  %v17453_v45 = vld [vmem:[#allocation151_spill] sm:$0xff]  ;;  %v17499_v15 = vld [vmem:[#allocation12_spill] sm:$0xff] }
 0x306   :  { %v2213_v50 = vpack.c.bf16 %v12020_v19, %v11993_v58  ;;  %v6467_v36 = vunpack.i.h.bf16 %v17447_v40  ;;  %v6466_v11 = vunpack.i.l.bf16 %v17447_v40  ;;  %v6462_v9 = vunpack.i.h.bf16 %v17448_v53  ;;  %6141 = vmatprep.subr.msk.bf16.mxu1 %vm16598_vm12, %v2401_v5  ;;  %v17451_v58 = vld [vmem:[#allocation16_spill] sm:$0xff] }
 0x307   :  { %2710 = vmatprep.subr.bf16.mxu0 %v17445_v61  ;;  %v17449_v47 = vunpack.i.l.bf16 %v17438_v16  ;;  %v12055_v13 = vsel %vm319_vm3, %v6346_v26, %v6347_v60  ;;  %v17450_v41 = vunpack.i.l.bf16 %v17434_v32  ;;  %2661 = vmatmul.mubr.bf16.vlgmr.msra.gmra.mrb[8].mxu0 %v17451_v58  ;;  %v333_v19 = vsel %vm319_vm3, %v6342_v22, %v6346_v26  ;;  %v17454_v16 = vld [vmem:[#allocation153_spill] sm:$0xff]  ;;  %v17456_v32 = vld [vmem:[#allocation35_spill] sm:$0xff] }
 0x308   :  { %v335_v61 = vsel %vm319_vm3, %v6347_v60, %v17452_v35  ;;  %v2447_v5 = vsel %vm16598_vm12, %v2400_v38, 0  ;;  %v17455_v40 = vpack.c.bf16 %v17453_v45, %v17454_v16  ;;  %v2228_v10 = vpack.c.bf16 %v12038_v25, %v12055_v13  ;;  %v12075_v60 = vpop.permute.xlu1 %7474  ;;  %v12077_v38 = vpop.permute.xlu0 %7479  ;;  %v17463_v45 = vld [vmem:[#allocation155_spill] sm:$0xff] }
 0x309   :  { %v332_v48 = vsel %vm319_vm3, %v17449_v47, %v6342_v22  ;;  %v399_v39 = vsel %vm386_vm4, %v17450_v41, %v6382_v14  ;;  %v2227_v47 = vpack.c.bf16 %v400_v17, %v333_v19  ;;  %v402_v14 = vsel %vm386_vm4, %v6387_v23, %v17456_v32  ;;  %v17457_v41 = vld [vmem:[#allocation39_spill] sm:$0xff]  ;;  %2696 = vmatpush1.bf16.msra.mxu1 %v2447_v5 }
 0x30a   :  { %2711 = vmatpush1.bf16.msra.mxu0 %v17455_v40  ;;  %v6422_v51 = vunpack.i.h.bf16 %v17457_v41  ;;  %v6427_v22 = vunpack.i.h.bf16 %v17458_v34  ;;  %v6426_v26 = vunpack.i.l.bf16 %v17458_v34  ;;  %vm17459_vm13 = vcmask 875520   ;;  %v17462_v23 = vld [vmem:[#allocation3_spill] sm:$0xff] }
 0x30b   :  { %2712 = vmatprep.subr.bf16.mxu0 %v2211_v4  ;;  %v12080_v17 = vsel %vm17459_vm13, %v6466_v11, %v6467_v36  ;;  %v17460_v19 = vunpack.i.l.bf16 %v17448_v53  ;;  %vm17461_vm7 = vmmov %vm17459_vm13  ;;  %v17464_v16 = vpack.c.bf16 %v17462_v23, %v17463_v45  ;;  %v2226_v40 = vpack.c.bf16 %v399_v39, %v332_v48  ;;  %v17465_v32 = vld [vmem:[#allocation135_spill] sm:$0xff]  ;;  %v17472_v45 = vld [vmem:[#allocation76_spill] sm:$0xff] }
 0x30c   :  { %6144 = vmatprep.mubr.msk.bf16.mxu0 %vm2411_vm5, %v17465_v32  ;;  %v17466_v34 = vld [vmem:[#allocation51_spill] sm:$0xff]  ;;  %vm17467_vm10 = vmmov %vm17461_vm7  ;;  %v6507_v56 = vunpack.i.h.bf16 %v17469_v46  ;;  %v6506_v53 = vunpack.i.l.bf16 %v17469_v46  ;;  %v6632_v48 = vunpack.i.h.bf16 %v17472_v45  ;;  %2702 = vmatmul.mubr.bf16.vlgmr.msra.gmra.mrb[8].mxu1 %v17451_v58  ;;  %v2229_v39 = vpack.c.bf16 %v402_v14, %v335_v61  ;;  %v17479_v46 = vld [vmem:[#allocation41_spill] sm:$0xff] }
 0x30d   :  { %v533_v35 = vsel %vm17461_vm7, %v17460_v19, %v6462_v9  ;;  %2751 = vmatprep.subr.bf16.mxu1 %v17464_v16  ;;  %v536_v42 = vsel %vm17467_vm10, %v6467_v36, %v17466_v34  ;;  %v17468_v5 = vld [vmem:[#allocation55_spill] sm:$0xff]  ;;  %vm17470_vm14 = vmmov %vm17461_vm7  ;;  %v17473_v36 = vunpack.i.l.bf16 %v17457_v41  ;;  %vm17474_vm11 = vcmask 883712   ;;  %6146 = vmatprep.mubr.msk.bf16.mxu1 %vm2411_vm5, %v17465_v32 }
 0x30e   :  { %v6502_v4 = vunpack.i.h.bf16 %v17468_v5  ;;  %v534_v3 = vsel %vm17470_vm14, %v6462_v9, %v6466_v11  ;;  %v17471_v19 = vld [vmem:[#allocation75_spill] sm:$0xff]  ;;  %2713 = vmatpush1.bf16.msra.mxu0 %v2210_v55  ;;  %vm17475_vm13 = vmmov %vm17474_vm11  ;;  %v17477_v11 = vld [vmem:[#allocation154_spill] sm:$0xff]  ;;  %v17482_v14 = vunpack.i.l.bf16 %v17468_v5  ;;  %vm17483_vm14 = vcmask 867328  }
 0x30f   :  { %v6637_v30 = vunpack.i.h.bf16 %v17471_v19  ;;  %v6636_v23 = vunpack.i.l.bf16 %v17471_v19  ;;  %v466_v16 = vsel %vm17474_vm11, %v17473_v36, %v6422_v51  ;;  %v468_v34 = vsel %vm17475_vm13, %v6426_v26, %v6427_v22  ;;  %2714 = vmatprep.subr.bf16.mxu0 %v2227_v47  ;;  %vm17480_vm7 = vmmov %vm17474_vm11  ;;  %v12116_v36 = vpop.permute.xlu1 %7484  ;;  %v17490_v32 = vld [vmem:[#allocation91_spill] sm:$0xff] }
 0x310   :  { %v17478_v9 = vpack.c.bf16 %v17476_v20, %v17477_v11  ;;  %v469_v19 = vsel %vm17480_vm7, %v6427_v22, %v17479_v46  ;;  %vm17481_vm10 = vmmov %vm17480_vm7  ;;  %v2244_v55 = vpack.c.bf16 %v12080_v17, %v468_v34  ;;  %v600_v41 = vsel %vm17483_vm14, %v17482_v14, %v6502_v4  ;;  %v12118_v20 = vpop.permute.xlu0 %7489  ;;  %v17497_v34 = vld [vmem:[#allocation111_spill] sm:$0xff]  ;;  %v17498_v46 = vld [vmem:[#allocation21_spill] sm:$0xff] }
 0x311   :  { %v467_v52 = vsel %vm17481_vm10, %v6422_v51, %v6426_v26  ;;  %v2245_v61 = vpack.c.bf16 %v536_v42, %v469_v19  ;;  %v2242_v11 = vpack.c.bf16 %v533_v35, %v466_v16  ;;  %vm17484_vm11 = vmmov %vm17483_vm14  ;;  %vm17485_vm13 = vcmask 211968   ;;  %v17491_v35 = vld [vmem:[#allocation77_spill] sm:$0xff] }
 0x312   :  { %2752 = vmatpush1.bf16.msra.mxu1 %v17478_v9  ;;  %v2243_v47 = vpack.c.bf16 %v534_v3, %v467_v52  ;;  %v12124_v51 = vsel %vm17485_vm13, %v6636_v23, %v6637_v30  ;;  %2715 = vmatpush1.bf16.msra.mxu0 %v2226_v40  ;;  %vm17486_vm7 = vmmov %vm17484_vm11  ;;  %v17488_v26 = vunpack.i.l.bf16 %v17472_v45  ;;  %v6717_v5 = vunpack.i.h.bf16 %v17490_v32 }
 0x313   :  { %2753 = vmatprep.subr.bf16.mxu1 %v2213_v50  ;;  %v12121_v50 = vsel %vm17484_vm11, %v6506_v53, %v6507_v56  ;;  %v601_v22 = vsel %vm17486_vm7, %v6502_v4, %v6506_v53  ;;  %vm17487_vm10 = vmmov %vm17485_vm13  ;;  %v6716_v52 = vunpack.i.l.bf16 %v17490_v32  ;;  %v6712_v3 = vunpack.i.h.bf16 %v17372_v6  ;;  %v17493_v4 = vld [vmem:[#allocation14_spill] sm:$0xff] }
 0x314   :  { %v802_v42 = vsel %vm17487_vm10, %v6632_v48, %v6636_v23  ;;  %vm17489_vm14 = vmmov %vm17487_vm10  ;;  %2716 = vmatprep.subr.bf16.mxu0 %v2243_v47  ;;  %v2259_v53 = vpack.c.bf16 %v17493_v4, %v601_v22  ;;  %v17494_v23 = vld [vmem:[#allocation131_spill] sm:$0xff]  ;;  %v2276_v9 = vpack.c.bf16 %v12124_v51, %v17497_v34  ;;  %v6792_v25 = vunpack.i.h.bf16 %v17394_v1 }
 0x315   :  { %v801_v17 = vsel %vm17489_vm14, %v17488_v26, %v6632_v48  ;;  %vm17492_vm11 = vmmov %vm17487_vm10  ;;  %v2258_v45 = vpack.c.bf16 %v17494_v23, %v600_v41  ;;  %v17495_v48 = vld [vmem:[#allocation57_spill] sm:$0xff]  ;;  %v2275_v19 = vpack.c.bf16 %v802_v42, %v17498_v46  ;;  %v17502_v41 = vld [vmem:[#allocation63_spill] sm:$0xff]  ;;  %v17505_v42 = vunpack.i.l.bf16 %v17372_v6  ;;  %v12165_v23 = vpop.permute.xlu0 %7499 }
 0x316   :  { %2754 = vmatpush1.bf16.msra.mxu1 %v2212_v27  ;;  %v12139_v40 = vsel %vm17492_vm11, %v6637_v30, %v17491_v35  ;;  %vm17496_vm13 = vmmov %vm17486_vm7  ;;  %v17500_v27 = vld [vmem:[#allocation62_spill] sm:$0xff]  ;;  %v6672_v30 = vunpack.i.h.bf16 %v17376_v54  ;;  %2717 = vmatpush1.bf16.msra.mxu0 %v2242_v11  ;;  %v2274_v26 = vpack.c.bf16 %v801_v17, %v17502_v41  ;;  %vm17504_vm7 = vcmask 138240   ;;  %v17507_v17 = vld [vmem:[#allocation100_spill] sm:$0xff] }
 0x317   :  { %2755 = vmatprep.subr.bf16.mxu1 %v2229_v39  ;;  %v603_v16 = vsel %vm17496_vm13, %v6507_v56, %v17495_v48  ;;  %v2260_v14 = vpack.c.bf16 %v17500_v27, %v12121_v50  ;;  %v17501_v39 = vld [vmem:[#allocation84_spill] sm:$0xff]  ;;  %v12158_v35 = vsel %vm17504_vm7, %v6716_v52, %v6717_v5  ;;  %vm17506_vm10 = vmmov %vm17504_vm7  ;;  %v12163_v50 = vpop.permute.xlu1 %7494  ;;  %2718 = vmatprep.subr.bf16.mxu0 %v2259_v53  ;;  %v6752_v11 = vunpack.i.h.bf16 %v17392_v63  ;;  %v17515_v41 = vld [vmem:[#allocation83_spill] sm:$0xff] }
 0x318   :  { %v2261_v31 = vpack.c.bf16 %v17499_v15, %v603_v16  ;;  %v6677_v47 = vunpack.i.h.bf16 %v17501_v39  ;;  %v6676_v22 = vunpack.i.l.bf16 %v17501_v39  ;;  %v17503_v56 = vld [vmem:[#allocation112_spill] sm:$0xff]  ;;  %v935_v4 = vsel %vm17506_vm10, %v17505_v42, %v6712_v3  ;;  %vm17508_vm14 = vmmov %vm17504_vm7  ;;  %v17509_v16 = vld [vmem:[#allocation93_spill] sm:$0xff] }
 0x319   :  { %v2277_v32 = vpack.c.bf16 %v12139_v40, %v17503_v56  ;;  %v6757_v40 = vunpack.i.h.bf16 %v17507_v17  ;;  %v6756_v48 = vunpack.i.l.bf16 %v17507_v17  ;;  %v936_v6 = vsel %vm17508_vm14, %v6712_v3, %v6716_v52  ;;  %vm17510_vm11 = vmmov %vm17504_vm7  ;;  %v17511_v15 = vld [vmem:[#allocation107_spill] sm:$0xff] }
 0x31a   :  { %2756 = vmatpush1.bf16.msra.mxu1 %v2228_v10  ;;  %v938_v46 = vsel %vm17510_vm11, %v6717_v5, %v17509_v16  ;;  %v6797_v27 = vunpack.i.h.bf16 %v17511_v15  ;;  %v6796_v39 = vunpack.i.l.bf16 %v17511_v15  ;;  %v17512_v10 = vunpack.i.l.bf16 %v17376_v54  ;;  %2719 = vmatpush1.bf16.msra.mxu0 %v2258_v45 }
 0x31b   :  { %2757 = vmatprep.subr.bf16.mxu1 %v2245_v61  ;;  %vm17513_vm13 = vcmask 146432   ;;  %v7437_v5 = vunpack.i.h.bf16 %v11891_v62  ;;  %v7442_v3 = vunpack.i.h.bf16 %v11893_v7  ;;  %2720 = vmatprep.subr.bf16.mxu0 %v2275_v19  ;;  %v17518_v17 = vunpack.i.l.bf16 %v17392_v63  ;;  %v12206_v63 = vpop.permute.xlu0 %7509 }
 0x31c   :  { %v868_v13 = vsel %vm17513_vm13, %v17512_v10, %v6672_v30  ;;  %vm17514_vm7 = vmmov %vm17513_vm13  ;;  %vm17519_vm11 = vcmask 130048   ;;  %v7441_v19 = vunpack.i.l.bf16 %v11893_v7  ;;  %v7446_v10 = vunpack.i.l.bf16 %v11928_v59 }
 0x31d   :  { %v12183_v53 = vsel %vm17514_vm7, %v6676_v22, %v6677_v47  ;;  %vm17516_vm10 = vmmov %vm17514_vm7  ;;  %v2290_v42 = vpack.c.bf16 %v935_v4, %v868_v13  ;;  %v1002_v16 = vsel %vm17519_vm11, %v17518_v17, %v6752_v11  ;;  %v17530_v7 = vunpack.i.l.bf16 %v11500_v28 }
 0x31e   :  { %v871_v61 = vsel %vm17516_vm10, %v6677_v47, %v17515_v41  ;;  %vm17517_vm14 = vmmov %vm17514_vm7  ;;  %2758 = vmatpush1.bf16.msra.mxu1 %v2244_v55  ;;  %v2292_v45 = vpack.c.bf16 %v12158_v35, %v12183_v53  ;;  %vm17521_vm7 = vcmask 64512   ;;  %v17522_v47 = vld [vmem:[#allocation99_spill] sm:$0xff]  ;;  %2721 = vmatpush1.bf16.msra.mxu0 %v2274_v26  ;;  %v17531_v53 = vunpack.i.l.bf16 %v11537_v8 }
 0x31f   :  { %v869_v52 = vsel %vm17517_vm14, %v6672_v30, %v6676_v22  ;;  %v2293_v54 = vpack.c.bf16 %v938_v46, %v871_v61  ;;  %vm17520_vm13 = vmmov %vm17519_vm11  ;;  %2759 = vmatprep.subr.bf16.mxu1 %v2261_v31  ;;  %v12199_v30 = vsel %vm17521_vm7, %v6796_v39, %v6797_v27  ;;  %v12204_v22 = vpop.permute.xlu1 %7504  ;;  %v17527_v46 = vld [vmem:[#allocation109_spill] sm:$0xff]  ;;  %v1840_v13 = vsel %vm1827_vm6, %v17530_v7, %v7437_v5 }
 0x320   :  { %v2291_v56 = vpack.c.bf16 %v936_v6, %v869_v52  ;;  %v12194_v15 = vsel %vm17520_vm13, %v6756_v48, %v6757_v40  ;;  %vm17523_vm10 = vmmov %vm17519_vm11  ;;  %v17525_v6 = vunpack.i.l.bf16 %v17394_v1  ;;  %v7447_v1 = vunpack.i.h.bf16 %v11928_v59 }
 0x321   :  { %v1005_v55 = vsel %vm17523_vm10, %v6757_v40, %v17522_v47  ;;  %vm17524_vm14 = vmmov %vm17521_vm7  ;;  %v7456_v26 = vunpack.i.l.bf16 %v11975_v21  ;;  %v2308_v28 = vpack.c.bf16 %v12199_v30, %v12194_v15  ;;  %v7466_v8 = vunpack.i.l.bf16 %v12030_v44 }
 0x322   :  { %v1070_v4 = vsel %vm17524_vm14, %v6792_v25, %v6796_v39  ;;  %vm17526_vm11 = vmmov %vm17521_vm7  ;;  %v1856_v39 = vsel %vm1827_vm6, %v17531_v53, %v7442_v3  ;;  %2760 = vmatpush1.bf16.msra.mxu1 %v2260_v14  ;;  %2722 = vmatprep.subr.bf16.mxu0 %v2291_v56  ;;  %v1841_v61 = vsel %vm1827_vm6, %v7437_v5, %v7441_v19  ;;  %v7457_v59 = vunpack.i.h.bf16 %v11975_v21  ;;  %v12243_v5 = vpop.permute.xlu0 %7519 }
 0x323   :  { %v1069_v31 = vsel %vm17526_vm11, %v17525_v6, %v6792_v25  ;;  %vm17528_vm13 = vmmov %vm17521_vm7  ;;  %v7452_v25 = vunpack.i.h.bf16 %v11930_v18  ;;  %2761 = vmatprep.subr.bf16.mxu1 %v2277_v32  ;;  %v7462_v14 = vunpack.i.h.bf16 %v11977_v37  ;;  %2723 = vmatpush1.bf16.msra.mxu0 %v2290_v42  ;;  %v2322_v52 = vpack.c.bf16 %v1856_v39, %v1840_v13  ;;  %v12241_v15 = vpop.permute.xlu1 %7514 }
 0x324   :  { %v1072_v35 = vsel %vm17528_vm13, %v6797_v27, %v17527_v46  ;;  %vm17529_vm7 = vmmov %vm17523_vm10  ;;  %v7451_v27 = vunpack.i.l.bf16 %v11930_v18  ;;  %v2306_v41 = vpack.c.bf16 %v1069_v31, %v1002_v16  ;;  %v1857_v18 = vsel %vm1827_vm6, %v7442_v3, %v7446_v10 }
 0x325   :  { %v1003_v40 = vsel %vm17529_vm7, %v6752_v11, %v6756_v48  ;;  %v2309_v48 = vpack.c.bf16 %v1072_v35, %v1005_v55  ;;  %v12234_v32 = vsel %vm1827_vm6, %v7441_v19, %v7447_v1  ;;  %v12237_v56 = vsel %vm1827_vm6, %v7446_v10, %v7452_v25 }
 0x326   :  { %v2307_v11 = vpack.c.bf16 %v1070_v4, %v1003_v40  ;;  %v7461_v17 = vunpack.i.l.bf16 %v11977_v37  ;;  %v7467_v16 = vunpack.i.h.bf16 %v12030_v44  ;;  %2762 = vmatpush1.bf16.msra.mxu1 %v2276_v9  ;;  %v7472_v21 = vunpack.i.h.bf16 %v12032_v0  ;;  %v12281_v39 = vpop.permute.xlu0 %7529 }
 0x327   :  { %v7482_v3 = vunpack.i.h.bf16 %v12077_v38  ;;  %2763 = vmatprep.subr.bf16.mxu1 %v2293_v54  ;;  %v1843_v42 = vsel %vm1827_vm6, %v7447_v1, %v7451_v27  ;;  %v1859_v37 = vsel %vm1827_vm6, %v7452_v25, %v7456_v26  ;;  %v7477_v44 = vunpack.i.h.bf16 %v12075_v60  ;;  %v12279_v53 = vpop.permute.xlu1 %7524 }
 0x328   :  { %2724 = vmatprep.subr.bf16.mxu0 %v2307_v11  ;;  %v7476_v30 = vunpack.i.l.bf16 %v12075_v60  ;;  %v2323_v47 = vpack.c.bf16 %v1857_v18, %v1841_v61  ;;  %v1889_v55 = vsel %vm1827_vm6, %v7462_v14, %v7466_v8  ;;  %v17532_v51 = vunpack.i.l.bf16 %v11553_v43 }
 0x329   :  { %v17533_v9 = vunpack.i.l.bf16 %v11596_v29  ;;  %v7486_v54 = vunpack.i.l.bf16 %v12116_v36  ;;  %2725 = vmatpush1.bf16.msra.mxu0 %v2306_v41  ;;  %v2324_v4 = vpack.c.bf16 %v12237_v56, %v12234_v32  ;;  %v12265_v6 = vsel %vm1827_vm6, %v7461_v17, %v7467_v16 }
 0x32a   :  { %v1872_v34 = vsel %vm1827_vm6, %v17532_v51, %v7457_v59  ;;  %v7471_v60 = vunpack.i.l.bf16 %v12032_v0  ;;  %2764 = vmatpush1.bf16.msra.mxu1 %v2292_v45  ;;  %2726 = vmatprep.subr.bf16.mxu0 %v2323_v47  ;;  %v1873_v43 = vsel %vm1827_vm6, %v7457_v59, %v7461_v17  ;;  %v2325_v31 = vpack.c.bf16 %v1859_v37, %v1843_v42 }
 0x32b   :  { %v1888_v19 = vsel %vm1827_vm6, %v17533_v9, %v7462_v14  ;;  %v1890_v29 = vsel %vm1827_vm6, %v7466_v8, %v7472_v21  ;;  %v17534_v46 = vunpack.i.l.bf16 %v11678_v33  ;;  %v7481_v10 = vunpack.i.l.bf16 %v12077_v38  ;;  %2765 = vmatprep.subr.bf16.mxu1 %v2309_v48 }
 0x32c   :  { %v2339_v40 = vpack.c.bf16 %v1889_v55, %v1873_v43  ;;  %v17535_v7 = vunpack.i.l.bf16 %v11628_v57  ;;  %v7487_v0 = vunpack.i.h.bf16 %v12116_v36  ;;  %v7492_v45 = vunpack.i.h.bf16 %v12118_v20 }
 0x32d   :  { %v1920_v35 = vsel %vm1827_vm6, %v17534_v46, %v7482_v3  ;;  %v1891_v33 = vsel %vm1827_vm6, %v7472_v21, %v7476_v30  ;;  %v7497_v1 = vunpack.i.h.bf16 %v12163_v50  ;;  %v7502_v38 = vunpack.i.h.bf16 %v12165_v23  ;;  %2727 = vmatpush1.bf16.msra.mxu0 %v2322_v52  ;;  %v7535_v21 = vpop.permute.xlu1 %7534 }
 0x32e   :  { %v1904_v13 = vsel %vm1827_vm6, %v17535_v7, %v7477_v44  ;;  %v7506_v25 = vunpack.i.l.bf16 %v12204_v22  ;;  %v1921_v57 = vsel %vm1827_vm6, %v7482_v3, %v7486_v54  ;;  %v7496_v27 = vunpack.i.l.bf16 %v12163_v50  ;;  %2766 = vmatpush1.bf16.msra.mxu1 %v2308_v28  ;;  %2728 = vmatprep.subr.bf16.mxu0 %v2339_v40  ;;  %v7540_v3 = vpop.permute.xlu0 %7539 }
 0x32f   :  { %v7501_v36 = vunpack.i.l.bf16 %v12165_v23  ;;  %v2338_v26 = vpack.c.bf16 %v1888_v19, %v1872_v34  ;;  %v1875_v11 = vsel %vm1827_vm6, %v7467_v16, %v7471_v60  ;;  %v7491_v48 = vunpack.i.l.bf16 %v12118_v20  ;;  %2767 = vmatprep.subr.bf16.mxu1 %v2325_v31 }
 0x330   :  { %v1905_v8 = vsel %vm1827_vm6, %v7477_v44, %v7481_v10  ;;  %v2341_v41 = vpack.c.bf16 %v1891_v33, %v1875_v11  ;;  %v2340_v61 = vpack.c.bf16 %v1890_v29, %v12265_v6  ;;  %v1906_v59 = vsel %vm1827_vm6, %v7481_v10, %v7487_v0 }
 0x331   :  { %v1922_v14 = vsel %vm1827_vm6, %v7486_v54, %v7492_v45  ;;  %v2355_v50 = vpack.c.bf16 %v1921_v57, %v1905_v8  ;;  %v2354_v18 = vpack.c.bf16 %v1920_v35, %v1904_v13  ;;  %v17536_v23 = vunpack.i.l.bf16 %v17418_v24  ;;  %2729 = vmatpush1.bf16.msra.mxu0 %v2338_v26 }
 0x332   :  { %v17537_v52 = vunpack.i.l.bf16 %v11765_v49  ;;  %v7526_v32 = vunpack.i.l.bf16 %v12279_v53  ;;  %v1953_v56 = vsel %vm1827_vm6, %v7502_v38, %v7506_v25  ;;  %v7507_v17 = vunpack.i.h.bf16 %v12204_v22  ;;  %2768 = vmatpush1.bf16.msra.mxu1 %v2324_v4 }
 0x333   :  { %v1936_v28 = vsel %vm1827_vm6, %v17536_v23, %v7497_v1  ;;  %v7516_v16 = vunpack.i.l.bf16 %v12241_v15  ;;  %2730 = vmatprep.subr.bf16.mxu0 %v2355_v50  ;;  %v1937_v24 = vsel %vm1827_vm6, %v7497_v1, %v7501_v36  ;;  %v1923_v42 = vsel %vm1827_vm6, %v7492_v45, %v7496_v27  ;;  %2769 = vmatprep.subr.bf16.mxu1 %v2341_v41  ;;  %v1826_v1 = vpop.permute.xlu1 %1825  ;;  %v12350_v23 = vld [vmem:[%s16235_s10 + $0x10] sm:$0x3] }
 0x334   :  { %v1952_v20 = vsel %vm1827_vm6, %v17537_v52, %v7502_v38  ;;  %v7511_v49 = vunpack.i.l.bf16 %v12206_v63  ;;  %v7517_v37 = vunpack.i.h.bf16 %v12241_v15  ;;  %v7522_v44 = vunpack.i.h.bf16 %v12243_v5 }
 0x335   :  { %v7521_v30 = vunpack.i.l.bf16 %v12243_v5  ;;  %v7512_v22 = vunpack.i.h.bf16 %v12206_v63  ;;  %v2371_v47 = vpack.c.bf16 %v1953_v56, %v1937_v24  ;;  %v1907_v55 = vsel %vm1827_vm6, %v7487_v0, %v7491_v48  ;;  %2731 = vmatpush1.bf16.msra.mxu0 %v2354_v18 }
 0x336   :  { %v2356_v51 = vpack.c.bf16 %v1922_v14, %v1906_v59  ;;  %v7537_v34 = vunpack.i.h.bf16 %v7535_v21  ;;  %v7541_v9 = vunpack.i.l.bf16 %v7540_v3  ;;  %v2357_v19 = vpack.c.bf16 %v1923_v42, %v1907_v55  ;;  %2770 = vmatpush1.bf16.msra.mxu1 %v2340_v61 }
 0x337   :  { %v1985_v54 = vsel %vm1827_vm6, %v7522_v44, %v7526_v32  ;;  %v1938_v4 = vsel %vm1827_vm6, %v7501_v36, %v7507_v17  ;;  %v7536_v15 = vunpack.i.l.bf16 %v7535_v21  ;;  %2732 = vmatprep.subr.bf16.mxu0 %v2371_v47  ;;  %v2370_v6 = vpack.c.bf16 %v1952_v20, %v1936_v28 }
 0x338   :  { %v1955_v5 = vsel %vm1827_vm6, %v7512_v22, %v7516_v16  ;;  %v17538_v63 = vunpack.i.l.bf16 %v11810_v12  ;;  %v17539_v43 = vunpack.i.l.bf16 %v11848_v2  ;;  %2771 = vmatprep.subr.bf16.mxu1 %v2357_v19  ;;  %v1969_v29 = vsel %vm1827_vm6, %v7517_v37, %v7521_v30 }
 0x339   :  { %v1939_v46 = vsel %vm1827_vm6, %v7507_v17, %v7511_v49  ;;  %v7527_v35 = vunpack.i.h.bf16 %v12279_v53  ;;  %v7532_v10 = vunpack.i.h.bf16 %v12281_v39  ;;  %v7531_v40 = vunpack.i.l.bf16 %v12281_v39  ;;  %2733 = vmatpush1.bf16.msra.mxu0 %v2370_v6 }
 0x33a   :  { %v1968_v60 = vsel %vm1827_vm6, %v17538_v63, %v7517_v37  ;;  %v1984_v31 = vsel %vm1827_vm6, %v17539_v43, %v7522_v44  ;;  %v2387_v7 = vpack.c.bf16 %v1985_v54, %v1969_v29  ;;  %v1954_v12 = vsel %vm1827_vm6, %v7506_v25, %v7512_v22  ;;  %2772 = vmatpush1.bf16.msra.mxu1 %v2356_v51  ;;  %v39_v63 = vld [vmem:[%s16236_s9] sm:$0xff] }
 0x33b   :  { %v2373_v13 = vpack.c.bf16 %v1955_v5, %v1939_v46  ;;  %v2001_v2 = vsel %vm1827_vm6, %v7537_v34, %v7541_v9  ;;  %v17540_v0 = vunpack.i.l.bf16 %v11891_v62  ;;  %v7542_v33 = vunpack.i.h.bf16 %v7540_v3 }
 0x33c   :  { %2734 = vmatprep.subr.bf16.mxu0 %v2387_v7  ;;  %v1987_v53 = vsel %vm1827_vm6, %v7532_v10, %v7536_v15  ;;  %v2386_v38 = vpack.c.bf16 %v1984_v31, %v1968_v60  ;;  %v2372_v39 = vpack.c.bf16 %v1954_v12, %v1938_v4  ;;  %v2403_v57 = vpack.c.bf16 %v2001_v2, %v2001_v2  ;;  %v12369_v60 = vpop.permute.xlu0 %2408 }
 0x33d   :  { %v2000_v45 = vsel %vm1827_vm6, %v17540_v0, %v7537_v34  ;;  %2773 = vmatprep.subr.bf16.mxu1 %v2373_v13  ;;  %v1971_v25 = vsel %vm1827_vm6, %v7527_v35, %v7531_v40  ;;  %v1970_v36 = vsel %vm1827_vm6, %v7521_v30, %v7527_v35  ;;  %v1986_v26 = vsel %vm1827_vm6, %v7526_v32, %v7532_v10 }
 0x33e   :  { %v2402_v27 = vpack.c.bf16 %v2000_v45, %v2000_v45  ;;  %2735 = vmatpush1.bf16.msra.mxu0 %v2386_v38  ;;  %v2389_v62 = vpack.c.bf16 %v1987_v53, %v1971_v25  ;;  %v2003_v11 = vsel %vm1827_vm6, %v7542_v33, %v1826_v1  ;;  %2774 = vmatpush1.bf16.msra.mxu1 %v2372_v39  ;;  %v2794_v50 = vlaneseq }
 0x33f   :  { %6143 = vmatprep.subr.msk.bf16.mxu0 %vm16598_vm12, %v2403_v57  ;;  %v2002_v48 = vsel %vm1827_vm6, %v7541_v9, %v7542_v33  ;;  %v2388_v41 = vpack.c.bf16 %v1986_v26, %v1970_v36  ;;  %v2405_v61 = vpack.c.bf16 %v2003_v11, %v2003_v11  ;;  %vm3083_vm10 = vcmask 908288  }
 0x340   :  { %2775 = vmatprep.subr.bf16.mxu1 %v2389_v62  ;;  %v2453_v8 = vsel %vm16598_vm12, %v2402_v27, 0  ;;  %v2404_v59 = vpack.c.bf16 %v2002_v48, %v2002_v48  ;;  %v12345_v18 = vshrl.u32 %v2794_v50, 7  ;;  %vm17626_vm14 = vcmask 883712  }
 0x341   :  { %vm17628_vm11 = vmmov %vm17626_vm14  ;;  %vm17632_vm7 = vcmask 875520  }
 0x342   :  { %2737 = vmatpush1.bf16.msra.mxu0 %v2453_v8  ;;  %2776 = vmatpush1.bf16.msra.mxu1 %v2388_v41  ;;  %v2459_v14 = vsel %vm16598_vm12, %v2404_v59, 0  ;;  %v12353_v28 = vsub.s32 1, %v12345_v18  ;;  %v12364_v5 = vsub.s32 0, %v12345_v18  ;;  %v12384_v35 = vsub.s32 2, %v12345_v18  ;;  %vm17630_vm13 = vmmov %vm17628_vm11 }
 0x343   :  { %6145 = vmatprep.subr.msk.bf16.mxu1 %vm16598_vm12, %v2405_v61  ;;  %v12387_v10 = vsub.s32 3, %v12345_v18  ;;  %v12400_v2 = vsub.s32 4, %v12345_v18  ;;  %v12417_v39 = vsub.s32 5, %v12345_v18  ;;  %v12422_v27 = vsub.s32 6, %v12345_v18  ;;  %vm17637_vm12 = vmmov %vm17632_vm7 }
 0x344   :  { %v3192_v52 = vrot.slane %v12350_v23, %v12353_v28  ;;  %v12372_v43 = vrot.slane %v39_v63, %v12364_v5  ;;  %v12381_v46 = vrot.slane %v39_v63, %v12353_v28  ;;  %v12397_v13 = vrot.slane %v39_v63, %v12384_v35 }
 0x345   :  { %2743 = vmatmul.mubr.bf16.vlgmr.msra.gmra.mrb[12].mxu0 %v17451_v58  ;;  %v12408_v53 = vrot.slane %v39_v63, %v12387_v10  ;;  %v12414_v38 = vrot.slane %v39_v63, %v12400_v2  ;;  %v12430_v62 = vrot.slane %v39_v63, %v12417_v39  ;;  %v12433_v48 = vrot.slane %v39_v63, %v12422_v27 }
 0x346   :  { %2778 = vmatpush1.bf16.msra.mxu1 %v2459_v14  ;;  %v12357_v20 = vmul.f32 0.0, %v3192_v52  ;;  %17542 = vst [vmem:[#allocation114_spill] sm:$0xff] %v12372_v43  ;;  %17543 = vst [vmem:[#allocation117_spill] sm:$0xff] %v12381_v46  ;;  %v12441_v59 = vsub.s32 7, %v12345_v18  ;;  %v40_v14 = vld [vmem:[%s16236_s9 + $0x8] sm:$0xff] }
 0x347   :  { %17544 = vst [vmem:[#allocation128_spill] sm:$0xff] %v12397_v13  ;;  %17545 = vst [vmem:[#allocation126_spill] sm:$0xff] %v12408_v53  ;;  %v12458_v18 = vrot.slane %v40_v14, %v12364_v5 }
 0x348   :  { %17541 = vst [vmem:[#allocation110_spill] sm:$0xff] %v12357_v20  ;;  %4274 = vrot.lane.b32.xlu1 %v12357_v20, %s8950_s12  ;;  %4324 = vrot.lane.b32.xlu0 %v12357_v20, %s8951_s30  ;;  %17546 = vst [vmem:[#allocation68_spill] sm:$0xff] %v12414_v38 }
 0x349   :  { %2784 = vmatmul.mubr.bf16.vlgmr.msra.gmra.mrb[12].mxu1 %v17451_v58  ;;  %17547 = vst [vmem:[#allocation122_spill] sm:$0xff] %v12430_v62  ;;  %17548 = vst [vmem:[#allocation125_spill] sm:$0xff] %v12433_v48 }
 0x34a   :  { %17550 = vst [vmem:[#allocation69_spill] sm:$0xff] %v12458_v18 }
 0x352   :  { %v2498_v58 = vpop.f32.mrb[0].mxu0 }
 0x353   :  { %v2500_v32 = vpop.f32.mrb[1].mxu0  ;;  %v12375_v31 = vadd.f32 %v2498_v58, %v12369_v60 }
 0x354   :  { %v2502_v56 = vpop.f32.mrb[2].mxu0  ;;  %v12378_v29 = vadd.f32 %v2500_v32, %v12369_v60  ;;  %v12452_v32 = vrot.slane %v39_v63, %v12441_v59 }
 0x355   :  { %v2503_v17 = vpop.f32.mrb[3].mxu0  ;;  %v2874_v40 = vmul.f32 %v12372_v43, %v12375_v31 }
 0x356   :  { %v2875_v7 = vmul.f32 %v12381_v46, %v12378_v29  ;;  %17549 = vst [vmem:[#allocation134_spill] sm:$0xff] %v12452_v32 }
 0x357   :  { %v2539_v16 = vpop.f32.mrb[0].mxu1 }
 0x358   :  { %v2541_v21 = vpop.f32.mrb[1].mxu1  ;;  %v12394_v12 = vadd.f32 %v2539_v16, %v12369_v60  ;;  %v2890_v0 = vadd.f32 %v2875_v7, %v2874_v40 }
 0x359   :  { %v2543_v3 = vpop.f32.mrb[2].mxu1  ;;  %v12405_v33 = vadd.f32 %v2541_v21, %v12369_v60 }
 0x35a   :  { %v2544_v24 = vpop.f32.mrb[3].mxu1  ;;  %v2876_v45 = vmul.f32 %v12397_v13, %v12394_v12 }
 0x35b   :  { %v2877_v25 = vmul.f32 %v12408_v53, %v12405_v33  ;;  %v12468_v24 = vrot.slane %v40_v14, %v12353_v28 }
 0x35c   :  { %v2891_v57 = vadd.f32 %v2890_v0, %v2876_v45 }
 0x35d   :  { %17551 = vst [vmem:[#allocation130_spill] sm:$0xff] %v12468_v24 }
 0x35e   :  { %v2892_v11 = vadd.f32 %v2891_v57, %v2877_v25  ;;  %v12502_v25 = vrot.slane %v40_v14, %v12422_v27 }
 0x360   :  { %17556 = vst [vmem:[#allocation43_spill] sm:$0xff] %v12502_v25 }
 0x398   :  { %v2580_v42 = vpop.f32.mrb[4].mxu0 }
 0x399   :  { %v2582_v49 = vpop.f32.mrb[5].mxu0  ;;  %v12411_v1 = vadd.f32 %v2580_v42, %v12369_v60 }
 0x39a   :  { %v2584_v37 = vpop.f32.mrb[6].mxu0  ;;  %v12427_v26 = vadd.f32 %v2582_v49, %v12369_v60 }
 0x39b   :  { %v2585_v44 = vpop.f32.mrb[7].mxu0  ;;  %v2878_v36 = vmul.f32 %v12414_v38, %v12411_v1 }
 0x39c   :  { %v2879_v41 = vmul.f32 %v12430_v62, %v12427_v26 }
 0x39d   :  { %v2621_v30 = vpop.f32.mrb[4].mxu1  ;;  %v2893_v8 = vadd.f32 %v2892_v11, %v2878_v36 }
 0x39e   :  { %v2623_v22 = vpop.f32.mrb[5].mxu1  ;;  %v12438_v61 = vadd.f32 %v2621_v30, %v12369_v60  ;;  %v12476_v30 = vrot.slane %v40_v14, %v12384_v35 }
 0x39f   :  { %v2625_v47 = vpop.f32.mrb[6].mxu1  ;;  %v2894_v50 = vadd.f32 %v2893_v8, %v2879_v41  ;;  %v12449_v58 = vadd.f32 %v2623_v22, %v12369_v60  ;;  %v12505_v8 = vrot.slane %v40_v14, %v12441_v59 }
 0x3a0   :  { %v2626_v55 = vpop.f32.mrb[7].mxu1  ;;  %v2880_v52 = vmul.f32 %v12433_v48, %v12438_v61  ;;  %17552 = vst [vmem:[#allocation133_spill] sm:$0xff] %v12476_v30 }
 0x3a1   :  { %v2881_v16 = vmul.f32 %v12452_v32, %v12449_v58  ;;  %17557 = vst [vmem:[#allocation48_spill] sm:$0xff] %v12505_v8 }
 0x3a2   :  { %v2895_v17 = vadd.f32 %v2894_v50, %v2880_v52 }
 0x3a4   :  { %v2896_v42 = vadd.f32 %v2895_v17, %v2881_v16 }
 0x3da   :  { %v2662_v51 = vpop.f32.mrb[8].mxu0 }
 0x3db   :  { %v2664_v34 = vpop.f32.mrb[9].mxu0  ;;  %v12455_v56 = vadd.f32 %v2662_v51, %v12369_v60  ;;  %v12484_v51 = vrot.slane %v40_v14, %v12387_v10 }
 0x3dc   :  { %v2666_v9 = vpop.f32.mrb[10].mxu0  ;;  %v12465_v3 = vadd.f32 %v2664_v34, %v12369_v60 }
 0x3dd   :  { %v2667_v19 = vpop.f32.mrb[11].mxu0  ;;  %v2882_v21 = vmul.f32 %v12458_v18, %v12455_v56  ;;  %17553 = vst [vmem:[#allocation28_spill] sm:$0xff] %v12484_v51 }
 0x3de   :  { %v2883_v37 = vmul.f32 %v12468_v24, %v12465_v3  ;;  %v12489_v19 = vrot.slane %v40_v14, %v12400_v2 }
 0x3df   :  { %v2703_v54 = vpop.f32.mrb[8].mxu1  ;;  %v2897_v49 = vadd.f32 %v2896_v42, %v2882_v21 }
 0x3e0   :  { %v2705_v4 = vpop.f32.mrb[9].mxu1  ;;  %v12473_v44 = vadd.f32 %v2703_v54, %v12369_v60  ;;  %17554 = vst [vmem:[#allocation32_spill] sm:$0xff] %v12489_v19 }
 0x3e1   :  { %v2707_v15 = vpop.f32.mrb[10].mxu1  ;;  %v2898_v22 = vadd.f32 %v2897_v49, %v2883_v37  ;;  %v12481_v55 = vadd.f32 %v2705_v4, %v12369_v60 }
 0x3e2   :  { %v2708_v6 = vpop.f32.mrb[11].mxu1  ;;  %v2884_v47 = vmul.f32 %v12476_v30, %v12473_v44  ;;  %v12492_v15 = vrot.slane %v40_v14, %v12417_v39 }
 0x3e3   :  { %v2885_v9 = vmul.f32 %v12484_v51, %v12481_v55 }
 0x3e4   :  { %v2899_v34 = vadd.f32 %v2898_v22, %v2884_v47  ;;  %17555 = vst [vmem:[#allocation38_spill] sm:$0xff] %v12492_v15  ;;  %v12511_v47 = vpop.permute.xlu1 %4274 }
 0x3e5   :  { %17558 = vst [vmem:[#allocation20_spill] sm:$0xff] %v12511_v47 }
 0x3e6   :  { %v2900_v7 = vadd.f32 %v2899_v34, %v2885_v9 }
 0x418   :  { %v2744_v54 = vpop.f32.mrb[12].mxu0 }
 0x419   :  { %v2745_v6 = vadd.f32 %v2744_v54, %v12369_v60  ;;  %v2746_v63 = vpop.f32.mrb[13].mxu0 }
 0x41a   :  { %v12496_v4 = vadd.f32 %v2746_v63, %v12369_v60  ;;  %v2748_v40 = vpop.f32.mrb[14].mxu0 }
 0x41b   :  { %v2886_v0 = vmul.f32 %v12489_v19, %v2745_v6  ;;  %v2749_v45 = vpop.f32.mrb[15].mxu0 }
 0x41c   :  { %v2887_v57 = vmul.f32 %v12492_v15, %v12496_v4  ;;  %v2785_v11 = vpop.f32.mrb[12].mxu1 }
 0x41d   :  { %v2901_v36 = vadd.f32 %v2900_v7, %v2886_v0  ;;  %v2786_v41 = vadd.f32 %v2785_v11, %v12369_v60  ;;  %v2787_v50 = vpop.f32.mrb[13].mxu1 }
 0x41e   :  { %v2788_v17 = vadd.f32 %v2787_v50, %v12369_v60  ;;  %v2789_v16 = vpop.f32.mrb[14].mxu1 }
 0x41f   :  { %v2902_v52 = vadd.f32 %v2901_v36, %v2887_v57  ;;  %v2888_v21 = vmul.f32 %v12502_v25, %v2786_v41  ;;  %v2790_v42 = vpop.f32.mrb[15].mxu1 }
 0x420   :  { %v2889_v49 = vmul.f32 %v12505_v8, %v2788_v17 }
 0x421   :  { %v2903_v37 = vadd.f32 %v2902_v52, %v2888_v21 }
 0x423   :  { %v2904_v22 = vadd.f32 %v2903_v37, %v2889_v49 }
 0x425   :  { %2905 = vadd.xlane.f32.xlu1 %v2904_v22 }
 0x4b2   :  { %v2906_v34 = vpop.xlane.xlu1 %2905 }
 0x4b3   :  { %v2907_v14 = vmul.f32 0.0009765625, %v2906_v34 }
 0x4b5   :  { %v12514_v9 = vsub.f32 %v12375_v31, %v2907_v14  ;;  %v12517_v54 = vsub.f32 %v12378_v29, %v2907_v14  ;;  %v12520_v60 = vsub.f32 %v12394_v12, %v2907_v14  ;;  %v12527_v7 = vsub.f32 %v12405_v33, %v2907_v14 }
 0x4b6   :  { %v12530_v0 = vsub.f32 %v12411_v1, %v2907_v14  ;;  %v12537_v45 = vsub.f32 %v12427_v26, %v2907_v14  ;;  %v12542_v36 = vsub.f32 %v12438_v61, %v2907_v14  ;;  %v12548_v50 = vsub.f32 %v12449_v58, %v2907_v14 }
 0x4b7   :  { %v2924_v63 = vmul.f32 %v12514_v9, %v12514_v9  ;;  %v2925_v40 = vmul.f32 %v12517_v54, %v12517_v54  ;;  %v2926_v31 = vmul.f32 %v12520_v60, %v12520_v60  ;;  %v2927_v57 = vmul.f32 %v12527_v7, %v12527_v7 }
 0x4b8   :  { %v2928_v33 = vmul.f32 %v12530_v0, %v12530_v0  ;;  %v2929_v52 = vmul.f32 %v12537_v45, %v12537_v45  ;;  %v12554_v21 = vsub.f32 %v12455_v56, %v2907_v14  ;;  %v2930_v61 = vmul.f32 %v12542_v36, %v12542_v36 }
 0x4b9   :  { %v2940_v29 = vmul.f32 %v2924_v63, %v12372_v43  ;;  %v2941_v12 = vmul.f32 %v2925_v40, %v12381_v46  ;;  %v2942_v1 = vmul.f32 %v2926_v31, %v12397_v13  ;;  %v2943_v26 = vmul.f32 %v2927_v57, %v12408_v53 }
 0x4ba   :  { %v2944_v42 = vmul.f32 %v2928_v33, %v12414_v38  ;;  %v12560_v37 = vsub.f32 %v12465_v3, %v2907_v14  ;;  %v2931_v58 = vmul.f32 %v12548_v50, %v12548_v50  ;;  %v2945_v22 = vmul.f32 %v2929_v52, %v12430_v62 }
 0x4bb   :  { %v2956_v11 = vadd.f32 %v2941_v12, %v2940_v29  ;;  %v12566_v63 = vsub.f32 %v12473_v44, %v2907_v14  ;;  %v2932_v56 = vmul.f32 %v12554_v21, %v12554_v21  ;;  %v2946_v40 = vmul.f32 %v2930_v61, %v12433_v48 }
 0x4bc   :  { %v12572_v29 = vsub.f32 %v12481_v55, %v2907_v14  ;;  %v2933_v3 = vmul.f32 %v12560_v37, %v12560_v37  ;;  %v2947_v12 = vmul.f32 %v2931_v58, %v12452_v32  ;;  %v12577_v33 = vsub.f32 %v2745_v6, %v2907_v14 }
 0x4bd   :  { %v2957_v16 = vadd.f32 %v2956_v11, %v2942_v1  ;;  %v2934_v44 = vmul.f32 %v12566_v63, %v12566_v63  ;;  %v2948_v1 = vmul.f32 %v2932_v56, %v12458_v18  ;;  %v12583_v52 = vsub.f32 %v12496_v4, %v2907_v14 }
 0x4be   :  { %v2935_v55 = vmul.f32 %v12572_v29, %v12572_v29  ;;  %v12588_v61 = vsub.f32 %v2786_v41, %v2907_v14  ;;  %v2936_v6 = vmul.f32 %v12577_v33, %v12577_v33  ;;  %v12593_v58 = vsub.f32 %v2788_v17, %v2907_v14 }
 0x4bf   :  { %v2958_v49 = vadd.f32 %v2957_v16, %v2943_v26  ;;  %v2949_v26 = vmul.f32 %v2933_v3, %v12468_v24  ;;  %v2937_v4 = vmul.f32 %v12583_v52, %v12583_v52 }
 0x4c0   :  { %v2938_v56 = vmul.f32 %v12588_v61, %v12588_v61  ;;  %v2952_v41 = vmul.f32 %v2936_v6, %v12489_v19 }
 0x4c1   :  { %v2959_v34 = vadd.f32 %v2958_v49, %v2944_v42  ;;  %v2950_v42 = vmul.f32 %v2934_v44, %v12476_v30  ;;  %v2953_v3 = vmul.f32 %v2937_v4, %v12492_v15 }
 0x4c2   :  { %v2954_v17 = vmul.f32 %v2938_v56, %v12502_v25 }
 0x4c3   :  { %v2960_v31 = vadd.f32 %v2959_v34, %v2945_v22  ;;  %v2951_v22 = vmul.f32 %v2935_v55, %v12484_v51 }
 0x4c5   :  { %v2961_v57 = vadd.f32 %v2960_v31, %v2946_v40  ;;  %v2939_v31 = vmul.f32 %v12593_v58, %v12593_v58 }
 0x4c7   :  { %v2962_v11 = vadd.f32 %v2961_v57, %v2947_v12  ;;  %v2955_v57 = vmul.f32 %v2939_v31, %v12505_v8 }
 0x4c9   :  { %v2963_v16 = vadd.f32 %v2962_v11, %v2948_v1  ;;  %v12606_v11 = vpop.permute.xlu0 %3000 }
 0x4cb   :  { %v2964_v49 = vadd.f32 %v2963_v16, %v2949_v26 }
 0x4cd   :  { %v2965_v34 = vadd.f32 %v2964_v49, %v2950_v42  ;;  %v12608_v55 = vpop.permute.xlu0 %4324  ;;  %v65_v42 = vld [vmem:[%s16237_s3] sm:$0xff]  ;;  %s8959_s3 = smov 111  }
 0x4ce   :  { %17559 = vst [vmem:[#allocation37_spill] sm:$0xff] %v12608_v55 }
 0x4cf   :  { %v2966_v40 = vadd.f32 %v2965_v34, %v2951_v22 }
 0x4d1   :  { %v2967_v12 = vadd.f32 %v2966_v40, %v2952_v41 }
 0x4d3   :  { %v2968_v14 = vadd.f32 %v2967_v12, %v2953_v3 }
 0x4d5   :  { %v2969_v44 = vadd.f32 %v2968_v14, %v2954_v17 }
 0x4d7   :  { %v2970_v1 = vadd.f32 %v2969_v44, %v2955_v57 }
 0x4d9   :  { %2971 = vadd.xlane.f32.xlu0 %v2970_v1 }
 0x566   :  { %v2972_v26 = vpop.xlane.xlu0 %2971 }
 0x567   :  { %v2973_v16 = vmul.f32 0.0009765625, %v2972_v26 }
 0x569   :  { %v2974_v6 = vadd.f32 1e-05, %v2973_v16 }
 0x56b   :  { %8900 = vrsqrt.f32 %v2974_v6 }
 0x575   :  { %v8901_v49 = vpop.eup %8900 }
 0x576   :  { %v2976_v4 = vmul.f32 %v8901_v49, %v65_v42 }
 0x578   :  { %2979 = vperm.xlu1 %7544, %v2976_v4  }
 0x5f7   :  { %v2980_v22 = vpop.permute.xlu1 %2979 }
 0x5f8   :  { %v2984_v34 = vmul.f32 %v2980_v22, %v12520_v60  ;;  %v2982_v56 = vmul.f32 %v2980_v22, %v12514_v9  ;;  %v2986_v41 = vmul.f32 %v2980_v22, %v12530_v0  ;;  %v2983_v40 = vmul.f32 %v2980_v22, %v12517_v54 }
 0x5f9   :  { %v2988_v12 = vmul.f32 %v2980_v22, %v12542_v36  ;;  %v2985_v17 = vmul.f32 %v2980_v22, %v12527_v7  ;;  %v2990_v9 = vmul.f32 %v2980_v22, %v12554_v21  ;;  %v2987_v54 = vmul.f32 %v2980_v22, %v12537_v45 }
 0x5fa   :  { %v3005_v31 = vadd.f32 %v12606_v11, %v2984_v34  ;;  %v3003_v3 = vadd.f32 %v12606_v11, %v2982_v56  ;;  %v3007_v44 = vadd.f32 %v12606_v11, %v2986_v41  ;;  %v3004_v60 = vadd.f32 %v12606_v11, %v2983_v40 }
 0x5fb   :  { %v3009_v36 = vadd.f32 %v12606_v11, %v2988_v12  ;;  %v3006_v7 = vadd.f32 %v12606_v11, %v2985_v17  ;;  %v3011_v26 = vadd.f32 %v12606_v11, %v2990_v9  ;;  %v3008_v16 = vadd.f32 %v12606_v11, %v2987_v54 }
 0x5fc   :  { %v3021_v14 = vmax.f32 %v3005_v31, 0.0  ;;  %v3019_v57 = vmax.f32 %v3003_v3, 0.0  ;;  %v3023_v0 = vmax.f32 %v3007_v44, 0.0  ;;  %v3020_v1 = vmax.f32 %v3004_v60, 0.0 }
 0x5fd   :  { %v3025_v6 = vmax.f32 %v3009_v36, 0.0  ;;  %v3022_v42 = vmax.f32 %v3006_v7, 0.0  ;;  %v2992_v21 = vmul.f32 %v2980_v22, %v12566_v63  ;;  %v2989_v45 = vmul.f32 %v2980_v22, %v12548_v50 }
 0x5fe   :  { %3055 = vrot.lane.b32.xlu0 %v3021_v14, %s8959_s3  ;;  %3051 = vrot.lane.b32.xlu1 %v3019_v57, %s8959_s3  ;;  %v3027_v49 = vmax.f32 %v3011_v26, 0.0  ;;  %v3024_v4 = vmax.f32 %v3008_v16, 0.0  ;;  %v2994_v41 = vmul.f32 %v2980_v22, %v12577_v33  ;;  %v2991_v40 = vmul.f32 %v2980_v22, %v12560_v37 }
 0x5ff   :  { %v3013_v34 = vadd.f32 %v12606_v11, %v2992_v21  ;;  %v3010_v56 = vadd.f32 %v12606_v11, %v2989_v45  ;;  %v2996_v50 = vmul.f32 %v2980_v22, %v12588_v61  ;;  %v2993_v63 = vmul.f32 %v2980_v22, %v12572_v29 }
 0x600   :  { %v3015_v12 = vadd.f32 %v12606_v11, %v2994_v41  ;;  %v3012_v17 = vadd.f32 %v12606_v11, %v2991_v40  ;;  %v2995_v37 = vmul.f32 %v2980_v22, %v12583_v52  ;;  %v2997_v9 = vmul.f32 %v2980_v22, %v12593_v58 }
 0x601   :  { %v3029_v31 = vmax.f32 %v3013_v34, 0.0  ;;  %v3026_v3 = vmax.f32 %v3010_v56, 0.0  ;;  %v3017_v57 = vadd.f32 %v12606_v11, %v2996_v50  ;;  %v3014_v61 = vadd.f32 %v12606_v11, %v2993_v63 }
 0x602   :  { %3059 = vrot.lane.b32.xlu0 %v3023_v0, %s8959_s3  ;;  %3053 = vrot.lane.b32.xlu1 %v3020_v1, %s8959_s3  ;;  %v3031_v33 = vmax.f32 %v3015_v12, 0.0  ;;  %v3028_v14 = vmax.f32 %v3012_v17, 0.0  ;;  %v3016_v60 = vadd.f32 %v12606_v11, %v2995_v37  ;;  %v3018_v54 = vadd.f32 %v12606_v11, %v2997_v9  ;;  %v41_v1 = vld [vmem:[%s16235_s10] sm:$0xff]  ;;  %v42_v9 = vld [vmem:[%s16235_s10 + $0x8] sm:$0xff]  ;;  %s17618_s10 = smov 39  }
 0x603   :  { %v3033_v29 = vmax.f32 %v3017_v57, 0.0  ;;  %v3030_v44 = vmax.f32 %v3014_v61, 0.0  ;;  %v3124_v58 = vrot.slane %v41_v1, %v12364_v5  ;;  %v3128_v22 = vrot.slane %v41_v1, %v12353_v28 }
 0x604   :  { %v3032_v52 = vmax.f32 %v3016_v60, 0.0  ;;  %v3034_v0 = vmax.f32 %v3018_v54, 0.0  ;;  %v3132_v21 = vrot.slane %v41_v1, %v12384_v35  ;;  %v3140_v63 = vrot.slane %v41_v1, %v12400_v2 }
 0x605   :  { %v3148_v61 = vrot.slane %v41_v1, %v12422_v27 }
 0x606   :  { %3063 = vrot.lane.b32.xlu0 %v3025_v6, %s8959_s3  ;;  %3057 = vrot.lane.b32.xlu1 %v3022_v42, %s8959_s3 }
 0x60a   :  { %3067 = vrot.lane.b32.xlu0 %v3027_v49, %s8959_s3  ;;  %3061 = vrot.lane.b32.xlu1 %v3024_v4, %s8959_s3  ;;  %v3136_v49 = vrot.slane %v41_v1, %v12387_v10 }
 0x60e   :  { %3071 = vrot.lane.b32.xlu0 %v3029_v31, %s8959_s3  ;;  %3065 = vrot.lane.b32.xlu1 %v3026_v3, %s8959_s3  ;;  %v3144_v3 = vrot.slane %v41_v1, %v12417_v39 }
 0x612   :  { %3075 = vrot.lane.b32.xlu0 %v3031_v33, %s8959_s3  ;;  %3069 = vrot.lane.b32.xlu1 %v3028_v14, %s8959_s3 }
 0x616   :  { %3079 = vrot.lane.b32.xlu0 %v3033_v29, %s8959_s3  ;;  %3073 = vrot.lane.b32.xlu1 %v3030_v44, %s8959_s3  ;;  %v3152_v44 = vrot.slane %v41_v1, %v12441_v59  ;;  %v3160_v1 = vrot.slane %v42_v9, %v12353_v28  ;;  %v3168_v28 = vrot.slane %v42_v9, %v12387_v10 }
 0x617   :  { %v3176_v10 = vrot.slane %v42_v9, %v12417_v39  ;;  %v3184_v39 = vrot.slane %v42_v9, %v12441_v59 }
 0x61a   :  { %3077 = vrot.lane.b32.xlu1 %v3032_v52, %s8959_s3 }
 0x61e   :  { %3081 = vrot.lane.b32.xlu1 %v3034_v0, %s8959_s3 }
 0x670   :  { %v3056_v36 = vpop.permute.xlu0 %3055  ;;  %v3052_v7 = vpop.permute.xlu1 %3051 }
 0x671   :  { %v3116_v26 = vsel %vm3083_vm10, 0.0, %v3052_v7 }
 0x672   :  { %v12668_v42 = vmul.f32 %v3124_v58, %v3116_v26  ;;  %v3156_v58 = vrot.slane %v42_v9, %v12364_v5 }
 0x674   :  { %v3060_v16 = vpop.permute.xlu0 %3059  ;;  %v3054_v11 = vpop.permute.xlu1 %3053 }
 0x675   :  { %v3084_v6 = vsel %vm3083_vm10, %v3052_v7, %v3054_v11  ;;  %v3085_v4 = vsel %vm3083_vm10, %v3054_v11, %v3056_v36 }
 0x676   :  { %v12671_v45 = vmul.f32 %v3128_v22, %v3084_v6  ;;  %v12680_v50 = vmul.f32 %v3132_v21, %v3085_v4 }
 0x678   :  { %v3064_v34 = vpop.permute.xlu0 %3063  ;;  %v3058_v56 = vpop.permute.xlu1 %3057  ;;  %v12677_v41 = vpack.i.bf16 %v12671_v45, %v12668_v42 }
 0x679   :  { %v3086_v40 = vsel %vm3083_vm10, %v3056_v36, %v3058_v56  ;;  %v3087_v12 = vsel %vm3083_vm10, %v3058_v56, %v3060_v16 }
 0x67a   :  { %v12683_v31 = vmul.f32 %v3136_v49, %v3086_v40  ;;  %7546 = vrot.lane.b32.xlu0 %v12677_v41, %s8935_s14  ;;  %v12694_v57 = vmul.f32 %v3140_v63, %v3087_v12  ;;  %v3164_v49 = vrot.slane %v42_v9, %v12384_v35  ;;  %v3172_v35 = vrot.slane %v42_v9, %v12400_v2 }
 0x67b   :  { %v3180_v2 = vrot.slane %v42_v9, %v12422_v27 }
 0x67c   :  { %v3068_v17 = vpop.permute.xlu0 %3067  ;;  %v3062_v37 = vpop.permute.xlu1 %3061  ;;  %v12691_v33 = vpack.i.bf16 %v12683_v31, %v12680_v50  ;;  %17560 = vst [vmem:[#allocation13_spill] sm:$0xff] %v12694_v57 }
 0x67d   :  { %v3088_v14 = vsel %vm3083_vm10, %v3060_v16, %v3062_v37  ;;  %v3089_v60 = vsel %vm3083_vm10, %v3062_v37, %v3064_v34 }
 0x67e   :  { %v12697_v29 = vmul.f32 %v3144_v3, %v3088_v14  ;;  %7551 = vrot.lane.b32.xlu1 %v12691_v33, %s8935_s14  ;;  %v12711_v36 = vmul.f32 %v3148_v61, %v3089_v60 }
 0x680   :  { %17561 = vst [vmem:[#allocation15_spill] sm:$0xff] %v12697_v29  ;;  %v3066_v52 = vpop.permute.xlu1 %3065  ;;  %v12708_v54 = vpack.i.bf16 %v12697_v29, %v12694_v57  ;;  %17562 = vst [vmem:[#allocation44_spill] sm:$0xff] %v12711_v36  ;;  %v3072_v7 = vpop.permute.xlu0 %3071 }
 0x681   :  { %v3090_v0 = vsel %vm3083_vm10, %v3064_v34, %v3066_v52  ;;  %v3091_v26 = vsel %vm3083_vm10, %v3066_v52, %v3068_v17 }
 0x682   :  { %v12714_v22 = vmul.f32 %v3152_v44, %v3090_v0  ;;  %7556 = vrot.lane.b32.xlu0 %v12708_v54, %s8935_s14  ;;  %v12725_v21 = vmul.f32 %v3156_v58, %v3091_v26  ;;  %v3188_v58 = vrot.slane %v12350_v23, %v12364_v5 }
 0x684   :  { %17563 = vst [vmem:[#allocation36_spill] sm:$0xff] %v12714_v22  ;;  %v3070_v16 = vpop.permute.xlu1 %3069  ;;  %v12722_v11 = vpack.i.bf16 %v12714_v22, %v12711_v36  ;;  %17564 = vst [vmem:[#allocation54_spill] sm:$0xff] %v12725_v21  ;;  %v3076_v56 = vpop.permute.xlu0 %3075 }
 0x685   :  { %v3092_v6 = vsel %vm3083_vm10, %v3068_v17, %v3070_v16  ;;  %v3093_v34 = vsel %vm3083_vm10, %v3070_v16, %v3072_v7 }
 0x686   :  { %v12728_v4 = vmul.f32 %v3160_v1, %v3092_v6  ;;  %7561 = vrot.lane.b32.xlu1 %v12722_v11, %s8935_s14  ;;  %v12739_v12 = vmul.f32 %v3164_v49, %v3093_v34 }
 0x688   :  { %17565 = vst [vmem:[#allocation70_spill] sm:$0xff] %v12728_v4  ;;  %v3074_v40 = vpop.permute.xlu1 %3073  ;;  %v12736_v63 = vpack.i.bf16 %v12728_v4, %v12725_v21  ;;  %17566 = vst [vmem:[#allocation53_spill] sm:$0xff] %v12739_v12  ;;  %v3080_v60 = vpop.permute.xlu0 %3079 }
 0x689   :  { %v3094_v3 = vsel %vm3083_vm10, %v3072_v7, %v3074_v40  ;;  %v3095_v37 = vsel %vm3083_vm10, %v3074_v40, %v3076_v56 }
 0x68a   :  { %v12742_v17 = vmul.f32 %v3168_v28, %v3094_v3  ;;  %7566 = vrot.lane.b32.xlu0 %v12736_v63, %s8935_s14  ;;  %v12753_v52 = vmul.f32 %v3172_v35, %v3095_v37 }
 0x68c   :  { %17567 = vst [vmem:[#allocation29_spill] sm:$0xff] %v12742_v17  ;;  %v3078_v14 = vpop.permute.xlu1 %3077  ;;  %v12750_v61 = vpack.i.bf16 %v12742_v17, %v12739_v12  ;;  %17568 = vst [vmem:[#allocation31_spill] sm:$0xff] %v12753_v52 }
 0x68d   :  { %v3096_v44 = vsel %vm3083_vm10, %v3076_v56, %v3078_v14  ;;  %v3097_v7 = vsel %vm3083_vm10, %v3078_v14, %v3080_v60 }
 0x68e   :  { %v12756_v0 = vmul.f32 %v3176_v10, %v3096_v44  ;;  %7571 = vrot.lane.b32.xlu1 %v12750_v61, %s8935_s14  ;;  %v12770_v6 = vmul.f32 %v3180_v2, %v3097_v7 }
 0x690   :  { %17569 = vst [vmem:[#allocation74_spill] sm:$0xff] %v12756_v0  ;;  %v3082_v1 = vpop.permute.xlu1 %3081  ;;  %v12766_v26 = vpack.i.bf16 %v12756_v0, %v12753_v52  ;;  %17570 = vst [vmem:[#allocation52_spill] sm:$0xff] %v12770_v6 }
 0x691   :  { %v3098_v16 = vsel %vm3083_vm10, %v3080_v60, %v3082_v1  ;;  %v3117_v27 = vsel %vm3083_vm10, %v3082_v1, 0.0  ;;  %vm17633_vm10 = vmmov %vm17628_vm11 }
 0x692   :  { %v12772_v49 = vmul.f32 %v3184_v39, %v3098_v16  ;;  %7576 = vrot.lane.b32.xlu0 %v12766_v26, %s8935_s14  ;;  %v12776_v59 = vmul.f32 %v3188_v58, %v3117_v27 }
 0x694   :  { %17571 = vst [vmem:[#allocation85_spill] sm:$0xff] %v12772_v49  ;;  %17572 = vst [vmem:[#allocation80_spill] sm:$0xff] %v12776_v59  ;;  %v12780_v23 = vpack.i.bf16 %v12772_v49, %v12770_v6  ;;  %v7905_v48 = vpack.i.bf16 %v12357_v20, %v12776_v59 }
 0x696   :  { %17573 = vst [vmem:[#allocation45_spill] sm:$0xff] %v12780_v23  ;;  %3283 = vrot.lane.b32.xlu0 %v12776_v59, %s8935_s14  ;;  %7581 = vrot.lane.b32.xlu1 %v12780_v23, %s8935_s14  ;;  %s17623_s14 = smov 38  }
 0x69a   :  { %7591 = vrot.lane.b32.xlu0 %v12691_v33, %s8936_s15  ;;  %7586 = vrot.lane.b32.xlu1 %v12677_v41, %s8936_s15 }
 0x69e   :  { %7601 = vrot.lane.b32.xlu0 %v12722_v11, %s8936_s15  ;;  %7596 = vrot.lane.b32.xlu1 %v12708_v54, %s8936_s15 }
 0x6a2   :  { %7611 = vrot.lane.b32.xlu0 %v12750_v61, %s8936_s15  ;;  %7606 = vrot.lane.b32.xlu1 %v12736_v63, %s8936_s15 }
 0x6a6   :  { %7621 = vrot.lane.b32.xlu0 %v12780_v23, %s8936_s15  ;;  %7616 = vrot.lane.b32.xlu1 %v12766_v26, %s8936_s15 }
 0x6aa   :  { %7626 = vrot.lane.b32.xlu0 %v12677_v41, %s8937_s16  ;;  %3349 = vrot.lane.b32.xlu1 %v12776_v59, %s8936_s15  ;;  %s17625_s15 = smov 37  }
 0x6ae   :  { %7636 = vrot.lane.b32.xlu0 %v12708_v54, %s8937_s16  ;;  %7631 = vrot.lane.b32.xlu1 %v12691_v33, %s8937_s16 }
 0x6b2   :  { %7646 = vrot.lane.b32.xlu0 %v12736_v63, %s8937_s16  ;;  %7641 = vrot.lane.b32.xlu1 %v12722_v11, %s8937_s16 }
 0x6b6   :  { %7656 = vrot.lane.b32.xlu0 %v12766_v26, %s8937_s16  ;;  %7651 = vrot.lane.b32.xlu1 %v12750_v61, %s8937_s16 }
 0x6ba   :  { %3415 = vrot.lane.b32.xlu0 %v12776_v59, %s8937_s16  ;;  %7661 = vrot.lane.b32.xlu1 %v12780_v23, %s8937_s16  ;;  %s17642_s16 = smov 29  }
 0x6be   :  { %7671 = vrot.lane.b32.xlu0 %v12691_v33, %s8938_s17  ;;  %7666 = vrot.lane.b32.xlu1 %v12677_v41, %s8938_s17 }
 0x6c2   :  { %7681 = vrot.lane.b32.xlu0 %v12722_v11, %s8938_s17  ;;  %7676 = vrot.lane.b32.xlu1 %v12708_v54, %s8938_s17 }
 0x6c6   :  { %7691 = vrot.lane.b32.xlu0 %v12750_v61, %s8938_s17  ;;  %7686 = vrot.lane.b32.xlu1 %v12736_v63, %s8938_s17 }
 0x6ca   :  { %7701 = vrot.lane.b32.xlu0 %v12780_v23, %s8938_s17  ;;  %7696 = vrot.lane.b32.xlu1 %v12766_v26, %s8938_s17 }
 0x6ce   :  { %7706 = vrot.lane.b32.xlu0 %v12677_v41, %s8939_s18  ;;  %3481 = vrot.lane.b32.xlu1 %v12776_v59, %s8938_s17  ;;  %s17647_s17 = smov 17  }
 0x6d2   :  { %7716 = vrot.lane.b32.xlu0 %v12708_v54, %s8939_s18  ;;  %7711 = vrot.lane.b32.xlu1 %v12691_v33, %s8939_s18 }
 0x6d6   :  { %7726 = vrot.lane.b32.xlu0 %v12736_v63, %s8939_s18  ;;  %7721 = vrot.lane.b32.xlu1 %v12722_v11, %s8939_s18 }
 0x6da   :  { %7736 = vrot.lane.b32.xlu0 %v12766_v26, %s8939_s18  ;;  %7731 = vrot.lane.b32.xlu1 %v12750_v61, %s8939_s18 }
 0x6de   :  { %3547 = vrot.lane.b32.xlu0 %v12776_v59, %s8939_s18  ;;  %7741 = vrot.lane.b32.xlu1 %v12780_v23, %s8939_s18  ;;  %s17648_s18 = smov 18  }
 0x6e2   :  { %7751 = vrot.lane.b32.xlu0 %v12691_v33, %s8940_s19  ;;  %7746 = vrot.lane.b32.xlu1 %v12677_v41, %s8940_s19 }
 0x6e6   :  { %7761 = vrot.lane.b32.xlu0 %v12722_v11, %s8940_s19  ;;  %7756 = vrot.lane.b32.xlu1 %v12708_v54, %s8940_s19 }
 0x6ea   :  { %7771 = vrot.lane.b32.xlu0 %v12750_v61, %s8940_s19  ;;  %7766 = vrot.lane.b32.xlu1 %v12736_v63, %s8940_s19 }
 0x6ec   :  { %v7547_v5 = vpop.permute.xlu0 %7546 }
 0x6ed   :  { %v7549_v9 = vunpack.i.h.bf16 %v7547_v5  ;;  %v7548_v28 = vunpack.i.l.bf16 %v7547_v5 }
 0x6ee   :  { %7781 = vrot.lane.b32.xlu0 %v12780_v23, %s8940_s19  ;;  %7776 = vrot.lane.b32.xlu1 %v12766_v26, %s8940_s19 }
 0x6ef   :  { %v12879_v3 = vsel %vm118_vm0, %v7548_v28, %v7549_v9 }
 0x6f0   :  { %v7552_v34 = vpop.permute.xlu1 %7551  ;;  %v5326_v39 = vpack.c.bf16 %v12879_v3, %v12668_v42 }
 0x6f1   :  { %v7554_v56 = vunpack.i.h.bf16 %v7552_v34  ;;  %v7553_v40 = vunpack.i.l.bf16 %v7552_v34 }
 0x6f2   :  { %7786 = vrot.lane.b32.xlu0 %v12677_v41, %s8941_s20  ;;  %3613 = vrot.lane.b32.xlu1 %v12776_v59, %s8940_s19  ;;  %s17653_s19 = smov 8  }
 0x6f3   :  { %v12882_v35 = vsel %vm118_vm0, %v7549_v9, %v7553_v40  ;;  %v12885_v10 = vsel %vm118_vm0, %v7553_v40, %v7554_v56 }
 0x6f4   :  { %v12887_v37 = vpop.permute.xlu0 %7556  ;;  %v5327_v44 = vpack.c.bf16 %v12882_v35, %v12671_v45  ;;  %v5328_v27 = vpack.c.bf16 %v12885_v10, %v12680_v50 }
 0x6f5   :  { %17574 = vst [vmem:[#allocation47_spill] sm:$0xff] %v12887_v37  ;;  %v16536_v60 = vunpack.i.h.bf16 %v12887_v37  ;;  %v7558_v2 = vunpack.i.l.bf16 %v12887_v37 }
 0x6f6   :  { %7796 = vrot.lane.b32.xlu0 %v12708_v54, %s8941_s20  ;;  %7791 = vrot.lane.b32.xlu1 %v12691_v33, %s8941_s20 }
 0x6f7   :  { %5606 = vmatprep.subr.bf16.mxu0 %v5327_v44  ;;  %v12902_v7 = vsel %vm118_vm0, %v7554_v56, %v7558_v2  ;;  %v12907_v58 = vsel %vm118_vm0, %v7558_v2, %v16536_v60 }
 0x6f8   :  { %17575 = vst [vmem:[#allocation71_spill] sm:$0xff] %v12907_v58  ;;  %5607 = vmatpush1.bf16.msra.mxu0 %v5326_v39  ;;  %v5329_v16 = vpack.c.bf16 %v12902_v7, %v12683_v31  ;;  %v12923_v5 = vpop.permute.xlu1 %7561 }
 0x6f9   :  { %17576 = vst [vmem:[#allocation90_spill] sm:$0xff] %v12923_v5 }
 0x6fa   :  { %7806 = vrot.lane.b32.xlu0 %v12736_v63, %s8941_s20  ;;  %7801 = vrot.lane.b32.xlu1 %v12722_v11, %s8941_s20 }
 0x6fb   :  { %5647 = vmatprep.subr.bf16.mxu1 %v5329_v16 }
 0x6fc   :  { %5648 = vmatpush1.bf16.msra.mxu1 %v5328_v27  ;;  %v12925_v9 = vpop.permute.xlu0 %7566 }
 0x6fd   :  { %17577 = vst [vmem:[#allocation79_spill] sm:$0xff] %v12925_v9 }
 0x6fe   :  { %7816 = vrot.lane.b32.xlu0 %v12766_v26, %s8941_s20  ;;  %7811 = vrot.lane.b32.xlu1 %v12750_v61, %s8941_s20 }
 0x700   :  { %v12931_v28 = vpop.permute.xlu1 %7571 }
 0x701   :  { %17578 = vst [vmem:[#allocation101_spill] sm:$0xff] %v12931_v28 }
 0x702   :  { %3679 = vrot.lane.b32.xlu0 %v12776_v59, %s8941_s20  ;;  %7821 = vrot.lane.b32.xlu1 %v12780_v23, %s8941_s20  ;;  %s17654_s20 = smov 16  }
 0x704   :  { %v12933_v34 = vpop.permute.xlu0 %7576 }
 0x705   :  { %17579 = vst [vmem:[#allocation106_spill] sm:$0xff] %v12933_v34 }
 0x706   :  { %7831 = vrot.lane.b32.xlu0 %v12691_v33, %s8942_s21  ;;  %7826 = vrot.lane.b32.xlu1 %v12677_v41, %s8942_s21 }
 0x708   :  { %v12939_v56 = vpop.permute.xlu0 %3283  ;;  %v12941_v40 = vpop.permute.xlu1 %7581 }
 0x709   :  { %17580 = vst [vmem:[#allocation142_spill] sm:$0xff] %v12939_v56  ;;  %17581 = vst [vmem:[#allocation86_spill] sm:$0xff] %v12941_v40 }
 0x70a   :  { %7841 = vrot.lane.b32.xlu0 %v12722_v11, %s8942_s21  ;;  %7836 = vrot.lane.b32.xlu1 %v12708_v54, %s8942_s21 }
 0x70c   :  { %v7592_v44 = vpop.permute.xlu0 %7591  ;;  %v7587_v2 = vpop.permute.xlu1 %7586 }
 0x70d   :  { %v7594_v8 = vunpack.i.h.bf16 %v7592_v44  ;;  %v7593_v25 = vunpack.i.l.bf16 %v7592_v44  ;;  %v7589_v15 = vunpack.i.h.bf16 %v7587_v2  ;;  %v7588_v62 = vunpack.i.l.bf16 %v7587_v2 }
 0x70e   :  { %7851 = vrot.lane.b32.xlu0 %v12750_v61, %s8942_s21  ;;  %7846 = vrot.lane.b32.xlu1 %v12736_v63, %s8942_s21 }
 0x70f   :  { %v3353_v44 = vsel %vm185_vm1, %v7593_v25, %v7594_v8  ;;  %v3352_v30 = vsel %vm185_vm1, %v7589_v15, %v7593_v25 }
 0x710   :  { %v12951_v39 = vpop.permute.xlu0 %7601  ;;  %v12953_v16 = vpop.permute.xlu1 %7596 }
 0x711   :  { %17582 = vst [vmem:[#allocation96_spill] sm:$0xff] %v12951_v39  ;;  %17583 = vst [vmem:[#allocation59_spill] sm:$0xff] %v12953_v16  ;;  %v7598_v24 = vunpack.i.l.bf16 %v12953_v16 }
 0x712   :  { %7861 = vrot.lane.b32.xlu0 %v12780_v23, %s8942_s21  ;;  %7856 = vrot.lane.b32.xlu1 %v12766_v26, %s8942_s21 }
 0x713   :  { %v3354_v25 = vsel %vm185_vm1, %v7594_v8, %v7598_v24  ;;  %v3351_v8 = vsel %vm185_vm1, %v7588_v62, %v7589_v15 }
 0x714   :  { %v12959_v27 = vpop.permute.xlu0 %7611  ;;  %v12961_v60 = vpop.permute.xlu1 %7606 }
 0x715   :  { %17584 = vst [vmem:[#allocation61_spill] sm:$0xff] %v12959_v27  ;;  %17585 = vst [vmem:[#allocation141_spill] sm:$0xff] %v12961_v60 }
 0x716   :  { %7866 = vrot.lane.b32.xlu0 %v12677_v41, %s8943_s22  ;;  %3745 = vrot.lane.b32.xlu1 %v12776_v59, %s8942_s21 }
 0x718   :  { %v12967_v1 = vpop.permute.xlu0 %7621  ;;  %v12969_v14 = vpop.permute.xlu1 %7616 }
 0x719   :  { %17586 = vst [vmem:[#allocation95_spill] sm:$0xff] %v12967_v1  ;;  %17587 = vst [vmem:[#allocation78_spill] sm:$0xff] %v12969_v14 }
 0x71a   :  { %7876 = vrot.lane.b32.xlu0 %v12708_v54, %s8943_s22  ;;  %7871 = vrot.lane.b32.xlu1 %v12691_v33, %s8943_s22 }
 0x71c   :  { %v7627_v19 = vpop.permute.xlu0 %7626  ;;  %v12975_v51 = vpop.permute.xlu1 %3349 }
 0x71d   :  { %17588 = vst [vmem:[#allocation137_spill] sm:$0xff] %v12975_v51  ;;  %v7629_v18 = vunpack.i.h.bf16 %v7627_v19  ;;  %v7628_v32 = vunpack.i.l.bf16 %v7627_v19  ;;  %v17590_v51 = vunpack.i.h.bf16 %v12953_v16 }
 0x71e   :  { %7886 = vrot.lane.b32.xlu0 %v12736_v63, %s8943_s22  ;;  %7881 = vrot.lane.b32.xlu1 %v12722_v11, %s8943_s22 }
 0x71f   :  { %v12994_v1 = vsel %vm185_vm1, %v7598_v24, %v17590_v51  ;;  %v3417_v55 = vsel %vm252_vm2, %v7628_v32, %v7629_v18 }
 0x720   :  { %v12986_v38 = vpop.permute.xlu0 %7636  ;;  %v7632_v53 = vpop.permute.xlu1 %7631  ;;  %17591 = vst [vmem:[#allocation72_spill] sm:$0xff] %v12994_v1 }
 0x721   :  { %17589 = vst [vmem:[#allocation102_spill] sm:$0xff] %v12986_v38  ;;  %v16574_v13 = vunpack.i.h.bf16 %v12986_v38  ;;  %v7638_v19 = vunpack.i.l.bf16 %v12986_v38  ;;  %v7634_v46 = vunpack.i.h.bf16 %v7632_v53  ;;  %v7633_v43 = vunpack.i.l.bf16 %v7632_v53 }
 0x722   :  { %7896 = vrot.lane.b32.xlu0 %v12766_v26, %s8943_s22  ;;  %7891 = vrot.lane.b32.xlu1 %v12750_v61, %s8943_s22 }
 0x723   :  { %v13005_v2 = vsel %vm252_vm2, %v7638_v19, %v16574_v13  ;;  %v3419_v53 = vsel %vm252_vm2, %v7633_v43, %v7634_v46  ;;  %v3418_v51 = vsel %vm252_vm2, %v7629_v18, %v7633_v43  ;;  %v3420_v47 = vsel %vm252_vm2, %v7634_v46, %v7638_v19 }
 0x724   :  { %17592 = vst [vmem:[#allocation65_spill] sm:$0xff] %v13005_v2  ;;  %v13010_v32 = vpop.permute.xlu0 %7646  ;;  %v13012_v14 = vpop.permute.xlu1 %7641  ;;  %v5343_v16 = vpack.c.bf16 %v3418_v51, %v3352_v30  ;;  %v5345_v60 = vpack.c.bf16 %v3420_v47, %v3354_v25  ;;  %v5344_v27 = vpack.c.bf16 %v3419_v53, %v3353_v44  ;;  %v5342_v43 = vpack.c.bf16 %v3417_v55, %v3351_v8 }
 0x725   :  { %17593 = vst [vmem:[#allocation94_spill] sm:$0xff] %v13010_v32  ;;  %17594 = vst [vmem:[#allocation138_spill] sm:$0xff] %v13012_v14  ;;  %v13499_v32 = vpack.i.bf16 %v12776_v59, %v12772_v49 }
 0x726   :  { %7906 = vrot.lane.b32.xlu0 %v7905_v48, %s8943_s22  ;;  %7901 = vrot.lane.b32.xlu1 %v12780_v23, %s8943_s22 }
 0x727   :  { %5608 = vmatprep.subr.bf16.mxu0 %v5343_v16  ;;  %5649 = vmatprep.subr.bf16.mxu1 %v5345_v60 }
 0x728   :  { %5609 = vmatpush1.bf16.msra.mxu0 %v5342_v43  ;;  %5650 = vmatpush1.bf16.msra.mxu1 %v5344_v27  ;;  %v13020_v46 = vpop.permute.xlu0 %7656  ;;  %v13022_v18 = vpop.permute.xlu1 %7651 }
 0x729   :  { %17595 = vst [vmem:[#allocation87_spill] sm:$0xff] %v13020_v46  ;;  %17596 = vst [vmem:[#allocation89_spill] sm:$0xff] %v13022_v18 }
 0x72a   :  { %7916 = vrot.lane.b32.xlu0 %v12691_v33, %s8944_s25  ;;  %7911 = vrot.lane.b32.xlu1 %v12677_v41, %s8944_s25 }
 0x72c   :  { %v13028_v62 = vpop.permute.xlu0 %3415  ;;  %v13030_v30 = vpop.permute.xlu1 %7661 }
 0x72d   :  { %17597 = vst [vmem:[#allocation139_spill] sm:$0xff] %v13028_v62  ;;  %17598 = vst [vmem:[#allocation140_spill] sm:$0xff] %v13030_v30 }
 0x72e   :  { %7926 = vrot.lane.b32.xlu0 %v12722_v11, %s8944_s25  ;;  %7921 = vrot.lane.b32.xlu1 %v12708_v54, %s8944_s25 }
 0x730   :  { %v7672_v15 = vpop.permute.xlu0 %7671  ;;  %v7667_v47 = vpop.permute.xlu1 %7666 }
 0x731   :  { %v7674_v25 = vunpack.i.h.bf16 %v7672_v15  ;;  %v7673_v53 = vunpack.i.l.bf16 %v7672_v15  ;;  %v7669_v51 = vunpack.i.h.bf16 %v7667_v47  ;;  %v7668_v62 = vunpack.i.l.bf16 %v7667_v47 }
 0x732   :  { %7936 = vrot.lane.b32.xlu0 %v12750_v61, %s8944_s25  ;;  %7931 = vrot.lane.b32.xlu1 %v12736_v63, %s8944_s25 }
 0x733   :  { %v3485_v15 = vsel %vm319_vm3, %v7673_v53, %v7674_v25 }
 0x734   :  { %v13040_v55 = vpop.permute.xlu0 %7681  ;;  %v13042_v60 = vpop.permute.xlu1 %7676 }
 0x735   :  { %17599 = vst [vmem:[#allocation103_spill] sm:$0xff] %v13040_v55  ;;  %17600 = vst [vmem:[#allocation105_spill] sm:$0xff] %v13042_v60 }
 0x736   :  { %7946 = vrot.lane.b32.xlu0 %v12780_v23, %s8944_s25  ;;  %7941 = vrot.lane.b32.xlu1 %v12766_v26, %s8944_s25 }
 0x738   :  { %v13048_v16 = vpop.permute.xlu0 %7691  ;;  %v13050_v27 = vpop.permute.xlu1 %7686 }
 0x739   :  { %17601 = vst [vmem:[#allocation119_spill] sm:$0xff] %v13048_v16  ;;  %17602 = vst [vmem:[#allocation116_spill] sm:$0xff] %v13050_v27 }
 0x73a   :  { %7956 = vrot.lane.b32.xlu0 %v12677_v41, %s8945_s26  ;;  %7951 = vrot.lane.b32.xlu1 %v7905_v48, %s8944_s25  ;;  %v7678_v48 = vunpack.i.l.bf16 %v13042_v60 }
 0x73c   :  { %v13055_v44 = vpop.permute.xlu0 %7701  ;;  %v13057_v19 = vpop.permute.xlu1 %7696 }
 0x73d   :  { %17603 = vst [vmem:[#allocation30_spill] sm:$0xff] %v13055_v44  ;;  %17604 = vst [vmem:[#allocation24_spill] sm:$0xff] %v13057_v19  ;;  %v3484_v44 = vsel %vm319_vm3, %v7669_v51, %v7673_v53  ;;  %v17607_v19 = vunpack.i.h.bf16 %v13042_v60 }
 0x73e   :  { %7966 = vrot.lane.b32.xlu0 %v12708_v54, %s8945_s26  ;;  %7961 = vrot.lane.b32.xlu1 %v12691_v33, %s8945_s26  ;;  %v13073_v33 = vpack.i.bf16 %v12680_v50, %v12671_v45  ;;  %v3486_v50 = vsel %vm319_vm3, %v7674_v25, %v7678_v48 }
 0x73f   :  { %v13084_v27 = vsel %vm319_vm3, %v7678_v48, %v17607_v19  ;;  %v3483_v48 = vsel %vm319_vm3, %v7668_v62, %v7669_v51 }
 0x740   :  { %v7707_v8 = vpop.permute.xlu0 %7706  ;;  %v13063_v43 = vpop.permute.xlu1 %3481  ;;  %17608 = vst [vmem:[#allocation144_spill] sm:$0xff] %v13084_v27 }
 0x741   :  { %17605 = vst [vmem:[#allocation66_spill] sm:$0xff] %v13063_v43  ;;  %v7709_v24 = vunpack.i.h.bf16 %v7707_v8  ;;  %v7708_v13 = vunpack.i.l.bf16 %v7707_v8 }
 0x742   :  { %7976 = vrot.lane.b32.xlu0 %v12736_v63, %s8945_s26  ;;  %7971 = vrot.lane.b32.xlu1 %v12722_v11, %s8945_s26 }
 0x743   :  { %v3549_v45 = vsel %vm386_vm4, %v7708_v13, %v7709_v24 }
 0x744   :  { %v13076_v43 = vpop.permute.xlu0 %7716  ;;  %v7712_v41 = vpop.permute.xlu1 %7711 }
 0x745   :  { %17606 = vst [vmem:[#allocation46_spill] sm:$0xff] %v13076_v43  ;;  %v16585_v8 = vunpack.i.h.bf16 %v13076_v43  ;;  %v7718_v30 = vunpack.i.l.bf16 %v13076_v43  ;;  %v7714_v1 = vunpack.i.h.bf16 %v7712_v41  ;;  %v7713_v2 = vunpack.i.l.bf16 %v7712_v41 }
 0x746   :  { %7986 = vrot.lane.b32.xlu0 %v12766_v26, %s8945_s26  ;;  %7981 = vrot.lane.b32.xlu1 %v12750_v61, %s8945_s26 }
 0x747   :  { %v13095_v47 = vsel %vm386_vm4, %v7718_v30, %v16585_v8  ;;  %v3551_v53 = vsel %vm386_vm4, %v7713_v2, %v7714_v1  ;;  %v3550_v19 = vsel %vm386_vm4, %v7709_v24, %v7713_v2  ;;  %v3552_v41 = vsel %vm386_vm4, %v7714_v1, %v7718_v30 }
 0x748   :  { %17609 = vst [vmem:[#allocation148_spill] sm:$0xff] %v13095_v47  ;;  %v13100_v13 = vpop.permute.xlu0 %7726  ;;  %v13102_v16 = vpop.permute.xlu1 %7721  ;;  %v5359_v60 = vpack.c.bf16 %v3550_v19, %v3484_v44  ;;  %v5361_v55 = vpack.c.bf16 %v3552_v41, %v3486_v50  ;;  %v5360_v46 = vpack.c.bf16 %v3551_v53, %v3485_v15  ;;  %v5358_v2 = vpack.c.bf16 %v3549_v45, %v3483_v48 }
 0x749   :  { %17610 = vst [vmem:[#allocation40_spill] sm:$0xff] %v13100_v13  ;;  %17611 = vst [vmem:[#allocation136_spill] sm:$0xff] %v13102_v16  ;;  %v13117_v30 = vpack.i.bf16 %v12694_v57, %v12683_v31 }
 0x74a   :  { %7996 = vrot.lane.b32.xlu0 %v13073_v33, %s8950_s12  ;;  %7991 = vrot.lane.b32.xlu1 %v12780_v23, %s8945_s26 }
 0x74b   :  { %5610 = vmatprep.subr.bf16.mxu0 %v5359_v60  ;;  %5651 = vmatprep.subr.bf16.mxu1 %v5361_v55 }
 0x74c   :  { %5611 = vmatpush1.bf16.msra.mxu0 %v5358_v2  ;;  %5652 = vmatpush1.bf16.msra.mxu1 %v5360_v46  ;;  %v13111_v1 = vpop.permute.xlu0 %7736  ;;  %v13113_v24 = vpop.permute.xlu1 %7731  ;;  %v13129_v46 = vpack.i.bf16 %v12711_v36, %v12697_v29 }
 0x74d   :  { %17612 = vst [vmem:[#allocation113_spill] sm:$0xff] %v13111_v1  ;;  %17613 = vst [vmem:[#allocation4_spill] sm:$0xff] %v13113_v24 }
 0x74e   :  { %8006 = vrot.lane.b32.xlu0 %v13073_v33, %s8951_s30  ;;  %8001 = vrot.lane.b32.xlu1 %v13117_v30, %s8950_s12 }
 0x750   :  { %v13123_v62 = vpop.permute.xlu0 %3547  ;;  %v13125_v60 = vpop.permute.xlu1 %7741 }
 0x751   :  { %17614 = vst [vmem:[#allocation8_spill] sm:$0xff] %v13123_v62  ;;  %17615 = vst [vmem:[#allocation56_spill] sm:$0xff] %v13125_v60 }
 0x752   :  { %8016 = vrot.lane.b32.xlu0 %v13129_v46, %s8950_s12  ;;  %8011 = vrot.lane.b32.xlu1 %v13117_v30, %s8951_s30 }
 0x754   :  { %v7752_v55 = vpop.permute.xlu0 %7751  ;;  %v7747_v44 = vpop.permute.xlu1 %7746 }
 0x755   :  { %v7754_v41 = vunpack.i.h.bf16 %v7752_v55  ;;  %v7753_v48 = vunpack.i.l.bf16 %v7752_v55  ;;  %v7749_v2 = vunpack.i.h.bf16 %v7747_v44  ;;  %v7748_v23 = vunpack.i.l.bf16 %v7747_v44 }
 0x756   :  { %8026 = vrot.lane.b32.xlu0 %v13073_v33, %s8952_s24  ;;  %8021 = vrot.lane.b32.xlu1 %v13129_v46, %s8951_s30 }
 0x757   :  { %v3617_v47 = vsel %vm17626_vm14, %v7753_v48, %v7754_v41  ;;  %vm17634_vm14 = vmmov %vm17632_vm7 }
 0x758   :  { %v13139_v51 = vpop.permute.xlu0 %7761  ;;  %v13141_v15 = vpop.permute.xlu1 %7756 }
 0x759   :  { %17616 = vst [vmem:[#allocation147_spill] sm:$0xff] %v13139_v51  ;;  %17617 = vst [vmem:[#allocation152_spill] sm:$0xff] %v13141_v15  ;;  %v7758_v60 = vunpack.i.l.bf16 %v13141_v15  ;;  %v17629_v51 = vunpack.i.h.bf16 %v13141_v15 }
 0x75a   :  { %8036 = vrot.lane.b32.xlu0 %v13073_v33, %s17618_s10  ;;  %8031 = vrot.lane.b32.xlu1 %v13117_v30, %s8952_s24 }
 0x75b   :  { %v13180_v1 = vsel %vm17630_vm13, %v7758_v60, %v17629_v51  ;;  %v3618_v44 = vsel %vm17633_vm10, %v7754_v41, %v7758_v60  ;;  %vm17638_vm13 = vmmov %vm17632_vm7 }
 0x75c   :  { %v13147_v45 = vpop.permute.xlu0 %7771  ;;  %v13149_v50 = vpop.permute.xlu1 %7766  ;;  %17631 = vst [vmem:[#allocation88_spill] sm:$0xff] %v13180_v1 }
 0x75d   :  { %17619 = vst [vmem:[#allocation73_spill] sm:$0xff] %v13147_v45  ;;  %17620 = vst [vmem:[#allocation11_spill] sm:$0xff] %v13149_v50 }
 0x75e   :  { %8046 = vrot.lane.b32.xlu0 %v13129_v46, %s8952_s24  ;;  %8041 = vrot.lane.b32.xlu1 %v13117_v30, %s17618_s10 }
 0x760   :  { %v13155_v53 = vpop.permute.xlu0 %7781  ;;  %v13157_v19 = vpop.permute.xlu1 %7776 }
 0x761   :  { %17621 = vst [vmem:[#allocation124_spill] sm:$0xff] %v13155_v53  ;;  %17622 = vst [vmem:[#allocation2_spill] sm:$0xff] %v13157_v19 }
 0x762   :  { %8056 = vrot.lane.b32.xlu0 %v13073_v33, %s17623_s14  ;;  %8051 = vrot.lane.b32.xlu1 %v13129_v46, %s17618_s10 }
 0x764   :  { %v7787_v25 = vpop.permute.xlu0 %7786  ;;  %v13163_v8 = vpop.permute.xlu1 %3613 }
 0x765   :  { %17624 = vst [vmem:[#allocation146_spill] sm:$0xff] %v13163_v8  ;;  %v7789_v27 = vunpack.i.h.bf16 %v7787_v25  ;;  %v7788_v53 = vunpack.i.l.bf16 %v7787_v25  ;;  %v3616_v8 = vsel %vm17628_vm11, %v7749_v2, %v7753_v48  ;;  %vm17636_vm11 = vmmov %vm17632_vm7 }
 0x766   :  { %8066 = vrot.lane.b32.xlu0 %v13073_v33, %s17625_s15  ;;  %8061 = vrot.lane.b32.xlu1 %v13117_v30, %s17623_s14 }
 0x767   :  { %v3681_v43 = vsel %vm17632_vm7, %v7788_v53, %v7789_v27  ;;  %vm17641_vm7 = vmmov %vm17633_vm10 }
 0x768   :  { %v13172_v55 = vpop.permute.xlu0 %7796  ;;  %v7792_v19 = vpop.permute.xlu1 %7791  ;;  %v3615_v41 = vsel %vm17641_vm7, %v7748_v23, %v7749_v2  ;;  %vm17683_vm7 = vcmask 211968  }
 0x769   :  { %17627 = vst [vmem:[#allocation17_spill] sm:$0xff] %v13172_v55  ;;  %v16604_v62 = vunpack.i.h.bf16 %v13172_v55  ;;  %v7798_v50 = vunpack.i.l.bf16 %v13172_v55  ;;  %v7794_v45 = vunpack.i.h.bf16 %v7792_v19  ;;  %v7793_v25 = vunpack.i.l.bf16 %v7792_v19 }
 0x76a   :  { %8076 = vrot.lane.b32.xlu0 %v13129_v46, %s17623_s14  ;;  %8071 = vrot.lane.b32.xlu1 %v13117_v30, %s17625_s15 }
 0x76b   :  { %v13191_v48 = vsel %vm17634_vm14, %v7798_v50, %v16604_v62  ;;  %v3683_v19 = vsel %vm17636_vm11, %v7793_v25, %v7794_v45  ;;  %v3682_v51 = vsel %vm17637_vm12, %v7789_v27, %v7793_v25  ;;  %v3684_v15 = vsel %vm17638_vm13, %v7794_v45, %v7798_v50 }
 0x76c   :  { %17635 = vst [vmem:[#allocation82_spill] sm:$0xff] %v13191_v48  ;;  %v13196_v53 = vpop.permute.xlu0 %7806  ;;  %v13198_v24 = vpop.permute.xlu1 %7801  ;;  %v5375_v13 = vpack.c.bf16 %v3682_v51, %v3616_v8  ;;  %v5377_v16 = vpack.c.bf16 %v3684_v15, %v3618_v44  ;;  %v5376_v18 = vpack.c.bf16 %v3683_v19, %v3617_v47  ;;  %v5374_v27 = vpack.c.bf16 %v3681_v43, %v3615_v41 }
 0x76d   :  { %17639 = vst [vmem:[#allocation67_spill] sm:$0xff] %v13196_v53  ;;  %17640 = vst [vmem:[#allocation6_spill] sm:$0xff] %v13198_v24  ;;  %v8115_v43 = vpack.i.bf16 %v12683_v31, %v12668_v42  ;;  %v13260_v62 = vpack.i.bf16 %v12725_v21, %v12714_v22  ;;  %vm17659_vm12 = vcmask 867328  }
 0x76e   :  { %8086 = vrot.lane.b32.xlu0 %v13073_v33, %s17642_s16  ;;  %8081 = vrot.lane.b32.xlu1 %v13129_v46, %s17625_s15  ;;  %vm17660_vm10 = vmmov %vm17659_vm12 }
 0x76f   :  { %5612 = vmatprep.subr.bf16.mxu0 %v5375_v13  ;;  %5653 = vmatprep.subr.bf16.mxu1 %v5377_v16  ;;  %vm17665_vm14 = vmmov %vm17660_vm10 }
 0x770   :  { %5613 = vmatpush1.bf16.msra.mxu0 %v5374_v27  ;;  %5654 = vmatpush1.bf16.msra.mxu1 %v5376_v18  ;;  %v13207_v45 = vpop.permute.xlu0 %7816  ;;  %v13209_v8 = vpop.permute.xlu1 %7811  ;;  %vm17666_vm11 = vmmov %vm17660_vm10 }
 0x771   :  { %17643 = vst [vmem:[#allocation92_spill] sm:$0xff] %v13207_v45  ;;  %17644 = vst [vmem:[#allocation121_spill] sm:$0xff] %v13209_v8 }
 0x772   :  { %8096 = vrot.lane.b32.xlu0 %v13129_v46, %s17642_s16  ;;  %8091 = vrot.lane.b32.xlu1 %v13117_v30, %s17642_s16  ;;  %vm17668_vm13 = vmmov %vm17660_vm10 }
 0x774   :  { %v13215_v23 = vpop.permute.xlu0 %3679  ;;  %v13217_v47 = vpop.permute.xlu1 %7821 }
 0x775   :  { %17645 = vst [vmem:[#allocation143_spill] sm:$0xff] %v13215_v23  ;;  %17646 = vst [vmem:[#allocation123_spill] sm:$0xff] %v13217_v47 }
 0x776   :  { %8106 = vrot.lane.b32.xlu0 %v13073_v33, %s17647_s17  ;;  %8101 = vrot.lane.b32.xlu1 %v13073_v33, %s17648_s18 }
 0x778   :  { %v7832_v18 = vpop.permute.xlu0 %7831  ;;  %v7827_v16 = vpop.permute.xlu1 %7826 }
 0x779   :  { %v7833_v19 = vunpack.i.l.bf16 %v7832_v18  ;;  %v7829_v51 = vunpack.i.h.bf16 %v7827_v16  ;;  %v7828_v23 = vunpack.i.l.bf16 %v7827_v16 }
 0x77a   :  { %8116 = vrot.lane.b32.xlu0 %v8115_v43, %s17647_s17  ;;  %8111 = vrot.lane.b32.xlu1 %v8115_v43, %s17648_s18 }
 0x77b   :  { %v3747_v55 = vsel %vm17666_vm11, %v7828_v23, %v7829_v51  ;;  %vm17688_vm11 = vmmov %vm17683_vm7 }
 0x77c   :  { %v13227_v13 = vpop.permute.xlu0 %7841  ;;  %v13229_v46 = vpop.permute.xlu1 %7836 }
 0x77d   :  { %17649 = vst [vmem:[#allocation81_spill] sm:$0xff] %v13227_v13  ;;  %17650 = vst [vmem:[#allocation129_spill] sm:$0xff] %v13229_v46  ;;  %v7838_v41 = vunpack.i.l.bf16 %v13229_v46 }
 0x77e   :  { %8126 = vrot.lane.b32.xlu0 %v12708_v54, %s17647_s17  ;;  %8121 = vrot.lane.b32.xlu1 %v12708_v54, %s17648_s18 }
 0x780   :  { %v13235_v15 = vpop.permute.xlu0 %7851  ;;  %v13237_v50 = vpop.permute.xlu1 %7846 }
 0x781   :  { %17651 = vst [vmem:[#allocation127_spill] sm:$0xff] %v13235_v15  ;;  %17652 = vst [vmem:[#allocation5_spill] sm:$0xff] %v13237_v50 }
 0x782   :  { %8136 = vrot.lane.b32.xlu0 %v13073_v33, %s17653_s19  ;;  %8131 = vrot.lane.b32.xlu1 %v13073_v33, %s17654_s20 }
 0x784   :  { %v13243_v31 = vpop.permute.xlu0 %7861  ;;  %v13245_v2 = vpop.permute.xlu1 %7856 }
 0x785   :  { %17655 = vst [vmem:[#allocation145_spill] sm:$0xff] %v13243_v31  ;;  %17656 = vst [vmem:[#allocation132_spill] sm:$0xff] %v13245_v2 }
 0x786   :  { %8146 = vrot.lane.b32.xlu0 %v8115_v43, %s17653_s19  ;;  %8141 = vrot.lane.b32.xlu1 %v8115_v43, %s17654_s20  ;;  %v7834_v43 = vunpack.i.h.bf16 %v7832_v18  ;;  %v3748_v18 = vsel %vm17659_vm12, %v7829_v51, %v7833_v19  ;;  %v8180_v51 = vpack.i.bf16 %v12739_v12, %v12728_v4  ;;  %vm17684_vm12 = vmmov %vm17683_vm7 }
 0x788   :  { %v7867_v25 = vpop.permute.xlu0 %7866  ;;  %v13249_v44 = vpop.permute.xlu1 %3745  ;;  %v3750_v16 = vsel %vm17660_vm10, %v7834_v43, %v7838_v41  ;;  %v3749_v8 = vsel %vm17665_vm14, %v7833_v19, %v7834_v43  ;;  %vm17686_vm10 = vmmov %vm17683_vm7 }
 0x789   :  { %17657 = vst [vmem:[#allocation104_spill] sm:$0xff] %v13249_v44  ;;  %v13252_v27 = vunpack.i.h.bf16 %v7867_v25  ;;  %v7868_v60 = vunpack.i.l.bf16 %v7867_v25  ;;  %vm17687_vm14 = vmmov %vm17683_vm7 }
 0x78a   :  { %8156 = vrot.lane.b32.xlu0 %v12708_v54, %s17653_s19  ;;  %8151 = vrot.lane.b32.xlu1 %v12708_v54, %s17654_s20 }
 0x78b   :  { %v3813_v54 = vsel %vm654_vm8, %v7868_v60, %v13252_v27 }
 0x78c   :  { %v13263_v31 = vpop.permute.xlu0 %7876  ;;  %v7872_v47 = vpop.permute.xlu1 %7871 }
 0x78d   :  { %17658 = vst [vmem:[#allocation97_spill] sm:$0xff] %v13263_v31  ;;  %v7878_v25 = vunpack.i.l.bf16 %v13263_v31  ;;  %v7874_v15 = vunpack.i.h.bf16 %v7872_v47  ;;  %v7873_v45 = vunpack.i.l.bf16 %v7872_v47  ;;  %v17661_v60 = vunpack.i.h.bf16 %v13263_v31 }
 0x78e   :  { %8171 = vrot.lane.b32.xlu0 %v13260_v62, %s8951_s30  ;;  %8161 = vrot.lane.b32.xlu1 %v13073_v33, %s8957_s29 }
 0x78f   :  { %v13277_v44 = vsel %vm654_vm8, %v13252_v27, %v7873_v45  ;;  %v13280_v2 = vsel %vm654_vm8, %v7873_v45, %v7874_v15  ;;  %v13283_v47 = vsel %vm654_vm8, %v7874_v15, %v7878_v25  ;;  %v13288_v1 = vsel %vm654_vm8, %v7878_v25, %v17661_v60 }
 0x790   :  { %17662 = vst [vmem:[#allocation98_spill] sm:$0xff] %v13288_v1  ;;  %v13290_v33 = vpop.permute.xlu0 %7886  ;;  %v13292_v48 = vpop.permute.xlu1 %7881  ;;  %v5391_v13 = vpack.c.bf16 %v13277_v44, %v3748_v18  ;;  %v5393_v15 = vpack.c.bf16 %v13283_v47, %v3750_v16  ;;  %v17667_v25 = vunpack.i.h.bf16 %v13229_v46  ;;  %v5390_v18 = vpack.c.bf16 %v3813_v54, %v3747_v55 }
 0x791   :  { %17663 = vst [vmem:[#allocation108_spill] sm:$0xff] %v13290_v33  ;;  %17664 = vst [vmem:[#allocation27_spill] sm:$0xff] %v13292_v48  ;;  %v5392_v45 = vpack.c.bf16 %v13280_v2, %v3749_v8 }
 0x792   :  { %v13305_v60 = vsel %vm17668_vm13, %v7838_v41, %v17667_v25  ;;  %8176 = vrot.lane.b32.xlu0 %v13117_v30, %s8957_s29  ;;  %8166 = vrot.lane.b32.xlu1 %v13260_v62, %s8950_s12  ;;  %vm17694_vm13 = vcmask 146432  }
 0x793   :  { %17669 = vst [vmem:[#allocation22_spill] sm:$0xff] %v13305_v60  ;;  %5614 = vmatprep.subr.bf16.mxu0 %v5391_v13  ;;  %5655 = vmatprep.subr.bf16.mxu1 %v5393_v15 }
 0x794   :  { %5615 = vmatpush1.bf16.msra.mxu0 %v5390_v18  ;;  %v13314_v23 = vpop.permute.xlu0 %7896  ;;  %v13316_v19 = vpop.permute.xlu1 %7891  ;;  %5656 = vmatpush1.bf16.msra.mxu1 %v5392_v45 }
 0x795   :  { %17670 = vst [vmem:[#allocation64_spill] sm:$0xff] %v13314_v23  ;;  %17671 = vst [vmem:[#allocation18_spill] sm:$0xff] %v13316_v19 }
 0x796   :  { %8181 = vrot.lane.b32.xlu0 %v8180_v51, %s8950_s12  ;;  %8186 = vrot.lane.b32.xlu1 %v8180_v51, %s8951_s30 }
 0x798   :  { %v13322_v30 = vpop.permute.xlu0 %7906  ;;  %v13324_v55 = vpop.permute.xlu1 %7901 }
 0x799   :  { %17672 = vst [vmem:[#allocation118_spill] sm:$0xff] %v13322_v30  ;;  %17673 = vst [vmem:[#allocation120_spill] sm:$0xff] %v13324_v55 }
 0x79a   :  { %8191 = vrot.lane.b32.xlu0 %v13260_v62, %s8952_s24  ;;  %8196 = vrot.lane.b32.xlu1 %v13260_v62, %s17618_s10 }
 0x79c   :  { %v7917_v8 = vpop.permute.xlu0 %7916  ;;  %v7912_v13 = vpop.permute.xlu1 %7911 }
 0x79d   :  { %v7918_v41 = vunpack.i.l.bf16 %v7917_v8  ;;  %v13330_v43 = vunpack.i.h.bf16 %v7912_v13  ;;  %v7919_v54 = vunpack.i.h.bf16 %v7917_v8 }
 0x79e   :  { %8206 = vrot.lane.b32.xlu0 %v8180_v51, %s17618_s10  ;;  %8201 = vrot.lane.b32.xlu1 %v8180_v51, %s8952_s24 }
 0x79f   :  { %v13336_v45 = vsel %vm721_vm9, %v13330_v43, %v7918_v41  ;;  %v13350_v8 = vsel %vm721_vm9, %v7918_v41, %v7919_v54 }
 0x7a0   :  { %v13338_v15 = vpop.permute.xlu0 %7926  ;;  %v13340_v25 = vpop.permute.xlu1 %7921 }
 0x7a1   :  { %17674 = vst [vmem:[#allocation10_spill] sm:$0xff] %v13338_v15  ;;  %17675 = vst [vmem:[#allocation9_spill] sm:$0xff] %v13340_v25  ;;  %v7923_v16 = vunpack.i.l.bf16 %v13340_v25 }
 0x7a2   :  { %8216 = vrot.lane.b32.xlu0 %v13260_v62, %s17625_s15  ;;  %8211 = vrot.lane.b32.xlu1 %v13260_v62, %s17623_s14 }
 0x7a3   :  { %v13353_v50 = vsel %vm721_vm9, %v7919_v54, %v7923_v16 }
 0x7a4   :  { %v13355_v30 = vpop.permute.xlu0 %7936  ;;  %v13357_v55 = vpop.permute.xlu1 %7931 }
 0x7a5   :  { %17676 = vst [vmem:[#allocation33_spill] sm:$0xff] %v13355_v30  ;;  %17677 = vst [vmem:[#allocation34_spill] sm:$0xff] %v13357_v55  ;;  %v16629_v30 = vunpack.i.h.bf16 %v13340_v25 }
 0x7a6   :  { %8221 = vrot.lane.b32.xlu0 %v8180_v51, %s17623_s14  ;;  %8226 = vrot.lane.b32.xlu1 %v8180_v51, %s17625_s15 }
 0x7a8   :  { %v13363_v60 = vpop.permute.xlu0 %7946  ;;  %v13365_v46 = vpop.permute.xlu1 %7941 }
 0x7a9   :  { %17678 = vst [vmem:[#allocation19_spill] sm:$0xff] %v13363_v60  ;;  %17679 = vst [vmem:[#allocation23_spill] sm:$0xff] %v13365_v46  ;;  %v7913_v60 = vunpack.i.l.bf16 %v7912_v13 }
 0x7aa   :  { %8231 = vrot.lane.b32.xlu0 %v13260_v62, %s17642_s16  ;;  %8241 = vrot.lane.b32.xlu1 %v12722_v11, %s17648_s18 }
 0x7ac   :  { %v7957_v41 = vpop.permute.xlu0 %7956  ;;  %v13371_v54 = vpop.permute.xlu1 %7951 }
 0x7ad   :  { %17680 = vst [vmem:[#allocation7_spill] sm:$0xff] %v13371_v54  ;;  %v7959_v18 = vunpack.i.h.bf16 %v7957_v41  ;;  %v7958_v24 = vunpack.i.l.bf16 %v7957_v41  ;;  %v13384_v54 = vsel %vm721_vm9, %v7923_v16, %v16629_v30 }
 0x7ae   :  { %8236 = vrot.lane.b32.xlu0 %v8180_v51, %s17642_s16  ;;  %8251 = vrot.lane.b32.xlu1 %v12736_v63, %s17648_s18  ;;  %17682 = vst [vmem:[#allocation150_spill] sm:$0xff] %v13384_v54 }
 0x7af   :  { %v3945_v51 = vsel %vm17683_vm7, %v7958_v24, %v7959_v18  ;;  %vm17695_vm7 = vcmask 138240  }
 0x7b0   :  { %v13377_v46 = vpop.permute.xlu0 %7966  ;;  %v7962_v53 = vpop.permute.xlu1 %7961 }
 0x7b1   :  { %17681 = vst [vmem:[#allocation26_spill] sm:$0xff] %v13377_v46  ;;  %v16633_v62 = vunpack.i.h.bf16 %v13377_v46  ;;  %v7968_v19 = vunpack.i.l.bf16 %v13377_v46  ;;  %v7964_v23 = vunpack.i.h.bf16 %v7962_v53  ;;  %v7963_v55 = vunpack.i.l.bf16 %v7962_v53 }
 0x7b2   :  { %8246 = vrot.lane.b32.xlu0 %v12722_v11, %s17647_s17  ;;  %8261 = vrot.lane.b32.xlu1 %v12722_v11, %s17654_s20  ;;  %v3879_v46 = vsel %vm721_vm9, %v7913_v60, %v13330_v43 }
 0x7b3   :  { %v13394_v13 = vsel %vm17684_vm12, %v7968_v19, %v16633_v62  ;;  %v3947_v53 = vsel %vm17686_vm10, %v7963_v55, %v7964_v23  ;;  %v3946_v41 = vsel %vm17687_vm14, %v7959_v18, %v7963_v55  ;;  %v3948_v16 = vsel %vm17688_vm11, %v7964_v23, %v7968_v19  ;;  %vm17696_vm12 = vmmov %vm17695_vm7 }
 0x7b4   :  { %17685 = vst [vmem:[#allocation115_spill] sm:$0xff] %v13394_v13  ;;  %v13399_v30 = vpop.permute.xlu0 %7976  ;;  %v13401_v24 = vpop.permute.xlu1 %7971  ;;  %v5407_v25 = vpack.c.bf16 %v3946_v41, %v13336_v45  ;;  %v5409_v31 = vpack.c.bf16 %v3948_v16, %v13353_v50  ;;  %v5408_v33 = vpack.c.bf16 %v3947_v53, %v13350_v8  ;;  %v5406_v23 = vpack.c.bf16 %v3945_v51, %v3879_v46  ;;  %vm17697_vm10 = vmmov %vm17694_vm13 }
 0x7b5   :  { %17689 = vst [vmem:[#allocation60_spill] sm:$0xff] %v13399_v30  ;;  %17690 = vst [vmem:[#allocation49_spill] sm:$0xff] %v13401_v24  ;;  %v8280_v18 = vpack.i.bf16 %v12753_v52, %v12742_v17  ;;  %v8290_v46 = vpack.i.bf16 %v12770_v6, %v12756_v0 }
 0x7b6   :  { %8256 = vrot.lane.b32.xlu0 %v12736_v63, %s17647_s17  ;;  %8271 = vrot.lane.b32.xlu1 %v12736_v63, %s17654_s20  ;;  %vm17698_vm14 = vmmov %vm17695_vm7 }
 0x7b7   :  { %5616 = vmatprep.subr.bf16.mxu0 %v5407_v25  ;;  %5657 = vmatprep.subr.bf16.mxu1 %v5409_v31  ;;  %vm17699_vm11 = vmmov %vm17697_vm10 }
 0x7b8   :  { %5617 = vmatpush1.bf16.msra.mxu0 %v5406_v23  ;;  %5658 = vmatpush1.bf16.msra.mxu1 %v5408_v33  ;;  %v13414_v19 = vpop.permute.xlu0 %7986  ;;  %v13416_v55 = vpop.permute.xlu1 %7981 }
 0x7b9   :  { %17691 = vst [vmem:[#allocation50_spill] sm:$0xff] %v13414_v19  ;;  %17692 = vst [vmem:[#allocation16_spill] sm:$0xff] %v13416_v55 }
 0x7ba   :  { %8266 = vrot.lane.b32.xlu0 %v12722_v11, %s17653_s19  ;;  %8281 = vrot.lane.b32.xlu1 %v8280_v18, %s8950_s12 }
 0x7bc   :  { %v13423_v60 = vpop.permute.xlu0 %7996  ;;  %v13425_v53 = vpop.permute.xlu1 %7991 }
 0x7bd   :  { %17693 = vst [vmem:[#allocation25_spill] sm:$0xff] %v13425_v53  ;;  %v7999_v34 = vunpack.i.h.bf16 %v13423_v60 }
 0x7be   :  { %8276 = vrot.lane.b32.xlu0 %v12736_v63, %s17653_s19  ;;  %8291 = vrot.lane.b32.xlu1 %v8290_v46, %s8950_s12 }
 0x7c0   :  { %v13432_v31 = vpop.permute.xlu0 %8006  ;;  %v13434_v33 = vpop.permute.xlu1 %8001 }
 0x7c1   :  { %v8009_v37 = vunpack.i.h.bf16 %v13432_v31  ;;  %v8003_v20 = vunpack.i.l.bf16 %v13434_v33 }
 0x7c2   :  { %8286 = vrot.lane.b32.xlu0 %v8280_v18, %s8951_s30  ;;  %8301 = vrot.lane.b32.xlu1 %v8280_v18, %s8952_s24 }
 0x7c4   :  { %v13438_v11 = vpop.permute.xlu0 %8016  ;;  %v13440_v25 = vpop.permute.xlu1 %8011 }
 0x7c6   :  { %8296 = vrot.lane.b32.xlu0 %v8290_v46, %s8951_s30  ;;  %8311 = vrot.lane.b32.xlu1 %v8290_v46, %s8952_s24 }
 0x7c8   :  { %v13444_v51 = vpop.permute.xlu0 %8026  ;;  %v13446_v63 = vpop.permute.xlu1 %8021 }
 0x7c9   :  { %v16664_v14 = vunpack.i.l.bf16 %v13444_v51 }
 0x7ca   :  { %8306 = vrot.lane.b32.xlu0 %v8280_v18, %s17618_s10  ;;  %8321 = vrot.lane.b32.xlu1 %v8280_v18, %s17623_s14 }
 0x7cc   :  { %v13450_v41 = vpop.permute.xlu0 %8036  ;;  %v13452_v16 = vpop.permute.xlu1 %8031 }
 0x7ce   :  { %8316 = vrot.lane.b32.xlu0 %v8290_v46, %s17618_s10  ;;  %8331 = vrot.lane.b32.xlu1 %v8290_v46, %s17623_s14 }
 0x7d0   :  { %v13456_v23 = vpop.permute.xlu0 %8046  ;;  %v13458_v62 = vpop.permute.xlu1 %8041 }
 0x7d2   :  { %8326 = vrot.lane.b32.xlu0 %v8280_v18, %s17625_s15  ;;  %8341 = vrot.lane.b32.xlu1 %v8280_v18, %s17642_s16 }
 0x7d4   :  { %v13462_v53 = vpop.permute.xlu0 %8056  ;;  %v13464_v55 = vpop.permute.xlu1 %8051 }
 0x7d5   :  { %v16680_v17 = vunpack.i.l.bf16 %v13462_v53 }
 0x7d6   :  { %8336 = vrot.lane.b32.xlu0 %v8290_v46, %s17625_s15  ;;  %8351 = vrot.lane.b32.xlu1 %v12750_v61, %s17648_s18 }
 0x7d8   :  { %v13469_v19 = vpop.permute.xlu0 %8066  ;;  %v13471_v13 = vpop.permute.xlu1 %8061 }
 0x7d9   :  { %v16679_v0 = vunpack.i.l.bf16 %v13469_v19 }
 0x7da   :  { %8346 = vrot.lane.b32.xlu0 %v8290_v46, %s17642_s16  ;;  %8361 = vrot.lane.b32.xlu1 %v12766_v26, %s17648_s18  ;;  %v16665_v46 = vunpack.i.l.bf16 %v13450_v41 }
 0x7dc   :  { %v13476_v24 = vpop.permute.xlu0 %8076  ;;  %v13478_v18 = vpop.permute.xlu1 %8071  ;;  %v8405_v39 = vpack.i.bf16 %v16665_v46, %v16664_v14  ;;  %v7998_v46 = vunpack.i.l.bf16 %v13423_v60 }
 0x7de   :  { %8356 = vrot.lane.b32.xlu0 %v12750_v61, %s17647_s17  ;;  %8371 = vrot.lane.b32.xlu1 %v12750_v61, %s17654_s20 }
 0x7e0   :  { %v13484_v30 = vpop.permute.xlu0 %8086  ;;  %v13486_v15 = vpop.permute.xlu1 %8081 }
 0x7e2   :  { %8366 = vrot.lane.b32.xlu0 %v12766_v26, %s17647_s17  ;;  %8381 = vrot.lane.b32.xlu1 %v12766_v26, %s17654_s20 }
 0x7e4   :  { %v13493_v48 = vpop.permute.xlu0 %8096  ;;  %v13495_v38 = vpop.permute.xlu1 %8091 }
 0x7e6   :  { %8376 = vrot.lane.b32.xlu0 %v12750_v61, %s17653_s19  ;;  %8391 = vrot.lane.b32.xlu1 %v13499_v32, %s8950_s12  ;;  %v8008_v61 = vunpack.i.l.bf16 %v13432_v31 }
 0x7e8   :  { %v8107_v6 = vpop.permute.xlu0 %8106  ;;  %v8102_v52 = vpop.permute.xlu1 %8101 }
 0x7e9   :  { %v8109_v4 = vunpack.i.h.bf16 %v8107_v6  ;;  %v8108_v59 = vunpack.i.l.bf16 %v8107_v6  ;;  %v8104_v49 = vunpack.i.h.bf16 %v8102_v52  ;;  %v8103_v56 = vunpack.i.l.bf16 %v8102_v52 }
 0x7ea   :  { %8386 = vrot.lane.b32.xlu0 %v12766_v26, %s17653_s19  ;;  %8406 = vrot.lane.b32.xlu1 %v8405_v39, %s8957_s29  ;;  %v8410_v52 = vpack.i.bf16 %v16679_v0, %v16680_v17  ;;  %v16682_v6 = vunpack.i.l.bf16 %v13484_v30  ;;  %v8425_v0 = vpack.i.bf16 %v12879_v3, %v12668_v42  ;;  %v8400_v17 = vpack.i.bf16 %v8008_v61, %v7998_v46 }
 0x7eb   :  { %v4012_v12 = vsel %vm17694_vm13, %v8103_v56, %v8104_v49  ;;  %v4078_v14 = vsel %vm17695_vm7, %v8108_v59, %v8109_v4  ;;  %vm17702_vm13 = vmmov %vm17695_vm7 }
 0x7ec   :  { %v8117_v21 = vpop.permute.xlu0 %8116  ;;  %v8112_v57 = vpop.permute.xlu1 %8111  ;;  %v5423_v26 = vpack.c.bf16 %v4078_v14, %v4012_v12  ;;  %v8004_v12 = vunpack.i.h.bf16 %v13434_v33  ;;  %v8415_v14 = vpack.i.bf16 %v13252_v27, %v16682_v6  ;;  %v4277_v33 = vsel %vm1124_vm15, %v7999_v34, %v8003_v20  ;;  %vm17704_vm7 = vmmov %vm17697_vm10 }
 0x7ed   :  { %v8119_v22 = vunpack.i.h.bf16 %v8117_v21  ;;  %v8118_v39 = vunpack.i.l.bf16 %v8117_v21  ;;  %v8114_v36 = vunpack.i.h.bf16 %v8112_v57  ;;  %v8113_v40 = vunpack.i.l.bf16 %v8112_v57 }
 0x7ee   :  { %8396 = vrot.lane.b32.xlu0 %v13499_v32, %s8951_s30  ;;  %8411 = vrot.lane.b32.xlu1 %v8410_v52, %s8957_s29 }
 0x7ef   :  { %v4077_v21 = vsel %vm17696_vm12, %v8118_v39, %v8108_v59  ;;  %v4011_v57 = vsel %vm17697_vm10, %v8113_v40, %v8103_v56  ;;  %5618 = vmatprep.subr.bf16.mxu0 %v5423_v26  ;;  %v4079_v60 = vsel %vm17698_vm14, %v8109_v4, %v8119_v22  ;;  %v4013_v31 = vsel %vm17699_vm11, %v8104_v49, %v8114_v36  ;;  %vm17706_vm12 = vmmov %vm17704_vm7 }
 0x7f0   :  { %v13540_v52 = vpop.permute.xlu0 %8126  ;;  %v13542_v28 = vpop.permute.xlu1 %8121  ;;  %v5422_v42 = vpack.c.bf16 %v4077_v21, %v4011_v57  ;;  %v8014_v4 = vunpack.i.h.bf16 %v13440_v25  ;;  %v8013_v49 = vunpack.i.l.bf16 %v13440_v25  ;;  %vm17707_vm10 = vmmov %vm17702_vm13  ;;  %v16696_v25 = vunpack.i.l.bf16 %v13446_v63 }
 0x7f1   :  { %17700 = vst [vmem:[#allocation151_spill] sm:$0xff] %v13540_v52  ;;  %17701 = vst [vmem:[#allocation153_spill] sm:$0xff] %v13542_v28  ;;  %v16683_v3 = vunpack.i.h.bf16 %v13540_v52  ;;  %v8128_v59 = vunpack.i.l.bf16 %v13540_v52  ;;  %v16688_v56 = vunpack.i.h.bf16 %v13542_v28  ;;  %v8123_v40 = vunpack.i.l.bf16 %v13542_v28 }
 0x7f2   :  { %8401 = vrot.lane.b32.xlu0 %v8400_v17, %s8957_s29  ;;  %8416 = vrot.lane.b32.xlu1 %v8415_v14, %s8957_s29  ;;  %v5424_v27 = vpack.c.bf16 %v4079_v60, %v4013_v31  ;;  %vm17708_vm14 = vcmask 392192  }
 0x7f3   :  { %v13557_v26 = vsel %vm17702_vm13, %v8128_v59, %v16683_v3  ;;  %v13562_v39 = vsel %vm17704_vm7, %v8123_v40, %v16688_v56  ;;  %5619 = vmatpush1.bf16.msra.mxu0 %v5422_v42  ;;  %v4014_v21 = vsel %vm17706_vm12, %v8114_v36, %v8123_v40  ;;  %v4080_v57 = vsel %vm17707_vm10, %v8119_v22, %v8128_v59  ;;  %vm17709_vm11 = vmmov %vm17708_vm14 }
 0x7f4   :  { %17703 = vst [vmem:[#allocation35_spill] sm:$0xff] %v13557_v26  ;;  %17705 = vst [vmem:[#allocation39_spill] sm:$0xff] %v13562_v39  ;;  %v8137_v17 = vpop.permute.xlu0 %8136  ;;  %v8132_v6 = vpop.permute.xlu1 %8131  ;;  %v5425_v14 = vpack.c.bf16 %v4080_v57, %v4014_v21  ;;  %v4276_v56 = vsel %vm1124_vm15, %v7998_v46, %v7999_v34  ;;  %v4326_v42 = vsel %vm17708_vm14, %v8008_v61, %v8009_v37  ;;  %vm17711_vm13 = vcmask 130048   ;;  %v17783_v26 = vld [vmem:[#allocation53_spill] sm:$0xff] }
 0x7f5   :  { %v8139_v52 = vunpack.i.h.bf16 %v8137_v17  ;;  %v8138_v9 = vunpack.i.l.bf16 %v8137_v17  ;;  %v8134_v28 = vunpack.i.h.bf16 %v8132_v6  ;;  %v8133_v5 = vunpack.i.l.bf16 %v8132_v6  ;;  %vm17714_vm12 = vmmov %vm17709_vm11 }
 0x7f6   :  { %8426 = vrot.lane.b32.xlu1 %v8425_v0, %s8957_s29  ;;  %5659 = vmatprep.subr.bf16.mxu1 %v5425_v14  ;;  %v4327_v36 = vsel %vm17709_vm11, %v8009_v37, %v8013_v49  ;;  %v17710_v22 = vpack.i.bf16 %v12885_v10, %v12882_v35  ;;  %vm17712_vm7 = vcmask 64512   ;;  %v4278_v6 = vsel %vm1124_vm15, %v8003_v20, %v8004_v12  ;;  %vm17715_vm10 = vmmov %vm17709_vm11 }
 0x7f7   :  { %5660 = vmatpush1.bf16.msra.mxu1 %v5424_v27  ;;  %v4144_v60 = vsel %vm17711_vm13, %v8133_v5, %v8134_v28  ;;  %v4210_v31 = vsel %vm17712_vm7, %v8138_v9, %v8139_v52  ;;  %v17713_v34 = vunpack.i.l.bf16 %v13438_v11  ;;  %v8435_v59 = vpack.i.bf16 %v4277_v33, %v4276_v56  ;;  %vm17717_vm14 = vmmov %vm17712_vm7 }
 0x7f8   :  { %8421 = vrot.lane.b32.xlu0 %v17710_v22, %s8957_s29  ;;  %v8147_v0 = vpop.permute.xlu0 %8146  ;;  %v8142_v61 = vpop.permute.xlu1 %8141  ;;  %v5439_v37 = vpack.c.bf16 %v4210_v31, %v4144_v60  ;;  %v4328_v40 = vsel %vm17714_vm12, %v8013_v49, %v8014_v4  ;;  %v4329_v35 = vsel %vm17715_vm10, %v8014_v4, %v16696_v25  ;;  %v8043_v21 = vunpack.i.l.bf16 %v13458_v62  ;;  %vm17718_vm11 = vmmov %vm17711_vm13 }
 0x7f9   :  { %v4279_v46 = vsel %vm1124_vm15, %v8004_v12, %v17713_v34  ;;  %v8148_v10 = vunpack.i.l.bf16 %v8147_v0  ;;  %v8143_v27 = vunpack.i.l.bf16 %v8142_v61  ;;  %v8149_v57 = vunpack.i.h.bf16 %v8147_v0  ;;  %vm17722_vm12 = vmmov %vm17718_vm11 }
 0x7fa   :  { %v8144_v20 = vunpack.i.h.bf16 %v8142_v61  ;;  %v17716_v12 = vpack.i.bf16 %v12907_v58, %v12902_v7  ;;  %5620 = vmatprep.subr.bf16.mxu0 %v5439_v37  ;;  %v8440_v56 = vpack.i.bf16 %v4327_v36, %v4326_v42  ;;  %v8029_v33 = vunpack.i.h.bf16 %v13444_v51  ;;  %vm17723_vm10 = vmmov %vm17712_vm7 }
 0x7fb   :  { %v4209_v49 = vsel %vm17717_vm14, %v8148_v10, %v8138_v9  ;;  %v4143_v17 = vsel %vm17718_vm11, %v8143_v27, %v8133_v5  ;;  %v8445_v4 = vpack.i.bf16 %v4279_v46, %v4278_v6  ;;  %v8039_v14 = vunpack.i.h.bf16 %v13450_v41  ;;  %vm17725_vm14 = vmmov %vm17718_vm11 }
 0x7fc   :  { %8431 = vrot.lane.b32.xlu1 %v17716_v12, %s8957_s29  ;;  %8436 = vrot.lane.b32.xlu0 %v8435_v59, %s8957_s29  ;;  %v8033_v22 = vunpack.i.l.bf16 %v13452_v16  ;;  %v13598_v60 = vpop.permute.xlu0 %8156  ;;  %v13600_v31 = vpop.permute.xlu1 %8151  ;;  %v8450_v7 = vpack.i.bf16 %v4329_v35, %v4328_v40  ;;  %v5438_v34 = vpack.c.bf16 %v4209_v49, %v4143_v17  ;;  %v16695_v6 = vunpack.i.l.bf16 %v13456_v23 }
 0x7fd   :  { %17719 = vst [vmem:[#allocation42_spill] sm:$0xff] %v13598_v60  ;;  %17720 = vst [vmem:[#allocation3_spill] sm:$0xff] %v13600_v31  ;;  %v16689_v42 = vunpack.i.h.bf16 %v13598_v60  ;;  %v8158_v36 = vunpack.i.l.bf16 %v13598_v60  ;;  %v16690_v9 = vunpack.i.h.bf16 %v13600_v31  ;;  %v8153_v5 = vunpack.i.l.bf16 %v13600_v31 }
 0x7fe   :  { %vm17721_vm13 = vcmask 318464   ;;  %v4211_v0 = vsel %vm17712_vm7, %v8139_v52, %v8149_v57  ;;  %v4145_v61 = vsel %vm17722_vm12, %v8134_v28, %v8144_v20  ;;  %5621 = vmatpush1.bf16.msra.mxu0 %v5438_v34  ;;  %v17728_v28 = vunpack.i.l.bf16 %v13450_v41 }
 0x7ff   :  { %v4427_v46 = vsel %vm17721_vm13, %v8039_v14, %v8043_v21  ;;  %v13614_v59 = vsel %vm17723_vm10, %v8158_v36, %v16689_v42  ;;  %v13619_v37 = vsel %vm17725_vm14, %v8153_v5, %v16690_v9  ;;  %v4146_v40 = vsel %vm17718_vm11, %v8144_v20, %v8153_v5  ;;  %vm17727_vm13 = vmmov %vm17712_vm7  ;;  %v17776_v42 = vld [vmem:[#allocation86_spill] sm:$0xff] }
 0x800   :  { %8441 = vrot.lane.b32.xlu1 %v8440_v56, %s8957_s29  ;;  %17724 = vst [vmem:[#allocation155_spill] sm:$0xff] %v13614_v59  ;;  %17726 = vst [vmem:[#allocation135_spill] sm:$0xff] %v13619_v37  ;;  %8451 = vrot.lane.b32.xlu0 %v8450_v7, %s8957_s29  ;;  %v4212_v52 = vsel %vm17727_vm13, %v8149_v57, %v8158_v36  ;;  %vm17729_vm7 = vcmask 318464   ;;  %v8034_v10 = vunpack.i.h.bf16 %v13452_v16  ;;  %v13628_v27 = vpop.permute.xlu0 %8171  ;;  %v13630_v12 = vpop.permute.xlu1 %8161  ;;  %vm17730_vm12 = vcmask 384000  }
 0x801   :  { %v4426_v35 = vsel %vm17729_vm7, %v17728_v28, %v8039_v14  ;;  %v5441_v56 = vpack.c.bf16 %v4212_v52, %v4146_v40  ;;  %v4377_v17 = vsel %vm17730_vm12, %v8029_v33, %v8033_v22  ;;  %v16694_v20 = vunpack.i.l.bf16 %v13464_v55  ;;  %vm17731_vm10 = vmmov %vm17730_vm12 }
 0x802   :  { %v8460_v7 = vpack.i.bf16 %v4427_v46, %v4426_v35  ;;  %v5440_v57 = vpack.c.bf16 %v4211_v0, %v4145_v61  ;;  %v4379_v41 = vsel %vm17731_vm10, %v8034_v10, %v16695_v6  ;;  %v8063_v16 = vunpack.i.l.bf16 %v13471_v13  ;;  %vm17733_vm14 = vmmov %vm17731_vm10 }
 0x803   :  { %5661 = vmatprep.subr.bf16.mxu1 %v5441_v56  ;;  %v17732_v14 = vunpack.i.l.bf16 %v13444_v51  ;;  %v8044_v36 = vunpack.i.h.bf16 %v13458_v62  ;;  %vm17734_vm11 = vmmov %vm17731_vm10  ;;  %v8059_v46 = vunpack.i.h.bf16 %v13462_v53  ;;  %v16693_v52 = vunpack.i.l.bf16 %v13476_v24 }
 0x804   :  { %8446 = vrot.lane.b32.xlu1 %v8445_v4, %s8957_s29  ;;  %8461 = vrot.lane.b32.xlu0 %v8460_v7, %s8957_s29  ;;  %v4378_v5 = vsel %vm17734_vm11, %v8033_v22, %v8034_v10  ;;  %v13648_v0 = vpop.permute.xlu0 %8176  ;;  %v13650_v61 = vpop.permute.xlu1 %8166  ;;  %vm17736_vm13 = vmmov %vm17729_vm7  ;;  %vm17737_vm7 = vcmask 310272   ;;  %v8069_v28 = vunpack.i.h.bf16 %v13469_v19  ;;  %v17739_v35 = vunpack.i.l.bf16 %v13462_v53 }
 0x805   :  { %v4376_v34 = vsel %vm17733_vm14, %v17732_v14, %v8029_v33  ;;  %5662 = vmatpush1.bf16.msra.mxu1 %v5440_v57  ;;  %17735 = vst [vmem:[#allocation51_spill] sm:$0xff] %v13648_v0  ;;  %v4429_v51 = vsel %vm17736_vm13, %v8044_v36, %v16694_v20  ;;  %v8073_v33 = vunpack.i.l.bf16 %v13478_v18  ;;  %v8465_v4 = vpack.i.bf16 %v4379_v41, %v4378_v5  ;;  %vm17738_vm12 = vmmov %vm17736_vm13  ;;  %v17801_v20 = vld [vmem:[#allocation61_spill] sm:$0xff] }
 0x806   :  { %v8455_v40 = vpack.i.bf16 %v4377_v17, %v4376_v34  ;;  %v4477_v62 = vsel %vm17737_vm7, %v8059_v46, %v8063_v16  ;;  %v4428_v22 = vsel %vm17738_vm12, %v8043_v21, %v8044_v36  ;;  %vm17740_vm10 = vmmov %vm17737_vm7  ;;  %v8064_v56 = vunpack.i.h.bf16 %v13471_v13 }
 0x807   :  { %v4476_v10 = vsel %vm17740_vm10, %v17739_v35, %v8059_v46  ;;  %v8470_v57 = vpack.i.bf16 %v4429_v51, %v4428_v22  ;;  %vm17741_vm14 = vcmask 302080   ;;  %v16692_v14 = vunpack.i.l.bf16 %v13486_v15  ;;  %vm17742_vm11 = vmmov %vm17737_vm7 }
 0x808   :  { %8456 = vrot.lane.b32.xlu1 %v8455_v40, %s8957_s29  ;;  %8466 = vrot.lane.b32.xlu0 %v8465_v4, %s8957_s29  ;;  %v13666_v17 = vpop.permute.xlu0 %8181  ;;  %v13668_v7 = vpop.permute.xlu1 %8186  ;;  %v4527_v41 = vsel %vm17741_vm14, %v8069_v28, %v8073_v33  ;;  %v8475_v21 = vpack.i.bf16 %v4477_v62, %v4476_v10  ;;  %v4479_v34 = vsel %vm17742_vm11, %v8064_v56, %v16693_v52  ;;  %v8093_v53 = vunpack.i.l.bf16 %v13495_v38  ;;  %vm17744_vm13 = vmmov %vm17741_vm14 }
 0x809   :  { %v17743_v13 = vunpack.i.l.bf16 %v13469_v19  ;;  %v8074_v5 = vunpack.i.h.bf16 %v13478_v18  ;;  %v4478_v46 = vsel %vm17737_vm7, %v8063_v16, %v8064_v56  ;;  %v8089_v40 = vunpack.i.h.bf16 %v13484_v30  ;;  %vm17745_vm12 = vmmov %vm17744_vm13 }
 0x80a   :  { %v8485_v19 = vpack.i.bf16 %v4479_v34, %v4478_v46  ;;  %v8094_v18 = vunpack.i.h.bf16 %v13495_v38  ;;  %vm17746_vm10 = vcmask 236544   ;;  %vm17747_vm14 = vmmov %vm17745_vm12  ;;  %v17748_v10 = vunpack.i.l.bf16 %v13484_v30 }
 0x80b   :  { %v4526_v36 = vsel %vm17744_vm13, %v17743_v13, %v8069_v28  ;;  %v4529_v22 = vsel %vm17745_vm12, %v8074_v5, %v16692_v14  ;;  %v16691_v28 = vunpack.i.l.bf16 %v13493_v48  ;;  %v4577_v35 = vsel %vm17746_vm10, %v8089_v40, %v8093_v53  ;;  %vm17749_vm11 = vmmov %vm17746_vm10  ;;  %v17778_v14 = vld [vmem:[#allocation36_spill] sm:$0xff] }
 0x80c   :  { %8471 = vrot.lane.b32.xlu1 %v8470_v57, %s8957_s29  ;;  %8476 = vrot.lane.b32.xlu0 %v8475_v21, %s8957_s29  ;;  %v13684_v51 = vpop.permute.xlu0 %8191  ;;  %v13686_v4 = vpop.permute.xlu1 %8196  ;;  %v8480_v62 = vpack.i.bf16 %v4527_v41, %v4526_v36  ;;  %v4528_v16 = vsel %vm17747_vm14, %v8073_v33, %v8074_v5  ;;  %v4576_v56 = vsel %vm17749_vm11, %v17748_v10, %v8089_v40  ;;  %vm17750_vm13 = vmmov %vm17746_vm10  ;;  %v7583_v9 = vunpack.i.l.bf16 %v17776_v42 }
 0x80d   :  { %v8490_v21 = vpack.i.bf16 %v4529_v22, %v4528_v16  ;;  %v8495_v34 = vpack.i.bf16 %v4577_v35, %v4576_v56  ;;  %v4579_v38 = vsel %vm17750_vm13, %v8094_v18, %v16691_v28  ;;  %vm17751_vm7 = vmmov %vm17746_vm10  ;;  %v17752_v5 = vpack.i.bf16 %v13280_v2, %v13277_v44  ;;  %v3230_v44 = vld [vmem:[%s16238_s5 + $0x8] sm:$0xff] }
 0x80e   :  { %v4578_v13 = vsel %vm17751_vm7, %v8093_v53, %v8094_v18  ;;  %v17753_v53 = vpack.i.bf16 %v13288_v1, %v13283_v47  ;;  %v13742_v47 = vpack.c.bf16 %v3230_v44, %v3230_v44  ;;  %v8535_v18 = vpack.i.bf16 %v12697_v29, %v13384_v54  ;;  %v17760_v16 = vld [vmem:[#allocation79_spill] sm:$0xff]  ;;  %v17784_v1 = vld [vmem:[#allocation29_spill] sm:$0xff] }
 0x80f   :  { %v8505_v36 = vpack.i.bf16 %v4579_v38, %v4578_v13  ;;  %v7569_v10 = vunpack.i.h.bf16 %v17760_v16  ;;  %v7568_v56 = vunpack.i.l.bf16 %v17760_v16  ;;  %v8168_v31 = vunpack.i.l.bf16 %v13650_v61 }
 0x810   :  { %8481 = vrot.lane.b32.xlu1 %v8480_v62, %s8957_s29  ;;  %8486 = vrot.lane.b32.xlu0 %v8485_v19, %s8957_s29  ;;  %v13700_v57 = vpop.permute.xlu0 %8206  ;;  %v13702_v41 = vpop.permute.xlu1 %8201  ;;  %v17754_v62 = vpack.i.bf16 %v13336_v45, %v13330_v43  ;;  %v17756_v19 = vpack.i.bf16 %v13353_v50, %v13350_v8  ;;  %17757 = vst [vmem:[#allocation58_spill] sm:$0xff] %v13742_v47  ;;  %v17759_v50 = vld [vmem:[#allocation90_spill] sm:$0xff]  ;;  %v17790_v60 = vunpack.i.l.bf16 %v13438_v11  ;;  %v8169_v6 = vunpack.i.h.bf16 %v13650_v61 }
 0x811   :  { %6148 = vmatprep.mubr.msk.bf16.mxu0 %vm2411_vm5, %v13742_v47  ;;  %6150 = vmatprep.mubr.msk.bf16.mxu1 %vm2411_vm5, %v13742_v47  ;;  %v7564_v8 = vunpack.i.h.bf16 %v17759_v50  ;;  %v7563_v35 = vunpack.i.l.bf16 %v17759_v50  ;;  %v13785_v50 = vsel %vm118_vm0, %v7568_v56, %v7569_v10  ;;  %vm17810_vm11 = vcmask 384000  }
 0x812   :  { %17770 = vst [vmem:[#allocation77_spill] sm:$0xff] %v13785_v50  ;;  %vm17815_vm13 = vmmov %vm17810_vm11 }
 0x813   :  { %vm17817_vm7 = vmmov %vm17810_vm11 }
 0x814   :  { %8491 = vrot.lane.b32.xlu1 %v8490_v21, %s8957_s29  ;;  %8496 = vrot.lane.b32.xlu0 %v8495_v34, %s8957_s29  ;;  %v13710_v33 = vpop.permute.xlu0 %8216  ;;  %v13712_v30 = vpop.permute.xlu1 %8211  ;;  %v17761_v21 = vld [vmem:[#allocation101_spill] sm:$0xff] }
 0x815   :  { %v7573_v34 = vunpack.i.l.bf16 %v17761_v21 }
 0x817   :  { %v13788_v16 = vsel %vm118_vm0, %v7569_v10, %v7573_v34  ;;  %v17777_v10 = vld [vmem:[#allocation44_spill] sm:$0xff] }
 0x818   :  { %8501 = vrot.lane.b32.xlu1 %v17752_v5, %s8957_s29  ;;  %8506 = vrot.lane.b32.xlu0 %v8505_v36, %s8957_s29  ;;  %v13719_v46 = vpop.permute.xlu0 %8221  ;;  %v13721_v40 = vpop.permute.xlu1 %8226  ;;  %v7574_v36 = vunpack.i.h.bf16 %v17761_v21  ;;  %v17764_v5 = vld [vmem:[#allocation110_spill] sm:$0xff]  ;;  %17771 = vst [vmem:[#allocation14_spill] sm:$0xff] %v13788_v16 }
 0x819   :  { %v17772_v21 = vld [vmem:[#allocation106_spill] sm:$0xff] }
 0x81a   :  { %v7579_v3 = vunpack.i.h.bf16 %v17772_v21 }
 0x81c   :  { %8511 = vrot.lane.b32.xlu1 %v17753_v53, %s8957_s29  ;;  %8516 = vrot.lane.b32.xlu0 %v17754_v62, %s8957_s29  ;;  %v13731_v22 = vpop.permute.xlu0 %8231  ;;  %v13733_v2 = vpop.permute.xlu1 %8241  ;;  %v17765_v53 = vld [vmem:[#allocation47_spill] sm:$0xff]  ;;  %v13837_v37 = vsel %vm118_vm0, %v7579_v3, %v7583_v9 }
 0x81d   :  { %17755 = vst [vmem:[#allocation55_spill] sm:$0xff] %v13733_v2  ;;  %v17766_v62 = vunpack.i.h.bf16 %v17765_v53  ;;  %v7578_v53 = vunpack.i.l.bf16 %v17772_v21  ;;  %v17780_v21 = vld [vmem:[#allocation54_spill] sm:$0xff]  ;;  %17786 = vst [vmem:[#allocation84_spill] sm:$0xff] %v13837_v37 }
 0x81e   :  { %v17816_v2 = vld [vmem:[#allocation78_spill] sm:$0xff] }
 0x81f   :  { %v13774_v44 = vsel %vm118_vm0, %v17766_v62, %v7563_v35  ;;  %v13821_v59 = vsel %vm118_vm0, %v7574_v36, %v7578_v53  ;;  %v13834_v25 = vsel %vm118_vm0, %v7578_v53, %v7579_v3  ;;  %v17791_v53 = vld [vmem:[#allocation70_spill] sm:$0xff]  ;;  %v17811_v3 = vld [vmem:[#allocation59_spill] sm:$0xff] }
 0x820   :  { %8521 = vrot.lane.b32.xlu1 %v17756_v19, %s8957_s29  ;;  %8531 = vrot.lane.b32.xlu0 %v13499_v32, %s17618_s10  ;;  %v13746_v43 = vpop.permute.xlu0 %8236  ;;  %v13748_v45 = vpop.permute.xlu1 %8251  ;;  %17767 = vst [vmem:[#allocation154_spill] sm:$0xff] %v13774_v44  ;;  %v13777_v19 = vsel %vm118_vm0, %v7563_v35, %v7564_v8  ;;  %v13796_v35 = vsel %vm118_vm0, %v7573_v34, %v7574_v36  ;;  %17781 = vst [vmem:[#allocation21_spill] sm:$0xff] %v13821_v59 }
 0x821   :  { %17758 = vst [vmem:[#allocation75_spill] sm:$0xff] %v13748_v45  ;;  %17768 = vst [vmem:[#allocation41_spill] sm:$0xff] %v13777_v19  ;;  %v8550_v28 = vpack.i.bf16 %v13774_v44, %v17777_v10  ;;  %v8555_v52 = vpack.i.bf16 %v17778_v14, %v13777_v19  ;;  %v17788_v10 = vld [vmem:[#allocation142_spill] sm:$0xff]  ;;  %v17796_v14 = vld [vmem:[#allocation80_spill] sm:$0xff]  ;;  %v8214_v44 = vunpack.i.h.bf16 %v13712_v30 }
 0x822   :  { %17775 = vst [vmem:[#allocation111_spill] sm:$0xff] %v13796_v35  ;;  %17785 = vst [vmem:[#allocation62_spill] sm:$0xff] %v13834_v25 }
 0x824   :  { %8526 = vrot.lane.b32.xlu1 %v13499_v32, %s8952_s24  ;;  %8536 = vrot.lane.b32.xlu0 %v8535_v18, %s8957_s29  ;;  %v13764_v38 = vpop.permute.xlu0 %8246  ;;  %v13766_v13 = vpop.permute.xlu1 %8261  ;;  %v13782_v18 = vsel %vm118_vm0, %v7564_v8, %v7568_v56  ;;  %v7584_v8 = vunpack.i.h.bf16 %v17776_v42  ;;  %v8019_v56 = vunpack.i.h.bf16 %v13438_v11 }
 0x825   :  { %17762 = vst [vmem:[#allocation76_spill] sm:$0xff] %v13764_v38  ;;  %17763 = vst [vmem:[#allocation149_spill] sm:$0xff] %v13766_v13  ;;  %v8560_v42 = vpack.i.bf16 %v13782_v18, %v17780_v21  ;;  %v8198_v13 = vunpack.i.l.bf16 %v13686_v4 }
 0x826   :  { %17769 = vst [vmem:[#allocation91_spill] sm:$0xff] %v13782_v18  ;;  %v13840_v36 = vsel %vm118_vm0, %v7583_v9, %v7584_v8  ;;  %v13845_v54 = vsel %vm118_vm0, %v7584_v8, %v17788_v10  ;;  %v4280_v19 = vsel %vm1124_vm15, %v17790_v60, %v8019_v56  ;;  %v8024_v9 = vunpack.i.h.bf16 %v13446_v63 }
 0x827   :  { %17787 = vst [vmem:[#allocation63_spill] sm:$0xff] %v13840_v36  ;;  %17789 = vst [vmem:[#allocation112_spill] sm:$0xff] %v13845_v54  ;;  %v8173_v60 = vunpack.i.l.bf16 %v13628_v27  ;;  %v4281_v8 = vsel %vm1124_vm15, %v8019_v56, %v8168_v31  ;;  %v8565_v11 = vpack.i.bf16 %v4280_v19, %v13785_v50  ;;  %v4282_v18 = vsel %vm1124_vm15, %v8168_v31, %v8169_v6  ;;  %v17798_v56 = vld [vmem:[#allocation96_spill] sm:$0xff] }
 0x828   :  { %4374 = vrot.lane.b32.xlu1 %v17764_v5, %s8952_s24  ;;  %4424 = vrot.lane.b32.xlu0 %v17764_v5, %s17618_s10  ;;  %v13791_v49 = vpop.permute.xlu0 %8256  ;;  %v13793_v62 = vpop.permute.xlu1 %8271  ;;  %v7604_v58 = vunpack.i.h.bf16 %v17798_v56  ;;  %v17799_v19 = vunpack.i.l.bf16 %v13446_v63  ;;  %vm17800_vm0 = vcmask 392192   ;;  %v8174_v31 = vunpack.i.h.bf16 %v13628_v27 }
 0x829   :  { %17773 = vst [vmem:[#allocation131_spill] sm:$0xff] %v13791_v49  ;;  %17774 = vst [vmem:[#allocation57_spill] sm:$0xff] %v13793_v62  ;;  %v7603_v62 = vunpack.i.l.bf16 %v17798_v56  ;;  %v8049_v50 = vunpack.i.h.bf16 %v13456_v23  ;;  %v7613_v56 = vunpack.i.l.bf16 %v17801_v20  ;;  %v17803_v63 = vunpack.i.l.bf16 %v13666_v17 }
 0x82a   :  { %vm17802_vm12 = vmmov %vm17800_vm0  ;;  %v8193_v27 = vunpack.i.l.bf16 %v13684_v51 }
 0x82b   :  { %vm17805_vm10 = vmmov %vm17800_vm0 }
 0x82c   :  { %8541 = vrot.lane.b32.xlu1 %v13499_v32, %s17623_s14  ;;  %8546 = vrot.lane.b32.xlu0 %v13499_v32, %s17625_s15  ;;  %v13823_v39 = vpop.permute.xlu0 %8266  ;;  %v13825_v34 = vpop.permute.xlu1 %8281  ;;  %vm17807_vm14 = vmmov %vm17800_vm0 }
 0x82d   :  { %17782 = vst [vmem:[#allocation12_spill] sm:$0xff] %v13823_v39  ;;  %v4331_v39 = vsel %vm17802_vm12, %v8024_v9, %v8173_v60 }
 0x830   :  { %8551 = vrot.lane.b32.xlu1 %v8550_v28, %s8957_s29  ;;  %8556 = vrot.lane.b32.xlu0 %v8555_v52, %s8957_s29  ;;  %v13863_v61 = vpop.permute.xlu0 %8276  ;;  %v13865_v28 = vpop.permute.xlu1 %8291  ;;  %v17804_v52 = vunpack.i.l.bf16 %v13668_v7 }
 0x831   :  { %17793 = vst [vmem:[#allocation100_spill] sm:$0xff] %v13863_v61  ;;  %v4330_v61 = vsel %vm17800_vm0, %v17799_v19, %v8024_v9  ;;  %v4283_v19 = vsel %vm1124_vm15, %v8169_v6, %v17803_v63  ;;  %v8194_v9 = vunpack.i.h.bf16 %v13684_v51  ;;  %v8054_v63 = vunpack.i.h.bf16 %v13464_v55 }
 0x832   :  { %v8570_v54 = vpack.i.bf16 %v4330_v61, %v4281_v8  ;;  %v4333_v49 = vsel %vm17805_vm10, %v8174_v31, %v17804_v52  ;;  %v17806_v8 = vld [vmem:[#allocation141_spill] sm:$0xff]  ;;  %v17809_v51 = vunpack.i.l.bf16 %v13456_v23  ;;  %vm17818_vm0 = vcmask 318464   ;;  %vm17825_vm10 = vmmov %vm17817_vm7 }
 0x833   :  { %v7609_v61 = vunpack.i.h.bf16 %v17806_v8  ;;  %v7608_v6 = vunpack.i.l.bf16 %v17806_v8  ;;  %v17812_v8 = vunpack.i.h.bf16 %v17811_v3  ;;  %v4382_v38 = vsel %vm17817_vm7, %v8193_v27, %v8194_v9  ;;  %vm17821_vm12 = vmmov %vm17818_vm0 }
 0x834   :  { %8561 = vrot.lane.b32.xlu1 %v8560_v42, %s8957_s29  ;;  %8566 = vrot.lane.b32.xlu0 %v8565_v11, %s8957_s29  ;;  %v7614_v42 = vunpack.i.h.bf16 %v17801_v20  ;;  %v13895_v37 = vpop.permute.xlu0 %8286  ;;  %v13897_v47 = vpop.permute.xlu1 %8301  ;;  %v8575_v11 = vpack.i.bf16 %v4282_v18, %v4331_v39  ;;  %v4332_v39 = vsel %vm17807_vm14, %v8173_v60, %v8174_v31  ;;  %v13918_v18 = vsel %vm185_vm1, %v7603_v62, %v7604_v58  ;;  %vm17828_vm14 = vmmov %vm17818_vm0 }
 0x835   :  { %17808 = vst [vmem:[#allocation93_spill] sm:$0xff] %v13918_v18  ;;  %v8580_v36 = vpack.i.bf16 %v4332_v39, %v4283_v19  ;;  %v13930_v45 = vsel %vm185_vm1, %v17812_v8, %v7603_v62  ;;  %v4381_v31 = vsel %vm17815_vm13, %v8049_v50, %v8193_v27  ;;  %v4431_v29 = vsel %vm17818_vm0, %v8054_v63, %v8198_v13  ;;  %v17823_v27 = vld [vmem:[#allocation138_spill] sm:$0xff] }
 0x836   :  { %17813 = vst [vmem:[#allocation107_spill] sm:$0xff] %v13930_v45  ;;  %v13933_v60 = vsel %vm185_vm1, %v7613_v56, %v7614_v42  ;;  %v13943_v62 = vsel %vm185_vm1, %v7608_v6, %v7609_v61  ;;  %v17820_v3 = vunpack.i.l.bf16 %v13464_v55  ;;  %v8199_v39 = vunpack.i.h.bf16 %v13686_v4 }
 0x837   :  { %17814 = vst [vmem:[#allocation83_spill] sm:$0xff] %v13933_v60  ;;  %17819 = vst [vmem:[#allocation99_spill] sm:$0xff] %v13943_v62  ;;  %v7643_v8 = vunpack.i.l.bf16 %v17823_v27  ;;  %vm17835_vm13 = vcmask 310272   ;;  %v17875_v60 = vunpack.i.l.bf16 %v13746_v43  ;;  %v17881_v62 = vld [vmem:[#allocation136_spill] sm:$0xff] }
 0x838   :  { %8571 = vrot.lane.b32.xlu1 %v8570_v54, %s8957_s29  ;;  %8576 = vrot.lane.b32.xlu0 %v8575_v11, %s8957_s29  ;;  %v4380_v54 = vsel %vm17810_vm11, %v17809_v51, %v8049_v50  ;;  %v13923_v52 = vpop.permute.xlu0 %8296  ;;  %v13925_v20 = vpop.permute.xlu1 %8311  ;;  %v16732_v11 = vunpack.i.l.bf16 %v13702_v41  ;;  %v4430_v50 = vsel %vm17821_vm12, %v17820_v3, %v8054_v63  ;;  %v8213_v63 = vunpack.i.l.bf16 %v13712_v30  ;;  %vm17832_vm11 = vmmov %vm17818_vm0 }
 0x839   :  { %v8585_v23 = vpack.i.bf16 %v4380_v54, %v4333_v49  ;;  %v13951_v49 = vsel %vm185_vm1, %v7604_v58, %v7608_v6  ;;  %v7644_v54 = vunpack.i.h.bf16 %v17823_v27  ;;  %v8590_v55 = vpack.i.bf16 %v4430_v50, %v4381_v31  ;;  %v17831_v50 = vld [vmem:[#allocation94_spill] sm:$0xff]  ;;  %vm17841_vm7 = vmmov %vm17835_vm13 }
 0x83a   :  { %17822 = vst [vmem:[#allocation109_spill] sm:$0xff] %v13951_v49  ;;  %v4383_v4 = vsel %vm17825_vm10, %v8194_v9, %v16732_v11  ;;  %v13965_v58 = vsel %vm185_vm1, %v7609_v61, %v7613_v56  ;;  %v17827_v6 = vunpack.i.l.bf16 %v13700_v57  ;;  %v8218_v27 = vunpack.i.l.bf16 %v13710_v33  ;;  %vm17843_vm12 = vmmov %vm17841_vm7 }
 0x83b   :  { %17826 = vst [vmem:[#allocation79_spill] sm:$0xff] %v13965_v58  ;;  %v17829_v31 = vunpack.i.l.bf16 %v17816_v2  ;;  %v8084_v56 = vunpack.i.h.bf16 %v13486_v15  ;;  %v4432_v61 = vsel %vm17832_vm11, %v8198_v13, %v8199_v39  ;;  %v17834_v30 = vunpack.i.l.bf16 %v13476_v24  ;;  %v17837_v2 = vld [vmem:[#allocation102_spill] sm:$0xff]  ;;  %v17840_v13 = vld [vmem:[#allocation89_spill] sm:$0xff]  ;;  %vm17852_vm11 = vmmov %vm17841_vm7 }
 0x83c   :  { %8581 = vrot.lane.b32.xlu1 %v8580_v36, %s8957_s29  ;;  %8586 = vrot.lane.b32.xlu0 %v8585_v23, %s8957_s29  ;;  %v8079_v36 = vunpack.i.h.bf16 %v13476_v24  ;;  %v13956_v51 = vpop.permute.xlu0 %8306  ;;  %v13958_v19 = vpop.permute.xlu1 %8321  ;;  %v8595_v23 = vpack.i.bf16 %v4382_v38, %v4431_v29  ;;  %v4433_v3 = vsel %vm17828_vm14, %v8199_v39, %v17827_v6  ;;  %v7649_v29 = vunpack.i.h.bf16 %v17831_v50 }
 0x83d   :  { %17824 = vst [vmem:[#allocation90_spill] sm:$0xff] %v13958_v19  ;;  %v13976_v9 = vsel %vm185_vm1, %v7614_v42, %v17829_v31  ;;  %v7648_v38 = vunpack.i.l.bf16 %v17831_v50  ;;  %v13984_v6 = vsel %vm252_vm2, %v7643_v8, %v7644_v54  ;;  %v8600_v31 = vpack.i.bf16 %v4432_v61, %v4383_v4 }
 0x83e   :  { %17830 = vst [vmem:[#allocation101_spill] sm:$0xff] %v13976_v9  ;;  %17833 = vst [vmem:[#allocation110_spill] sm:$0xff] %v13984_v6  ;;  %v17838_v50 = vunpack.i.h.bf16 %v17837_v2  ;;  %v7654_v39 = vunpack.i.h.bf16 %v17840_v13  ;;  %v16737_v19 = vunpack.i.l.bf16 %v13721_v40  ;;  %v7653_v24 = vunpack.i.l.bf16 %v17840_v13  ;;  %v17844_v2 = vld [vmem:[#allocation87_spill] sm:$0xff]  ;;  %v17874_v9 = vld [vmem:[#allocation34_spill] sm:$0xff] }
 0x83f   :  { %vm17842_vm0 = vcmask 302080   ;;  %v17845_v61 = vunpack.i.l.bf16 %v13486_v15  ;;  %v14023_v15 = vsel %vm252_vm2, %v7644_v54, %v7648_v38 }
 0x840   :  { %8591 = vrot.lane.b32.xlu1 %v8590_v55, %s8957_s29  ;;  %8596 = vrot.lane.b32.xlu0 %v8595_v23, %s8957_s29  ;;  %v4480_v55 = vsel %vm17835_vm13, %v17834_v30, %v8079_v36  ;;  %v13989_v11 = vpop.permute.xlu0 %8316  ;;  %v13991_v42 = vpop.permute.xlu1 %8331  ;;  %v13996_v10 = vsel %vm252_vm2, %v17838_v50, %v7643_v8  ;;  %v4481_v23 = vsel %vm17841_vm7, %v8079_v36, %v8213_v63  ;;  %vm17846_vm10 = vmmov %vm17842_vm0  ;;  %v8099_v36 = vunpack.i.h.bf16 %v13493_v48  ;;  %v17854_v8 = vld [vmem:[#allocation27_spill] sm:$0xff] }
 0x841   :  { %17836 = vst [vmem:[#allocation47_spill] sm:$0xff] %v13989_v11  ;;  %17839 = vst [vmem:[#allocation106_spill] sm:$0xff] %v13996_v10  ;;  %v8605_v21 = vpack.i.bf16 %v4480_v55, %v4433_v3  ;;  %v4531_v30 = vsel %vm17842_vm0, %v8084_v56, %v8218_v27  ;;  %v4482_v11 = vsel %vm17843_vm12, %v8213_v63, %v8214_v44  ;;  %v8219_v3 = vunpack.i.h.bf16 %v13710_v33 }
 0x842   :  { %v4530_v50 = vsel %vm17846_vm10, %v17845_v61, %v8084_v56  ;;  %v14014_v55 = vsel %vm252_vm2, %v7648_v38, %v7649_v29  ;;  %17848 = vst [vmem:[#allocation80_spill] sm:$0xff] %v14023_v15  ;;  %vm17849_vm14 = vmmov %vm17842_vm0  ;;  %v8233_v56 = vunpack.i.l.bf16 %v13731_v22  ;;  %v8615_v61 = vpack.i.bf16 %v4482_v11, %v4531_v30  ;;  %v17892_v15 = vld [vmem:[#allocation24_spill] sm:$0xff] }
 0x843   :  { %17847 = vst [vmem:[#allocation86_spill] sm:$0xff] %v14014_v55  ;;  %v4533_v33 = vsel %vm17849_vm14, %v8219_v3, %v16737_v19  ;;  %v14031_v4 = vsel %vm252_vm2, %v7653_v24, %v7654_v39  ;;  %v14040_v38 = vsel %vm252_vm2, %v7649_v29, %v7653_v24  ;;  %v7884_v19 = vunpack.i.h.bf16 %v17854_v8  ;;  %vm17860_vm7 = vmmov %vm17842_vm0 }
 0x844   :  { %8601 = vrot.lane.b32.xlu1 %v8600_v31, %s8957_s29  ;;  %8606 = vrot.lane.b32.xlu0 %v8605_v21, %s8957_s29  ;;  %v14016_v63 = vpop.permute.xlu0 %8326  ;;  %v14018_v13 = vpop.permute.xlu1 %8341  ;;  %v8610_v31 = vpack.i.bf16 %v4530_v50, %v4481_v23  ;;  %v8234_v21 = vunpack.i.h.bf16 %v13731_v22  ;;  %17850 = vst [vmem:[#allocation96_spill] sm:$0xff] %v14031_v4  ;;  %v17851_v23 = vunpack.i.l.bf16 %v13719_v46  ;;  %17853 = vst [vmem:[#allocation61_spill] sm:$0xff] %v14040_v38  ;;  %v7883_v22 = vunpack.i.l.bf16 %v17854_v8 }
 0x845   :  { %v17855_v11 = vunpack.i.l.bf16 %v13493_v48  ;;  %vm17856_vm13 = vcmask 236544   ;;  %v4532_v24 = vsel %vm17860_vm7, %v8218_v27, %v8219_v3  ;;  %v17869_v3 = vld [vmem:[#allocation97_spill] sm:$0xff]  ;;  %v7724_v55 = vunpack.i.h.bf16 %v17881_v62 }
 0x846   :  { %v4483_v50 = vsel %vm17852_vm11, %v8214_v44, %v17851_v23  ;;  %v17857_v44 = vunpack.i.l.bf16 %v17844_v2  ;;  %v17859_v23 = vld [vmem:[#allocation103_spill] sm:$0xff]  ;;  %vm17862_vm0 = vmmov %vm17856_vm13  ;;  %v17870_v27 = vunpack.i.h.bf16 %v17869_v3  ;;  %vm17925_vm14 = vcmask 883712  }
 0x847   :  { %v4580_v30 = vsel %vm17856_vm13, %v17855_v11, %v8099_v36  ;;  %v7683_v29 = vunpack.i.l.bf16 %v17859_v23  ;;  %v4582_v11 = vsel %vm17862_vm0, %v8233_v56, %v8234_v21  ;;  %v8620_v6 = vpack.i.bf16 %v4532_v24, %v4483_v50  ;;  %vm17864_vm12 = vmmov %vm17862_vm0 }
 0x848   :  { %8611 = vrot.lane.b32.xlu1 %v8610_v31, %s8957_s29  ;;  %8616 = vrot.lane.b32.xlu0 %v8615_v61, %s8957_s29  ;;  %v14051_v31 = vsel %vm252_vm2, %v7654_v39, %v17857_v44  ;;  %v14056_v18 = vpop.permute.xlu0 %8336  ;;  %v14058_v8 = vpop.permute.xlu1 %8351  ;;  %v8625_v48 = vpack.i.bf16 %v4580_v30, %v4533_v33  ;;  %v17863_v44 = vld [vmem:[#allocation10_spill] sm:$0xff]  ;;  %v4581_v54 = vsel %vm17864_vm12, %v8099_v36, %v8233_v56  ;;  %v17865_v33 = vld [vmem:[#allocation108_spill] sm:$0xff]  ;;  %v17867_v56 = vunpack.i.h.bf16 %v17859_v23  ;;  %vm17876_vm10 = vmmov %vm17862_vm0 }
 0x849   :  { %17858 = vst [vmem:[#allocation141_spill] sm:$0xff] %v14051_v31  ;;  %17861 = vst [vmem:[#allocation59_spill] sm:$0xff] %v14058_v8  ;;  %v7928_v2 = vunpack.i.l.bf16 %v17863_v44  ;;  %v7888_v30 = vunpack.i.l.bf16 %v17865_v33  ;;  %v14073_v61 = vsel %vm654_vm8, %v7883_v22, %v7884_v19  ;;  %v14089_v39 = vsel %vm654_vm8, %v17870_v27, %v7883_v22  ;;  %v17880_v22 = vld [vmem:[#allocation119_spill] sm:$0xff] }
 0x84a   :  { %17866 = vst [vmem:[#allocation138_spill] sm:$0xff] %v14073_v61  ;;  %v14083_v24 = vsel %vm319_vm3, %v7683_v29, %v17867_v56  ;;  %17871 = vst [vmem:[#allocation102_spill] sm:$0xff] %v14089_v39  ;;  %v8635_v50 = vpack.i.bf16 %v4582_v11, %v14073_v61  ;;  %v7933_v36 = vunpack.i.l.bf16 %v17874_v9  ;;  %v4583_v56 = vsel %vm17876_vm10, %v8234_v21, %v17875_v60  ;;  %v17882_v11 = vld [vmem:[#allocation9_spill] sm:$0xff]  ;;  %v17885_v21 = vld [vmem:[#allocation40_spill] sm:$0xff] }
 0x84b   :  { %17868 = vst [vmem:[#allocation94_spill] sm:$0xff] %v14083_v24  ;;  %v8630_v4 = vpack.i.bf16 %v14089_v39, %v4581_v54  ;;  %v7694_v27 = vunpack.i.h.bf16 %v17880_v22  ;;  %v17883_v58 = vunpack.i.h.bf16 %v17882_v11  ;;  %v7693_v60 = vunpack.i.l.bf16 %v17880_v22  ;;  %vm17930_vm11 = vmmov %vm17925_vm14 }
 0x84c   :  { %8626 = vrot.lane.b32.xlu1 %v8625_v48, %s8957_s29  ;;  %8621 = vrot.lane.b32.xlu0 %v8620_v6, %s8957_s29  ;;  %v14091_v8 = vpop.permute.xlu0 %8346  ;;  %v14093_v6 = vpop.permute.xlu1 %8361  ;;  %v17877_v48 = vld [vmem:[#allocation105_spill] sm:$0xff]  ;;  %v7728_v54 = vunpack.i.l.bf16 %v17885_v21  ;;  %v17910_v61 = vunpack.i.l.bf16 %v17892_v15  ;;  %vm17931_vm13 = vmmov %vm17930_vm11  ;;  %v17967_v39 = vunpack.i.h.bf16 %v13721_v40 }
 0x84d   :  { %17872 = vst [vmem:[#allocation89_spill] sm:$0xff] %v14091_v8  ;;  %17873 = vst [vmem:[#allocation27_spill] sm:$0xff] %v14093_v6  ;;  %v17878_v31 = vunpack.i.h.bf16 %v17877_v48  ;;  %v7723_v6 = vunpack.i.l.bf16 %v17881_v62  ;;  %v14112_v38 = vsel %vm721_vm9, %v17883_v58, %v7928_v2  ;;  %v17887_v48 = vld [vmem:[#allocation116_spill] sm:$0xff]  ;;  %v17888_v58 = vunpack.i.h.bf16 %v17865_v33 }
 0x84e   :  { %17884 = vst [vmem:[#allocation10_spill] sm:$0xff] %v14112_v38  ;;  %v7689_v62 = vunpack.i.h.bf16 %v17887_v48  ;;  %v7688_v11 = vunpack.i.l.bf16 %v17887_v48  ;;  %vm17933_vm7 = vmmov %vm17930_vm11 }
 0x84f   :  { %v14104_v3 = vsel %vm319_vm3, %v17878_v31, %v7683_v29  ;;  %v14118_v31 = vsel %vm654_vm8, %v7884_v19, %v7888_v30  ;;  %v7929_v29 = vunpack.i.h.bf16 %v17863_v44  ;;  %v14127_v49 = vsel %vm654_vm8, %v7888_v30, %v17888_v58  ;;  %v17895_v30 = vld [vmem:[#allocation4_spill] sm:$0xff]  ;;  %vm17936_vm0 = vmmov %vm17933_vm7 }
 0x850   :  { %17879 = vst [vmem:[#allocation103_spill] sm:$0xff] %v14104_v3  ;;  %8636 = vrot.lane.b32.xlu1 %v8635_v50, %s8957_s29  ;;  %17886 = vst [vmem:[#allocation108_spill] sm:$0xff] %v14118_v31  ;;  %8631 = vrot.lane.b32.xlu0 %v8630_v4, %s8957_s29  ;;  %v14129_v50 = vpop.permute.xlu0 %8356  ;;  %v14131_v22 = vpop.permute.xlu1 %8371  ;;  %v8640_v19 = vpack.i.bf16 %v14118_v31, %v4583_v56  ;;  %v7729_v44 = vunpack.i.h.bf16 %v17885_v21  ;;  %v8645_v48 = vpack.i.bf16 %v14112_v38, %v14127_v49  ;;  %v17896_v56 = vld [vmem:[#allocation46_spill] sm:$0xff]  ;;  %v17899_v21 = vld [vmem:[#allocation113_spill] sm:$0xff] }
 0x851   :  { %17889 = vst [vmem:[#allocation97_spill] sm:$0xff] %v14127_v49  ;;  %17890 = vst [vmem:[#allocation34_spill] sm:$0xff] %v14129_v50  ;;  %v14137_v4 = vsel %vm721_vm9, %v7929_v29, %v7933_v36  ;;  %v14142_v10 = vsel %vm386_vm4, %v7723_v6, %v7724_v55  ;;  %v7733_v58 = vunpack.i.l.bf16 %v17895_v30  ;;  %v7734_v31 = vunpack.i.h.bf16 %v17895_v30 }
 0x852   :  { %17891 = vst [vmem:[#allocation105_spill] sm:$0xff] %v14131_v22  ;;  %17893 = vst [vmem:[#allocation119_spill] sm:$0xff] %v14137_v4  ;;  %v17897_v22 = vunpack.i.h.bf16 %v17896_v56  ;;  %v14155_v49 = vsel %vm721_vm9, %v7928_v2, %v7929_v29  ;;  %v14159_v38 = vsel %vm386_vm4, %v7724_v55, %v7728_v54  ;;  %v14162_v50 = vsel %vm319_vm3, %v7693_v60, %v7694_v27 }
 0x853   :  { %17894 = vst [vmem:[#allocation136_spill] sm:$0xff] %v14142_v10  ;;  %17900 = vst [vmem:[#allocation40_spill] sm:$0xff] %v14155_v49  ;;  %v8650_v30 = vpack.i.bf16 %v14137_v4, %v14155_v49  ;;  %v17906_v2 = vunpack.i.h.bf16 %v17859_v23  ;;  %v14179_v55 = vsel %vm386_vm4, %v7728_v54, %v7729_v44  ;;  %v14184_v56 = vsel %vm319_vm3, %v7689_v62, %v7693_v60  ;;  %v17920_v54 = vld [vmem:[#allocation11_spill] sm:$0xff] }
 0x854   :  { %8641 = vrot.lane.b32.xlu1 %v8640_v19, %s8957_s29  ;;  %v14150_v45 = vsel %vm386_vm4, %v17897_v22, %v7723_v6  ;;  %8646 = vrot.lane.b32.xlu0 %v8645_v48, %s8957_s29  ;;  %17901 = vst [vmem:[#allocation116_spill] sm:$0xff] %v14159_v38  ;;  %17902 = vst [vmem:[#allocation4_spill] sm:$0xff] %v14162_v50  ;;  %v14165_v19 = vsel %vm319_vm3, %v7688_v11, %v7689_v62  ;;  %v14167_v6 = vpop.permute.xlu0 %8366  ;;  %v14169_v22 = vpop.permute.xlu1 %8381  ;;  %v7769_v48 = vunpack.i.h.bf16 %v17920_v54  ;;  %v17944_v50 = vld [vmem:[#allocation6_spill] sm:$0xff] }
 0x855   :  { %17898 = vst [vmem:[#allocation9_spill] sm:$0xff] %v14150_v45  ;;  %17903 = vst [vmem:[#allocation46_spill] sm:$0xff] %v14165_v19  ;;  %v14176_v29 = vsel %vm319_vm3, %v17906_v2, %v7688_v11  ;;  %v14202_v60 = vsel %vm386_vm4, %v7729_v44, %v7733_v58  ;;  %v14205_v62 = vsel %vm386_vm4, %v7733_v58, %v7734_v31  ;;  %v7768_v58 = vunpack.i.l.bf16 %v17920_v54 }
 0x856   :  { %17904 = vst [vmem:[#allocation156_spill] sm:$0xff] %v14167_v6  ;;  %17905 = vst [vmem:[#allocation157_spill] sm:$0xff] %v14169_v22  ;;  %v14189_v22 = vsel %vm319_vm3, %v7694_v27, %v17910_v61  ;;  %v17912_v6 = vunpack.i.h.bf16 %v17874_v9  ;;  %v17916_v61 = vld [vmem:[#allocation147_spill] sm:$0xff]  ;;  %v8164_v10 = vunpack.i.h.bf16 %v13630_v12  ;;  %v8284_v45 = vunpack.i.h.bf16 %v13825_v34 }
 0x857   :  { %17907 = vst [vmem:[#allocation158_spill] sm:$0xff] %v14176_v29  ;;  %17908 = vst [vmem:[#allocation159_spill] sm:$0xff] %v14179_v55  ;;  %v7764_v27 = vunpack.i.h.bf16 %v17916_v61  ;;  %v7763_v2 = vunpack.i.l.bf16 %v17916_v61  ;;  %v17923_v61 = vld [vmem:[#allocation2_spill] sm:$0xff]  ;;  %v17928_v29 = vld [vmem:[#allocation152_spill] sm:$0xff]  ;;  %v14254_v54 = vsel %vm17933_vm7, %v7768_v58, %v7769_v48  ;;  %v17959_v49 = vunpack.i.h.bf16 %v13700_v57 }
 0x858   :  { %17909 = vst [vmem:[#allocation160_spill] sm:$0xff] %v14184_v56  ;;  %17911 = vst [vmem:[#allocation161_spill] sm:$0xff] %v14189_v22  ;;  %v14194_v23 = vsel %vm721_vm9, %v7933_v36, %v17912_v6  ;;  %8651 = vrot.lane.b32.xlu1 %v8650_v30, %s8957_s29  ;;  %4524 = vrot.lane.b32.xlu0 %v17764_v5, %s17625_s15  ;;  %v17917_v36 = vunpack.i.l.bf16 %v17899_v21  ;;  %v17919_v30 = vld [vmem:[#allocation73_spill] sm:$0xff]  ;;  %v14220_v15 = vpop.permute.xlu0 %8376  ;;  %v14222_v24 = vpop.permute.xlu1 %8391  ;;  %v17929_v19 = vunpack.i.h.bf16 %v17928_v29  ;;  %vm17966_vm7 = vcmask 310272  }
 0x859   :  { %17913 = vst [vmem:[#allocation162_spill] sm:$0xff] %v14194_v23  ;;  %17914 = vst [vmem:[#allocation163_spill] sm:$0xff] %v14202_v60  ;;  %v7774_v11 = vunpack.i.h.bf16 %v17919_v30  ;;  %v7773_v44 = vunpack.i.l.bf16 %v17919_v30  ;;  %v8660_v21 = vpack.i.bf16 %v17791_v53, %v14194_v23  ;;  %v17924_v30 = vld [vmem:[#allocation64_spill] sm:$0xff]  ;;  %v14264_v29 = vsel %vm17936_vm0, %v7764_v27, %v7768_v58 }
 0x85a   :  { %17915 = vst [vmem:[#allocation164_spill] sm:$0xff] %v14205_v62  ;;  %v14214_v6 = vsel %vm386_vm4, %v7734_v31, %v17917_v36  ;;  %17921 = vst [vmem:[#allocation73_spill] sm:$0xff] %v14220_v15  ;;  %v7898_v38 = vunpack.i.l.bf16 %v17924_v30  ;;  %v14240_v15 = vsel %vm17925_vm14, %v7763_v2, %v7764_v27  ;;  %v17927_v31 = vld [vmem:[#allocation18_spill] sm:$0xff]  ;;  %v14248_v55 = vsel %vm17930_vm11, %v17929_v19, %v7763_v2 }
 0x85b   :  { %17918 = vst [vmem:[#allocation147_spill] sm:$0xff] %v14214_v6  ;;  %17922 = vst [vmem:[#allocation11_spill] sm:$0xff] %v14222_v24  ;;  %v7894_v23 = vunpack.i.h.bf16 %v17927_v31  ;;  %v7893_v36 = vunpack.i.l.bf16 %v17927_v31  ;;  %v14251_v56 = vsel %vm17931_vm13, %v7773_v44, %v7774_v11  ;;  %v17940_v2 = vunpack.i.l.bf16 %v17923_v61  ;;  %v17943_v6 = vld [vmem:[#allocation67_spill] sm:$0xff] }
 0x85c   :  { %4474 = vrot.lane.b32.xlu1 %v17764_v5, %s17623_s14  ;;  %17926 = vst [vmem:[#allocation165_spill] sm:$0xff] %v14240_v15  ;;  %8661 = vrot.lane.b32.xlu0 %v8660_v21, %s8957_s29  ;;  %17932 = vst [vmem:[#allocation18_spill] sm:$0xff] %v14251_v56  ;;  %v14258_v62 = vpop.permute.xlu0 %8386  ;;  %v14260_v31 = vpop.permute.xlu1 %8406  ;;  %v8184_v21 = vunpack.i.h.bf16 %v13666_v17  ;;  %v17945_v56 = vunpack.i.h.bf16 %v17924_v30  ;;  %v8178_v58 = vunpack.i.l.bf16 %v13648_v0  ;;  %v17954_v53 = vunpack.i.l.bf16 %v13666_v17 }
 0x85d   :  { %17934 = vst [vmem:[#allocation152_spill] sm:$0xff] %v14254_v54  ;;  %17935 = vst [vmem:[#allocation166_spill] sm:$0xff] %v14258_v62  ;;  %v8289_v30 = vunpack.i.h.bf16 %v13895_v37  ;;  %vm17958_vm14 = vcmask 392192   ;;  %vm17961_vm11 = vcmask 318464   ;;  %vm17963_vm13 = vcmask 384000  }
 0x85e   :  { %17937 = vst [vmem:[#allocation167_spill] sm:$0xff] %v14264_v29  ;;  %vm17938_vm12 = vmmov %vm17936_vm0  ;;  %v14280_v3 = vsel %vm654_vm8, %v7898_v38, %v17945_v56  ;;  %v14297_v56 = vsel %vm654_vm8, %v7893_v36, %v7894_v23  ;;  %v14323_v17 = vsel %vm1827_vm6, %v8164_v10, %v8178_v58  ;;  %v8308_v15 = vunpack.i.l.bf16 %v13956_v51 }
 0x85f   :  { %v14267_v19 = vsel %vm17938_vm12, %v7769_v48, %v7773_v44  ;;  %vm17941_vm10 = vmmov %vm17936_vm0  ;;  %17946 = vst [vmem:[#allocation6_spill] sm:$0xff] %v14280_v3  ;;  %v14285_v48 = vsel %vm654_vm8, %v7894_v23, %v7898_v38  ;;  %v8189_v38 = vunpack.i.h.bf16 %v13668_v7  ;;  %v17955_v23 = vld [vmem:[#allocation45_spill] sm:$0xff]  ;;  %v17956_v44 = vunpack.i.h.bf16 %v13648_v0 }
 0x860   :  { %17939 = vst [vmem:[#allocation168_spill] sm:$0xff] %v14267_v19  ;;  %v14272_v22 = vsel %vm17941_vm10, %v7774_v11, %v17940_v2  ;;  %8656 = vrot.lane.b32.xlu1 %v13499_v32, %s17642_s16  ;;  %17947 = vst [vmem:[#allocation170_spill] sm:$0xff] %v14285_v48  ;;  %v17948_v11 = vunpack.i.h.bf16 %v17865_v33  ;;  %4574 = vrot.lane.b32.xlu0 %v17764_v5, %s17642_s16  ;;  %v17951_v2 = vld [vmem:[#allocation33_spill] sm:$0xff]  ;;  %v14301_v60 = vpop.permute.xlu0 %8396  ;;  %v14303_v33 = vpop.permute.xlu1 %8411  ;;  %v4284_v5 = vsel %vm1124_vm15, %v17954_v53, %v8184_v21  ;;  %vm17969_vm0 = vcmask 302080  }
 0x861   :  { %17942 = vst [vmem:[#allocation169_spill] sm:$0xff] %v14272_v22  ;;  %17950 = vst [vmem:[#allocation172_spill] sm:$0xff] %v14297_v56  ;;  %v8283_v32 = vunpack.i.l.bf16 %v13825_v34  ;;  %v8288_v22 = vunpack.i.l.bf16 %v13895_v37  ;;  %v14332_v61 = vsel %vm1827_vm6, %v8178_v58, %v17956_v44  ;;  %v17957_v37 = vunpack.i.l.bf16 %v13668_v7 }
 0x862   :  { %v14290_v27 = vsel %vm654_vm8, %v17948_v11, %v7893_v36  ;;  %17952 = vst [vmem:[#allocation33_spill] sm:$0xff] %v14301_v60  ;;  %v17953_v11 = vunpack.i.l.bf16 %v13630_v12  ;;  %v8204_v36 = vunpack.i.h.bf16 %v13702_v41  ;;  %v8304_v53 = vunpack.i.h.bf16 %v13897_v47  ;;  %vm17970_vm12 = vmmov %vm17958_vm14 }
 0x863   :  { %17949 = vst [vmem:[#allocation171_spill] sm:$0xff] %v14290_v27  ;;  %v4334_v19 = vsel %vm17958_vm14, %v17957_v37, %v8189_v38  ;;  %v17960_v0 = vunpack.i.l.bf16 %v13700_v57  ;;  %v17962_v7 = vunpack.i.l.bf16 %v13702_v41  ;;  %v4285_v34 = vsel %vm1124_vm15, %v8184_v21, %v8283_v32  ;;  %vm17971_vm10 = vmmov %vm17970_vm12 }
 0x864   :  { %v14308_v62 = vsel %vm1827_vm6, %v17953_v11, %v8164_v10  ;;  %3943 = vrot.lane.b32.xlu1 %v17796_v14, %s8945_s26  ;;  %v8303_v11 = vunpack.i.l.bf16 %v13897_v47  ;;  %8666 = vrot.lane.b32.xlu0 %v17955_v23, %s17648_s18  ;;  %v14340_v60 = vpop.permute.xlu0 %8401  ;;  %v14342_v24 = vpop.permute.xlu1 %8416  ;;  %v8685_v47 = vpack.i.bf16 %v4284_v5, %v13834_v25  ;;  %v17964_v37 = vunpack.i.h.bf16 %v13719_v46 }
 0x865   :  { %v14349_v44 = vsel %vm17961_vm11, %v17960_v0, %v17959_v49  ;;  %v14354_v58 = vsel %vm17963_vm13, %v17962_v7, %v8204_v36  ;;  %v17965_v10 = vunpack.i.l.bf16 %v13719_v46  ;;  %v17968_v0 = vunpack.i.l.bf16 %v13721_v40  ;;  %vm17976_vm11 = vmmov %vm17963_vm13 }
 0x866   :  { %v4335_v49 = vsel %vm17970_vm12, %v8189_v38, %v8288_v22  ;;  %v4336_v21 = vsel %vm17971_vm10, %v8288_v22, %v8289_v30  ;;  %v17972_v5 = vpack.i.bf16 %v13788_v16, %v17783_v26  ;;  %v17973_v7 = vunpack.i.h.bf16 %v13746_v43  ;;  %vm17979_vm13 = vmmov %vm17976_vm11 }
 0x867   :  { %v14363_v4 = vsel %vm17966_vm7, %v17965_v10, %v17964_v37  ;;  %v14370_v41 = vsel %vm17969_vm0, %v17968_v0, %v17967_v39  ;;  %v17974_v10 = vunpack.i.l.bf16 %v13746_v43  ;;  %vm17975_vm14 = vcmask 236544   ;;  %vm17983_vm7 = vmmov %vm17971_vm10 }
 0x868   :  { %8671 = vrot.lane.b32.xlu1 %v17972_v5, %s8957_s29  ;;  %v14386_v25 = vsel %vm17976_vm11, %v8204_v36, %v8303_v11  ;;  %v17977_v22 = vpack.i.bf16 %v17784_v1, %v13796_v35  ;;  %v4286_v0 = vsel %vm1124_vm15, %v8283_v32, %v8284_v45  ;;  %v17978_v5 = vunpack.i.l.bf16 %v13865_v28  ;;  %v8427_v36 = vpop.permute.xlu1 %8426  ;;  %v17980_v32 = vld [vmem:[#allocation31_spill] sm:$0xff]  ;;  %vm17985_vm0 = vmmov %vm17976_vm11 }
 0x869   :  { %v14383_v37 = vsel %vm17975_vm14, %v17974_v10, %v17973_v7  ;;  %v14399_v7 = vsel %vm17979_vm13, %v8303_v11, %v8304_v53  ;;  %v8690_v10 = vpack.i.bf16 %v4334_v19, %v4285_v34  ;;  %v8429_v16 = vunpack.i.h.bf16 %v8427_v36 }
 0x86a   :  { %8676 = vrot.lane.b32.xlu0 %v17977_v22, %s8957_s29  ;;  %v4287_v26 = vsel %vm1124_vm15, %v8284_v45, %v17978_v5  ;;  %v8428_v39 = vunpack.i.l.bf16 %v8427_v36  ;;  %v8422_v54 = vpop.permute.xlu0 %8421  ;;  %v8695_v38 = vpack.i.bf16 %v4286_v0, %v4335_v49  ;;  %v17981_v1 = vpack.i.bf16 %v13821_v59, %v17980_v32  ;;  %v17991_v45 = vld [vmem:[#allocation47_spill] sm:$0xff] }
 0x86b   :  { %v8700_v29 = vpack.i.bf16 %v4336_v21, %v4287_v26  ;;  %v8424_v35 = vunpack.i.h.bf16 %v8422_v54  ;;  %v8423_v22 = vunpack.i.l.bf16 %v8422_v54  ;;  %v17982_v11 = vunpack.i.l.bf16 %v13923_v52 }
 0x86c   :  { %8681 = vrot.lane.b32.xlu1 %v17981_v1, %s8957_s29  ;;  %v17984_v34 = vunpack.i.l.bf16 %v13925_v20  ;;  %v8309_v49 = vunpack.i.h.bf16 %v13956_v51  ;;  %v17986_v54 = vunpack.i.l.bf16 %v13630_v12  ;;  %v17987_v1 = vld [vmem:[#allocation90_spill] sm:$0xff]  ;;  %vm17990_vm12 = vcmask 318464  }
 0x86d   :  { %v4337_v19 = vsel %vm17983_vm7, %v8289_v30, %v17982_v11  ;;  %v8323_v5 = vunpack.i.l.bf16 %v17987_v1  ;;  %v4988_v36 = vsel %vm1827_vm6, %v8429_v16, %v8423_v22  ;;  %v4989_v11 = vsel %vm1827_vm6, %v8423_v22, %v8424_v35  ;;  %vm17992_vm10 = vmmov %vm17990_vm12 }
 0x86e   :  { %v14414_v26 = vsel %vm17985_vm0, %v8304_v53, %v17984_v34  ;;  %v4972_v21 = vsel %vm1827_vm6, %v8428_v39, %v17986_v54  ;;  %8686 = vrot.lane.b32.xlu0 %v8685_v47, %s8957_s29  ;;  %v14424_v30 = vpop.permute.xlu1 %8431  ;;  %v8437_v34 = vpop.permute.xlu0 %8436  ;;  %v5455_v12 = vpack.c.bf16 %v4989_v11, %v14308_v62  ;;  %v17989_v47 = vunpack.i.h.bf16 %v13700_v57  ;;  %vm17998_vm13 = vmmov %vm17992_vm10 }
 0x86f   :  { %17988 = vst [vmem:[#allocation45_spill] sm:$0xff] %v14424_v30  ;;  %v8433_v51 = vunpack.i.l.bf16 %v14424_v30  ;;  %v5454_v39 = vpack.c.bf16 %v4988_v36, %v4972_v21  ;;  %v16821_v0 = vunpack.i.l.bf16 %v17991_v45  ;;  %v8438_v32 = vunpack.i.l.bf16 %v8437_v34 }
 0x870   :  { %v4435_v54 = vsel %vm17990_vm12, %v17989_v47, %v8308_v15  ;;  %8691 = vrot.lane.b32.xlu1 %v8690_v10, %s8957_s29  ;;  %v8705_v16 = vpack.i.bf16 %v14354_v58, %v4337_v19  ;;  %v14437_v22 = vsel %vm17992_vm10, %v8308_v15, %v8309_v49  ;;  %v8439_v59 = vunpack.i.h.bf16 %v8437_v34  ;;  %5622 = vmatprep.subr.bf16.mxu0 %v5455_v12 }
 0x871   :  { %v4990_v53 = vsel %vm1827_vm6, %v8424_v35, %v8433_v51  ;;  %v17993_v57 = vunpack.i.h.bf16 %v14424_v30  ;;  %v17994_v21 = vunpack.i.h.bf16 %v13719_v46  ;;  %vm17995_vm14 = vcmask 310272   ;;  %5623 = vmatpush1.bf16.msra.mxu0 %v5454_v39  ;;  %v18126_v30 = vld [vmem:[#allocation63_spill] sm:$0xff] }
 0x872   :  { %8696 = vrot.lane.b32.xlu0 %v8695_v38, %s8957_s29  ;;  %v8403_v58 = vunpack.i.l.bf16 %v14340_v60  ;;  %v8442_v15 = vpop.permute.xlu1 %8441  ;;  %v5456_v35 = vpack.c.bf16 %v4990_v53, %v14323_v17  ;;  %v17996_v38 = vunpack.i.h.bf16 %v17987_v1  ;;  %vm17997_vm11 = vmmov %vm17995_vm14  ;;  %v8404_v11 = vunpack.i.h.bf16 %v14340_v60  ;;  %v14458_v34 = vpop.permute.xlu0 %8451 }
 0x873   :  { %v4991_v62 = vsel %vm1827_vm6, %v8433_v51, %v17993_v57  ;;  %v14447_v36 = vsel %vm17995_vm14, %v17994_v21, %v8323_v5  ;;  %v8444_v51 = vunpack.i.h.bf16 %v8442_v15  ;;  %v8443_v46 = vunpack.i.l.bf16 %v8442_v15  ;;  %vm18005_vm12 = vmmov %vm17997_vm11 }
 0x874   :  { %v5457_v10 = vpack.c.bf16 %v4991_v62, %v14332_v61  ;;  %v14455_v19 = vsel %vm17997_vm11, %v8323_v5, %v17996_v38  ;;  %v4437_v12 = vsel %vm17998_vm13, %v8309_v49, %v16821_v0  ;;  %v5004_v39 = vsel %vm1827_vm6, %v8403_v58, %v8438_v32  ;;  %8701 = vrot.lane.b32.xlu1 %v8700_v29, %s8957_s29 }
 0x875   :  { %v8453_v61 = vunpack.i.l.bf16 %v14458_v34  ;;  %v8715_v17 = vpack.i.bf16 %v14399_v7, %v4435_v54  ;;  %v5020_v5 = vsel %vm1827_vm6, %v8404_v11, %v8443_v46  ;;  %v16817_v60 = vunpack.i.h.bf16 %v14458_v34 }
 0x876   :  { %5663 = vmatprep.subr.bf16.mxu1 %v5457_v10  ;;  %8706 = vrot.lane.b32.xlu0 %v8705_v16, %s8957_s29  ;;  %v5005_v53 = vsel %vm1827_vm6, %v8438_v32, %v8439_v59  ;;  %v5021_v49 = vsel %vm1827_vm6, %v8443_v46, %v8444_v51  ;;  %v16819_v47 = vunpack.i.l.bf16 %v13991_v42  ;;  %v14473_v57 = vpop.permute.xlu1 %8446  ;;  %v5470_v29 = vpack.c.bf16 %v5020_v5, %v5004_v39  ;;  %v8462_v58 = vpop.permute.xlu0 %8461 }
 0x877   :  { %5664 = vmatpush1.bf16.msra.mxu1 %v5456_v35  ;;  %v5471_v62 = vpack.c.bf16 %v5021_v49, %v5005_v53  ;;  %v8720_v7 = vpack.i.bf16 %v14437_v22, %v14414_v26  ;;  %v8329_v54 = vunpack.i.h.bf16 %v14016_v63  ;;  %v16818_v21 = vunpack.i.h.bf16 %v14473_v57 }
 0x878   :  { %v8448_v16 = vunpack.i.l.bf16 %v14473_v57  ;;  %v8725_v32 = vpack.i.bf16 %v14363_v4, %v4437_v12  ;;  %v8328_v15 = vunpack.i.l.bf16 %v14016_v63  ;;  %v8344_v10 = vunpack.i.h.bf16 %v14018_v13 }
 0x879   :  { %v5022_v35 = vsel %vm1827_vm6, %v8444_v51, %v8453_v61  ;;  %v8463_v38 = vunpack.i.l.bf16 %v8462_v58  ;;  %v17999_v26 = vpack.i.bf16 %v14349_v44, %v14386_v25  ;;  %5624 = vmatprep.subr.bf16.mxu0 %v5471_v62  ;;  %v8464_v11 = vunpack.i.h.bf16 %v8462_v58 }
 0x87a   :  { %v5006_v22 = vsel %vm1827_vm6, %v8439_v59, %v8448_v16  ;;  %8716 = vrot.lane.b32.xlu0 %v8715_v17, %s8957_s29  ;;  %5625 = vmatpush1.bf16.msra.mxu0 %v5470_v29  ;;  %v5007_v63 = vsel %vm1827_vm6, %v8448_v16, %v16818_v21  ;;  %v5023_v4 = vsel %vm1827_vm6, %v8453_v61, %v16817_v60  ;;  %v8343_v51 = vunpack.i.l.bf16 %v14018_v13  ;;  %v8457_v44 = vpop.permute.xlu1 %8456  ;;  %v14500_v53 = vpop.permute.xlu0 %8466  ;;  %v18073_v21 = vld [vmem:[#allocation131_spill] sm:$0xff] }
 0x87b   :  { %8711 = vrot.lane.b32.xlu1 %v17999_v26, %s8957_s29  ;;  %v8409_v25 = vunpack.i.h.bf16 %v14260_v31  ;;  %v5473_v46 = vpack.c.bf16 %v5023_v4, %v5007_v63  ;;  %v5472_v12 = vpack.c.bf16 %v5022_v35, %v5006_v22  ;;  %v16820_v59 = vunpack.i.l.bf16 %v14056_v18  ;;  %18000 = vst [vmem:[#allocation90_spill] sm:$0xff] %v14500_v53 }
 0x87c   :  { %v8408_v39 = vunpack.i.l.bf16 %v14260_v31  ;;  %v8459_v17 = vunpack.i.h.bf16 %v8457_v44  ;;  %v8458_v5 = vunpack.i.l.bf16 %v8457_v44  ;;  %v18001_v49 = vunpack.i.h.bf16 %v13721_v40 }
 0x87d   :  { %vm18002_vm7 = vcmask 302080   ;;  %v5052_v29 = vsel %vm1827_vm6, %v8409_v25, %v8463_v38  ;;  %v8468_v16 = vunpack.i.l.bf16 %v14500_v53  ;;  %5665 = vmatprep.subr.bf16.mxu1 %v5473_v46  ;;  %v16816_v31 = vunpack.i.h.bf16 %v14500_v53 }
 0x87e   :  { %v4535_v62 = vsel %vm18002_vm7, %v18001_v49, %v8328_v15  ;;  %vm18003_vm0 = vmmov %vm18002_vm7  ;;  %v5036_v58 = vsel %vm1827_vm6, %v8408_v39, %v8458_v5  ;;  %8726 = vrot.lane.b32.xlu0 %v8725_v32, %s8957_s29  ;;  %5666 = vmatpush1.bf16.msra.mxu1 %v5472_v12  ;;  %v5037_v40 = vsel %vm1827_vm6, %v8458_v5, %v8459_v17  ;;  %v14519_v22 = vpop.permute.xlu1 %8471  ;;  %v8477_v44 = vpop.permute.xlu0 %8476  ;;  %vm18008_vm14 = vcmask 236544  }
 0x87f   :  { %v4536_v61 = vsel %vm18003_vm0, %v8328_v15, %v8329_v54  ;;  %8721 = vrot.lane.b32.xlu1 %v8720_v7, %s8957_s29  ;;  %v5053_v35 = vsel %vm1827_vm6, %v8463_v38, %v8464_v11  ;;  %v18004_v15 = vunpack.i.h.bf16 %v17987_v1  ;;  %18006 = vst [vmem:[#allocation47_spill] sm:$0xff] %v14519_v22  ;;  %v8730_v7 = vpack.i.bf16 %v14370_v41, %v14447_v36  ;;  %vm18007_vm10 = vmmov %vm18003_vm0 }
 0x880   :  { %v5487_v63 = vpack.c.bf16 %v5053_v35, %v5037_v40  ;;  %v5486_v4 = vpack.c.bf16 %v5052_v29, %v5036_v58  ;;  %v4537_v32 = vsel %vm18007_vm10, %v8329_v54, %v16820_v59  ;;  %v16815_v25 = vunpack.i.h.bf16 %v14519_v22  ;;  %vm18014_vm11 = vmmov %vm18008_vm14 }
 0x881   :  { %v4487_v26 = vsel %vm18005_vm12, %v18004_v15, %v16819_v47  ;;  %v8473_v38 = vunpack.i.l.bf16 %v14519_v22  ;;  %v8735_v1 = vpack.i.bf16 %v14455_v19, %v4535_v62  ;;  %v4586_v46 = vsel %vm18008_vm14, %v8343_v51, %v8344_v10  ;;  %vm18017_vm13 = vmmov %vm18014_vm11  ;;  %v18050_v47 = vld [vmem:[#allocation129_spill] sm:$0xff]  ;;  %v18120_v22 = vld [vmem:[#allocation103_spill] sm:$0xff] }
 0x882   :  { %v5038_v12 = vsel %vm1827_vm6, %v8459_v17, %v8468_v16  ;;  %v8478_v41 = vunpack.i.l.bf16 %v8477_v44  ;;  %5626 = vmatprep.subr.bf16.mxu0 %v5487_v63  ;;  %v8740_v36 = vpack.i.bf16 %v4536_v61, %v4487_v26  ;;  %v8479_v39 = vunpack.i.h.bf16 %v8477_v44  ;;  %v8482_v49 = vpop.permute.xlu1 %8481  ;;  %v14546_v15 = vpop.permute.xlu0 %8486  ;;  %v18015_v44 = vld [vmem:[#allocation23_spill] sm:$0xff] }
 0x883   :  { %8731 = vrot.lane.b32.xlu1 %v8730_v7, %s8957_s29  ;;  %v5054_v54 = vsel %vm1827_vm6, %v8464_v11, %v8473_v38  ;;  %8736 = vrot.lane.b32.xlu0 %v8735_v1, %s8957_s29  ;;  %v5039_v19 = vsel %vm1827_vm6, %v8468_v16, %v16816_v31  ;;  %v5055_v5 = vsel %vm1827_vm6, %v8473_v38, %v16815_v25  ;;  %v8413_v17 = vunpack.i.l.bf16 %v14303_v33  ;;  %v18041_v25 = vld [vmem:[#allocation60_spill] sm:$0xff] }
 0x884   :  { %5627 = vmatpush1.bf16.msra.mxu0 %v5486_v4  ;;  %v8745_v62 = vpack.i.bf16 %v14383_v37, %v4537_v32  ;;  %v5489_v61 = vpack.c.bf16 %v5055_v5, %v5039_v19  ;;  %v5488_v29 = vpack.c.bf16 %v5054_v54, %v5038_v12  ;;  %v16814_v11 = vunpack.i.l.bf16 %v14091_v8  ;;  %18009 = vst [vmem:[#allocation173_spill] sm:$0xff] %v14546_v15  ;;  %v18100_v8 = vld [vmem:[#allocation153_spill] sm:$0xff] }
 0x885   :  { %v8414_v58 = vunpack.i.h.bf16 %v14303_v33  ;;  %v8484_v40 = vunpack.i.h.bf16 %v8482_v49  ;;  %v8483_v35 = vunpack.i.l.bf16 %v8482_v49  ;;  %v18010_v16 = vunpack.i.l.bf16 %v17951_v2 }
 0x886   :  { %v18011_v26 = vunpack.i.h.bf16 %v17874_v9  ;;  %v18013_v63 = vunpack.i.h.bf16 %v13746_v43  ;;  %v5068_v4 = vsel %vm1827_vm6, %v8413_v17, %v8478_v41  ;;  %v8488_v32 = vunpack.i.l.bf16 %v14546_v15  ;;  %5667 = vmatprep.subr.bf16.mxu1 %v5489_v61  ;;  %v14567_v1 = vpop.permute.xlu1 %8491  ;;  %v8497_v17 = vpop.permute.xlu0 %8496 }
 0x887   :  { %8746 = vrot.lane.b32.xlu1 %v8745_v62, %s8957_s29  ;;  %v5084_v33 = vsel %vm1827_vm6, %v8414_v58, %v8483_v35  ;;  %v16812_v38 = vunpack.i.h.bf16 %v14546_v15  ;;  %8741 = vrot.lane.b32.xlu0 %v8740_v36, %s8957_s29  ;;  %v5069_v9 = vsel %vm1827_vm6, %v8478_v41, %v8479_v39  ;;  %v5085_v43 = vsel %vm1827_vm6, %v8483_v35, %v8484_v40  ;;  %v18090_v15 = vld [vmem:[#allocation11_spill] sm:$0xff] }
 0x888   :  { %v14553_v7 = vsel %vm721_vm9, %v18011_v26, %v18010_v16  ;;  %v4585_v37 = vsel %vm18014_vm11, %v18013_v63, %v8343_v51  ;;  %5668 = vmatpush1.bf16.msra.mxu1 %v5488_v29  ;;  %v7943_v51 = vunpack.i.l.bf16 %v18015_v44  ;;  %18016 = vst [vmem:[#allocation175_spill] sm:$0xff] %v14567_v1  ;;  %v8755_v12 = vpack.i.bf16 %v4586_v46, %v14297_v56  ;;  %v18078_v56 = vld [vmem:[#allocation138_spill] sm:$0xff] }
 0x889   :  { %18012 = vst [vmem:[#allocation174_spill] sm:$0xff] %v14553_v7  ;;  %v5503_v54 = vpack.c.bf16 %v5085_v43, %v5069_v9  ;;  %v5502_v19 = vpack.c.bf16 %v5084_v33, %v5068_v4  ;;  %v4587_v5 = vsel %vm18017_vm13, %v8344_v10, %v16814_v11  ;;  %v16813_v36 = vunpack.i.h.bf16 %v14567_v1 }
 0x88a   :  { %v8493_v41 = vunpack.i.l.bf16 %v14567_v1  ;;  %v8750_v49 = vpack.i.bf16 %v14290_v27, %v4585_v37  ;;  %v7939_v62 = vunpack.i.h.bf16 %v17951_v2  ;;  %v5070_v61 = vsel %vm1827_vm6, %v8479_v39, %v8488_v32  ;;  %v8502_v26 = vpop.permute.xlu1 %8501  ;;  %v14597_v43 = vpop.permute.xlu0 %8506 }
 0x88b   :  { %v8498_v46 = vunpack.i.l.bf16 %v8497_v17  ;;  %8756 = vrot.lane.b32.xlu1 %v8755_v12, %s8957_s29  ;;  %5628 = vmatprep.subr.bf16.mxu0 %v5503_v54  ;;  %v8765_v13 = vpack.i.bf16 %v14553_v7, %v14280_v3  ;;  %v8499_v29 = vunpack.i.h.bf16 %v8497_v17  ;;  %v5071_v58 = vsel %vm1827_vm6, %v8488_v32, %v16812_v38  ;;  %18019 = vst [vmem:[#allocation177_spill] sm:$0xff] %v14597_v43 }
 0x88c   :  { %v5086_v10 = vsel %vm1827_vm6, %v8484_v40, %v8493_v41  ;;  %8751 = vrot.lane.b32.xlu0 %v8750_v49, %s8957_s29  ;;  %5629 = vmatpush1.bf16.msra.mxu0 %v5502_v19  ;;  %v5087_v39 = vsel %vm1827_vm6, %v8493_v41, %v16813_v36  ;;  %v8418_v35 = vunpack.i.l.bf16 %v14342_v24  ;;  %v8760_v63 = vpack.i.bf16 %v14285_v48, %v4587_v5  ;;  %v18097_v48 = vld [vmem:[#allocation84_spill] sm:$0xff] }
 0x88d   :  { %v5504_v16 = vpack.c.bf16 %v5086_v10, %v5070_v61  ;;  %v5505_v37 = vpack.c.bf16 %v5087_v39, %v5071_v58  ;;  %v14594_v40 = vsel %vm721_vm9, %v7939_v62, %v7943_v51  ;;  %v8419_v4 = vunpack.i.h.bf16 %v14342_v24 }
 0x88e   :  { %18018 = vst [vmem:[#allocation176_spill] sm:$0xff] %v14594_v40  ;;  %v8504_v33 = vunpack.i.h.bf16 %v8502_v26  ;;  %v8503_v9 = vunpack.i.l.bf16 %v8502_v26  ;;  %v18020_v32 = vunpack.i.l.bf16 %v17951_v2  ;;  %v16809_v54 = vunpack.i.h.bf16 %v18015_v44  ;;  %v14614_v61 = vpop.permute.xlu1 %8511  ;;  %v8517_v26 = vpop.permute.xlu0 %8516  ;;  %v18105_v44 = vld [vmem:[#allocation65_spill] sm:$0xff] }
 0x88f   :  { %v5100_v19 = vsel %vm1827_vm6, %v8418_v35, %v8498_v46  ;;  %v8508_v5 = vunpack.i.l.bf16 %v14597_v43  ;;  %8761 = vrot.lane.b32.xlu1 %v8760_v63, %s8957_s29  ;;  %5669 = vmatprep.subr.bf16.mxu1 %v5505_v37  ;;  %v16810_v41 = vunpack.i.h.bf16 %v14597_v43  ;;  %v5101_v2 = vsel %vm1827_vm6, %v8498_v46, %v8499_v29  ;;  %18022 = vst [vmem:[#allocation179_spill] sm:$0xff] %v14614_v61  ;;  %v18027_v37 = vld [vmem:[#allocation17_spill] sm:$0xff]  ;;  %v18089_v43 = vld [vmem:[#allocation12_spill] sm:$0xff] }
 0x890   :  { %v14602_v12 = vsel %vm721_vm9, %v18020_v32, %v7939_v62  ;;  %v5116_v24 = vsel %vm1827_vm6, %v8419_v4, %v8503_v9  ;;  %8766 = vrot.lane.b32.xlu0 %v8765_v13, %s8957_s29  ;;  %5670 = vmatpush1.bf16.msra.mxu1 %v5504_v16  ;;  %v5117_v17 = vsel %vm1827_vm6, %v8503_v9, %v8504_v33  ;;  %v7808_v49 = vunpack.i.l.bf16 %v17943_v6 }
 0x891   :  { %18021 = vst [vmem:[#allocation178_spill] sm:$0xff] %v14602_v12  ;;  %v5518_v62 = vpack.c.bf16 %v5116_v24, %v5100_v19  ;;  %v8770_v10 = vpack.i.bf16 %v14594_v40, %v14602_v12  ;;  %v5519_v58 = vpack.c.bf16 %v5117_v17, %v5101_v2  ;;  %v18023_v39 = vunpack.i.h.bf16 %v17944_v50  ;;  %v18072_v12 = vld [vmem:[#allocation149_spill] sm:$0xff] }
 0x892   :  { %v18024_v35 = vunpack.i.l.bf16 %v17944_v50  ;;  %vm18025_vm7 = vcmask 875520   ;;  %v16811_v46 = vunpack.i.h.bf16 %v14614_v61  ;;  %v8513_v16 = vunpack.i.l.bf16 %v14614_v61 }
 0x893   :  { %v18028_v4 = vunpack.i.h.bf16 %v18027_v37  ;;  %vm18029_vm0 = vmmov %vm18025_vm7  ;;  %v14637_v32 = vsel %vm721_vm9, %v7943_v51, %v16809_v54  ;;  %v5102_v19 = vsel %vm1827_vm6, %v8499_v29, %v8508_v5  ;;  %v8519_v24 = vunpack.i.h.bf16 %v8517_v26  ;;  %8771 = vrot.lane.b32.xlu1 %v8770_v10, %s8957_s29  ;;  %5630 = vmatprep.subr.bf16.mxu0 %v5519_v58  ;;  %v8522_v58 = vpop.permute.xlu1 %8521  ;;  %v14656_v37 = vpop.permute.xlu0 %8531 }
 0x894   :  { %v14623_v13 = vsel %vm18025_vm7, %v18024_v35, %v18023_v39  ;;  %v18026_v63 = vmov %v18024_v35  ;;  %18030 = vst [vmem:[#allocation17_spill] sm:$0xff] %v14637_v32  ;;  %v8518_v2 = vunpack.i.l.bf16 %v8517_v26  ;;  %v5118_v17 = vsel %vm1827_vm6, %v8504_v33, %v8513_v16  ;;  %4009 = vrot.lane.b32.xlu0 %v17796_v14, %s17648_s18  ;;  %5631 = vmatpush1.bf16.msra.mxu0 %v5518_v62  ;;  %vm18032_vm12 = vmmov %vm18029_vm0 }
 0x895   :  { %v14632_v9 = vsel %vm18029_vm0, %v18028_v4, %v18026_v63  ;;  %v5103_v39 = vsel %vm1827_vm6, %v8508_v5, %v16810_v41  ;;  %v5119_v51 = vsel %vm1827_vm6, %v8513_v16, %v16811_v46  ;;  %v18031_v29 = vunpack.i.h.bf16 %v17943_v6  ;;  %v18034_v5 = vld [vmem:[#allocation74_spill] sm:$0xff]  ;;  %vm18036_vm10 = vmmov %vm18029_vm0  ;;  %v18039_v41 = vld [vmem:[#allocation81_spill] sm:$0xff] }
 0x896   :  { %v5520_v10 = vpack.c.bf16 %v5118_v17, %v5102_v19  ;;  %v5521_v33 = vpack.c.bf16 %v5119_v51, %v5103_v39  ;;  %v5132_v26 = vsel %vm1827_vm6, %v8518_v2, %v8519_v24  ;;  %v8524_v63 = vunpack.i.h.bf16 %v8522_v58  ;;  %v18037_v2 = vld [vmem:[#allocation165_spill] sm:$0xff]  ;;  %vm18048_vm13 = vmmov %vm18029_vm0 }
 0x897   :  { %v14653_v35 = vsel %vm18032_vm12, %v7808_v49, %v18031_v29  ;;  %v8523_v62 = vunpack.i.l.bf16 %v8522_v58  ;;  %v8780_v4 = vpack.i.bf16 %v18034_v5, %v14637_v32  ;;  %8776 = vrot.lane.b32.xlu1 %v17955_v23, %s17647_s17  ;;  %v5534_v29 = vpack.c.bf16 %v5132_v26, %v5132_v26  ;;  %v18038_v51 = vld [vmem:[#allocation121_spill] sm:$0xff]  ;;  %v14681_v36 = vpop.permute.xlu1 %8526  ;;  %v14686_v60 = vpop.permute.xlu0 %8536 }
 0x898   :  { %18033 = vst [vmem:[#allocation180_spill] sm:$0xff] %v14653_v35  ;;  %5671 = vmatprep.subr.bf16.mxu1 %v5521_v33  ;;  %v18035_v19 = vunpack.i.h.bf16 %v17944_v50  ;;  %v16822_v58 = vunpack.i.h.bf16 %v18038_v51  ;;  %v16823_v54 = vunpack.i.l.bf16 %v18038_v51  ;;  %v7843_v46 = vunpack.i.l.bf16 %v18039_v41  ;;  %v3229_v50 = vld [vmem:[%s16238_s5] sm:$0xff]  ;;  %v18040_v33 = vld [vmem:[#allocation5_spill] sm:$0xff]  ;;  %v18081_v35 = vld [vmem:[#allocation107_spill] sm:$0xff] }
 0x899   :  { %v5133_v38 = vsel %vm1827_vm6, %v8519_v24, %v8523_v62  ;;  %8781 = vrot.lane.b32.xlu0 %v8780_v4, %s8957_s29  ;;  %5672 = vmatpush1.bf16.msra.mxu1 %v5520_v10  ;;  %v16827_v26 = vunpack.i.l.bf16 %v18040_v33  ;;  %v5134_v11 = vsel %vm1827_vm6, %v8523_v62, %v8524_v63  ;;  %v18042_v39 = vld [vmem:[#allocation49_spill] sm:$0xff]  ;;  %v18043_v10 = vld [vmem:[#allocation167_spill] sm:$0xff]  ;;  %vm18045_vm14 = vcmask 1043456  }
 0x89a   :  { %v14667_v17 = vsel %vm18036_vm10, %v18035_v19, %v7808_v49  ;;  %v7844_v49 = vunpack.i.h.bf16 %v18039_v41  ;;  %v5535_v19 = vpack.c.bf16 %v5133_v38, %v5133_v38  ;;  %v7973_v24 = vunpack.i.l.bf16 %v18042_v39  ;;  %vm18046_vm11 = vmmov %vm18045_vm14 }
 0x89b   :  { %v7974_v41 = vunpack.i.h.bf16 %v18042_v39  ;;  %v16826_v38 = vunpack.i.l.bf16 %v14686_v60  ;;  %4075 = vrot.lane.b32.xlu1 %v17796_v14, %s17647_s17  ;;  %v5559_v62 = vsel %vm18046_vm11, %v5534_v29, 0  ;;  %v14698_v59 = vpack.c.bf16 %v3229_v50, %v3229_v50  ;;  %v14720_v16 = vpop.permute.xlu1 %4374 }
 0x89c   :  { %6147 = vmatprep.subr.msk.bf16.mxu0 %vm18045_vm14, %v5535_v19  ;;  %v14705_v4 = vsel %vm18048_vm13, %v16823_v54, %v16822_v58  ;;  %v5536_v39 = vpack.c.bf16 %v5134_v11, %v5134_v11  ;;  %v18051_v0 = vunpack.i.h.bf16 %v18050_v47  ;;  %vm18052_vm7 = vcmask 867328   ;;  %v18054_v58 = vld [vmem:[#allocation154_spill] sm:$0xff]  ;;  %v18055_v54 = vld [vmem:[#allocation15_spill] sm:$0xff]  ;;  %v18059_v47 = vld [vmem:[#allocation76_spill] sm:$0xff] }
 0x89d   :  { %18047 = vst [vmem:[#allocation165_spill] sm:$0xff] %v14698_v59  ;;  %18049 = vst [vmem:[#allocation81_spill] sm:$0xff] %v14705_v4  ;;  %8786 = vrot.lane.b32.xlu0 %v17955_v23, %s17654_s20  ;;  %5633 = vmatpush1.bf16.msra.mxu0 %v5559_v62  ;;  %v5135_v50 = vsel %vm1827_vm6, %v8524_v63, %v16826_v38  ;;  %v18056_v31 = vpack.c.bf16 %v18054_v58, %v18055_v54  ;;  %v18057_v11 = vld [vmem:[#allocation102_spill] sm:$0xff]  ;;  %v8248_v32 = vunpack.i.l.bf16 %v18059_v47  ;;  %v14734_v63 = vpop.permute.xlu0 %4424  ;;  %vm18062_vm10 = vcmask 211968   ;;  %v18065_v58 = vld [vmem:[#allocation108_spill] sm:$0xff] }
 0x89e   :  { %v14712_v19 = vsel %vm18052_vm7, %v18051_v0, %v7843_v46  ;;  %vm18053_vm0 = vmmov %vm18052_vm7  ;;  %v5537_v3 = vpack.c.bf16 %v5135_v50, %v5135_v50  ;;  %v18060_v38 = vld [vmem:[#allocation26_spill] sm:$0xff]  ;;  %v18066_v50 = vunpack.i.l.bf16 %v18041_v25  ;;  %v18069_v62 = vld [vmem:[#allocation75_spill] sm:$0xff]  ;;  %vm18070_vm13 = vcmask 1043456  }
 0x89f   :  { %v14715_v29 = vsel %vm18053_vm0, %v7843_v46, %v7844_v49  ;;  %5688 = vmatprep.subr.bf16.mxu0 %v18056_v31  ;;  %vm18058_vm12 = vmmov %vm18053_vm0  ;;  %v8249_v46 = vunpack.i.h.bf16 %v18059_v47  ;;  %v18061_v5 = vunpack.i.h.bf16 %v18060_v38  ;;  %8791 = vrot.lane.b32.xlu1 %v17955_v23, %s17653_s19  ;;  %v18068_v38 = vld [vmem:[#allocation55_spill] sm:$0xff]  ;;  %v14766_v7 = vpop.permute.xlu1 %8541  ;;  %vm18079_vm0 = vcmask 138240   ;;  %v18088_v4 = vld [vmem:[#allocation57_spill] sm:$0xff] }
 0x8a0   :  { %v14730_v0 = vsel %vm18058_vm12, %v7844_v49, %v16827_v26  ;;  %vm18063_vm14 = vmmov %vm18062_vm10  ;;  %5639 = vmatmul.mubr.bf16.vlgmr.msra.gmra.mrb[16].mxu0 %v14698_v59  ;;  %v8244_v26 = vunpack.i.h.bf16 %v18068_v38  ;;  %6149 = vmatprep.subr.msk.bf16.mxu1 %vm18070_vm13, %v5537_v3  ;;  %v8268_v61 = vunpack.i.l.bf16 %v18089_v43  ;;  %v8393_v1 = vunpack.i.l.bf16 %v18090_v15 }
 0x8a1   :  { %v14739_v54 = vsel %vm18062_vm10, %v18061_v5, %v7973_v24  ;;  %v14742_v31 = vsel %vm18063_vm14, %v7973_v24, %v7974_v41  ;;  %vm18067_vm11 = vmmov %vm18062_vm10  ;;  %v8243_v5 = vunpack.i.l.bf16 %v18068_v38  ;;  %4141 = vrot.lane.b32.xlu0 %v17796_v14, %s17654_s20  ;;  %v18077_v38 = vld [vmem:[#allocation10_spill] sm:$0xff]  ;;  %v14773_v3 = vsel %vm18079_vm0, %v8248_v32, %v8249_v46  ;;  %v14776_v49 = vpop.permute.xlu0 %8546  ;;  %v18098_v24 = vld [vmem:[#allocation52_spill] sm:$0xff] }
 0x8a2   :  { %18064 = vst [vmem:[#allocation49_spill] sm:$0xff] %v14742_v31  ;;  %v14752_v47 = vsel %vm18067_vm11, %v7974_v41, %v18066_v50  ;;  %vm18071_vm7 = vmmov %vm18070_vm13  ;;  %v18074_v41 = vld [vmem:[#allocation71_spill] sm:$0xff]  ;;  %v18075_v50 = vld [vmem:[#allocation13_spill] sm:$0xff]  ;;  %vm18095_vm10 = vcmask 146432   ;;  %v18099_v33 = vpack.i.bf16 %v18097_v48, %v18098_v24  ;;  %v8269_v51 = vunpack.i.h.bf16 %v18089_v43 }
 0x8a3   :  { %v5565_v23 = vsel %vm18071_vm7, %v5536_v39, 0  ;;  %v18076_v40 = vpack.c.bf16 %v18074_v41, %v18075_v50  ;;  %v8294_v39 = vunpack.i.h.bf16 %v13865_v28  ;;  %v18084_v41 = vld [vmem:[#allocation36_spill] sm:$0xff]  ;;  %4207 = vrot.lane.b32.xlu1 %v17796_v14, %s17653_s19  ;;  %vm18093_vm12 = vmmov %vm18079_vm0  ;;  %vm18114_vm13 = vcmask 130048  }
 0x8a4   :  { %5674 = vmatpush1.bf16.msra.mxu1 %v5565_v23  ;;  %v18080_v23 = vld [vmem:[#allocation106_spill] sm:$0xff]  ;;  %vm18102_vm14 = vmmov %vm18095_vm10  ;;  %v18106_v31 = vld [vmem:[#allocation72_spill] sm:$0xff]  ;;  %v18115_v43 = vunpack.i.l.bf16 %v18073_v21 }
 0x8a5   :  { %5689 = vmatpush1.bf16.msra.mxu0 %v18076_v40  ;;  %v18082_v27 = vpack.c.bf16 %v18080_v23, %v18081_v35  ;;  %v18083_v40 = vld [vmem:[#allocation91_spill] sm:$0xff]  ;;  %8796 = vrot.lane.b32.xlu0 %v18099_v33, %s8957_s29  ;;  %vm18104_vm11 = vmmov %vm18095_vm10  ;;  %v18107_v24 = vpack.c.bf16 %v18105_v44, %v18106_v31  ;;  %v18108_v33 = vld [vmem:[#allocation41_spill] sm:$0xff]  ;;  %v18117_v44 = vunpack.i.l.bf16 %v13865_v28  ;;  %v8314_v28 = vunpack.i.h.bf16 %v13925_v20 }
 0x8a6   :  { %v18085_v50 = vpack.c.bf16 %v18083_v40, %v18084_v41  ;;  %v18094_v40 = vld [vmem:[#allocation58_spill] sm:$0xff]  ;;  %v14801_v41 = vsel %vm18095_vm10, %v8243_v5, %v8244_v26  ;;  %v18109_v48 = vld [vmem:[#allocation44_spill] sm:$0xff]  ;;  %vm18116_vm7 = vmmov %vm18079_vm0  ;;  %vm18130_vm0 = vcmask 64512  }
 0x8a7   :  { %5690 = vmatprep.subr.bf16.mxu0 %v18082_v27  ;;  %v18091_v27 = vld [vmem:[#allocation151_spill] sm:$0xff]  ;;  %6152 = vmatprep.mubr.msk.bf16.mxu0 %vm2411_vm5, %v18094_v40  ;;  %18096 = vst [vmem:[#allocation167_spill] sm:$0xff] %v14801_v41  ;;  %v4288_v31 = vsel %vm1124_vm15, %v18117_v44, %v8294_v39  ;;  %v18125_v21 = vld [vmem:[#allocation85_spill] sm:$0xff]  ;;  %vm18137_vm10 = vmmov %vm18130_vm0 }
 0x8a8   :  { %5729 = vmatprep.subr.bf16.mxu1 %v18085_v50  ;;  %v18092_v35 = vunpack.i.h.bf16 %v18091_v27  ;;  %5680 = vmatmul.mubr.bf16.vlgmr.msra.gmra.mrb[16].mxu1 %v14698_v59  ;;  %v18101_v27 = vunpack.i.h.bf16 %v18100_v8  ;;  %v8299_v50 = vunpack.i.h.bf16 %v13923_v52  ;;  %v18110_v59 = vpack.c.bf16 %v18108_v33, %v18109_v48  ;;  %v14827_v8 = vpop.permute.xlu1 %8551  ;;  %v18118_v48 = vld [vmem:[#allocation33_spill] sm:$0xff] }
 0x8a9   :  { %5691 = vmatpush1.bf16.msra.mxu0 %v18107_v24  ;;  %v14845_v24 = vpop.permute.xlu0 %8556  ;;  %v18119_v33 = vld [vmem:[#allocation9_spill] sm:$0xff]  ;;  %v8399_v44 = vunpack.i.h.bf16 %v18118_v48  ;;  %v18127_v25 = vpack.i.bf16 %v18125_v21, %v18126_v30  ;;  %6154 = vmatprep.mubr.msk.bf16.mxu1 %vm2411_vm5, %v18094_v40  ;;  %v18141_v21 = vld [vmem:[#allocation148_spill] sm:$0xff]  ;;  %v18144_v40 = vld [vmem:[#allocation110_spill] sm:$0xff] }
 0x8aa   :  { %v14796_v23 = vsel %vm18093_vm12, %v18092_v35, %v8248_v32  ;;  %v14812_v32 = vsel %vm18102_vm14, %v18101_v27, %v8243_v5  ;;  %v18103_v35 = vunpack.i.l.bf16 %v18069_v62  ;;  %5730 = vmatpush1.bf16.msra.mxu1 %v18110_v59  ;;  %v18111_v5 = vunpack.i.l.bf16 %v18072_v12  ;;  %v18112_v27 = vld [vmem:[#allocation3_spill] sm:$0xff]  ;;  %vm18133_vm12 = vmmov %vm18114_vm13  ;;  %v18145_v41 = vld [vmem:[#allocation93_spill] sm:$0xff] }
 0x8ab   :  { %v18113_v62 = vunpack.i.h.bf16 %v18112_v27  ;;  %v8398_v59 = vunpack.i.l.bf16 %v18118_v48  ;;  %v18121_v53 = vpack.c.bf16 %v18119_v33, %v18120_v22  ;;  %v18122_v27 = vld [vmem:[#allocation80_spill] sm:$0xff]  ;;  %8801 = vrot.lane.b32.xlu1 %v18127_v25, %s8957_s29  ;;  %v8394_v25 = vunpack.i.h.bf16 %v18090_v15 }
 0x8ac   :  { %v14817_v6 = vsel %vm18104_vm11, %v8244_v26, %v18103_v35  ;;  %v14839_v35 = vsel %vm18116_vm7, %v8249_v46, %v18115_v43  ;;  %v4289_v43 = vsel %vm1124_vm15, %v8294_v39, %v8393_v1  ;;  %v18134_v39 = vld [vmem:[#allocation100_spill] sm:$0xff]  ;;  %vm18140_vm14 = vcmask 392192   ;;  %v18147_v46 = vld [vmem:[#allocation142_spill] sm:$0xff] }
 0x8ad   :  { %v14834_v26 = vsel %vm18114_vm13, %v18113_v62, %v18111_v5  ;;  %5692 = vmatprep.subr.bf16.mxu0 %v18121_v53  ;;  %v18123_v62 = vld [vmem:[#allocation109_spill] sm:$0xff]  ;;  %v18128_v53 = vld [vmem:[#allocation42_spill] sm:$0xff]  ;;  %v8319_v48 = vunpack.i.h.bf16 %v17991_v45  ;;  %vm18148_vm11 = vmmov %vm18140_vm14  ;;  %vm18155_vm7 = vcmask 384000  }
 0x8ae   :  { %v18124_v5 = vpack.c.bf16 %v18122_v27, %v18123_v62  ;;  %v18129_v22 = vunpack.i.h.bf16 %v18128_v53  ;;  %v18131_v27 = vunpack.i.l.bf16 %v18088_v4  ;;  %v18132_v62 = vunpack.i.h.bf16 %v18072_v12  ;;  %v18135_v53 = vld [vmem:[#allocation112_spill] sm:$0xff]  ;;  %vm18153_vm13 = vmmov %vm18148_vm11 }
 0x8af   :  { %v18142_v4 = vld [vmem:[#allocation144_spill] sm:$0xff] }
 0x8b0   :  { %5731 = vmatprep.subr.bf16.mxu1 %v18124_v5  ;;  %v14866_v33 = vsel %vm18130_vm0, %v18129_v22, %v8268_v61  ;;  %v14873_v5 = vsel %vm18133_vm12, %v18132_v62, %v18131_v27  ;;  %v18136_v22 = vpack.i.bf16 %v18135_v53, %v17796_v14  ;;  %v14887_v27 = vsel %vm18137_vm10, %v8268_v61, %v8269_v51  ;;  %vm18167_vm10 = vmmov %vm18148_vm11 }
 0x8b1   :  { %18138 = vst [vmem:[#allocation129_spill] sm:$0xff] %v14887_v27  ;;  %v18139_v62 = vunpack.i.l.bf16 %v13923_v52  ;;  %v18143_v15 = vpack.c.bf16 %v18141_v21, %v18142_v4  ;;  %v18146_v14 = vpack.c.bf16 %v18144_v40, %v18145_v41  ;;  %v8810_v53 = vpack.i.bf16 %v4288_v31, %v18147_v46  ;;  %v14904_v27 = vpop.permute.xlu0 %8566  ;;  %v18150_v21 = vld [vmem:[#allocation116_spill] sm:$0xff]  ;;  %v18151_v4 = vld [vmem:[#allocation158_spill] sm:$0xff] }
 0x8b2   :  { %8806 = vrot.lane.b32.xlu0 %v18136_v22, %s8957_s29  ;;  %v14899_v22 = vpop.permute.xlu1 %8561  ;;  %v8334_v61 = vunpack.i.h.bf16 %v13991_v42  ;;  %v4339_v52 = vsel %vm18148_vm11, %v8299_v50, %v8398_v59  ;;  %v4340_v46 = vsel %vm18153_vm13, %v8398_v59, %v8399_v44  ;;  %vm18158_vm12 = vcmask 318464   ;;  %v18163_v41 = vld [vmem:[#allocation136_spill] sm:$0xff]  ;;  %vm18174_vm11 = vmmov %vm18155_vm7 }
 0x8b3   :  { %v4338_v30 = vsel %vm18140_vm14, %v18139_v62, %v8299_v50  ;;  %5693 = vmatpush1.bf16.msra.mxu0 %v18143_v15  ;;  %5732 = vmatpush1.bf16.msra.mxu1 %v18146_v14  ;;  %v18149_v62 = vpack.c.bf16 %v14632_v9, %v14248_v55  ;;  %v18152_v15 = vpack.c.bf16 %v18150_v21, %v18151_v4  ;;  %v8529_v50 = vunpack.i.h.bf16 %v14681_v36  ;;  %vm18173_vm14 = vmmov %vm18155_vm7 }
 0x8b4   :  { %v8815_v40 = vpack.i.bf16 %v4338_v30, %v4289_v43  ;;  %v8528_v14 = vunpack.i.l.bf16 %v14681_v36  ;;  %8811 = vrot.lane.b32.xlu1 %v8810_v53, %s8957_s29  ;;  %v18154_v55 = vunpack.i.l.bf16 %v13925_v20  ;;  %v18156_v43 = vunpack.i.l.bf16 %v18134_v39  ;;  %v18159_v53 = vld [vmem:[#allocation20_spill] sm:$0xff] }
 0x8b5   :  { %5694 = vmatprep.subr.bf16.mxu0 %v18149_v62  ;;  %5733 = vmatprep.subr.bf16.mxu1 %v18152_v15  ;;  %v4290_v62 = vsel %vm1124_vm15, %v8393_v1, %v8394_v25  ;;  %v18157_v21 = vunpack.i.l.bf16 %v17991_v45  ;;  %v4291_v20 = vsel %vm1124_vm15, %v8394_v25, %v18159_v53  ;;  %v8533_v4 = vunpack.i.l.bf16 %v14656_v37  ;;  %v18160_v15 = vld [vmem:[#allocation82_spill] sm:$0xff]  ;;  %v18161_v1 = vld [vmem:[#allocation88_spill] sm:$0xff]  ;;  %v14948_v53 = vpop.permute.xlu0 %8576 }
 0x8b6   :  { %v4388_v9 = vsel %vm18155_vm7, %v18154_v55, %v8314_v28  ;;  %8816 = vrot.lane.b32.xlu0 %v8815_v40, %s8957_s29  ;;  %v14928_v59 = vsel %vm18130_vm0, %v8269_v51, %v18156_v43  ;;  %v18162_v55 = vpack.c.bf16 %v18160_v15, %v18161_v1  ;;  %v18164_v40 = vld [vmem:[#allocation94_spill] sm:$0xff]  ;;  %v14942_v31 = vpop.permute.xlu1 %8571  ;;  %v8820_v51 = vpack.i.bf16 %v4290_v62, %v4339_v52  ;;  %v18166_v43 = vld [vmem:[#allocation37_spill] sm:$0xff]  ;;  %vm18180_vm0 = vmmov %vm18158_vm12 }
 0x8b7   :  { %v4438_v36 = vsel %vm18158_vm12, %v18157_v21, %v8319_v48  ;;  %v18165_v30 = vpack.c.bf16 %v18163_v41, %v18164_v40  ;;  %v4341_v45 = vsel %vm18167_vm10, %v8399_v44, %v18166_v43  ;;  %v8534_v21 = vunpack.i.h.bf16 %v14656_v37  ;;  %v18182_v40 = vld [vmem:[#allocation22_spill] sm:$0xff]  ;;  %vm18185_vm12 = vmmov %vm18180_vm0 }
 0x8b8   :  { %5695 = vmatpush1.bf16.msra.mxu0 %v18162_v55  ;;  %v8574_v25 = vunpack.i.h.bf16 %v14942_v31  ;;  %v18168_v15 = vpack.c.bf16 %v18057_v11, %v14712_v19  ;;  %v18169_v41 = vpack.c.bf16 %v14667_v17, %v18043_v10  ;;  %v18170_v52 = vunpack.i.h.bf16 %v14056_v18  ;;  %8821 = vrot.lane.b32.xlu1 %v8820_v51, %s8957_s29  ;;  %vm18186_vm10 = vmmov %vm18180_vm0 }
 0x8b9   :  { %5734 = vmatpush1.bf16.msra.mxu1 %v18165_v30  ;;  %v8825_v30 = vpack.i.bf16 %v4340_v46, %v4291_v20  ;;  %v18171_v62 = vunpack.i.l.bf16 %v14056_v18  ;;  %vm18172_vm15 = vcmask 302080   ;;  %v4389_v37 = vsel %vm18173_vm14, %v8314_v28, %v8528_v14  ;;  %v18181_v20 = vld [vmem:[#allocation98_spill] sm:$0xff] }
 0x8ba   :  { %5696 = vmatprep.subr.bf16.mxu0 %v18168_v15  ;;  %5735 = vmatprep.subr.bf16.mxu1 %v18169_v41  ;;  %v4390_v1 = vsel %vm18174_vm11, %v8528_v14, %v8529_v50  ;;  %v18175_v55 = vunpack.i.l.bf16 %v13991_v42  ;;  %vm18176_vm13 = vcmask 310272   ;;  %v4391_v17 = vsel %vm18155_vm7, %v8529_v50, %v14720_v16  ;;  %v14998_v43 = vpop.permute.xlu1 %8581 }
 0x8bb   :  { %v14961_v44 = vsel %vm18172_vm15, %v18171_v62, %v18170_v52  ;;  %v8543_v10 = vunpack.i.l.bf16 %v14766_v7  ;;  %v18177_v11 = vunpack.i.h.bf16 %v14904_v27  ;;  %v18178_v46 = vunpack.i.h.bf16 %v14473_v57  ;;  %8826 = vrot.lane.b32.xlu0 %v8825_v30, %s8957_s29  ;;  %v15004_v52 = vpop.permute.xlu0 %8586  ;;  %vm18189_vm15 = vmmov %vm18176_vm13 }
 0x8bc   :  { %v14968_v19 = vsel %vm18176_vm13, %v18175_v55, %v8334_v61  ;;  %v18179_v42 = vunpack.i.h.bf16 %v14458_v34  ;;  %v4439_v16 = vsel %vm18180_vm0, %v8319_v48, %v8533_v4  ;;  %v18183_v57 = vpack.c.bf16 %v18181_v20, %v18182_v40  ;;  %v18191_v55 = vld [vmem:[#allocation150_spill] sm:$0xff]  ;;  %vm18197_vm14 = vmmov %vm18176_vm13 }
 0x8bd   :  { %v14979_v28 = vsel %vm1827_vm6, %v18178_v46, %v18177_v11  ;;  %v18184_v51 = vpack.c.bf16 %v14623_v13, %v18037_v2  ;;  %v8830_v34 = vpack.i.bf16 %v4388_v9, %v4341_v45  ;;  %v8835_v15 = vpack.i.bf16 %v4438_v36, %v4389_v37 }
 0x8be   :  { %v14986_v14 = vsel %vm1827_vm6, %v18179_v42, %v8574_v25  ;;  %5697 = vmatpush1.bf16.msra.mxu0 %v18183_v57  ;;  %v8539_v41 = vunpack.i.h.bf16 %v14686_v60  ;;  %v4440_v30 = vsel %vm18185_vm12, %v8533_v4, %v8534_v21  ;;  %v4441_v48 = vsel %vm18186_vm10, %v8534_v21, %v14734_v63  ;;  %v15030_v11 = vpop.permute.xlu1 %8591  ;;  %v18195_v57 = vld [vmem:[#allocation119_spill] sm:$0xff] }
 0x8bf   :  { %v5474_v50 = vpack.c.bf16 %v14986_v14, %v14979_v28  ;;  %5736 = vmatpush1.bf16.msra.mxu1 %v18184_v51  ;;  %v18187_v62 = vpack.c.bf16 %v14739_v54, %v18077_v38  ;;  %v18188_v13 = vpack.c.bf16 %v18065_v58, %v14730_v0  ;;  %v8840_v2 = vpack.i.bf16 %v4390_v1, %v4439_v16  ;;  %v18190_v1 = vld [vmem:[#allocation115_spill] sm:$0xff]  ;;  %v15036_v20 = vpop.permute.xlu0 %8596 }
 0x8c0   :  { %v8845_v9 = vpack.i.bf16 %v4440_v30, %v4391_v17  ;;  %v8544_v36 = vunpack.i.h.bf16 %v14766_v7  ;;  %v8548_v45 = vunpack.i.l.bf16 %v14776_v49  ;;  %8831 = vrot.lane.b32.xlu1 %v8830_v34, %s8957_s29  ;;  %v4489_v63 = vsel %vm18189_vm15, %v8334_v61, %v8543_v10  ;;  %8836 = vrot.lane.b32.xlu0 %v8835_v15, %s8957_s29  ;;  %vm18248_vm15 = vmmov %vm18197_vm14 }
 0x8c1   :  { %5698 = vmatprep.subr.bf16.mxu0 %v18187_v62  ;;  %5737 = vmatprep.subr.bf16.mxu1 %v18188_v13  ;;  %v8554_v4 = vunpack.i.h.bf16 %v14827_v8  ;;  %v8553_v21 = vunpack.i.l.bf16 %v14827_v8  ;;  %v8589_v54 = vunpack.i.h.bf16 %v15004_v52  ;;  %v8850_v0 = vpack.i.bf16 %v14968_v19, %v4441_v48  ;;  %v18202_v48 = vld [vmem:[#allocation90_spill] sm:$0xff]  ;;  %v18204_v62 = vld [vmem:[#allocation47_spill] sm:$0xff] }
 0x8c2   :  { %v8558_v58 = vunpack.i.l.bf16 %v14845_v24  ;;  %v8564_v38 = vunpack.i.h.bf16 %v14899_v22  ;;  %v16860_v37 = vunpack.i.l.bf16 %v14899_v22  ;;  %v18192_v17 = vpack.c.bf16 %v18190_v1, %v18191_v55  ;;  %v18207_v1 = vld [vmem:[#allocation39_spill] sm:$0xff] }
 0x8c3   :  { %v18193_v61 = vpack.c.bf16 %v18078_v56, %v14715_v29  ;;  %v16859_v46 = vunpack.i.l.bf16 %v14904_v27  ;;  %v8573_v19 = vunpack.i.l.bf16 %v14942_v31  ;;  %v8578_v42 = vunpack.i.l.bf16 %v14948_v53 }
 0x8c4   :  { %5699 = vmatpush1.bf16.msra.mxu0 %v18192_v17  ;;  %v8594_v16 = vunpack.i.h.bf16 %v15030_v11  ;;  %v18194_v40 = vpack.c.bf16 %v14796_v23, %v14812_v32  ;;  %v18196_v56 = vpack.c.bf16 %v14752_v47, %v18195_v57  ;;  %v4490_v29 = vsel %vm18197_vm14, %v8543_v10, %v8544_v36  ;;  %8841 = vrot.lane.b32.xlu1 %v8840_v2, %s8957_s29  ;;  %v18200_v23 = vld [vmem:[#allocation45_spill] sm:$0xff]  ;;  %v15082_v57 = vpop.permute.xlu1 %8601 }
 0x8c5   :  { %5738 = vmatpush1.bf16.msra.mxu1 %v18193_v61  ;;  %v8855_v51 = vpack.i.bf16 %v14961_v44, %v4489_v63  ;;  %v18198_v34 = vunpack.i.h.bf16 %v14056_v18  ;;  %vm18199_vm11 = vcmask 302080   ;;  %v8559_v30 = vunpack.i.h.bf16 %v14845_v24  ;;  %8846 = vrot.lane.b32.xlu0 %v8845_v9, %s8957_s29  ;;  %v18206_v63 = vld [vmem:[#allocation35_spill] sm:$0xff]  ;;  %v18209_v17 = vld [vmem:[#allocation49_spill] sm:$0xff]  ;;  %v18210_v61 = vld [vmem:[#allocation40_spill] sm:$0xff] }
 0x8c6   :  { %5700 = vmatprep.subr.bf16.mxu0 %v18194_v40  ;;  %5739 = vmatprep.subr.bf16.mxu1 %v18196_v56  ;;  %v18201_v32 = vunpack.i.h.bf16 %v18200_v23  ;;  %v18203_v10 = vunpack.i.h.bf16 %v18202_v48  ;;  %v18205_v13 = vunpack.i.h.bf16 %v18204_v62  ;;  %v4977_v24 = vsel %vm1827_vm6, %v8539_v41, %v8553_v21  ;;  %v15089_v23 = vpop.permute.xlu0 %8606  ;;  %vm18244_vm12 = vmmov %vm18199_vm11 }
 0x8c7   :  { %v4539_v15 = vsel %vm18199_vm11, %v18198_v34, %v8548_v45  ;;  %v18208_v55 = vpack.c.bf16 %v18206_v63, %v18207_v1  ;;  %v18211_v40 = vpack.c.bf16 %v18209_v17, %v18210_v61  ;;  %v4993_v56 = vsel %vm1827_vm6, %v8554_v4, %v8558_v58  ;;  %vm18249_vm14 = vmmov %vm18199_vm11 }
 0x8c8   :  { %v4992_v47 = vsel %vm1827_vm6, %v18201_v32, %v8554_v4  ;;  %v15063_v44 = vsel %vm1827_vm6, %v18203_v10, %v8589_v54  ;;  %v15068_v18 = vsel %vm1827_vm6, %v18205_v13, %v8594_v16  ;;  %v4979_v9 = vsel %vm1827_vm6, %v8559_v30, %v16860_v37  ;;  %8851 = vrot.lane.b32.xlu1 %v8850_v0, %s8957_s29 }
 0x8c9   :  { %v5490_v2 = vpack.c.bf16 %v15068_v18, %v15063_v44  ;;  %5701 = vmatpush1.bf16.msra.mxu0 %v18208_v55  ;;  %5740 = vmatpush1.bf16.msra.mxu1 %v18211_v40  ;;  %v8584_v34 = vunpack.i.h.bf16 %v14998_v43  ;;  %v18212_v32 = vpack.c.bf16 %v14866_v33, %v14834_v26  ;;  %v18213_v48 = vpack.c.bf16 %v14839_v35, %v14817_v6  ;;  %v18218_v55 = vld [vmem:[#allocation51_spill] sm:$0xff] }
 0x8ca   :  { %v18214_v4 = vunpack.i.h.bf16 %v14904_v27  ;;  %v5025_v62 = vsel %vm1827_vm6, %v8574_v25, %v8578_v42  ;;  %v4995_v26 = vsel %vm1827_vm6, %v8564_v38, %v16859_v46  ;;  %v16872_v33 = vunpack.i.l.bf16 %v14998_v43  ;;  %8856 = vrot.lane.b32.xlu0 %v8855_v51, %s8957_s29  ;;  %v18221_v46 = vld [vmem:[#allocation135_spill] sm:$0xff] }
 0x8cb   :  { %5702 = vmatprep.subr.bf16.mxu0 %v18212_v32  ;;  %5741 = vmatprep.subr.bf16.mxu1 %v18213_v48  ;;  %v16871_v6 = vunpack.i.l.bf16 %v15004_v52  ;;  %v8593_v35 = vunpack.i.l.bf16 %v15030_v11  ;;  %v8598_v13 = vunpack.i.l.bf16 %v15036_v20  ;;  %v18215_v63 = vunpack.i.h.bf16 %v18072_v12 }
 0x8cc   :  { %v5009_v10 = vsel %vm1827_vm6, %v18214_v4, %v8573_v19  ;;  %v18216_v1 = vunpack.i.l.bf16 %v18072_v12  ;;  %vm18217_vm13 = vcmask 130048   ;;  %v18219_v17 = vunpack.i.h.bf16 %v18218_v55  ;;  %v18220_v4 = vld [vmem:[#allocation155_spill] sm:$0xff] }
 0x8cd   :  { %v5459_v40 = vpack.c.bf16 %v4993_v56, %v4977_v24  ;;  %v5445_v11 = vpack.c.bf16 %v14928_v59, %v14873_v5  ;;  %v8860_v32 = vpack.i.bf16 %v4490_v29, %v4539_v15  ;;  %v8579_v0 = vunpack.i.h.bf16 %v14948_v53  ;;  %v18223_v12 = vld [vmem:[#allocation167_spill] sm:$0xff]  ;;  %v15137_v56 = vpop.permute.xlu0 %8616 }
 0x8ce   :  { %v4149_v25 = vsel %vm18217_vm13, %v18216_v1, %v18215_v63  ;;  %v4976_v61 = vsel %vm1827_vm6, %v18219_v17, %v8539_v41  ;;  %v18222_v37 = vpack.c.bf16 %v18220_v4, %v18221_v46  ;;  %v18224_v63 = vpack.c.bf16 %v14773_v3, %v18223_v12  ;;  %v15133_v1 = vpop.permute.xlu1 %8611  ;;  %v18225_v41 = vld [vmem:[#allocation129_spill] sm:$0xff] }
 0x8cf   :  { %v5458_v48 = vpack.c.bf16 %v4992_v47, %v4976_v61  ;;  %v5444_v51 = vpack.c.bf16 %v18225_v41, %v4149_v25  ;;  %v4994_v24 = vsel %vm1827_vm6, %v8558_v58, %v8564_v38  ;;  %v5475_v5 = vpack.c.bf16 %v5025_v62, %v5009_v10  ;;  %8861 = vrot.lane.b32.xlu1 %v8860_v32, %s8957_s29  ;;  %v18226_v62 = vld [vmem:[#allocation121_spill] sm:$0xff]  ;;  %v18228_v25 = vld [vmem:[#allocation67_spill] sm:$0xff] }
 0x8d0   :  { %5703 = vmatpush1.bf16.msra.mxu0 %v18222_v37  ;;  %5742 = vmatpush1.bf16.msra.mxu1 %v18224_v63  ;;  %v5461_v59 = vpack.c.bf16 %v4995_v26, %v4979_v9  ;;  %v5041_v37 = vsel %vm1827_vm6, %v8589_v54, %v8593_v35  ;;  %v5057_v3 = vsel %vm1827_vm6, %v8594_v16, %v8598_v13  ;;  %v8604_v38 = vunpack.i.h.bf16 %v15082_v57  ;;  %v18231_v61 = vld [vmem:[#allocation89_spill] sm:$0xff] }
 0x8d1   :  { %5704 = vmatprep.subr.bf16.mxu0 %v5459_v40  ;;  %5743 = vmatprep.subr.bf16.mxu1 %v5445_v11  ;;  %v5011_v46 = vsel %vm1827_vm6, %v8579_v0, %v16872_v33  ;;  %v5027_v58 = vsel %vm1827_vm6, %v8584_v34, %v16871_v6  ;;  %v16868_v29 = vunpack.i.l.bf16 %v15082_v57  ;;  %v16867_v15 = vunpack.i.l.bf16 %v15089_v23  ;;  %v15171_v11 = vpop.permute.xlu0 %8621  ;;  %v18326_v6 = vld [vmem:[#allocation172_spill] sm:$0xff] }
 0x8d2   :  { %v8613_v47 = vunpack.i.l.bf16 %v15133_v1  ;;  %v4978_v54 = vsel %vm1827_vm6, %v8553_v21, %v8559_v30  ;;  %v8614_v16 = vunpack.i.h.bf16 %v15133_v1  ;;  %v8618_v9 = vunpack.i.l.bf16 %v15137_v56  ;;  %v15159_v10 = vpop.permute.xlu1 %8626  ;;  %v18335_v33 = vld [vmem:[#allocation176_spill] sm:$0xff] }
 0x8d3   :  { %v18227_v26 = vunpack.i.l.bf16 %v18226_v62  ;;  %v18229_v55 = vunpack.i.h.bf16 %v18228_v25  ;;  %vm18230_vm7 = vcmask 875520   ;;  %v8349_v40 = vunpack.i.h.bf16 %v18231_v61  ;;  %v18236_v25 = vld [vmem:[#allocation92_spill] sm:$0xff] }
 0x8d4   :  { %5705 = vmatpush1.bf16.msra.mxu0 %v5458_v48  ;;  %5744 = vmatpush1.bf16.msra.mxu1 %v5444_v51  ;;  %v5460_v8 = vpack.c.bf16 %v4994_v24, %v4978_v54  ;;  %v8599_v21 = vunpack.i.h.bf16 %v15036_v20  ;;  %v8609_v30 = vunpack.i.h.bf16 %v15089_v23  ;;  %v5010_v32 = vsel %vm1827_vm6, %v8573_v19, %v8579_v0  ;;  %vm18247_vm10 = vmmov %vm18230_vm7 }
 0x8d5   :  { %v15166_v17 = vsel %vm18230_vm7, %v18229_v55, %v18227_v26  ;;  %5706 = vmatprep.subr.bf16.mxu0 %v5475_v5  ;;  %5745 = vmatprep.subr.bf16.mxu1 %v5461_v59  ;;  %v5026_v48 = vsel %vm1827_vm6, %v8578_v42, %v8584_v34  ;;  %v5491_v4 = vpack.c.bf16 %v5057_v3, %v5041_v37  ;;  %v16866_v53 = vunpack.i.l.bf16 %v15159_v10  ;;  %v15200_v5 = vpop.permute.xlu0 %8631 }
 0x8d6   :  { %v5477_v12 = vpack.c.bf16 %v5027_v58, %v5011_v46  ;;  %v5058_v63 = vsel %vm1827_vm6, %v8598_v13, %v8604_v38  ;;  %v5073_v20 = vsel %vm1827_vm6, %v8609_v30, %v8613_v47  ;;  %v5043_v41 = vsel %vm1827_vm6, %v8599_v21, %v16868_v29  ;;  %v15195_v34 = vpop.permute.xlu1 %8636  ;;  %v18234_v46 = vld [vmem:[#allocation175_spill] sm:$0xff] }
 0x8d7   :  { %v5059_v31 = vsel %vm1827_vm6, %v8604_v38, %v16867_v15  ;;  %v8624_v19 = vunpack.i.h.bf16 %v15171_v11  ;;  %v16865_v42 = vunpack.i.l.bf16 %v15171_v11  ;;  %v5089_v13 = vsel %vm1827_vm6, %v8614_v16, %v8618_v9 }
 0x8d8   :  { %5707 = vmatpush1.bf16.msra.mxu0 %v5474_v50  ;;  %5746 = vmatpush1.bf16.msra.mxu1 %v5460_v8  ;;  %v5476_v0 = vpack.c.bf16 %v5026_v48, %v5010_v32  ;;  %v5042_v51 = vsel %vm1827_vm6, %v8593_v35, %v8599_v21  ;;  %v8638_v24 = vunpack.i.l.bf16 %v15195_v34  ;;  %v18232_v59 = vunpack.i.l.bf16 %v18231_v61  ;;  %v18237_v32 = vld [vmem:[#allocation173_spill] sm:$0xff] }
 0x8d9   :  { %5708 = vmatprep.subr.bf16.mxu0 %v5491_v4  ;;  %5747 = vmatprep.subr.bf16.mxu1 %v5477_v12  ;;  %vm18233_vm0 = vcmask 236544   ;;  %v8619_v14 = vunpack.i.h.bf16 %v15137_v56  ;;  %v8629_v50 = vunpack.i.h.bf16 %v15159_v10  ;;  %v8634_v37 = vunpack.i.h.bf16 %v15200_v5  ;;  %v18274_v61 = vld [vmem:[#allocation77_spill] sm:$0xff] }
 0x8da   :  { %v15207_v28 = vsel %vm18233_vm0, %v18232_v59, %v8349_v40  ;;  %v8633_v35 = vunpack.i.l.bf16 %v15200_v5  ;;  %v5492_v3 = vpack.c.bf16 %v5058_v63, %v5042_v51  ;;  %v18235_v58 = vunpack.i.h.bf16 %v18234_v46  ;;  %v15220_v56 = vpop.permute.xlu1 %8641 }
 0x8db   :  { %v5507_v54 = vpack.c.bf16 %v5089_v13, %v5073_v20  ;;  %v5493_v26 = vpack.c.bf16 %v5059_v31, %v5043_v41  ;;  %v16861_v55 = vunpack.i.l.bf16 %v18236_v25  ;;  %v5075_v21 = vsel %vm1827_vm6, %v8619_v14, %v16865_v42 }
 0x8dc   :  { %v5088_v38 = vsel %vm1827_vm6, %v18235_v58, %v8614_v16  ;;  %5709 = vmatpush1.bf16.msra.mxu0 %v5490_v2  ;;  %5748 = vmatpush1.bf16.msra.mxu1 %v5476_v0  ;;  %v5105_v8 = vsel %vm1827_vm6, %v8629_v50, %v8633_v35  ;;  %v5091_v16 = vsel %vm1827_vm6, %v8624_v19, %v16866_v53  ;;  %v18238_v48 = vunpack.i.h.bf16 %v18237_v32  ;;  %v15234_v2 = vpop.permute.xlu0 %8646 }
 0x8dd   :  { %v8644_v44 = vunpack.i.h.bf16 %v15220_v56  ;;  %v16862_v18 = vunpack.i.l.bf16 %v15220_v56  ;;  %5710 = vmatprep.subr.bf16.mxu0 %v5507_v54  ;;  %5749 = vmatprep.subr.bf16.mxu1 %v5493_v26  ;;  %v5121_v12 = vsel %vm1827_vm6, %v8634_v37, %v8638_v24  ;;  %v8639_v20 = vunpack.i.h.bf16 %v15195_v34  ;;  %v18242_v54 = vld [vmem:[#allocation177_spill] sm:$0xff] }
 0x8de   :  { %v5072_v4 = vsel %vm1827_vm6, %v18238_v48, %v8609_v30  ;;  %v8649_v41 = vunpack.i.h.bf16 %v15234_v2  ;;  %v16864_v31 = vunpack.i.l.bf16 %v15234_v2  ;;  %v5090_v13 = vsel %vm1827_vm6, %v8618_v9, %v8624_v19  ;;  %v18239_v30 = vld [vmem:[#allocation179_spill] sm:$0xff]  ;;  %v8652_v58 = vpop.permute.xlu1 %8651 }
 0x8df   :  { %v5506_v63 = vpack.c.bf16 %v5088_v38, %v5072_v4  ;;  %v18240_v0 = vunpack.i.h.bf16 %v18239_v30  ;;  %v5523_v5 = vpack.c.bf16 %v5121_v12, %v5105_v8  ;;  %v5509_v59 = vpack.c.bf16 %v5091_v16, %v5075_v21 }
 0x8e0   :  { %v8549_v46 = vunpack.i.h.bf16 %v14776_v49  ;;  %5750 = vmatpush1.bf16.msra.mxu1 %v5492_v3  ;;  %v5107_v34 = vsel %vm1827_vm6, %v8639_v20, %v16862_v18  ;;  %v5123_v38 = vsel %vm1827_vm6, %v8644_v44, %v16864_v31  ;;  %v18241_v9 = vunpack.i.l.bf16 %v14686_v60  ;;  %v4525_v16 = vpop.permute.xlu0 %4524  ;;  %v18288_v18 = vld [vmem:[#allocation29_spill] sm:$0xff] }
 0x8e1   :  { %v5120_v51 = vsel %vm1827_vm6, %v18240_v0, %v8634_v37  ;;  %5711 = vmatpush1.bf16.msra.mxu0 %v5506_v63  ;;  %v5074_v37 = vsel %vm1827_vm6, %v8613_v47, %v8619_v14  ;;  %v18243_v26 = vunpack.i.h.bf16 %v18242_v54  ;;  %v8654_v8 = vunpack.i.h.bf16 %v8652_v58  ;;  %5751 = vmatprep.subr.bf16.mxu1 %v5509_v59  ;;  %v18245_v63 = vld [vmem:[#allocation127_spill] sm:$0xff]  ;;  %v18255_v54 = vld [vmem:[#allocation169_spill] sm:$0xff] }
 0x8e2   :  { %v5136_v19 = vsel %vm1827_vm6, %v18241_v9, %v8649_v41  ;;  %v8653_v21 = vunpack.i.l.bf16 %v8652_v58  ;;  %5712 = vmatprep.subr.bf16.mxu0 %v5523_v5  ;;  %v5508_v32 = vpack.c.bf16 %v5090_v13, %v5074_v37  ;;  %v5122_v4 = vsel %vm1827_vm6, %v8638_v24, %v8644_v44  ;;  %v4475_v0 = vpop.permute.xlu1 %4474 }
 0x8e3   :  { %v5104_v3 = vsel %vm1827_vm6, %v18243_v26, %v8629_v50  ;;  %v4541_v60 = vsel %vm18244_vm12, %v8549_v46, %v4525_v16  ;;  %v5525_v47 = vpack.c.bf16 %v5123_v38, %v5107_v34  ;;  %v5538_v14 = vpack.c.bf16 %v5136_v19, %v5136_v19  ;;  %vm18267_vm12 = vmmov %vm18233_vm0  ;;  %v18327_v16 = vld [vmem:[#allocation57_spill] sm:$0xff]  ;;  %v18328_v26 = vld [vmem:[#allocation34_spill] sm:$0xff] }
 0x8e4   :  { %v5522_v48 = vpack.c.bf16 %v5120_v51, %v5104_v3  ;;  %v5137_v12 = vsel %vm1827_vm6, %v8649_v41, %v8653_v21  ;;  %v8870_v1 = vpack.i.bf16 %v15207_v28, %v4541_v60  ;;  %v7854_v30 = vunpack.i.h.bf16 %v18245_v63  ;;  %5752 = vmatpush1.bf16.msra.mxu1 %v5508_v32  ;;  %v15281_v59 = vpop.permute.xlu0 %8661  ;;  %v18256_v3 = vld [vmem:[#allocation18_spill] sm:$0xff]  ;;  %v18258_v32 = vld [vmem:[#allocation19_spill] sm:$0xff] }
 0x8e5   :  { %v5539_v50 = vpack.c.bf16 %v5137_v12, %v5137_v12  ;;  %v5138_v5 = vsel %vm1827_vm6, %v8653_v21, %v8654_v8  ;;  %v18246_v24 = vunpack.i.h.bf16 %v18226_v62  ;;  %v7853_v41 = vunpack.i.l.bf16 %v18245_v63  ;;  %5753 = vmatprep.subr.bf16.mxu1 %v5525_v47  ;;  %v18250_v62 = vld [vmem:[#allocation120_spill] sm:$0xff]  ;;  %v18257_v21 = vld [vmem:[#allocation81_spill] sm:$0xff]  ;;  %v18259_v47 = vld [vmem:[#allocation14_spill] sm:$0xff] }
 0x8e6   :  { %5713 = vmatpush1.bf16.msra.mxu0 %v5522_v48  ;;  %v5106_v28 = vsel %vm1827_vm6, %v8633_v35, %v8639_v20  ;;  %v4491_v13 = vsel %vm18248_vm15, %v8544_v36, %v4475_v0  ;;  %v4540_v51 = vsel %vm18249_vm14, %v8548_v45, %v8549_v46  ;;  %8871 = vrot.lane.b32.xlu1 %v8870_v1, %s8957_s29  ;;  %v7903_v58 = vunpack.i.l.bf16 %v18250_v62  ;;  %v18253_v35 = vld [vmem:[#allocation168_spill] sm:$0xff]  ;;  %v18254_v20 = vld [vmem:[#allocation5_spill] sm:$0xff]  ;;  %v8657_v37 = vpop.permute.xlu1 %8656  ;;  %v18263_v0 = vld [vmem:[#allocation118_spill] sm:$0xff] }
 0x8e7   :  { %v15271_v44 = vsel %vm18247_vm10, %v18246_v24, %v16861_v55  ;;  %v5524_v34 = vpack.c.bf16 %v5122_v4, %v5106_v28  ;;  %v8865_v38 = vpack.i.bf16 %v4540_v51, %v4491_v13  ;;  %v16863_v9 = vunpack.i.l.bf16 %v15281_v59  ;;  %v18264_v28 = vld [vmem:[#allocation64_spill] sm:$0xff]  ;;  %v18284_v55 = vld [vmem:[#allocation61_spill] sm:$0xff] }
 0x8e8   :  { %vm18251_vm11 = vcmask 1043456   ;;  %v7904_v7 = vunpack.i.h.bf16 %v18250_v62  ;;  %v5540_v49 = vpack.c.bf16 %v5138_v5, %v5138_v5  ;;  %v5383_v45 = vpack.c.bf16 %v15166_v17, %v18253_v35  ;;  %v4575_v1 = vpop.permute.xlu0 %4574  ;;  %v18310_v63 = vld [vmem:[#allocation97_spill] sm:$0xff] }
 0x8e9   :  { %6151 = vmatprep.subr.msk.bf16.mxu0 %vm18251_vm11, %v5539_v50  ;;  %vm18252_vm13 = vmmov %vm18251_vm11  ;;  %v7849_v46 = vunpack.i.h.bf16 %v18254_v20  ;;  %v5139_v19 = vsel %vm1827_vm6, %v8654_v8, %v16863_v9  ;;  %5754 = vmatpush1.bf16.msra.mxu1 %v5524_v34  ;;  %v7948_v48 = vunpack.i.l.bf16 %v18258_v32  ;;  %v8659_v60 = vunpack.i.h.bf16 %v8657_v37 }
 0x8ea   :  { %v5571_v36 = vsel %vm18252_vm13, %v5538_v14, 0  ;;  %v5541_v4 = vpack.c.bf16 %v5139_v19, %v5139_v19  ;;  %v8658_v12 = vunpack.i.l.bf16 %v8657_v37  ;;  %8866 = vrot.lane.b32.xlu0 %v8865_v38, %s8957_s29  ;;  %v18260_v14 = vld [vmem:[#allocation70_spill] sm:$0xff]  ;;  %vm18262_vm7 = vcmask 867328   ;;  %vm18269_vm10 = vmmov %vm18251_vm11 }
 0x8eb   :  { %5715 = vmatpush1.bf16.msra.mxu0 %v5571_v36  ;;  %v18261_v8 = vpack.c.bf16 %v18259_v47, %v18260_v14  ;;  %v15307_v50 = vsel %vm18262_vm7, %v7853_v41, %v7854_v30  ;;  %v7909_v5 = vunpack.i.h.bf16 %v18263_v0  ;;  %v7908_v24 = vunpack.i.l.bf16 %v18263_v0  ;;  %v18268_v36 = vld [vmem:[#allocation165_spill] sm:$0xff]  ;;  %vm18270_vm15 = vmmov %vm18269_vm10  ;;  %v18273_v14 = vld [vmem:[#allocation132_spill] sm:$0xff] }
 0x8ec   :  { %v18265_v13 = vunpack.i.h.bf16 %v18264_v28  ;;  %v15317_v62 = vsel %vm654_vm8, %v7903_v58, %v7904_v7  ;;  %v4590_v34 = vsel %vm18233_vm0, %v8658_v12, %v8659_v60  ;;  %v4589_v38 = vsel %vm18267_vm12, %v8349_v40, %v8658_v12  ;;  %6153 = vmatprep.subr.msk.bf16.mxu1 %vm18269_vm10, %v5541_v4  ;;  %vm18272_vm14 = vmmov %vm18262_vm7  ;;  %v18275_v40 = vld [vmem:[#allocation54_spill] sm:$0xff]  ;;  %v15337_v28 = vpop.permute.xlu1 %3943 }
 0x8ed   :  { %5770 = vmatprep.subr.bf16.mxu0 %v18261_v8  ;;  %18266 = vst [vmem:[#allocation154_spill] sm:$0xff] %v15317_v62  ;;  %v5577_v19 = vsel %vm18270_vm15, %v5540_v49, 0  ;;  %v18271_v37 = vunpack.i.l.bf16 %v18254_v20  ;;  %v8880_v8 = vpack.i.bf16 %v4590_v34, %v15317_v62  ;;  %v18276_v12 = vpack.c.bf16 %v18274_v61, %v18275_v40  ;;  %18277 = vst [vmem:[#allocation15_spill] sm:$0xff] %v15337_v28  ;;  %v18278_v49 = vld [vmem:[#allocation23_spill] sm:$0xff] }
 0x8ee   :  { %v15314_v51 = vsel %vm654_vm8, %v18265_v13, %v7903_v58  ;;  %5721 = vmatmul.mubr.bf16.vlgmr.msra.gmra.mrb[20].mxu0 %v18268_v36  ;;  %v16869_v58 = vunpack.i.l.bf16 %v18273_v14  ;;  %5756 = vmatpush1.bf16.msra.mxu1 %v5577_v19  ;;  %v18279_v20 = vunpack.i.h.bf16 %v18278_v49  ;;  %v18281_v13 = vld [vmem:[#allocation7_spill] sm:$0xff]  ;;  %vm18282_vm11 = vmmov %vm18233_vm0  ;;  %v15349_v19 = vpop.permute.xlu0 %8666  ;;  %v4594_v49 = vsel %vm654_vm8, %v7908_v24, %v7909_v5 }
 0x8ef   :  { %v15329_v47 = vsel %vm18272_vm14, %v18271_v37, %v7849_v46  ;;  %v8875_v0 = vpack.i.bf16 %v15314_v51, %v4589_v38  ;;  %5771 = vmatpush1.bf16.msra.mxu0 %v18276_v12  ;;  %v7954_v37 = vunpack.i.h.bf16 %v18281_v13  ;;  %v7953_v34 = vunpack.i.l.bf16 %v18281_v13  ;;  %18283 = vst [vmem:[#allocation76_spill] sm:$0xff] %v15349_v19  ;;  %v18285_v61 = vld [vmem:[#allocation79_spill] sm:$0xff]  ;;  %v18287_v12 = vld [vmem:[#allocation21_spill] sm:$0xff]  ;;  %8881 = vrot.lane.b32.xlu1 %v8880_v8, %s8957_s29  ;;  %vm18292_vm13 = vmmov %vm18262_vm7 }
 0x8f0   :  { %v15344_v4 = vsel %vm721_vm9, %v18279_v20, %v7948_v48  ;;  %v4591_v38 = vsel %vm18282_vm11, %v8659_v60, %v4575_v1  ;;  %v18286_v40 = vpack.c.bf16 %v18284_v55, %v18285_v61  ;;  %v18289_v9 = vpack.c.bf16 %v18287_v12, %v18288_v18  ;;  %v18290_v20 = vld [vmem:[#allocation60_spill] sm:$0xff]  ;;  %v18293_v1 = vld [vmem:[#allocation50_spill] sm:$0xff]  ;;  %v18297_v8 = vld [vmem:[#allocation99_spill] sm:$0xff]  ;;  %v15381_v12 = vpop.permute.xlu1 %8671 }
 0x8f1   :  { %18280 = vst [vmem:[#allocation102_spill] sm:$0xff] %v15344_v4  ;;  %v7979_v31 = vunpack.i.h.bf16 %v18290_v20  ;;  %v15360_v42 = vsel %vm654_vm8, %v7904_v7, %v7908_v24  ;;  %8876 = vrot.lane.b32.xlu0 %v8875_v0, %s8957_s29  ;;  %v15365_v60 = vsel %vm18292_vm13, %v7849_v46, %v7853_v41  ;;  %v7949_v55 = vunpack.i.h.bf16 %v18258_v32  ;;  %v18294_v18 = vld [vmem:[#allocation16_spill] sm:$0xff]  ;;  %5762 = vmatmul.mubr.bf16.vlgmr.msra.gmra.mrb[20].mxu1 %v18268_v36  ;;  %v18295_v61 = vld [vmem:[#allocation58_spill] sm:$0xff]  ;;  %v18299_v41 = vld [vmem:[#allocation111_spill] sm:$0xff] }
 0x8f2   :  { %5772 = vmatprep.subr.bf16.mxu0 %v18286_v40  ;;  %5811 = vmatprep.subr.bf16.mxu1 %v18289_v9  ;;  %18291 = vst [vmem:[#allocation26_spill] sm:$0xff] %v15360_v42  ;;  %v16870_v13 = vunpack.i.l.bf16 %v18293_v1  ;;  %v7984_v9 = vunpack.i.h.bf16 %v18294_v18  ;;  %v7983_v5 = vunpack.i.l.bf16 %v18294_v18  ;;  %v8885_v7 = vpack.i.bf16 %v15360_v42, %v4591_v38  ;;  %v18296_v24 = vld [vmem:[#allocation86_spill] sm:$0xff]  ;;  %v18300_v46 = vld [vmem:[#allocation53_spill] sm:$0xff]  ;;  %vm18302_vm8 = vmmov %vm18262_vm7 }
 0x8f3   :  { %6156 = vmatprep.mubr.msk.bf16.mxu0 %vm2411_vm5, %v18295_v61  ;;  %v18298_v0 = vpack.c.bf16 %v18296_v24, %v18297_v8  ;;  %v18301_v40 = vpack.c.bf16 %v18299_v41, %v18300_v46  ;;  %v8890_v53 = vpack.i.bf16 %v15344_v4, %v4594_v49  ;;  %v15389_v18 = vsel %vm18302_vm8, %v7854_v30, %v16869_v58  ;;  %v15395_v8 = vpop.permute.xlu0 %8676  ;;  %v18305_v41 = vld [vmem:[#allocation160_spill] sm:$0xff]  ;;  %v18308_v49 = vld [vmem:[#allocation101_spill] sm:$0xff]  ;;  %v18361_v42 = vld [vmem:[#allocation178_spill] sm:$0xff] }
 0x8f4   :  { %v15392_v38 = vsel %vm721_vm9, %v7949_v55, %v7953_v34  ;;  %v4597_v24 = vsel %vm721_vm9, %v7953_v34, %v7954_v37  ;;  %v5398_v29 = vpack.c.bf16 %v18310_v63, %v15329_v47  ;;  %v18311_v30 = vunpack.i.l.bf16 %v18290_v20  ;;  %v18313_v37 = vld [vmem:[#allocation171_spill] sm:$0xff]  ;;  %6158 = vmatprep.mubr.msk.bf16.mxu1 %vm2411_vm5, %v18295_v61  ;;  %v18330_v32 = vld [vmem:[#allocation161_spill] sm:$0xff]  ;;  %v18350_v19 = vld [vmem:[#allocation4_spill] sm:$0xff] }
 0x8f5   :  { %5773 = vmatpush1.bf16.msra.mxu0 %v18298_v0  ;;  %5812 = vmatpush1.bf16.msra.mxu1 %v18301_v40  ;;  %18303 = vst [vmem:[#allocation108_spill] sm:$0xff] %v15392_v38  ;;  %v18304_v0 = vld [vmem:[#allocation163_spill] sm:$0xff]  ;;  %v18307_v40 = vld [vmem:[#allocation141_spill] sm:$0xff]  ;;  %vm18312_vm7 = vcmask 211968   ;;  %v5399_v34 = vpack.c.bf16 %v18313_v37, %v15365_v60  ;;  %v8895_v60 = vpack.i.bf16 %v4597_v24, %v15392_v38  ;;  %v8274_v24 = vunpack.i.h.bf16 %v18327_v16  ;;  %v18349_v38 = vld [vmem:[#allocation164_spill] sm:$0xff] }
 0x8f6   :  { %v18306_v46 = vpack.c.bf16 %v18304_v0, %v18305_v41  ;;  %v18309_v15 = vpack.c.bf16 %v18307_v40, %v18308_v49  ;;  %v15408_v58 = vsel %vm18312_vm7, %v18311_v30, %v7979_v31  ;;  %8886 = vrot.lane.b32.xlu0 %v8885_v7, %s8957_s29  ;;  %8891 = vrot.lane.b32.xlu1 %v8890_v53, %s8957_s29  ;;  %v18314_v0 = vld [vmem:[#allocation170_spill] sm:$0xff]  ;;  %v18316_v40 = vld [vmem:[#allocation131_spill] sm:$0xff]  ;;  %vm18317_vm0 = vmmov %vm18312_vm7  ;;  %v8359_v53 = vunpack.i.h.bf16 %v18328_v26 }
 0x8f7   :  { %v5401_v41 = vpack.c.bf16 %v18314_v0, %v15389_v18  ;;  %v8259_v49 = vunpack.i.h.bf16 %v18316_v40  ;;  %v3954_v47 = vsel %vm18317_vm0, %v7979_v31, %v7983_v5  ;;  %vm18318_vm12 = vmmov %vm18317_vm0  ;;  %v18319_v7 = vld [vmem:[#allocation159_spill] sm:$0xff]  ;;  %v18320_v18 = vld [vmem:[#allocation46_spill] sm:$0xff]  ;;  %v15434_v31 = vpop.permute.xlu1 %8681  ;;  %vm18337_vm10 = vcmask 146432  }
 0x8f8   :  { %5774 = vmatprep.subr.bf16.mxu0 %v18306_v46  ;;  %5813 = vmatprep.subr.bf16.mxu1 %v18309_v15  ;;  %v18315_v46 = vld [vmem:[#allocation75_spill] sm:$0xff]  ;;  %v15422_v20 = vsel %vm18318_vm12, %v7984_v9, %v16870_v13  ;;  %v18321_v63 = vpack.c.bf16 %v18319_v7, %v18320_v18  ;;  %v18322_v30 = vld [vmem:[#allocation96_spill] sm:$0xff]  ;;  %v15439_v13 = vsel %vm721_vm9, %v7948_v48, %v7949_v55  ;;  %v8358_v7 = vunpack.i.l.bf16 %v18328_v26  ;;  %v15446_v18 = vpop.permute.xlu0 %8686  ;;  %v18332_v48 = vld [vmem:[#allocation162_spill] sm:$0xff] }
 0x8f9   :  { %v8254_v15 = vunpack.i.h.bf16 %v18315_v46  ;;  %v18323_v37 = vld [vmem:[#allocation83_spill] sm:$0xff]  ;;  %18325 = vst [vmem:[#allocation55_spill] sm:$0xff] %v15439_v13  ;;  %v5414_v55 = vpack.c.bf16 %v15408_v58, %v18332_v48  ;;  %vm18333_vm9 = vmmov %vm18317_vm0  ;;  %v18334_v26 = vld [vmem:[#allocation174_spill] sm:$0xff]  ;;  %v5417_v17 = vpack.c.bf16 %v15422_v20, %v18335_v33  ;;  %v18336_v35 = vunpack.i.l.bf16 %v18315_v46 }
 0x8fa   :  { %5775 = vmatpush1.bf16.msra.mxu0 %v18321_v63  ;;  %v18324_v0 = vpack.c.bf16 %v18322_v30, %v18323_v37  ;;  %v18329_v63 = vld [vmem:[#allocation147_spill] sm:$0xff]  ;;  %v15457_v37 = vsel %vm18333_vm9, %v7983_v5, %v7984_v9  ;;  %4966 = vrot.lane.b32.xlu0 %v15439_v13, %s8957_s29  ;;  %v18338_v58 = vunpack.i.l.bf16 %v18316_v40  ;;  %vm18339_vm15 = vcmask 138240   ;;  %vm18360_vm7 = vmmov %vm18337_vm10 }
 0x8fb   :  { %5776 = vmatprep.subr.bf16.mxu0 %v5383_v45  ;;  %v18331_v30 = vpack.c.bf16 %v18329_v63, %v18330_v32  ;;  %8896 = vrot.lane.b32.xlu1 %v8895_v60, %s8957_s29  ;;  %v15468_v45 = vsel %vm18337_vm10, %v18336_v35, %v8254_v15  ;;  %v18340_v5 = vld [vmem:[#allocation59_spill] sm:$0xff]  ;;  %v18341_v33 = vunpack.i.h.bf16 %v18134_v39  ;;  %v18342_v46 = vunpack.i.l.bf16 %v18134_v39  ;;  %v18346_v35 = vld [vmem:[#allocation180_spill] sm:$0xff]  ;;  %v15496_v4 = vpop.permute.xlu1 %8691  ;;  %vm18354_vm13 = vmmov %vm18339_vm15 }
 0x8fc   :  { %5814 = vmatpush1.bf16.msra.mxu1 %v18324_v0  ;;  %v5415_v0 = vpack.c.bf16 %v3954_v47, %v18334_v26  ;;  %v15473_v9 = vsel %vm18339_vm15, %v18338_v58, %v8259_v49  ;;  %v8354_v63 = vunpack.i.h.bf16 %v18340_v5  ;;  %v8353_v32 = vunpack.i.l.bf16 %v18340_v5  ;;  %v3231_v47 = vld [vmem:[%s16239_s6] sm:$0xff]  ;;  %v18344_v60 = vld [vmem:[#allocation27_spill] sm:$0xff]  ;;  %v18347_v58 = vld [vmem:[#allocation152_spill] sm:$0xff]  ;;  %v15506_v40 = vpop.permute.xlu0 %8696 }
 0x8fd   :  { %5815 = vmatprep.subr.bf16.mxu1 %v18331_v30  ;;  %vm18343_vm14 = vcmask 64512   ;;  %v18345_v30 = vld [vmem:[#allocation105_spill] sm:$0xff]  ;;  %v18348_v5 = vpack.c.bf16 %v18346_v35, %v18347_v58  ;;  %v18351_v28 = vpack.c.bf16 %v18349_v38, %v18350_v19  ;;  %v18352_v13 = vunpack.i.l.bf16 %v18327_v16  ;;  %vm18356_vm8 = vmmov %vm18354_vm13 }
 0x8fe   :  { %v15485_v20 = vsel %vm18343_vm14, %v18342_v46, %v18341_v33  ;;  %v8374_v48 = vunpack.i.h.bf16 %v18345_v30  ;;  %v8373_v26 = vunpack.i.l.bf16 %v18345_v30  ;;  %vm18353_vm11 = vcmask 130048   ;;  %v18358_v35 = vld [vmem:[#allocation157_spill] sm:$0xff]  ;;  %5552 = vperm.xlu0 %7543, %v3231_v47   ;;  %vm18365_vm12 = vmmov %vm18360_vm7 }
 0x8ff   :  { %5777 = vmatpush1.bf16.msra.mxu0 %v18348_v5  ;;  %v15501_v33 = vsel %vm18353_vm11, %v18352_v13, %v8274_v24  ;;  %v15504_v46 = vsel %vm18354_vm13, %v8358_v7, %v8359_v53  ;;  %v18355_v30 = vpack.c.bf16 %v15271_v44, %v18255_v54  ;;  %v4086_v19 = vsel %vm18356_vm8, %v8259_v49, %v8358_v7  ;;  %v18359_v16 = vld [vmem:[#allocation73_spill] sm:$0xff]  ;;  %v18362_v49 = vld [vmem:[#allocation95_spill] sm:$0xff]  ;;  %vm18363_vm0 = vmmov %vm18353_vm11 }
 0x900   :  { %5816 = vmatpush1.bf16.msra.mxu1 %v18351_v28  ;;  %5778 = vmatprep.subr.bf16.mxu0 %v5399_v34  ;;  %v18357_v28 = vld [vmem:[#allocation156_spill] sm:$0xff]  ;;  %v16879_v58 = vunpack.i.l.bf16 %v18358_v35  ;;  %v8379_v5 = vunpack.i.h.bf16 %v18359_v16  ;;  %v8378_v13 = vunpack.i.l.bf16 %v18359_v16  ;;  %v15517_v62 = vsel %vm18360_vm7, %v8353_v32, %v8354_v63  ;;  %v15532_v16 = vpop.permute.xlu1 %8701  ;;  %vm18367_vm9 = vmmov %vm18360_vm7  ;;  %v15539_v54 = vpop.permute.xlu0 %8706 }
 0x901   :  { %5817 = vmatprep.subr.bf16.mxu1 %v18355_v30  ;;  %v16880_v38 = vunpack.i.l.bf16 %v18357_v28  ;;  %v5430_v34 = vpack.c.bf16 %v15473_v9, %v15468_v45  ;;  %v5416_v44 = vpack.c.bf16 %v15457_v37, %v18361_v42  ;;  %v15527_v30 = vsel %vm18363_vm0, %v8373_v26, %v8374_v48  ;;  %vm18368_vm10 = vmmov %vm18363_vm0 }
 0x902   :  { %v18364_v47 = vpack.c.bf16 %v18257_v21, %v18256_v3  ;;  %v4020_v45 = vsel %vm18365_vm12, %v8254_v15, %v8353_v32  ;;  %v18366_v9 = vunpack.i.l.bf16 %v18344_v60  ;;  %v5432_v3 = vpack.c.bf16 %v15504_v46, %v15517_v62  ;;  %vm18369_vm15 = vmmov %vm18343_vm14  ;;  %v18370_v15 = vld [vmem:[#allocation166_spill] sm:$0xff] }
 0x903   :  { %5779 = vmatpush1.bf16.msra.mxu0 %v5398_v29  ;;  %v5431_v7 = vpack.c.bf16 %v4086_v19, %v4020_v45  ;;  %v4152_v29 = vsel %vm18368_vm10, %v8274_v24, %v8373_v26  ;;  %v15545_v21 = vsel %vm18369_vm15, %v8378_v13, %v8379_v5  ;;  %v16883_v32 = vunpack.i.l.bf16 %v18370_v15  ;;  %vm18371_vm14 = vmmov %vm18356_vm8 }
 0x904   :  { %5818 = vmatpush1.bf16.msra.mxu1 %v18364_v47  ;;  %v4022_v42 = vsel %vm18367_vm9, %v8354_v63, %v18366_v9  ;;  %5780 = vmatprep.subr.bf16.mxu0 %v5415_v0  ;;  %v4088_v63 = vsel %vm18371_vm14, %v8359_v53, %v16880_v38  ;;  %vm18372_vm11 = vmmov %vm18363_vm0  ;;  %v8674_v24 = vunpack.i.h.bf16 %v15381_v12  ;;  %v8673_v26 = vunpack.i.l.bf16 %v15381_v12  ;;  %v15567_v9 = vpop.permute.xlu1 %8711 }
 0x905   :  { %5819 = vmatprep.subr.bf16.mxu1 %v5401_v41  ;;  %v4154_v0 = vsel %vm18372_vm11, %v8374_v48, %v16879_v58  ;;  %v8664_v41 = vunpack.i.h.bf16 %v15281_v59  ;;  %v18373_v62 = vunpack.i.h.bf16 %v18134_v39  ;;  %vm18374_vm13 = vmmov %vm18369_vm15  ;;  %v8678_v19 = vunpack.i.l.bf16 %v15395_v8 }
 0x906   :  { %v8684_v47 = vunpack.i.h.bf16 %v15434_v31  ;;  %v16882_v53 = vunpack.i.l.bf16 %v15434_v31  ;;  %v16881_v45 = vunpack.i.l.bf16 %v15446_v18  ;;  %v18375_v48 = vpack.c.bf16 %v18326_v6, %v15307_v50  ;;  %vm18376_vm8 = vmmov %vm18374_vm13 }
 0x907   :  { %v4218_v46 = vsel %vm18374_vm13, %v18373_v62, %v8378_v13  ;;  %5781 = vmatpush1.bf16.msra.mxu0 %v5414_v55  ;;  %v8694_v12 = vunpack.i.h.bf16 %v15496_v4  ;;  %v16884_v39 = vunpack.i.l.bf16 %v15496_v4  ;;  %v15572_v62 = vpop.permute.xlu0 %8716  ;;  %v5433_v58 = vpack.c.bf16 %v4088_v63, %v4022_v42  ;;  %v18379_v42 = vld [vmem:[#allocation78_spill] sm:$0xff] }
 0x908   :  { %5820 = vmatpush1.bf16.msra.mxu1 %v18375_v48  ;;  %5782 = vmatprep.subr.bf16.mxu0 %v5431_v7  ;;  %v8679_v38 = vunpack.i.h.bf16 %v15395_v8  ;;  %v5447_v55 = vpack.c.bf16 %v4218_v46, %v4152_v29  ;;  %v4220_v6 = vsel %vm18376_vm8, %v8379_v5, %v16883_v32  ;;  %v5448_v50 = vpack.c.bf16 %v15545_v21, %v15527_v30  ;;  %v15589_v5 = vpop.permute.xlu1 %8721 }
 0x909   :  { %5821 = vmatprep.subr.bf16.mxu1 %v5417_v17  ;;  %v18377_v48 = vunpack.i.l.bf16 %v14899_v22  ;;  %v18378_v13 = vunpack.i.l.bf16 %v14904_v27  ;;  %v8689_v17 = vunpack.i.h.bf16 %v15446_v18  ;;  %v4981_v8 = vsel %vm1827_vm6, %v8664_v41, %v8673_v26 }
 0x90a   :  { %v4997_v30 = vsel %vm1827_vm6, %v8674_v24, %v8678_v19  ;;  %v4983_v22 = vsel %vm1827_vm6, %v8679_v38, %v16882_v53  ;;  %v4999_v27 = vsel %vm1827_vm6, %v8684_v47, %v16881_v45  ;;  %v8704_v21 = vunpack.i.h.bf16 %v15532_v16 }
 0x90b   :  { %v4980_v37 = vsel %vm1827_vm6, %v18377_v48, %v8664_v41  ;;  %v4996_v7 = vsel %vm1827_vm6, %v18378_v13, %v8674_v24  ;;  %5783 = vmatpush1.bf16.msra.mxu0 %v5430_v34  ;;  %v15600_v41 = vpop.permute.xlu0 %8726  ;;  %v5013_v34 = vsel %vm1827_vm6, %v8689_v17, %v16884_v39  ;;  %v8714_v13 = vunpack.i.h.bf16 %v15567_v9 }
 0x90c   :  { %5822 = vmatpush1.bf16.msra.mxu1 %v5416_v44  ;;  %5784 = vmatprep.subr.bf16.mxu0 %v5447_v55  ;;  %v18380_v44 = vunpack.i.l.bf16 %v15506_v40  ;;  %v8713_v48 = vunpack.i.l.bf16 %v15567_v9  ;;  %v8718_v45 = vunpack.i.l.bf16 %v15572_v62  ;;  %v5462_v53 = vpack.c.bf16 %v4996_v7, %v4980_v37  ;;  %v15622_v37 = vpop.permute.xlu1 %8731 }
 0x90d   :  { %5823 = vmatprep.subr.bf16.mxu1 %v5433_v58  ;;  %v4982_v55 = vsel %vm1827_vm6, %v8673_v26, %v8679_v38  ;;  %v5463_v58 = vpack.c.bf16 %v4997_v30, %v4981_v8  ;;  %v5449_v32 = vpack.c.bf16 %v4220_v6, %v4154_v0  ;;  %v4998_v29 = vsel %vm1827_vm6, %v8678_v19, %v8684_v47  ;;  %v18383_v38 = vld [vmem:[#allocation87_spill] sm:$0xff] }
 0x90e   :  { %v5029_v24 = vsel %vm1827_vm6, %v8694_v12, %v18380_v44  ;;  %v18381_v39 = vunpack.i.l.bf16 %v14998_v43  ;;  %v8699_v44 = vunpack.i.h.bf16 %v15506_v40  ;;  %v8709_v46 = vunpack.i.h.bf16 %v15539_v54 }
 0x90f   :  { %v18382_v9 = vpack.c.bf16 %v15485_v20, %v15501_v33  ;;  %v7659_v26 = vunpack.i.h.bf16 %v18383_v38  ;;  %v18384_v0 = vunpack.i.l.bf16 %v15004_v52  ;;  %v15628_v43 = vpop.permute.xlu0 %8736  ;;  %v5479_v47 = vpack.c.bf16 %v5029_v24, %v5013_v34 }
 0x910   :  { %v5012_v63 = vsel %vm1827_vm6, %v18381_v39, %v8689_v17  ;;  %5824 = vmatpush1.bf16.msra.mxu1 %v5432_v3  ;;  %v5465_v39 = vpack.c.bf16 %v4999_v27, %v4983_v22  ;;  %v5045_v6 = vsel %vm1827_vm6, %v8709_v46, %v8713_v48  ;;  %v5061_v20 = vsel %vm1827_vm6, %v8714_v13, %v8718_v45  ;;  %v15644_v24 = vpop.permute.xlu1 %8746 }
 0x911   :  { %5785 = vmatpush1.bf16.msra.mxu0 %v18382_v9  ;;  %v5028_v19 = vsel %vm1827_vm6, %v18384_v0, %v8694_v12  ;;  %5825 = vmatprep.subr.bf16.mxu1 %v5449_v32  ;;  %v18385_v33 = vunpack.i.l.bf16 %v15532_v16  ;;  %v18386_v7 = vunpack.i.l.bf16 %v15539_v54  ;;  %v8724_v12 = vunpack.i.h.bf16 %v15589_v5 }
 0x912   :  { %5786 = vmatprep.subr.bf16.mxu0 %v5463_v58  ;;  %v8723_v17 = vunpack.i.l.bf16 %v15589_v5  ;;  %v8728_v32 = vunpack.i.l.bf16 %v15600_v41  ;;  %v8733_v8 = vunpack.i.l.bf16 %v15622_v37  ;;  %v5464_v30 = vpack.c.bf16 %v4998_v29, %v4982_v55 }
 0x913   :  { %v5015_v3 = vsel %vm1827_vm6, %v8699_v44, %v18385_v33  ;;  %v5031_v52 = vsel %vm1827_vm6, %v8704_v21, %v18386_v7  ;;  %v5478_v22 = vpack.c.bf16 %v5028_v19, %v5012_v63  ;;  %v8734_v27 = vunpack.i.h.bf16 %v15622_v37  ;;  %v15654_v63 = vpop.permute.xlu0 %8741 }
 0x914   :  { %v8738_v34 = vunpack.i.l.bf16 %v15628_v43  ;;  %5826 = vmatpush1.bf16.msra.mxu1 %v5448_v50  ;;  %v18387_v58 = vunpack.i.l.bf16 %v15496_v4  ;;  %v18388_v0 = vunpack.i.l.bf16 %v15506_v40  ;;  %v8719_v7 = vunpack.i.h.bf16 %v15572_v62 }
 0x915   :  { %5787 = vmatpush1.bf16.msra.mxu0 %v5462_v53  ;;  %v8729_v29 = vunpack.i.h.bf16 %v15600_v41  ;;  %5827 = vmatprep.subr.bf16.mxu1 %v5465_v39  ;;  %v18389_v53 = vunpack.i.l.bf16 %v15082_v57  ;;  %v18390_v4 = vunpack.i.l.bf16 %v15089_v23  ;;  %v5481_v40 = vpack.c.bf16 %v5031_v52, %v5015_v3 }
 0x916   :  { %v5014_v9 = vsel %vm1827_vm6, %v18387_v58, %v8699_v44  ;;  %v5030_v33 = vsel %vm1827_vm6, %v18388_v0, %v8704_v21  ;;  %5788 = vmatprep.subr.bf16.mxu0 %v5479_v47  ;;  %v5495_v44 = vpack.c.bf16 %v5061_v20, %v5045_v6  ;;  %v5062_v21 = vsel %vm1827_vm6, %v8718_v45, %v8724_v12  ;;  %v15675_v45 = vpop.permute.xlu1 %8756 }
 0x917   :  { %v5044_v50 = vsel %vm1827_vm6, %v18389_v53, %v8709_v46  ;;  %v5060_v55 = vsel %vm1827_vm6, %v18390_v4, %v8714_v13  ;;  %v5077_v62 = vsel %vm1827_vm6, %v8729_v29, %v8733_v8  ;;  %v5047_v19 = vsel %vm1827_vm6, %v8719_v7, %v8723_v17  ;;  %v15680_v52 = vpop.permute.xlu0 %8751  ;;  %v18392_v53 = vld [vmem:[#allocation140_spill] sm:$0xff] }
 0x918   :  { %v5063_v57 = vsel %vm1827_vm6, %v8724_v12, %v8728_v32  ;;  %v8748_v23 = vunpack.i.l.bf16 %v15644_v24  ;;  %v8744_v46 = vunpack.i.h.bf16 %v15654_v63  ;;  %v8743_v13 = vunpack.i.l.bf16 %v15654_v63  ;;  %5828 = vmatpush1.bf16.msra.mxu1 %v5464_v30 }
 0x919   :  { %5789 = vmatpush1.bf16.msra.mxu0 %v5478_v22  ;;  %v5093_v47 = vsel %vm1827_vm6, %v8734_v27, %v8738_v34  ;;  %v5480_v39 = vpack.c.bf16 %v5030_v33, %v5014_v9  ;;  %v5494_v6 = vpack.c.bf16 %v5060_v55, %v5044_v50  ;;  %v5046_v20 = vsel %vm1827_vm6, %v8713_v48, %v8719_v7 }
 0x91a   :  { %v8758_v3 = vunpack.i.l.bf16 %v15675_v45  ;;  %5790 = vmatprep.subr.bf16.mxu0 %v5495_v44  ;;  %5829 = vmatprep.subr.bf16.mxu1 %v5481_v40  ;;  %v8739_v12 = vunpack.i.h.bf16 %v15628_v43  ;;  %v8749_v58 = vunpack.i.h.bf16 %v15644_v24  ;;  %v8754_v30 = vunpack.i.h.bf16 %v15680_v52  ;;  %v15690_v4 = vpop.permute.xlu1 %8761 }
 0x91b   :  { %v8753_v22 = vunpack.i.l.bf16 %v15680_v52  ;;  %v5496_v0 = vpack.c.bf16 %v5062_v21, %v5046_v20  ;;  %v18391_v9 = vunpack.i.l.bf16 %v15159_v10  ;;  %v5511_v48 = vpack.c.bf16 %v5093_v47, %v5077_v62  ;;  %v15704_v62 = vpop.permute.xlu0 %8766 }
 0x91c   :  { %v5497_v7 = vpack.c.bf16 %v5063_v57, %v5047_v19  ;;  %v7664_v50 = vunpack.i.h.bf16 %v18392_v53  ;;  %5830 = vmatpush1.bf16.msra.mxu1 %v5480_v39  ;;  %v5079_v55 = vsel %vm1827_vm6, %v8739_v12, %v8743_v13  ;;  %v5095_v10 = vsel %vm1827_vm6, %v8744_v46, %v8748_v23 }
 0x91d   :  { %v5092_v33 = vsel %vm1827_vm6, %v18391_v9, %v8734_v27  ;;  %5791 = vmatpush1.bf16.msra.mxu0 %v5494_v6  ;;  %v5109_v43 = vsel %vm1827_vm6, %v8749_v58, %v8753_v22  ;;  %v18393_v27 = vunpack.i.l.bf16 %v15171_v11  ;;  %v8764_v40 = vunpack.i.h.bf16 %v15690_v4 }
 0x91e   :  { %v8763_v21 = vunpack.i.l.bf16 %v15690_v4  ;;  %5792 = vmatprep.subr.bf16.mxu0 %v5511_v48  ;;  %5831 = vmatprep.subr.bf16.mxu1 %v5497_v7  ;;  %v5125_v19 = vsel %vm1827_vm6, %v8754_v30, %v8758_v3  ;;  %v8759_v47 = vunpack.i.h.bf16 %v15675_v45  ;;  %v8769_v39 = vunpack.i.h.bf16 %v15704_v62  ;;  %v8772_v7 = vpop.permute.xlu1 %8771 }
 0x91f   :  { %v5076_v44 = vsel %vm1827_vm6, %v18393_v27, %v8729_v29  ;;  %v16886_v6 = vunpack.i.l.bf16 %v15704_v62  ;;  %v5094_v11 = vsel %vm1827_vm6, %v8738_v34, %v8744_v46  ;;  %v18394_v29 = vunpack.i.l.bf16 %v15234_v2 }
 0x920   :  { %v5510_v57 = vpack.c.bf16 %v5092_v33, %v5076_v44  ;;  %v5527_v52 = vpack.c.bf16 %v5125_v19, %v5109_v43  ;;  %v5513_v9 = vpack.c.bf16 %v5095_v10, %v5079_v55  ;;  %v7663_v48 = vunpack.i.l.bf16 %v18392_v53  ;;  %5832 = vmatpush1.bf16.msra.mxu1 %v5496_v0  ;;  %v15730_v10 = vpop.permute.xlu0 %4009 }
 0x921   :  { %v5124_v20 = vsel %vm1827_vm6, %v18394_v29, %v8754_v30  ;;  %v5111_v45 = vsel %vm1827_vm6, %v8759_v47, %v8763_v21  ;;  %v5127_v33 = vsel %vm1827_vm6, %v8764_v40, %v16886_v6  ;;  %v18395_v34 = vunpack.i.l.bf16 %v15281_v59 }
 0x922   :  { %5793 = vmatpush1.bf16.msra.mxu0 %v5510_v57  ;;  %v5078_v46 = vsel %vm1827_vm6, %v8733_v8, %v8739_v12  ;;  %v18396_v30 = vunpack.i.l.bf16 %v15220_v56  ;;  %v8774_v43 = vunpack.i.h.bf16 %v8772_v7  ;;  %v8773_v55 = vunpack.i.l.bf16 %v8772_v7  ;;  %5833 = vmatprep.subr.bf16.mxu1 %v5513_v9  ;;  %v15748_v7 = vpop.permute.xlu1 %8776 }
 0x923   :  { %v5140_v2 = vsel %vm1827_vm6, %v18395_v34, %v8769_v39  ;;  %5794 = vmatprep.subr.bf16.mxu0 %v5527_v52  ;;  %v18397_v27 = vunpack.i.h.bf16 %v18362_v49  ;;  %v18398_v59 = vunpack.i.l.bf16 %v18362_v49  ;;  %v18399_v37 = vunpack.i.h.bf16 %v18379_v42 }
 0x924   :  { %v5108_v0 = vsel %vm1827_vm6, %v18396_v30, %v8749_v58  ;;  %v18400_v8 = vunpack.i.l.bf16 %v18379_v42  ;;  %v5512_v12 = vpack.c.bf16 %v5094_v11, %v5078_v46  ;;  %v5126_v19 = vsel %vm1827_vm6, %v8758_v3, %v8764_v40  ;;  %v18405_v46 = vld [vmem:[#allocation56_spill] sm:$0xff] }
 0x925   :  { %v15737_v44 = vsel %vm185_vm1, %v18398_v59, %v18397_v27  ;;  %v5526_v58 = vpack.c.bf16 %v5124_v20, %v5108_v0  ;;  %v5141_v57 = vsel %vm1827_vm6, %v8769_v39, %v8773_v55  ;;  %v5529_v29 = vpack.c.bf16 %v5127_v33, %v5111_v45  ;;  %v15769_v45 = vpop.permute.xlu0 %8781  ;;  %v18404_v33 = vld [vmem:[#allocation113_spill] sm:$0xff] }
 0x926   :  { %v15744_v56 = vsel %vm185_vm1, %v18400_v8, %v18399_v37  ;;  %v5542_v52 = vpack.c.bf16 %v5140_v2, %v5140_v2  ;;  %v5543_v9 = vpack.c.bf16 %v5141_v57, %v5141_v57  ;;  %5834 = vmatpush1.bf16.msra.mxu1 %v5512_v12  ;;  %v5142_v34 = vsel %vm1827_vm6, %v8773_v55, %v8774_v43  ;;  %v18409_v12 = vld [vmem:[#allocation139_spill] sm:$0xff] }
 0x927   :  { %5795 = vmatpush1.bf16.msra.mxu0 %v5526_v58  ;;  %v18401_v30 = vmov %v18398_v59  ;;  %v18402_v27 = vmov %v18399_v37  ;;  %v18403_v3 = vunpack.i.l.bf16 %v18383_v38  ;;  %v15766_v39 = vsel %vm252_vm2, %v7663_v48, %v7664_v50  ;;  %5835 = vmatprep.subr.bf16.mxu1 %v5529_v29  ;;  %v18407_v37 = vld [vmem:[#allocation30_spill] sm:$0xff]  ;;  %v15790_v29 = vpop.permute.xlu1 %4075 }
 0x928   :  { %v3364_v11 = vsel %vm185_vm1, %v18402_v27, %v18401_v30  ;;  %v5110_v20 = vsel %vm1827_vm6, %v8753_v22, %v8759_v47  ;;  %v3430_v42 = vsel %vm252_vm2, %v7659_v26, %v7663_v48  ;;  %v7739_v2 = vunpack.i.h.bf16 %v18404_v33  ;;  %v18410_v48 = vld [vmem:[#allocation24_spill] sm:$0xff]  ;;  %v18414_v27 = vld [vmem:[#allocation74_spill] sm:$0xff] }
 0x929   :  { %v15761_v40 = vsel %vm252_vm2, %v18403_v3, %v7659_v26  ;;  %v7743_v0 = vunpack.i.l.bf16 %v18405_v46  ;;  %v5528_v55 = vpack.c.bf16 %v5126_v19, %v5110_v20  ;;  %v16885_v59 = vunpack.i.l.bf16 %v15769_v45  ;;  %v18413_v30 = vld [vmem:[#allocation84_spill] sm:$0xff] }
 0x92a   :  { %vm18406_vm7 = vcmask 1043456   ;;  %v7704_v8 = vunpack.i.h.bf16 %v18407_v37  ;;  %v5544_v47 = vpack.c.bf16 %v5142_v34, %v5142_v34  ;;  %v3432_v38 = vsel %vm252_vm2, %v7664_v50, %v18409_v12  ;;  %v15796_v34 = vpop.permute.xlu0 %8786 }
 0x92b   :  { %6155 = vmatprep.subr.msk.bf16.mxu0 %vm18406_vm7, %v5543_v9  ;;  %vm18408_vm0 = vmmov %vm18406_vm7  ;;  %v7703_v26 = vunpack.i.l.bf16 %v18407_v37  ;;  %v7699_v58 = vunpack.i.h.bf16 %v18410_v48  ;;  %v7744_v19 = vunpack.i.h.bf16 %v18405_v46  ;;  %v5143_v57 = vsel %vm1827_vm6, %v8774_v43, %v16885_v59  ;;  %5836 = vmatpush1.bf16.msra.mxu1 %v5528_v55 }
 0x92c   :  { %v5583_v22 = vsel %vm18408_vm0, %v5542_v52, 0  ;;  %v18411_v52 = vld [vmem:[#allocation137_spill] sm:$0xff]  ;;  %v18412_v9 = vunpack.i.h.bf16 %v18362_v49  ;;  %v5545_v50 = vpack.c.bf16 %v5143_v57, %v5143_v57  ;;  %v18415_v3 = vpack.c.bf16 %v18413_v30, %v18414_v27  ;;  %v18417_v57 = vld [vmem:[#allocation123_spill] sm:$0xff]  ;;  %vm18419_vm2 = vmmov %vm18408_vm0 }
 0x92d   :  { %5797 = vmatpush1.bf16.msra.mxu0 %v5583_v22  ;;  %v5355_v20 = vpack.c.bf16 %v3430_v42, %v3364_v11  ;;  %v5354_v43 = vpack.c.bf16 %v15761_v40, %v15744_v56  ;;  %v18416_v46 = vunpack.i.l.bf16 %v18404_v33  ;;  %v3562_v37 = vsel %vm386_vm4, %v7739_v2, %v7743_v0  ;;  %v18426_v27 = vld [vmem:[#allocation2_spill] sm:$0xff] }
 0x92e   :  { %v3366_v53 = vsel %vm185_vm1, %v18412_v9, %v18411_v52  ;;  %5852 = vmatprep.subr.bf16.mxu0 %v18415_v3  ;;  %v5356_v22 = vpack.c.bf16 %v15766_v39, %v15737_v44  ;;  %v7819_v12 = vunpack.i.h.bf16 %v18236_v25  ;;  %v7824_v52 = vunpack.i.h.bf16 %v18417_v57  ;;  %vm18418_vm1 = vmmov %vm18408_vm0  ;;  %v18421_v44 = vld [vmem:[#allocation62_spill] sm:$0xff]  ;;  %v18422_v39 = vld [vmem:[#allocation31_spill] sm:$0xff] }
 0x92f   :  { %v3561_v55 = vsel %vm386_vm4, %v18416_v46, %v7739_v2  ;;  %v5357_v49 = vpack.c.bf16 %v3432_v38, %v3366_v53  ;;  %v7823_v9 = vunpack.i.l.bf16 %v18417_v57  ;;  %6157 = vmatprep.subr.msk.bf16.mxu1 %vm18418_vm1, %v5545_v50  ;;  %v5589_v56 = vsel %vm18419_vm2, %v5544_v47, 0  ;;  %v15824_v2 = vpop.permute.xlu1 %8791  ;;  %v18424_v38 = vld [vmem:[#allocation8_spill] sm:$0xff]  ;;  %v15831_v46 = vpop.permute.xlu0 %4141  ;;  %v18428_v57 = vld [vmem:[#allocation85_spill] sm:$0xff] }
 0x930   :  { %5803 = vmatmul.mubr.bf16.vlgmr.msra.gmra.mrb[24].mxu0 %v18268_v36  ;;  %v15816_v11 = vsel %vm319_vm3, %v7703_v26, %v7704_v8  ;;  %v18420_v40 = vunpack.i.l.bf16 %v18410_v48  ;;  %5838 = vmatpush1.bf16.msra.mxu1 %v5589_v56  ;;  %v18423_v33 = vpack.c.bf16 %v18421_v44, %v18422_v39  ;;  %v3564_v53 = vsel %vm386_vm4, %v7744_v19, %v18424_v38  ;;  %v18425_v50 = vld [vmem:[#allocation124_spill] sm:$0xff]  ;;  %v18430_v44 = vld [vmem:[#allocation66_spill] sm:$0xff] }
 0x931   :  { %v7784_v30 = vunpack.i.h.bf16 %v18425_v50  ;;  %v7783_v47 = vunpack.i.l.bf16 %v18425_v50  ;;  %v7779_v3 = vunpack.i.h.bf16 %v18426_v27  ;;  %v18427_v48 = vld [vmem:[#allocation112_spill] sm:$0xff]  ;;  %v3498_v39 = vsel %vm319_vm3, %v7704_v8, %v18430_v44  ;;  %6160 = vmatprep.mubr.msk.bf16.mxu0 %vm2411_vm5, %v18295_v61  ;;  %v18435_v8 = vld [vmem:[#allocation145_spill] sm:$0xff] }
 0x932   :  { %v3495_v42 = vsel %vm319_vm3, %v18420_v40, %v7699_v58  ;;  %5853 = vmatpush1.bf16.msra.mxu0 %v18423_v33  ;;  %v18429_v56 = vpack.c.bf16 %v18427_v48, %v18428_v57  ;;  %v3496_v40 = vsel %vm319_vm3, %v7699_v58, %v7703_v26  ;;  %v3563_v33 = vsel %vm386_vm4, %v7743_v0, %v7744_v19  ;;  %v18439_v57 = vld [vmem:[#allocation143_spill] sm:$0xff] }
 0x933   :  { %5854 = vmatprep.subr.bf16.mxu0 %v5355_v20  ;;  %v5371_v38 = vpack.c.bf16 %v3562_v37, %v3496_v40  ;;  %v5370_v59 = vpack.c.bf16 %v3561_v55, %v3495_v42  ;;  %v18431_v50 = vunpack.i.l.bf16 %v18236_v25  ;;  %vm18432_vm12 = vcmask 875520   ;;  %5844 = vmatmul.mubr.bf16.vlgmr.msra.gmra.mrb[24].mxu1 %v18268_v36  ;;  %v18436_v55 = vld [vmem:[#allocation63_spill] sm:$0xff]  ;;  %v18437_v37 = vld [vmem:[#allocation52_spill] sm:$0xff]  ;;  %v15856_v42 = vpop.permute.xlu1 %4207  ;;  %v15865_v44 = vpop.permute.xlu0 %8796 }
 0x934   :  { %5893 = vmatprep.subr.bf16.mxu1 %v18429_v56  ;;  %vm18433_vm9 = vmmov %vm18432_vm12  ;;  %v5373_v58 = vpack.c.bf16 %v3564_v53, %v3498_v39  ;;  %v7864_v48 = vunpack.i.h.bf16 %v18435_v8  ;;  %v7863_v0 = vunpack.i.l.bf16 %v18435_v8  ;;  %v7859_v19 = vunpack.i.h.bf16 %v18273_v14  ;;  %v18444_v39 = vld [vmem:[#allocation146_spill] sm:$0xff]  ;;  %v18446_v8 = vld [vmem:[#allocation25_spill] sm:$0xff]  ;;  %6162 = vmatprep.mubr.msk.bf16.mxu1 %vm2411_vm5, %v18295_v61 }
 0x935   :  { %v3693_v20 = vsel %vm18432_vm12, %v18431_v50, %v7819_v12  ;;  %v15846_v6 = vsel %vm18433_vm9, %v7823_v9, %v7824_v52  ;;  %vm18434_vm10 = vmmov %vm18433_vm9  ;;  %v18438_v25 = vpack.c.bf16 %v18436_v55, %v18437_v37  ;;  %vm18441_vm4 = vcmask 883712  }
 0x936   :  { %v3694_v26 = vsel %vm18434_vm10, %v7819_v12, %v7823_v9  ;;  %5855 = vmatpush1.bf16.msra.mxu0 %v5354_v43  ;;  %vm18440_vm3 = vmmov %vm18433_vm9  ;;  %v3629_v40 = vsel %vm18441_vm4, %v7783_v47, %v7784_v30  ;;  %v18442_v12 = vunpack.i.l.bf16 %v18426_v27  ;;  %v7989_v53 = vunpack.i.h.bf16 %v18293_v1 }
 0x937   :  { %5894 = vmatpush1.bf16.msra.mxu1 %v18438_v25  ;;  %v3696_v56 = vsel %vm18440_vm3, %v7824_v52, %v18439_v57  ;;  %vm18443_vm15 = vmmov %vm18441_vm4  ;;  %5856 = vmatprep.subr.bf16.mxu0 %v5371_v38  ;;  %v5372_v43 = vpack.c.bf16 %v3563_v33, %v15816_v11  ;;  %v7994_v55 = vunpack.i.h.bf16 %v18446_v8  ;;  %v7993_v52 = vunpack.i.l.bf16 %v18446_v8 }
 0x938   :  { %v3627_v9 = vsel %vm18443_vm15, %v18442_v12, %v7779_v3  ;;  %5895 = vmatprep.subr.bf16.mxu1 %v5357_v49  ;;  %vm18445_vm14 = vmmov %vm18441_vm4  ;;  %v5388_v38 = vpack.c.bf16 %v15846_v6, %v3629_v40  ;;  %vm18448_vm13 = vcmask 867328   ;;  %v18449_v11 = vunpack.i.l.bf16 %v18273_v14  ;;  %v15892_v14 = vpop.permute.xlu0 %8806  ;;  %v18456_v40 = vld [vmem:[#allocation6_spill] sm:$0xff] }
 0x939   :  { %v3630_v50 = vsel %vm18445_vm14, %v7784_v30, %v18444_v39  ;;  %vm18447_vm11 = vmmov %vm18441_vm4  ;;  %v5386_v25 = vpack.c.bf16 %v3693_v20, %v3627_v9  ;;  %v15877_v49 = vsel %vm18448_vm13, %v7863_v0, %v7864_v48  ;;  %v8369_v33 = vunpack.i.h.bf16 %v18357_v28  ;;  %v18459_v39 = vld [vmem:[#allocation26_spill] sm:$0xff] }
 0x93a   :  { %v3628_v37 = vsel %vm18447_vm11, %v7779_v3, %v7783_v47  ;;  %v5389_v57 = vpack.c.bf16 %v3696_v56, %v3630_v50  ;;  %vm18450_vm8 = vmmov %vm18448_vm13  ;;  %5857 = vmatpush1.bf16.msra.mxu0 %v5370_v59  ;;  %v15883_v47 = vpop.permute.xlu1 %8801  ;;  %v18452_v3 = vld [vmem:[#allocation104_spill] sm:$0xff]  ;;  %v18454_v6 = vunpack.i.l.bf16 %v18293_v1  ;;  %vm18455_vm0 = vcmask 211968  }
 0x93b   :  { %v5387_v27 = vpack.c.bf16 %v3694_v26, %v3628_v37  ;;  %v3759_v30 = vsel %vm18450_vm8, %v18449_v11, %v7859_v19  ;;  %5896 = vmatpush1.bf16.msra.mxu1 %v5356_v22  ;;  %vm18451_vm7 = vmmov %vm18450_vm8  ;;  %v8364_v56 = vunpack.i.h.bf16 %v18344_v60  ;;  %v8389_v22 = vunpack.i.h.bf16 %v18370_v15 }
 0x93c   :  { %v3760_v61 = vsel %vm18451_vm7, %v7859_v19, %v7863_v0  ;;  %vm18453_vm5 = vmmov %vm18451_vm7  ;;  %v3957_v26 = vsel %vm18455_vm0, %v18454_v6, %v7989_v53  ;;  %5897 = vmatprep.subr.bf16.mxu1 %v5373_v58  ;;  %v5402_v59 = vpack.c.bf16 %v18456_v40, %v3759_v30  ;;  %v8384_v1 = vunpack.i.h.bf16 %v18358_v35  ;;  %v18466_v30 = vld [vmem:[#allocation55_spill] sm:$0xff] }
 0x93d   :  { %v3762_v20 = vsel %vm18453_vm5, %v7864_v48, %v18452_v3  ;;  %5858 = vmatprep.subr.bf16.mxu0 %v5387_v27  ;;  %vm18457_vm1 = vmmov %vm18455_vm0  ;;  %v5403_v0 = vpack.c.bf16 %v15314_v51, %v3760_v61  ;;  %v8779_v19 = vunpack.i.h.bf16 %v15748_v7  ;;  %v8778_v9 = vunpack.i.l.bf16 %v15748_v7  ;;  %v18462_v51 = vld [vmem:[#allocation17_spill] sm:$0xff]  ;;  %v18470_v6 = vld [vmem:[#allocation15_spill] sm:$0xff] }
 0x93e   :  { %v15897_v12 = vsel %vm18457_vm1, %v7993_v52, %v7994_v55  ;;  %vm18458_vm2 = vmmov %vm18455_vm0  ;;  %v5405_v50 = vpack.c.bf16 %v18459_v39, %v3762_v20  ;;  %v18460_v58 = vunpack.i.l.bf16 %v18357_v28  ;;  %vm18461_vm12 = vcmask 138240   ;;  %5859 = vmatpush1.bf16.msra.mxu0 %v5386_v25  ;;  %v15910_v37 = vpop.permute.xlu1 %8811  ;;  %v15920_v28 = vpop.permute.xlu0 %8816  ;;  %v18467_v25 = vld [vmem:[#allocation102_spill] sm:$0xff] }
 0x93f   :  { %v3958_v48 = vsel %vm18458_vm2, %v7989_v53, %v7993_v52  ;;  %5898 = vmatpush1.bf16.msra.mxu1 %v5372_v43  ;;  %v5418_v27 = vpack.c.bf16 %v3957_v26, %v18462_v51  ;;  %v18463_v53 = vld [vmem:[#allocation154_spill] sm:$0xff]  ;;  %v18464_v11 = vunpack.i.l.bf16 %v18344_v60  ;;  %vm18465_vm9 = vcmask 146432   ;;  %5860 = vmatprep.subr.bf16.mxu0 %v5403_v0  ;;  %vm18471_vm3 = vmmov %vm18455_vm0  ;;  %v18472_v60 = vld [vmem:[#allocation76_spill] sm:$0xff] }
 0x940   :  { %v15908_v8 = vsel %vm18461_vm12, %v18460_v58, %v8369_v33  ;;  %v5404_v52 = vpack.c.bf16 %v18463_v53, %v15877_v49  ;;  %v5420_v61 = vpack.c.bf16 %v15897_v12, %v18466_v30  ;;  %5899 = vmatprep.subr.bf16.mxu1 %v5389_v57  ;;  %v5419_v43 = vpack.c.bf16 %v3958_v48, %v18467_v25  ;;  %vm18475_vm15 = vmmov %vm18461_vm12 }
 0x941   :  { %v4023_v7 = vsel %vm18465_vm9, %v18464_v11, %v8364_v56  ;;  %v18468_v3 = vunpack.i.l.bf16 %v18370_v15  ;;  %vm18469_vm10 = vcmask 64512   ;;  %v3960_v49 = vsel %vm18471_vm3, %v7994_v55, %v18470_v6  ;;  %vm18476_vm14 = vmmov %vm18461_vm12  ;;  %v18478_v11 = vld [vmem:[#allocation108_spill] sm:$0xff] }
 0x942   :  { %v8669_v26 = vunpack.i.h.bf16 %v18472_v60  ;;  %v8668_v40 = vunpack.i.l.bf16 %v18472_v60  ;;  %v18473_v12 = vunpack.i.l.bf16 %v18358_v35  ;;  %vm18474_vm4 = vcmask 130048   ;;  %5861 = vmatpush1.bf16.msra.mxu0 %v5402_v59  ;;  %v15948_v51 = vpop.permute.xlu1 %8821  ;;  %vm18477_vm11 = vmmov %vm18461_vm12 }
 0x943   :  { %v15926_v20 = vsel %vm18469_vm10, %v18468_v3, %v8389_v22  ;;  %v15940_v0 = vsel %vm18475_vm15, %v8778_v9, %v8779_v19  ;;  %v8784_v15 = vunpack.i.h.bf16 %v15769_v45  ;;  %v5434_v48 = vpack.c.bf16 %v15908_v8, %v4023_v7  ;;  %5900 = vmatpush1.bf16.msra.mxu1 %v5388_v38  ;;  %v15954_v8 = vpop.permute.xlu0 %8826  ;;  %5862 = vmatprep.subr.bf16.mxu0 %v5419_v43  ;;  %vm18479_vm13 = vmmov %vm18465_vm9 }
 0x944   :  { %v15937_v57 = vsel %vm18474_vm4, %v18473_v12, %v8384_v1  ;;  %v4092_v55 = vsel %vm18476_vm14, %v8779_v19, %v15790_v29  ;;  %v8794_v39 = vunpack.i.h.bf16 %v15824_v2  ;;  %v8793_v58 = vunpack.i.l.bf16 %v15824_v2  ;;  %5901 = vmatprep.subr.bf16.mxu1 %v5405_v50  ;;  %vm18480_vm8 = vmmov %vm18465_vm9 }
 0x945   :  { %v4090_v53 = vsel %vm18477_vm11, %v8369_v33, %v8778_v9  ;;  %v5421_v30 = vpack.c.bf16 %v3960_v49, %v18478_v11  ;;  %v8789_v25 = vunpack.i.h.bf16 %v15796_v34  ;;  %v8788_v3 = vunpack.i.l.bf16 %v15796_v34  ;;  %vm18481_vm7 = vmmov %vm18480_vm8 }
 0x946   :  { %v5450_v29 = vpack.c.bf16 %v15926_v20, %v15937_v57  ;;  %v4025_v2 = vsel %vm18479_vm13, %v8668_v40, %v8669_v26  ;;  %v4026_v38 = vsel %vm18480_vm8, %v8669_v26, %v15730_v10  ;;  %v8803_v33 = vunpack.i.l.bf16 %v15883_v47  ;;  %vm18483_vm5 = vmmov %vm18469_vm10  ;;  %5863 = vmatpush1.bf16.msra.mxu0 %v5418_v27  ;;  %v15974_v6 = vpop.permute.xlu1 %8831 }
 0x947   :  { %v4024_v59 = vsel %vm18481_vm7, %v8364_v56, %v8668_v40  ;;  %v5436_v19 = vpack.c.bf16 %v15940_v0, %v4025_v2  ;;  %v18482_v34 = vunpack.i.l.bf16 %v15434_v31  ;;  %v5437_v50 = vpack.c.bf16 %v4092_v55, %v4026_v38  ;;  %5902 = vmatpush1.bf16.msra.mxu1 %v5404_v52  ;;  %vm18484_vm0 = vmmov %vm18483_vm5  ;;  %v15982_v40 = vpop.permute.xlu0 %8836 }
 0x948   :  { %v5435_v7 = vpack.c.bf16 %v4090_v53, %v4024_v59  ;;  %v15970_v43 = vsel %vm18483_vm5, %v8793_v58, %v8794_v39  ;;  %v8799_v20 = vunpack.i.h.bf16 %v15865_v44  ;;  %v8798_v10 = vunpack.i.l.bf16 %v15865_v44  ;;  %vm18485_vm1 = vmmov %vm18474_vm4  ;;  %5903 = vmatprep.subr.bf16.mxu1 %v5421_v30 }
 0x949   :  { %v15967_v9 = vsel %vm1827_vm6, %v18482_v34, %v8784_v15  ;;  %v4222_v56 = vsel %vm18484_vm0, %v8389_v22, %v8793_v58  ;;  %v4157_v31 = vsel %vm18485_vm1, %v8788_v3, %v8789_v25  ;;  %vm18486_vm2 = vmmov %vm18484_vm0  ;;  %v8804_v60 = vunpack.i.h.bf16 %v15883_v47 }
 0x94a   :  { %v4224_v49 = vsel %vm18486_vm2, %v8794_v39, %v15856_v42  ;;  %v8809_v26 = vunpack.i.h.bf16 %v15892_v14  ;;  %5864 = vmatprep.subr.bf16.mxu0 %v5435_v7  ;;  %v8814_v44 = vunpack.i.h.bf16 %v15910_v37  ;;  %v8813_v27 = vunpack.i.l.bf16 %v15910_v37  ;;  %vm18487_vm12 = vmmov %vm18485_vm1  ;;  %v15998_v35 = vpop.permute.xlu1 %8841 }
 0x94b   :  { %v4156_v22 = vsel %vm18487_vm12, %v8384_v1, %v8788_v3  ;;  %v5001_v52 = vsel %vm1827_vm6, %v8799_v20, %v8803_v33  ;;  %v5452_v42 = vpack.c.bf16 %v15970_v43, %v4157_v31  ;;  %vm18488_vm9 = vmmov %vm18485_vm1  ;;  %v8819_v12 = vunpack.i.h.bf16 %v15920_v28  ;;  %5865 = vmatpush1.bf16.msra.mxu0 %v5434_v48  ;;  %5904 = vmatpush1.bf16.msra.mxu1 %v5420_v61  ;;  %v16004_v11 = vpop.permute.xlu0 %8846 }
 0x94c   :  { %v4158_v47 = vsel %vm18488_vm9, %v8789_v25, %v15831_v46  ;;  %v5451_v57 = vpack.c.bf16 %v4222_v56, %v4156_v22  ;;  %v18489_v55 = vunpack.i.l.bf16 %v15446_v18  ;;  %v8823_v37 = vunpack.i.l.bf16 %v15948_v51  ;;  %5905 = vmatprep.subr.bf16.mxu1 %v5437_v50 }
 0x94d   :  { %v5453_v0 = vpack.c.bf16 %v4224_v49, %v4158_v47  ;;  %v4985_v1 = vsel %vm1827_vm6, %v8784_v15, %v8798_v10  ;;  %v4986_v58 = vsel %vm1827_vm6, %v8798_v10, %v8804_v60  ;;  %v5002_v46 = vsel %vm1827_vm6, %v8803_v33, %v8809_v26 }
 0x94e   :  { %v5000_v39 = vsel %vm1827_vm6, %v18489_v55, %v8799_v20  ;;  %v8808_v53 = vunpack.i.l.bf16 %v15892_v14  ;;  %5866 = vmatprep.subr.bf16.mxu0 %v5451_v57  ;;  %v5467_v18 = vpack.c.bf16 %v5001_v52, %v4985_v1  ;;  %v18490_v30 = vunpack.i.l.bf16 %v15532_v16 }
 0x94f   :  { %v8818_v61 = vunpack.i.l.bf16 %v15920_v28  ;;  %v8824_v25 = vunpack.i.h.bf16 %v15948_v51  ;;  %v5003_v15 = vsel %vm1827_vm6, %v8809_v26, %v8813_v27  ;;  %v18491_v3 = vunpack.i.l.bf16 %v15539_v54  ;;  %5867 = vmatpush1.bf16.msra.mxu0 %v5450_v29  ;;  %5906 = vmatpush1.bf16.msra.mxu1 %v5436_v19  ;;  %v8852_v51 = vpop.permute.xlu1 %8851 }
 0x950   :  { %v5016_v48 = vsel %vm1827_vm6, %v18490_v30, %v8814_v44  ;;  %v8829_v14 = vunpack.i.h.bf16 %v15954_v8  ;;  %v8828_v38 = vunpack.i.l.bf16 %v15954_v8  ;;  %v8834_v33 = vunpack.i.h.bf16 %v15974_v6  ;;  %5868 = vmatprep.subr.bf16.mxu0 %v5467_v18  ;;  %5907 = vmatprep.subr.bf16.mxu1 %v5453_v0 }
 0x951   :  { %v5032_v2 = vsel %vm1827_vm6, %v18491_v3, %v8819_v12  ;;  %v8833_v16 = vunpack.i.l.bf16 %v15974_v6  ;;  %v8839_v59 = vunpack.i.h.bf16 %v15982_v40  ;;  %v8843_v28 = vunpack.i.l.bf16 %v15998_v35 }
 0x952   :  { %v5033_v34 = vsel %vm1827_vm6, %v8819_v12, %v8823_v37  ;;  %v5466_v54 = vpack.c.bf16 %v5000_v39, %v15967_v9  ;;  %v5468_v50 = vpack.c.bf16 %v5002_v46, %v4986_v58  ;;  %v8838_v7 = vunpack.i.l.bf16 %v15982_v40  ;;  %v8857_v9 = vpop.permute.xlu0 %8856 }
 0x953   :  { %v4987_v8 = vsel %vm1827_vm6, %v8804_v60, %v8808_v53  ;;  %v5482_v43 = vpack.c.bf16 %v5032_v2, %v5016_v48  ;;  %v5018_v20 = vsel %vm1827_vm6, %v8818_v61, %v8824_v25  ;;  %v5017_v10 = vsel %vm1827_vm6, %v8814_v44, %v8818_v61  ;;  %5908 = vmatpush1.bf16.msra.mxu1 %v5452_v42  ;;  %v8862_v26 = vpop.permute.xlu1 %8861 }
 0x954   :  { %v5469_v6 = vpack.c.bf16 %v5003_v15, %v4987_v8  ;;  %v5034_v29 = vsel %vm1827_vm6, %v8823_v37, %v8829_v14  ;;  %v5048_v19 = vsel %vm1827_vm6, %v8723_v17, %v8834_v33  ;;  %v5483_v56 = vpack.c.bf16 %v5033_v34, %v5017_v10  ;;  %5869 = vmatpush1.bf16.msra.mxu0 %v5466_v54 }
 0x955   :  { %v5019_v31 = vsel %vm1827_vm6, %v8824_v25, %v8828_v38  ;;  %v5064_v49 = vsel %vm1827_vm6, %v8728_v32, %v8839_v59  ;;  %v8853_v60 = vunpack.i.l.bf16 %v8852_v51  ;;  %v5065_v40 = vsel %vm1827_vm6, %v8839_v59, %v8843_v28 }
 0x956   :  { %v5035_v44 = vsel %vm1827_vm6, %v8829_v14, %v8833_v16  ;;  %v8849_v5 = vunpack.i.h.bf16 %v16004_v11  ;;  %v8844_v17 = vunpack.i.h.bf16 %v15998_v35  ;;  %v8863_v27 = vunpack.i.l.bf16 %v8862_v26  ;;  %5870 = vmatprep.subr.bf16.mxu0 %v5483_v56  ;;  %5909 = vmatprep.subr.bf16.mxu1 %v5469_v6 }
 0x957   :  { %v5049_v22 = vsel %vm1827_vm6, %v8834_v33, %v8838_v7  ;;  %v8848_v41 = vunpack.i.l.bf16 %v16004_v11  ;;  %v8859_v32 = vunpack.i.h.bf16 %v8857_v9  ;;  %v8858_v52 = vunpack.i.l.bf16 %v8857_v9  ;;  %5910 = vmatpush1.bf16.msra.mxu1 %v5468_v50 }
 0x958   :  { %v8854_v47 = vunpack.i.h.bf16 %v8852_v51  ;;  %v5499_v42 = vpack.c.bf16 %v5065_v40, %v5049_v22  ;;  %v5485_v12 = vpack.c.bf16 %v5035_v44, %v5019_v31  ;;  %5871 = vmatpush1.bf16.msra.mxu0 %v5482_v43  ;;  %v5067_v0 = vsel %vm1827_vm6, %v8849_v5, %v8853_v60  ;;  %v8872_v61 = vpop.permute.xlu1 %8871 }
 0x959   :  { %v5097_v57 = vsel %vm1827_vm6, %v8859_v32, %v8863_v27  ;;  %v5484_v55 = vpack.c.bf16 %v5034_v29, %v5018_v20  ;;  %v5498_v39 = vpack.c.bf16 %v5064_v49, %v5048_v19  ;;  %v5050_v37 = vsel %vm1827_vm6, %v8838_v7, %v8844_v17 }
 0x95a   :  { %5872 = vmatprep.subr.bf16.mxu0 %v5499_v42  ;;  %5911 = vmatprep.subr.bf16.mxu1 %v5485_v12  ;;  %v5066_v35 = vsel %vm1827_vm6, %v8843_v28, %v8849_v5  ;;  %v5081_v1 = vsel %vm1827_vm6, %v8854_v47, %v8858_v52  ;;  %v5051_v58 = vsel %vm1827_vm6, %v8844_v17, %v8848_v41  ;;  %v8864_v25 = vunpack.i.h.bf16 %v8862_v26 }
 0x95b   :  { %v5096_v46 = vsel %vm1827_vm6, %v8748_v23, %v8859_v32  ;;  %v5080_v53 = vsel %vm1827_vm6, %v8743_v13, %v8854_v47  ;;  %v5515_v11 = vpack.c.bf16 %v5097_v57, %v5081_v1  ;;  %v5501_v18 = vpack.c.bf16 %v5067_v0, %v5051_v58  ;;  %5912 = vmatpush1.bf16.msra.mxu1 %v5484_v55 }
 0x95c   :  { %5873 = vmatpush1.bf16.msra.mxu0 %v5498_v39  ;;  %v5500_v30 = vpack.c.bf16 %v5066_v35, %v5050_v37  ;;  %v5514_v48 = vpack.c.bf16 %v5096_v46, %v5080_v53  ;;  %v8867_v15 = vpop.permute.xlu0 %8866  ;;  %v8873_v24 = vunpack.i.l.bf16 %v8872_v61  ;;  %v5082_v63 = vsel %vm1827_vm6, %v8858_v52, %v8864_v25 }
 0x95d   :  { %5874 = vmatprep.subr.bf16.mxu0 %v5515_v11  ;;  %5913 = vmatprep.subr.bf16.mxu1 %v5501_v18  ;;  %v8869_v3 = vunpack.i.h.bf16 %v8867_v15  ;;  %v8868_v23 = vunpack.i.l.bf16 %v8867_v15  ;;  %v8874_v38 = vunpack.i.h.bf16 %v8872_v61  ;;  %v18492_v8 = vunpack.i.l.bf16 %v15704_v62 }
 0x95e   :  { %v18493_v40 = vunpack.i.l.bf16 %v15769_v45  ;;  %vm18494_vm10 = vcmask 1043456  }
 0x95f   :  { %5914 = vmatpush1.bf16.msra.mxu1 %v5500_v30  ;;  %v5098_v13 = vsel %vm1827_vm6, %v8863_v27, %v8869_v3  ;;  %v5083_v2 = vsel %vm1827_vm6, %v8864_v25, %v8868_v23  ;;  %v5099_v14 = vsel %vm1827_vm6, %v8869_v3, %v8873_v24  ;;  %v5112_v7 = vsel %vm1827_vm6, %v8763_v21, %v8874_v38  ;;  %vm18495_vm3 = vmmov %vm18494_vm10 }
 0x960   :  { %5875 = vmatpush1.bf16.msra.mxu0 %v5514_v48  ;;  %v5516_v33 = vpack.c.bf16 %v5098_v13, %v5082_v63  ;;  %v5517_v16 = vpack.c.bf16 %v5099_v14, %v5083_v2  ;;  %vm18496_vm4 = vmmov %vm18495_vm3 }
 0x961   :  { %v8882_v28 = vpop.permute.xlu1 %8881  ;;  %vm18497_vm15 = vmmov %vm18495_vm3 }
 0x962   :  { %v8883_v54 = vunpack.i.l.bf16 %v8882_v28  ;;  %5915 = vmatprep.subr.bf16.mxu1 %v5517_v16  ;;  %v8884_v50 = vunpack.i.h.bf16 %v8882_v28 }
 0x963   :  { %v8877_v59 = vpop.permute.xlu0 %8876  ;;  %5916 = vmatpush1.bf16.msra.mxu1 %v5516_v33 }
 0x964   :  { %v8879_v51 = vunpack.i.h.bf16 %v8877_v59  ;;  %v8878_v34 = vunpack.i.l.bf16 %v8877_v59 }
 0x966   :  { %v5128_v43 = vsel %vm1827_vm6, %v18492_v8, %v8879_v51  ;;  %v5113_v20 = vsel %vm1827_vm6, %v8874_v38, %v8878_v34  ;;  %v5129_v10 = vsel %vm1827_vm6, %v8879_v51, %v8883_v54  ;;  %v5114_v4 = vsel %vm1827_vm6, %v8878_v34, %v8884_v50  ;;  %v18498_v34 = vld [vmem:[#allocation114_spill] sm:$0xff] }
 0x967   :  { %v5530_v6 = vpack.c.bf16 %v5128_v43, %v5112_v7  ;;  %v5531_v9 = vpack.c.bf16 %v5129_v10, %v5113_v20  ;;  %v18500_v20 = vld [vmem:[#allocation128_spill] sm:$0xff] }
 0x968   :  { %v8887_v29 = vpop.permute.xlu0 %8886  ;;  %v8892_v19 = vpop.permute.xlu1 %8891 }
 0x969   :  { %v8889_v56 = vunpack.i.h.bf16 %v8887_v29  ;;  %v8888_v31 = vunpack.i.l.bf16 %v8887_v29  ;;  %v8894_v49 = vunpack.i.h.bf16 %v8892_v19  ;;  %v8893_v60 = vunpack.i.l.bf16 %v8892_v19  ;;  %5876 = vmatprep.subr.bf16.mxu0 %v5531_v9  ;;  %v18501_v9 = vld [vmem:[#allocation126_spill] sm:$0xff] }
 0x96a   :  { %5877 = vmatpush1.bf16.msra.mxu0 %v5530_v6 }
 0x96b   :  { %v5130_v21 = vsel %vm1827_vm6, %v8883_v54, %v8889_v56  ;;  %v5115_v62 = vsel %vm1827_vm6, %v8884_v50, %v8888_v31  ;;  %v5131_v26 = vsel %vm1827_vm6, %v8889_v56, %v8893_v60  ;;  %v5144_v44 = vsel %vm1827_vm6, %v18493_v40, %v8894_v49  ;;  %v18499_v50 = vld [vmem:[#allocation117_spill] sm:$0xff]  ;;  %v18502_v31 = vld [vmem:[#allocation68_spill] sm:$0xff] }
 0x96c   :  { %v5532_v5 = vpack.c.bf16 %v5130_v21, %v5114_v4  ;;  %v4967_v17 = vpop.permute.xlu0 %4966  ;;  %v5533_v22 = vpack.c.bf16 %v5131_v26, %v5115_v62  ;;  %v5546_v41 = vpack.c.bf16 %v5144_v44, %v5144_v44  ;;  %v18503_v62 = vld [vmem:[#allocation122_spill] sm:$0xff] }
 0x96d   :  { %v8897_v27 = vpop.permute.xlu1 %8896  ;;  %v5145_v32 = vsel %vm1827_vm6, %v8894_v49, %v4967_v17 }
 0x96e   :  { %v8899_v52 = vunpack.i.h.bf16 %v8897_v27  ;;  %v8898_v47 = vunpack.i.l.bf16 %v8897_v27  ;;  %v5547_v42 = vpack.c.bf16 %v5145_v32, %v5145_v32  ;;  %5917 = vmatprep.subr.bf16.mxu1 %v5533_v22  ;;  %v5595_v45 = vsel %vm18495_vm3, %v5546_v41, 0  ;;  %v18505_v32 = vld [vmem:[#allocation134_spill] sm:$0xff] }
 0x96f   :  { %5918 = vmatpush1.bf16.msra.mxu1 %v5532_v5  ;;  %v18504_v5 = vld [vmem:[#allocation125_spill] sm:$0xff] }
 0x970   :  { %v5147_v12 = vsel %vm1827_vm6, %v8898_v47, %v8899_v52  ;;  %v5146_v57 = vsel %vm1827_vm6, %v4967_v17, %v8898_v47  ;;  %6159 = vmatprep.subr.msk.bf16.mxu0 %vm18494_vm10, %v5547_v42  ;;  %v18506_v47 = vld [vmem:[#allocation69_spill] sm:$0xff] }
 0x971   :  { %v5549_v0 = vpack.c.bf16 %v5147_v12, %v5147_v12  ;;  %v5548_v55 = vpack.c.bf16 %v5146_v57, %v5146_v57  ;;  %5879 = vmatpush1.bf16.msra.mxu0 %v5595_v45  ;;  %v18507_v45 = vld [vmem:[#allocation130_spill] sm:$0xff] }
 0x973   :  { %6161 = vmatprep.subr.msk.bf16.mxu1 %vm18496_vm4, %v5549_v0  ;;  %v5601_v39 = vsel %vm18497_vm15, %v5548_v55, 0  ;;  %v5640_v37 = vpop.f32.mrb[16].mxu0 }
 0x974   :  { %5920 = vmatpush1.bf16.msra.mxu1 %v5601_v39  ;;  %5885 = vmatmul.mubr.bf16.vlgmr.msra.gmra.mrb[28].mxu0 %v18268_v36  ;;  %v5642_v35 = vpop.f32.mrb[17].mxu0 }
 0x975   :  { %v5644_v1 = vpop.f32.mrb[18].mxu0 }
 0x976   :  { %v5645_v58 = vpop.f32.mrb[19].mxu0 }
 0x977   :  { %5926 = vmatmul.mubr.bf16.vlgmr.msra.gmra.mrb[28].mxu1 %v18268_v36 }
 0x97b   :  { %v5681_v46 = vpop.f32.mrb[16].mxu1 }
 0x97c   :  { %v5683_v53 = vpop.f32.mrb[17].mxu1 }
 0x97d   :  { %v5685_v11 = vpop.f32.mrb[18].mxu1  ;;  %v5553_v59 = vpop.permute.xlu0 %5552 }
 0x97e   :  { %v5686_v18 = vpop.f32.mrb[19].mxu1  ;;  %v5641_v28 = vadd.f32 %v5640_v37, %v5553_v59  ;;  %v5643_v51 = vadd.f32 %v5642_v35, %v5553_v59  ;;  %v5682_v8 = vadd.f32 %v5681_v46, %v5553_v59  ;;  %v5684_v6 = vadd.f32 %v5683_v53, %v5553_v59  ;;  %v18508_v35 = vld [vmem:[#allocation133_spill] sm:$0xff]  ;;  %v18509_v53 = vld [vmem:[#allocation28_spill] sm:$0xff] }
 0x980   :  { %v5934_v54 = vmul.f32 %v5641_v28, %v18498_v34  ;;  %v5935_v7 = vmul.f32 %v5643_v51, %v18499_v50  ;;  %v5936_v10 = vmul.f32 %v5682_v8, %v18500_v20  ;;  %v5937_v56 = vmul.f32 %v5684_v6, %v18501_v9 }
 0x982   :  { %v5950_v43 = vadd.f32 %v5935_v7, %v5934_v54 }
 0x984   :  { %v5951_v19 = vadd.f32 %v5950_v43, %v5936_v10  ;;  %v18512_v43 = vld [vmem:[#allocation43_spill] sm:$0xff] }
 0x986   :  { %v5952_v4 = vadd.f32 %v5951_v19, %v5937_v56  ;;  %v18513_v56 = vld [vmem:[#allocation48_spill] sm:$0xff] }
 0x9c1   :  { %v5722_v30 = vpop.f32.mrb[20].mxu0 }
 0x9c2   :  { %v5724_v48 = vpop.f32.mrb[21].mxu0  ;;  %v5723_v29 = vadd.f32 %v5722_v30, %v5553_v59 }
 0x9c3   :  { %v5726_v61 = vpop.f32.mrb[22].mxu0  ;;  %v5725_v60 = vadd.f32 %v5724_v48, %v5553_v59 }
 0x9c4   :  { %v5727_v25 = vpop.f32.mrb[23].mxu0  ;;  %v5763_v15 = vpop.f32.mrb[20].mxu1  ;;  %v5938_v49 = vmul.f32 %v5723_v29, %v18502_v31 }
 0x9c5   :  { %v5765_v24 = vpop.f32.mrb[21].mxu1  ;;  %v5939_v26 = vmul.f32 %v5725_v60, %v18503_v62  ;;  %v5764_v40 = vadd.f32 %v5763_v15, %v5553_v59 }
 0x9c6   :  { %v5767_v3 = vpop.f32.mrb[22].mxu1  ;;  %v5953_v21 = vadd.f32 %v5952_v4, %v5938_v49  ;;  %v5766_v27 = vadd.f32 %v5765_v24, %v5553_v59 }
 0x9c7   :  { %v5768_v23 = vpop.f32.mrb[23].mxu1  ;;  %v5940_v17 = vmul.f32 %v5764_v40, %v18504_v5  ;;  %v18510_v3 = vld [vmem:[#allocation32_spill] sm:$0xff] }
 0x9c8   :  { %v5954_v44 = vadd.f32 %v5953_v21, %v5939_v26  ;;  %v5941_v52 = vmul.f32 %v5766_v27, %v18505_v32  ;;  %v3233_v21 = vld [vmem:[%s16240_s8] sm:$0xff] }
 0x9ca   :  { %v5955_v41 = vadd.f32 %v5954_v44, %v5940_v17 }
 0x9cc   :  { %v5956_v57 = vadd.f32 %v5955_v41, %v5941_v52 }
 0xa03   :  { %v5804_v63 = vpop.f32.mrb[24].mxu0 }
 0xa04   :  { %v5806_v13 = vpop.f32.mrb[25].mxu0  ;;  %v5805_v22 = vadd.f32 %v5804_v63, %v5553_v59 }
 0xa05   :  { %v5808_v2 = vpop.f32.mrb[26].mxu0  ;;  %v5807_v12 = vadd.f32 %v5806_v13, %v5553_v59 }
 0xa06   :  { %v5809_v36 = vpop.f32.mrb[27].mxu0  ;;  %v5845_v14 = vpop.f32.mrb[24].mxu1  ;;  %v5942_v42 = vmul.f32 %v5805_v22, %v18506_v47 }
 0xa07   :  { %v5847_v38 = vpop.f32.mrb[25].mxu1  ;;  %v5943_v55 = vmul.f32 %v5807_v12, %v18507_v45  ;;  %v5846_v39 = vadd.f32 %v5845_v14, %v5553_v59  ;;  %v18511_v36 = vld [vmem:[#allocation38_spill] sm:$0xff] }
 0xa08   :  { %v5849_v33 = vpop.f32.mrb[26].mxu1  ;;  %v5957_v0 = vadd.f32 %v5956_v57, %v5942_v42  ;;  %v5848_v58 = vadd.f32 %v5847_v38, %v5553_v59 }
 0xa09   :  { %v5850_v16 = vpop.f32.mrb[27].mxu1  ;;  %v5944_v1 = vmul.f32 %v5846_v39, %v18508_v35 }
 0xa0a   :  { %v5958_v37 = vadd.f32 %v5957_v0, %v5943_v55  ;;  %v5945_v11 = vmul.f32 %v5848_v58, %v18509_v53 }
 0xa0c   :  { %v5959_v46 = vadd.f32 %v5958_v37, %v5944_v1 }
 0xa0e   :  { %v5960_v24 = vadd.f32 %v5959_v46, %v5945_v11 }
 0xa47   :  { %v5886_v18 = vpop.f32.mrb[28].mxu0 }
 0xa48   :  { %v5887_v30 = vadd.f32 %v5886_v18, %v5553_v59  ;;  %v5888_v48 = vpop.f32.mrb[29].mxu0 }
 0xa49   :  { %v16093_v61 = vadd.f32 %v5888_v48, %v5553_v59  ;;  %v5890_v25 = vpop.f32.mrb[30].mxu0 }
 0xa4a   :  { %v5927_v15 = vpop.f32.mrb[28].mxu1  ;;  %v5946_v23 = vmul.f32 %v5887_v30, %v18510_v3  ;;  %v5891_v13 = vpop.f32.mrb[31].mxu0 }
 0xa4b   :  { %v16096_v63 = vadd.f32 %v5927_v15, %v5553_v59  ;;  %v5929_v2 = vpop.f32.mrb[29].mxu1  ;;  %v5947_v14 = vmul.f32 %v16093_v61, %v18511_v36 }
 0xa4c   :  { %v5931_v38 = vpop.f32.mrb[30].mxu1  ;;  %v5961_v33 = vadd.f32 %v5960_v24, %v5946_v23  ;;  %v5930_v16 = vadd.f32 %v5929_v2, %v5553_v59 }
 0xa4d   :  { %v5932_v54 = vpop.f32.mrb[31].mxu1  ;;  %v5948_v10 = vmul.f32 %v16096_v63, %v18512_v43 }
 0xa4e   :  { %v5962_v7 = vadd.f32 %v5961_v33, %v5947_v14  ;;  %v5949_v49 = vmul.f32 %v5930_v16, %v18513_v56 }
 0xa50   :  { %v5963_v19 = vadd.f32 %v5962_v7, %v5948_v10 }
 0xa52   :  { %v5964_v4 = vadd.f32 %v5963_v19, %v5949_v49 }
 0xa54   :  { %5965 = vadd.xlane.f32.xlu1 %v5964_v4 }
 0xa65   :  { %6060 = vperm.xlu1 %7544, %v3233_v21  }
 0xae1   :  { %v5966_v26 = vpop.xlane.xlu1 %5965 }
 0xae2   :  { %v5967_v44 = vmul.f32 0.0009765625, %v5966_v26 }
 0xae4   :  { %v16106_v17 = vsub.f32 %v5641_v28, %v5967_v44  ;;  %v16108_v59 = vsub.f32 %v5643_v51, %v5967_v44  ;;  %v16110_v41 = vsub.f32 %v5682_v8, %v5967_v44  ;;  %v16116_v57 = vsub.f32 %v5684_v6, %v5967_v44 }
 0xae5   :  { %v16118_v0 = vsub.f32 %v5723_v29, %v5967_v44  ;;  %v16124_v37 = vsub.f32 %v5725_v60, %v5967_v44  ;;  %v16128_v1 = vsub.f32 %v5764_v40, %v5967_v44  ;;  %v16133_v11 = vsub.f32 %v5766_v27, %v5967_v44 }
 0xae6   :  { %v5984_v52 = vmul.f32 %v16106_v17, %v16106_v17  ;;  %v5985_v42 = vmul.f32 %v16108_v59, %v16108_v59  ;;  %v5986_v55 = vmul.f32 %v16110_v41, %v16110_v41  ;;  %v5987_v8 = vmul.f32 %v16116_v57, %v16116_v57 }
 0xae7   :  { %v5988_v6 = vmul.f32 %v16118_v0, %v16118_v0  ;;  %v5989_v18 = vmul.f32 %v16124_v37, %v16124_v37  ;;  %v5976_v25 = vsub.f32 %v5805_v22, %v5967_v44  ;;  %v5990_v15 = vmul.f32 %v16128_v1, %v16128_v1 }
 0xae8   :  { %v6000_v28 = vmul.f32 %v5984_v52, %v18498_v34  ;;  %v6001_v51 = vmul.f32 %v5985_v42, %v18499_v50  ;;  %v6002_v29 = vmul.f32 %v5986_v55, %v18500_v20  ;;  %v6003_v48 = vmul.f32 %v5987_v8, %v18501_v9 }
 0xae9   :  { %v6004_v40 = vmul.f32 %v5988_v6, %v18502_v31  ;;  %v5977_v23 = vsub.f32 %v5807_v12, %v5967_v44  ;;  %v5991_v13 = vmul.f32 %v16133_v11, %v16133_v11  ;;  %v6005_v27 = vmul.f32 %v5989_v18, %v18503_v62 }
 0xaea   :  { %v6016_v46 = vadd.f32 %v6001_v51, %v6000_v28  ;;  %v5978_v14 = vsub.f32 %v5846_v39, %v5967_v44  ;;  %v5992_v38 = vmul.f32 %v5976_v25, %v5976_v25  ;;  %v6006_v33 = vmul.f32 %v5990_v15, %v18504_v5 }
 0xaeb   :  { %v5979_v7 = vsub.f32 %v5848_v58, %v5967_v44  ;;  %v5993_v22 = vmul.f32 %v5977_v23, %v5977_v23  ;;  %v6007_v10 = vmul.f32 %v5991_v13, %v18505_v32  ;;  %v5980_v49 = vsub.f32 %v5887_v30, %v5967_v44 }
 0xaec   :  { %v6017_v60 = vadd.f32 %v6016_v46, %v6002_v29  ;;  %v5994_v4 = vmul.f32 %v5978_v14, %v5978_v14  ;;  %v6008_v12 = vmul.f32 %v5992_v38, %v18506_v47  ;;  %v5981_v26 = vsub.f32 %v16093_v61, %v5967_v44  ;;  %v3232_v38 = vld [vmem:[%s16241_s7] sm:$0xff] }
 0xaed   :  { %v5995_v52 = vmul.f32 %v5979_v7, %v5979_v7  ;;  %v6009_v42 = vmul.f32 %v5993_v22, %v18507_v45  ;;  %v5982_v55 = vsub.f32 %v16096_v63, %v5967_v44  ;;  %v5996_v28 = vmul.f32 %v5980_v49, %v5980_v49 }
 0xaee   :  { %v6018_v24 = vadd.f32 %v6017_v60, %v6003_v48  ;;  %v6010_v58 = vmul.f32 %v5994_v4, %v18508_v35  ;;  %v5983_v8 = vsub.f32 %v5930_v16, %v5967_v44  ;;  %v5997_v6 = vmul.f32 %v5981_v26, %v5981_v26 }
 0xaef   :  { %v6011_v30 = vmul.f32 %v5995_v52, %v18509_v53  ;;  %v5998_v46 = vmul.f32 %v5982_v55, %v5982_v55  ;;  %v6012_v18 = vmul.f32 %v5996_v28, %v18510_v3 }
 0xaf0   :  { %v6019_v2 = vadd.f32 %v6018_v24, %v6004_v40  ;;  %v5999_v61 = vmul.f32 %v5983_v8, %v5983_v8  ;;  %v6013_v60 = vmul.f32 %v5997_v6, %v18511_v36 }
 0xaf1   :  { %v6014_v40 = vmul.f32 %v5998_v46, %v18512_v43 }
 0xaf2   :  { %v6020_v54 = vadd.f32 %v6019_v2, %v6005_v27  ;;  %v6015_v24 = vmul.f32 %v5999_v61, %v18513_v56 }
 0xaf4   :  { %v6021_v19 = vadd.f32 %v6020_v54, %v6006_v33 }
 0xaf6   :  { %v6022_v21 = vadd.f32 %v6021_v19, %v6007_v10 }
 0xaf8   :  { %v6023_v39 = vadd.f32 %v6022_v21, %v6008_v12 }
 0xafa   :  { %v6024_v51 = vadd.f32 %v6023_v39, %v6009_v42 }
 0xafc   :  { %v6025_v29 = vadd.f32 %v6024_v51, %v6010_v58 }
 0xafe   :  { %v6026_v48 = vadd.f32 %v6025_v29, %v6011_v30  ;;  %v6061_v30 = vpop.permute.xlu1 %6060 }
 0xb00   :  { %v6027_v15 = vadd.f32 %v6026_v48, %v6012_v18 }
 0xb02   :  { %v6028_v63 = vadd.f32 %v6027_v15, %v6013_v60 }
 0xb04   :  { %v6029_v13 = vadd.f32 %v6028_v63, %v6014_v40 }
 0xb06   :  { %v6030_v27 = vadd.f32 %v6029_v13, %v6015_v24 }
 0xb08   :  { %6031 = vadd.xlane.f32.xlu0 %v6030_v27 }
 0xb95   :  { %v6032_v16 = vpop.xlane.xlu0 %6031 }
 0xb96   :  { %v6033_v44 = vmul.f32 0.0009765625, %v6032_v16 }
 0xb98   :  { %v6034_v2 = vadd.f32 1e-05, %v6033_v44 }
 0xb9a   :  { %8902 = vrsqrt.f32 %v6034_v2 }
 0xba4   :  { %v8903_v33 = vpop.eup %8902 }
 0xba5   :  { %v6036_v54 = vmul.f32 %v8903_v33, %v3232_v38 }
 0xba7   :  { %6039 = vperm.xlu0 %7543, %v6036_v54  }
 0xc26   :  { %v6040_v22 = vpop.permute.xlu0 %6039 }
 0xc27   :  { %v6042_v10 = vmul.f32 %v6040_v22, %v16106_v17  ;;  %v6043_v19 = vmul.f32 %v6040_v22, %v16108_v59  ;;  %v6044_v4 = vmul.f32 %v6040_v22, %v16110_v41  ;;  %v6045_v12 = vmul.f32 %v6040_v22, %v16116_v57 }
 0xc28   :  { %v6046_v21 = vmul.f32 %v6040_v22, %v16118_v0  ;;  %v6047_v52 = vmul.f32 %v6040_v22, %v16124_v37  ;;  %v6048_v42 = vmul.f32 %v6040_v22, %v16128_v1  ;;  %v6049_v39 = vmul.f32 %v6040_v22, %v16133_v11 }
 0xc29   :  { %v6050_v28 = vmul.f32 %v6040_v22, %v5976_v25  ;;  %v6051_v58 = vmul.f32 %v6040_v22, %v5977_v23  ;;  %v6052_v51 = vmul.f32 %v6040_v22, %v5978_v14  ;;  %v6053_v6 = vmul.f32 %v6040_v22, %v5979_v7 }
 0xc2a   :  { %v6054_v17 = vmul.f32 %v6040_v22, %v5980_v49  ;;  %v6055_v29 = vmul.f32 %v6040_v22, %v5981_v26  ;;  %v6056_v59 = vmul.f32 %v6040_v22, %v5982_v55  ;;  %v6057_v46 = vmul.f32 %v6040_v22, %v5983_v8 }
 0xc2b   :  { %v6063_v41 = vadd.f32 %v6061_v30, %v6042_v10  ;;  %v6064_v18 = vadd.f32 %v6061_v30, %v6043_v19  ;;  %v6065_v57 = vadd.f32 %v6061_v30, %v6044_v4  ;;  %v6066_v48 = vadd.f32 %v6061_v30, %v6045_v12 }
 0xc2c   :  { %v6067_v0 = vadd.f32 %v6061_v30, %v6046_v21  ;;  %v6068_v61 = vadd.f32 %v6061_v30, %v6047_v52  ;;  %v6069_v37 = vadd.f32 %v6061_v30, %v6048_v42  ;;  %v6070_v60 = vadd.f32 %v6061_v30, %v6049_v39 }
 0xc2d   :  { %v6071_v1 = vadd.f32 %v6061_v30, %v6050_v28  ;;  %v6072_v15 = vadd.f32 %v6061_v30, %v6051_v58  ;;  %v6073_v11 = vadd.f32 %v6061_v30, %v6052_v51  ;;  %v6074_v25 = vadd.f32 %v6061_v30, %v6053_v6 }
 0xc2e   :  { %v6075_v23 = vadd.f32 %v6061_v30, %v6054_v17  ;;  %v6076_v14 = vadd.f32 %v6061_v30, %v6055_v29  ;;  %v6077_v7 = vadd.f32 %v6061_v30, %v6056_v59  ;;  %v6078_v40 = vadd.f32 %v6061_v30, %v6057_v46 }
 0xc2f   :  { %v6079_v49 = vmax.f32 %v6063_v41, 0.0  ;;  %v6080_v26 = vmax.f32 %v6064_v18, 0.0  ;;  %v6081_v55 = vmax.f32 %v6065_v57, 0.0  ;;  %v6082_v8 = vmax.f32 %v6066_v48, 0.0 }
 0xc30   :  { %v6083_v63 = vmax.f32 %v6067_v0, 0.0  ;;  %v6084_v24 = vmax.f32 %v6068_v61, 0.0  ;;  %v6085_v13 = vmax.f32 %v6069_v37, 0.0  ;;  %v6086_v27 = vmax.f32 %v6070_v60, 0.0 }
 0xc31   :  { %v6087_v16 = vmax.f32 %v6071_v1, 0.0  ;;  %v6088_v44 = vmax.f32 %v6072_v15, 0.0  ;;  %v6089_v2 = vmax.f32 %v6073_v11, 0.0  ;;  %v6090_v38 = vmax.f32 %v6074_v25, 0.0 }
 0xc32   :  { %v6091_v33 = vmax.f32 %v6075_v23, 0.0  ;;  %v6092_v54 = vmax.f32 %v6076_v14, 0.0  ;;  %v6093_v22 = vmax.f32 %v6077_v7, 0.0  ;;  %v6094_v10 = vmax.f32 %v6078_v40, 0.0 }
 0xc33   :  { %v6095_v19 = vmul.f32 %v6079_v49, %v18498_v34  ;;  %v6096_v4 = vmul.f32 %v6080_v26, %v18499_v50  ;;  %v6097_v12 = vmul.f32 %v6081_v55, %v18500_v20  ;;  %v6098_v21 = vmul.f32 %v6082_v8, %v18501_v9 }
 0xc34   :  { %v6099_v52 = vmul.f32 %v6083_v63, %v18502_v31  ;;  %v6100_v42 = vmul.f32 %v6084_v24, %v18503_v62  ;;  %v6101_v39 = vmul.f32 %v6085_v13, %v18504_v5  ;;  %v6102_v28 = vmul.f32 %v6086_v27, %v18505_v32 }
 0xc35   :  { %v6103_v58 = vmul.f32 %v6087_v16, %v18506_v47  ;;  %v6104_v51 = vmul.f32 %v6088_v44, %v18507_v45  ;;  %v6105_v34 = vmul.f32 %v6089_v2, %v18508_v35  ;;  %v6106_v50 = vmul.f32 %v6090_v38, %v18509_v53  ;;  %6111 = vst [vmem:[%s16242_s11] sm:$0xff] %v6095_v19 }
 0xc36   :  { %6112 = vst [vmem:[%s16242_s11 + $0x8] sm:$0xff] %v6096_v4  ;;  %6113 = vst [vmem:[%s16242_s11 + $0x10] sm:$0xff] %v6097_v12  ;;  %v6107_v20 = vmul.f32 %v6091_v33, %v18510_v3  ;;  %v6108_v9 = vmul.f32 %v6092_v54, %v18511_v36  ;;  %v6109_v31 = vmul.f32 %v6093_v22, %v18512_v43 }
 0xc37   :  { %6114 = vst [vmem:[%s16242_s11 + $0x18] sm:$0xff] %v6098_v21  ;;  %v6110_v62 = vmul.f32 %v6094_v10, %v18513_v56  ;;  %6115 = vst [vmem:[%s16242_s11 + $0x20] sm:$0xff] %v6099_v52 }
 0xc38   :  { %6116 = vst [vmem:[%s16242_s11 + $0x28] sm:$0xff] %v6100_v42  ;;  %6117 = vst [vmem:[%s16242_s11 + $0x30] sm:$0xff] %v6101_v39 }
 0xc39   :  { %6118 = vst [vmem:[%s16242_s11 + $0x38] sm:$0xff] %v6102_v28  ;;  %6119 = vst [vmem:[%s16242_s11 + $0x40] sm:$0xff] %v6103_v58 }
 0xc3a   :  { %6120 = vst [vmem:[%s16242_s11 + $0x48] sm:$0xff] %v6104_v51  ;;  %6121 = vst [vmem:[%s16242_s11 + $0x50] sm:$0xff] %v6105_v34 }
 0xc3b   :  { %6122 = vst [vmem:[%s16242_s11 + $0x58] sm:$0xff] %v6106_v50  ;;  %6123 = vst [vmem:[%s16242_s11 + $0x60] sm:$0xff] %v6107_v20 }
 0xc3c   :  { %6124 = vst [vmem:[%s16242_s11 + $0x68] sm:$0xff] %v6108_v9  ;;  %6125 = vst [vmem:[%s16242_s11 + $0x70] sm:$0xff] %v6109_v31 }
 0xc3d   :  { %6126 = vst [vmem:[%s16242_s11 + $0x78] sm:$0xff] %v6110_v62 }

</bundles_post_ra>
